<compile_context>
chip_gen: v5e
topology: v5e:2x2
jax: 0.10.0
libtpu: 0.0.40
codegen_flags: <defaults>
</compile_context>

<pallas_src>
import functools

import jax
import jax.numpy as jnp
import numpy as np
from jax.experimental import pallas as pl
from jax.experimental.pallas import tpu as pltpu


def _round_up(v, m):
    return ((v + m - 1) // m) * m


# ----------------------------------------------------------------------------
# Static geometry (all Python ints, computed once)
# ----------------------------------------------------------------------------
def build_geometry(layers_dims):
    c0, c1, c2 = layers_dims
    specs = [
        dict(co=c1, stride=3, padding=3, outp=0, transpose=True, act="relu"),
        dict(co=c2, stride=3, padding=3, outp=0, transpose=True, act="relu"),
        dict(co=8, stride=2, padding=1, outp=1, transpose=True, act="relu"),
        dict(co=3, stride=1, padding=0, outp=0, transpose=False, act="tanh"),
    ]
    layers = []
    hin = win = 5          # valid spatial extent of the incoming activation
    stride_in = 5          # lane stride of the incoming activation layout
    lin = 25               # (padded) lane width of the incoming activation
    cin_rows = c0          # sublane rows of the incoming activation
    for s in specs:
        if s["transpose"]:
            interior = s["stride"] - 1
            lo = 3 - 1 - s["padding"]          # negative => crop
            hi = lo + s["outp"]
            hp = (hin - 1) * s["stride"] + 1 + lo + hi
            wp = (win - 1) * s["stride"] + 1 + lo + hi
            oh, ow = hp - 2, wp - 2
            need_p = True
        else:
            interior, lo = 0, 0
            hp, wp = hin, stride_in            # reuse previous lane stride directly
            oh, ow = hin - 2, win - 2
            need_p = False
        co = s["co"]
        co_pad = max(8, _round_up(co, 8))
        lo_pad = _round_up(oh * wp, 128)       # output lane width (m = oh*wp + ow)
        lt = lo_pad + 128                      # staged matmul width (covers kw shifts)
        lxp = _round_up(2 * wp + lt, 128)      # padded-input width (covers kh shifts)
        layers.append(dict(cin_rows=cin_rows, co=co, co_pad=co_pad,
                           hin=hin, win=win, stride_in=stride_in, lin=lin,
                           interior=interior, lo=lo, hp=hp, wp=wp, oh=oh, ow=ow,
                           lo_pad=lo_pad, lt=lt, lxp=lxp,
                           need_p=need_p, act=s["act"]))
        hin, win, stride_in = oh, ow, wp
        lin, cin_rows = lo_pad, co_pad
    # A layer without a placement matmul consumes the previous layer's output
    # buffer directly -> widen that output so the whole shifted window is defined.
    for i in range(len(layers) - 1, 0, -1):
        if not layers[i]["need_p"]:
            prev = layers[i - 1]
            if prev["lo_pad"] < layers[i]["lxp"]:
                prev["lo_pad"] = layers[i]["lxp"]
                prev["lt"] = prev["lo_pad"] + 128
                prev["lxp"] = _round_up(2 * prev["wp"] + prev["lt"], 128)
    # keep P row counts consistent with (possibly widened) producer widths
    for i in range(1, len(layers)):
        layers[i]["lin"] = layers[i - 1]["lo_pad"]
    return dict(c0=c0, layers=layers)


def _build_placement(g):
    """0/1 matrix mapping prev-layer lane layout -> padded/dilated input layout."""
    P = np.zeros((g["lin"], g["lxp"]), np.float32)
    s = g["interior"] + 1
    for r in range(g["hin"]):
        pr = r * s + g["lo"]
        if pr < 0 or pr >= g["hp"]:
            continue
        for c in range(g["win"]):
            pc = c * s + g["lo"]
            if pc < 0 or pc >= g["wp"]:
                continue
            P[r * g["stride_in"] + c, pr * g["wp"] + pc] = 1.0
    return jnp.asarray(P, dtype=jnp.bfloat16)


# ----------------------------------------------------------------------------
# Parameters (PyTorch-style raw params -> folded / repacked kernel params)
# ----------------------------------------------------------------------------
def init_params(key, latent_size, layers_dims):
    c0, c1, c2 = layers_dims
    flat_size = c0 * 5 * 5
    mid = flat_size // 9
    ks = jax.random.split(key, 16)
    p = {}

    def lin(kw, kb, fan_in, fan_out):
        return (jax.random.normal(kw, (fan_in, fan_out), jnp.float32) * 0.1,
                jax.random.normal(kb, (fan_out,), jnp.float32) * 0.05)

    p["w1"], p["b1"] = lin(ks[0], ks[1], latent_size, mid)
    p["w2"], p["b2"] = lin(ks[2], ks[3], mid, flat_size)

    def convT(kw, kb, cin, cout):
        return (jax.random.normal(kw, (cin, cout, 3, 3), jnp.float32) * 0.1,
                jax.random.normal(kb, (cout,), jnp.float32) * 0.05)

    p["ct1_w"], p["ct1_b"] = convT(ks[4], ks[5], c0, c1)
    p["ct2_w"], p["ct2_b"] = convT(ks[6], ks[7], c1, c2)
    p["ct3_w"], p["ct3_b"] = convT(ks[8], ks[9], c2, 8)
    p["cv_w"] = jax.random.normal(ks[10], (3, 8, 3, 3), jnp.float32) * 0.1
    p["cv_b"] = jax.random.normal(ks[11], (3,), jnp.float32) * 0.05

    def bn(k, c):  # eval-mode BatchNorm -> per-channel scale/shift
        kk = jax.random.split(k, 4)
        gamma = 1.0 + 0.1 * jax.random.normal(kk[0], (c,), jnp.float32)
        beta = 0.1 * jax.random.normal(kk[1], (c,), jnp.float32)
        mean = 0.1 * jax.random.normal(kk[2], (c,), jnp.float32)
        var = 1.0 + 0.1 * jax.random.uniform(kk[3], (c,), jnp.float32)
        eps = 1e-5
        scale = gamma / jnp.sqrt(var + eps)
        shift = beta - mean * scale
        return scale, shift

    p["bn1_scale"], p["bn1_shift"] = bn(ks[12], c1)
    p["bn2_scale"], p["bn2_shift"] = bn(ks[13], c2)
    p["bn3_scale"], p["bn3_shift"] = bn(ks[14], 8)
    return p


def pack_params(raw, geom):
    c0 = geom["c0"]
    mid = raw["w1"].shape[1]
    p = {}
    # MLP (f32, computed on the VPU in-kernel, oriented to avoid any relayout)
    p["w1"] = jnp.asarray(raw["w1"].T, jnp.float32)                # [mid, latent]
    p["b1"] = jnp.asarray(raw["b1"].reshape(-1, 1), jnp.float32)   # [mid, 1]
    p["w2"] = jnp.asarray(jnp.transpose(raw["w2"].reshape(mid, c0, 25), (1, 0, 2)),
                          jnp.float32)                              # [c0, mid, 25]
    p["b2"] = jnp.asarray(raw["b2"].reshape(c0, 25), jnp.float32)   # [c0, 25]

    convs = [
        (raw["ct1_w"], raw["ct1_b"], raw["bn1_scale"], raw["bn1_shift"], True),
        (raw["ct2_w"], raw["ct2_b"], raw["bn2_scale"], raw["bn2_shift"], True),
        (raw["ct3_w"], raw["ct3_b"], raw["bn3_scale"], raw["bn3_shift"], True),
        (raw["cv_w"], raw["cv_b"], None, None, False),
    ]
    for i, ((w, b, scale, shift, is_t), g) in enumerate(zip(convs, geom["layers"]), 1):
        if is_t:
            # ConvTranspose weight [Cin, Cout, k, k] -> equivalent plain-conv weight
            # [Cout, Cin, k, k]: swap channel axes + flip spatially.
            wc = jnp.transpose(w[:, :, ::-1, ::-1], (1, 0, 2, 3))
        else:
            wc = w
        co, ci = wc.shape[0], wc.shape[1]
        if scale is None:
            scale = jnp.ones((co,), jnp.float32)
            shift = jnp.zeros((co,), jnp.float32)
        cop, cin_rows = g["co_pad"], g["cin_rows"]
        wf = wc * scale[:, None, None, None]                          # fold BN scale
        wt = jnp.transpose(wf, (2, 3, 0, 1))                          # [kh, kw, co, cin]
        wt = jnp.pad(wt, ((0, 0), (0, 0), (0, cop - co), (0, cin_rows - ci)))
        p[f"cw{i}"] = wt.reshape(3, 3 * cop, cin_rows).astype(jnp.bfloat16)
        p[f"cb{i}"] = (jnp.pad(b * scale + shift, (0, cop - co))
                       .reshape(cop, 1).astype(jnp.float32))
        if g["need_p"]:
            p[f"p{i}"] = _build_placement(g)
    return p


# ----------------------------------------------------------------------------
# The single fused kernel
# ----------------------------------------------------------------------------
def _fused_kernel(x_ref, w1_ref, b1_ref, w2_ref, b2_ref,
                  p1_ref, p2_ref, p3_ref,
                  cw1_ref, cb1_ref, cw2_ref, cb2_ref,
                  cw3_ref, cb3_ref, cw4_ref, cb4_ref,
                  o_ref,
                  xp1_ref, t1_ref, xp2_ref, t2_ref,
                  xp3_ref, t3_ref, xp4_ref, t4_ref,
                  *, geom):
    f32 = jnp.float32
    bf16 = jnp.bfloat16

    # ---- MLP: Linear -> ReLU -> Linear -> ReLU (tiny, VPU, f32) --------------
    xrow = x_ref[0]                                                   # [1, latent]
    h1 = jnp.sum(w1_ref[...] * xrow, axis=1, keepdims=True) + b1_ref[...]
    h1 = jnp.maximum(h1, 0.0)                                         # [mid, 1]
    mid = h1.shape[0]
    prod = w2_ref[...] * h1.reshape(1, mid, 1)                        # [c0, mid, 25]
    a = jnp.sum(prod, axis=1) + b2_ref[...]                           # [c0, 25]
    a = jnp.maximum(a, 0.0).astype(bf16)                              # == reshape(B,c0,5,5)

    # ---- conv stack -----------------------------------------------------------
    def conv_layer(a_prev, p_ref, w_ref, b_ref, xp_ref, t_ref, g):
        wp, lt, lo_pad, cop = g["wp"], g["lt"], g["lo_pad"], g["co_pad"]
        # (a) in-kernel dilate/pad/flatten: one placement matmul into VMEM scratch
        if p_ref is not None:
            xp_ref[...] = jnp.dot(a_prev, p_ref[...],
                                  preferred_element_type=f32).astype(bf16)
        else:
            xp_ref[...] = a_prev
        # (b) kh folded into the contraction: 3 accumulating MXU matmuls over
        #     row-shifted windows of the padded input (realigned ref loads)
        t_ref[...] = jnp.dot(w_ref[0], xp_ref[:, 0:lt], preferred_element_type=f32)
        t_ref[...] += jnp.dot(w_ref[1], xp_ref[:, wp:wp + lt],
                              preferred_element_type=f32)
        t_ref[...] += jnp.dot(w_ref[2], xp_ref[:, 2 * wp:2 * wp + lt],
                              preferred_element_type=f32)
        # (c) the 3 remaining kw taps, read back from the VMEM-staged result
        acc = (t_ref[0:cop, 0:lo_pad]
               + t_ref[cop:2 * cop, 1:1 + lo_pad]
               + t_ref[2 * cop:3 * cop, 2:2 + lo_pad])
        y = acc + b_ref[...]                                          # folded bias + BN shift
        if g["act"] == "relu":
            return jnp.maximum(y, 0.0)
        return jnp.tanh(y)

    g1, g2, g3, g4 = geom["layers"]
    y1 = conv_layer(a, p1_ref, cw1_ref, cb1_ref, xp1_ref, t1_ref, g1).astype(bf16)
    y2 = conv_layer(y1, p2_ref, cw2_ref, cb2_ref, xp2_ref, t2_ref, g2).astype(bf16)
    y3 = conv_layer(y2, p3_ref, cw3_ref, cb3_ref, xp3_ref, t3_ref, g3).astype(bf16)
    y4 = conv_layer(y3, None, cw4_ref, cb4_ref, xp4_ref, t4_ref, g4)  # f32 tanh
    o_ref[0] = y4


# ----------------------------------------------------------------------------
# Forward
# ----------------------------------------------------------------------------
def small_decoder40_forward(packed, x, geom):
    """x: [B, latent_size] -> [B, 3, 40, 40] (NCHW, float32)."""
    B, latent = x.shape
    gl = geom["layers"]
    g4 = gl[3]
    kernel = functools.partial(_fused_kernel, geom=geom)

    weights = [packed["w1"], packed["b1"], packed["w2"], packed["b2"],
               packed["p1"], packed["p2"], packed["p3"],
               packed["cw1"], packed["cb1"], packed["cw2"], packed["cb2"],
               packed["cw3"], packed["cb3"], packed["cw4"], packed["cb4"]]

    def full_spec(arr):
        return pl.BlockSpec(arr.shape, lambda b, n=arr.ndim: (0,) * n)

    scratch = []
    for g in gl:
        scratch.append(pltpu.VMEM((g["cin_rows"], g["lxp"]), jnp.bfloat16))
        scratch.append(pltpu.VMEM((3 * g["co_pad"], g["lt"]), jnp.float32))

    out = pl.pallas_call(
        kernel,
        out_shape=jax.ShapeDtypeStruct((B, g4["co_pad"], g4["lo_pad"]), jnp.float32),
        grid_spec=pltpu.PrefetchScalarGridSpec(
            num_scalar_prefetch=0,
            grid=(B,),
            in_specs=[pl.BlockSpec((1, 1, latent), lambda b: (b, 0, 0))]
                     + [full_spec(w) for w in weights],
            out_specs=pl.BlockSpec((1, g4["co_pad"], g4["lo_pad"]),
                                   lambda b: (b, 0, 0)),
            scratch_shapes=scratch),
        compiler_params=pltpu.CompilerParams(
            dimension_semantics=("parallel",)),
    )(x.reshape(B, 1, latent), *weights)

    # crop the stride-wp lane layout back to a dense NCHW image (3 tiny XLA ops)
    img = out[:, :g4["co"], :g4["oh"] * g4["wp"]]
    img = img.reshape(B, g4["co"], g4["oh"], g4["wp"])[:, :, :, :g4["ow"]]
    return img


if __name__ == "__main__":
    latent_size = 32
    layers_dims = (18, 16, 12)   # layers_dims[0]*25 must be divisible by 9 -> 18*25/9 = 50
    batch = 2

    key = jax.random.PRNGKey(0)
    k_param, k_x = jax.random.split(key)
    raw = init_params(k_param, latent_size, layers_dims)
    geom = build_geometry(layers_dims)        # static shapes / strides / paddings
    packed = pack_params(raw, geom)           # fold bias+BN, build placement matrices
    x = jax.random.normal(k_x, (batch, latent_size), jnp.float32)

    fwd = jax.jit(functools.partial(small_decoder40_forward, geom=geom))
    out = jax.block_until_ready(fwd(packed, x))

    assert out.shape == (batch, 3, 40, 40), out.shape
    assert out.dtype == jnp.float32
    assert bool(jnp.all(jnp.isfinite(out)))
    assert bool(jnp.all(jnp.abs(out) <= 1.0))   # tanh output range
    print("KERNEL_OK")
</pallas_src>

<mosaic_0001>
module attributes {stable_mosaic.version = 11 : i64} {
  func.func @_fused_kernel(%arg0: i32, %arg1: memref<1x1x32xf32, #tpu.memory_space<vmem>>, %arg2: memref<50x32xf32, #tpu.memory_space<vmem>>, %arg3: memref<50x1xf32, #tpu.memory_space<vmem>>, %arg4: memref<18x50x25xf32, #tpu.memory_space<vmem>>, %arg5: memref<18x25xf32, #tpu.memory_space<vmem>>, %arg6: memref<25x384xbf16, #tpu.memory_space<vmem>>, %arg7: memref<128x768xbf16, #tpu.memory_space<vmem>>, %arg8: memref<512x2304xbf16, #tpu.memory_space<vmem>>, %arg9: memref<3x48x18xbf16, #tpu.memory_space<vmem>>, %arg10: memref<16x1xf32, #tpu.memory_space<vmem>>, %arg11: memref<3x48x16xbf16, #tpu.memory_space<vmem>>, %arg12: memref<16x1xf32, #tpu.memory_space<vmem>>, %arg13: memref<3x24x16xbf16, #tpu.memory_space<vmem>>, %arg14: memref<8x1xf32, #tpu.memory_space<vmem>>, %arg15: memref<3x24x8xbf16, #tpu.memory_space<vmem>>, %arg16: memref<8x1xf32, #tpu.memory_space<vmem>>, %arg17: memref<1x8x1792xf32, #tpu.memory_space<vmem>>, %arg18: memref<18x384xbf16, #tpu.memory_space<vmem>>, %arg19: memref<48x256xf32, #tpu.memory_space<vmem>>, %arg20: memref<16x768xbf16, #tpu.memory_space<vmem>>, %arg21: memref<48x640xf32, #tpu.memory_space<vmem>>, %arg22: memref<16x2304xbf16, #tpu.memory_space<vmem>>, %arg23: memref<24x2176xf32, #tpu.memory_space<vmem>>, %arg24: memref<8x2048xbf16, #tpu.memory_space<vmem>>, %arg25: memref<24x1920xf32, #tpu.memory_space<vmem>>) attributes {dimension_semantics = [#tpu.dimension_semantics<parallel>], iteration_bounds = array<i64: 2>, scalar_prefetch = 0 : i64, scratch_operands = 8 : i64, tpu.core_type = #tpu.core_type<tc>, window_params = [{transform_indices = @transform_0, window_bounds = array<i64: 1, 1, 32>}, {pipeline_mode = #tpu.pipeline_mode<synchronous>, transform_indices = @transform_1, window_bounds = array<i64: 50, 32>}, {pipeline_mode = #tpu.pipeline_mode<synchronous>, transform_indices = @transform_2, window_bounds = array<i64: 50, 1>}, {pipeline_mode = #tpu.pipeline_mode<synchronous>, transform_indices = @transform_3, window_bounds = array<i64: 18, 50, 25>}, {pipeline_mode = #tpu.pipeline_mode<synchronous>, transform_indices = @transform_4, window_bounds = array<i64: 18, 25>}, {pipeline_mode = #tpu.pipeline_mode<synchronous>, transform_indices = @transform_5, window_bounds = array<i64: 25, 384>}, {pipeline_mode = #tpu.pipeline_mode<synchronous>, transform_indices = @transform_6, window_bounds = array<i64: 128, 768>}, {pipeline_mode = #tpu.pipeline_mode<synchronous>, transform_indices = @transform_7, window_bounds = array<i64: 512, 2304>}, {pipeline_mode = #tpu.pipeline_mode<synchronous>, transform_indices = @transform_8, window_bounds = array<i64: 3, 48, 18>}, {pipeline_mode = #tpu.pipeline_mode<synchronous>, transform_indices = @transform_9, window_bounds = array<i64: 16, 1>}, {pipeline_mode = #tpu.pipeline_mode<synchronous>, transform_indices = @transform_10, window_bounds = array<i64: 3, 48, 16>}, {pipeline_mode = #tpu.pipeline_mode<synchronous>, transform_indices = @transform_11, window_bounds = array<i64: 16, 1>}, {pipeline_mode = #tpu.pipeline_mode<synchronous>, transform_indices = @transform_12, window_bounds = array<i64: 3, 24, 16>}, {pipeline_mode = #tpu.pipeline_mode<synchronous>, transform_indices = @transform_13, window_bounds = array<i64: 8, 1>}, {pipeline_mode = #tpu.pipeline_mode<synchronous>, transform_indices = @transform_14, window_bounds = array<i64: 3, 24, 8>}, {pipeline_mode = #tpu.pipeline_mode<synchronous>, transform_indices = @transform_15, window_bounds = array<i64: 8, 1>}, {transform_indices = @transform_16, window_bounds = array<i64: 1, 8, 1792>}]} {
    %c0 = arith.constant 0 : index
    %c0_0 = arith.constant 0 : index
    %c0_1 = arith.constant 0 : index
    %0 = vector.load %arg1[%c0, %c0_0, %c0_1] : memref<1x1x32xf32, #tpu.memory_space<vmem>>, vector<1x1x32xf32>
    %1 = vector.shape_cast %0 : vector<1x1x32xf32> to vector<1x32xf32>
    %c0_2 = arith.constant 0 : index
    %c0_3 = arith.constant 0 : index
    %2 = vector.load %arg2[%c0_2, %c0_3] : memref<50x32xf32, #tpu.memory_space<vmem>>, vector<50x32xf32>
    %3 = vector.broadcast %1 : vector<1x32xf32> to vector<50x32xf32>
    %4 = arith.mulf %2, %3 : vector<50x32xf32>
    %cst = arith.constant dense<0.000000e+00> : vector<50xf32>
    %5 = vector.multi_reduction <add>, %4, %cst [1] : vector<50x32xf32> to vector<50xf32>
    %6 = vector.shape_cast %5 : vector<50xf32> to vector<50x1xf32>
    %c0_4 = arith.constant 0 : index
    %c0_5 = arith.constant 0 : index
    %7 = vector.load %arg3[%c0_4, %c0_5] : memref<50x1xf32, #tpu.memory_space<vmem>>, vector<50x1xf32>
    %8 = arith.addf %6, %7 : vector<50x1xf32>
    %cst_6 = arith.constant 0.000000e+00 : f32
    %9 = vector.broadcast %cst_6 : f32 to vector<50x1xf32>
    %10 = arith.maximumf %8, %9 : vector<50x1xf32>
    %c0_7 = arith.constant 0 : index
    %c0_8 = arith.constant 0 : index
    %c0_9 = arith.constant 0 : index
    %11 = vector.load %arg4[%c0_7, %c0_8, %c0_9] : memref<18x50x25xf32, #tpu.memory_space<vmem>>, vector<18x50x25xf32>
    %12 = vector.shape_cast %10 : vector<50x1xf32> to vector<1x50x1xf32>
    %13 = vector.broadcast %12 : vector<1x50x1xf32> to vector<18x50x25xf32>
    %14 = arith.mulf %11, %13 : vector<18x50x25xf32>
    %cst_10 = arith.constant dense<0.000000e+00> : vector<18x25xf32>
    %15 = vector.multi_reduction <add>, %14, %cst_10 [1] : vector<18x50x25xf32> to vector<18x25xf32>
    %c0_11 = arith.constant 0 : index
    %c0_12 = arith.constant 0 : index
    %16 = vector.load %arg5[%c0_11, %c0_12] : memref<18x25xf32, #tpu.memory_space<vmem>>, vector<18x25xf32>
    %17 = arith.addf %15, %16 : vector<18x25xf32>
    %cst_13 = arith.constant 0.000000e+00 : f32
    %18 = vector.broadcast %cst_13 : f32 to vector<18x25xf32>
    %19 = arith.maximumf %17, %18 : vector<18x25xf32>
    %20 = arith.truncf %19 : vector<18x25xf32> to vector<18x25xbf16>
    %c0_14 = arith.constant 0 : index
    %c0_15 = arith.constant 0 : index
    %21 = vector.load %arg6[%c0_14, %c0_15] : memref<25x384xbf16, #tpu.memory_space<vmem>>, vector<25x384xbf16>
    %cst_16 = arith.constant dense<0.000000e+00> : vector<18x384xf32>
    %22 = tpu.matmul %20, %21, %cst_16 {dimension_numbers = #tpu.dot_dimension_numbers<[1], [0], [0], [1], [0, 0, 1, 1], [], []>} : vector<18x25xbf16>, vector<25x384xbf16>, vector<18x384xf32> -> vector<18x384xf32>
    %23 = arith.truncf %22 : vector<18x384xf32> to vector<18x384xbf16>
    %c0_17 = arith.constant 0 : index
    %c0_18 = arith.constant 0 : index
    %24 = vector.load %arg18[%c0_17, %c0_18] : memref<18x384xbf16, #tpu.memory_space<vmem>>, vector<18x384xbf16>
    tpu.vector_store %arg18[%c0_17, %c0_18], %23 {strides = array<i32>} : memref<18x384xbf16, #tpu.memory_space<vmem>>, vector<18x384xbf16>,
    %c0_19 = arith.constant 0 : index
    %c0_20 = arith.constant 0 : index
    %c0_21 = arith.constant 0 : index
    %25 = vector.load %arg9[%c0_19, %c0_20, %c0_21] : memref<3x48x18xbf16, #tpu.memory_space<vmem>>, vector<1x48x18xbf16>
    %26 = vector.shape_cast %25 : vector<1x48x18xbf16> to vector<48x18xbf16>
    %c0_22 = arith.constant 0 : index
    %c0_23 = arith.constant 0 : index
    %27 = vector.load %arg18[%c0_22, %c0_23] : memref<18x384xbf16, #tpu.memory_space<vmem>>, vector<18x256xbf16>
    %cst_24 = arith.constant dense<0.000000e+00> : vector<48x256xf32>
    %28 = tpu.matmul %26, %27, %cst_24 {dimension_numbers = #tpu.dot_dimension_numbers<[1], [0], [0], [1], [0, 0, 1, 1], [], []>} : vector<48x18xbf16>, vector<18x256xbf16>, vector<48x256xf32> -> vector<48x256xf32>
    %c0_25 = arith.constant 0 : index
    %c0_26 = arith.constant 0 : index
    %29 = vector.load %arg19[%c0_25, %c0_26] : memref<48x256xf32, #tpu.memory_space<vmem>>, vector<48x256xf32>
    tpu.vector_store %arg19[%c0_25, %c0_26], %28 {strides = array<i32>} : memref<48x256xf32, #tpu.memory_space<vmem>>, vector<48x256xf32>,
    %c0_27 = arith.constant 0 : index
    %c0_28 = arith.constant 0 : index
    %30 = vector.load %arg19[%c0_27, %c0_28] : memref<48x256xf32, #tpu.memory_space<vmem>>, vector<48x256xf32>
    %c1 = arith.constant 1 : index
    %c0_29 = arith.constant 0 : index
    %c0_30 = arith.constant 0 : index
    %31 = vector.load %arg9[%c1, %c0_29, %c0_30] : memref<3x48x18xbf16, #tpu.memory_space<vmem>>, vector<1x48x18xbf16>
    %32 = vector.shape_cast %31 : vector<1x48x18xbf16> to vector<48x18xbf16>
    %c0_31 = arith.constant 0 : index
    %c11 = arith.constant 11 : index
    %33 = vector.load %arg18[%c0_31, %c11] : memref<18x384xbf16, #tpu.memory_space<vmem>>, vector<18x256xbf16>
    %cst_32 = arith.constant dense<0.000000e+00> : vector<48x256xf32>
    %34 = tpu.matmul %32, %33, %cst_32 {dimension_numbers = #tpu.dot_dimension_numbers<[1], [0], [0], [1], [0, 0, 1, 1], [], []>} : vector<48x18xbf16>, vector<18x256xbf16>, vector<48x256xf32> -> vector<48x256xf32>
    %35 = arith.addf %30, %34 : vector<48x256xf32>
    %c0_33 = arith.constant 0 : index
    %c0_34 = arith.constant 0 : index
    %36 = vector.load %arg19[%c0_33, %c0_34] : memref<48x256xf32, #tpu.memory_space<vmem>>, vector<48x256xf32>
    tpu.vector_store %arg19[%c0_33, %c0_34], %35 {strides = array<i32>} : memref<48x256xf32, #tpu.memory_space<vmem>>, vector<48x256xf32>,
    %c0_35 = arith.constant 0 : index
    %c0_36 = arith.constant 0 : index
    %37 = vector.load %arg19[%c0_35, %c0_36] : memref<48x256xf32, #tpu.memory_space<vmem>>, vector<48x256xf32>
    %c2 = arith.constant 2 : index
    %c0_37 = arith.constant 0 : index
    %c0_38 = arith.constant 0 : index
    %38 = vector.load %arg9[%c2, %c0_37, %c0_38] : memref<3x48x18xbf16, #tpu.memory_space<vmem>>, vector<1x48x18xbf16>
    %39 = vector.shape_cast %38 : vector<1x48x18xbf16> to vector<48x18xbf16>
    %c0_39 = arith.constant 0 : index
    %c22 = arith.constant 22 : index
    %40 = vector.load %arg18[%c0_39, %c22] : memref<18x384xbf16, #tpu.memory_space<vmem>>, vector<18x256xbf16>
    %cst_40 = arith.constant dense<0.000000e+00> : vector<48x256xf32>
    %41 = tpu.matmul %39, %40, %cst_40 {dimension_numbers = #tpu.dot_dimension_numbers<[1], [0], [0], [1], [0, 0, 1, 1], [], []>} : vector<48x18xbf16>, vector<18x256xbf16>, vector<48x256xf32> -> vector<48x256xf32>
    %42 = arith.addf %37, %41 : vector<48x256xf32>
    %c0_41 = arith.constant 0 : index
    %c0_42 = arith.constant 0 : index
    %43 = vector.load %arg19[%c0_41, %c0_42] : memref<48x256xf32, #tpu.memory_space<vmem>>, vector<48x256xf32>
    tpu.vector_store %arg19[%c0_41, %c0_42], %42 {strides = array<i32>} : memref<48x256xf32, #tpu.memory_space<vmem>>, vector<48x256xf32>,
    %c0_43 = arith.constant 0 : index
    %c0_44 = arith.constant 0 : index
    %44 = vector.load %arg19[%c0_43, %c0_44] : memref<48x256xf32, #tpu.memory_space<vmem>>, vector<16x128xf32>
    %c16 = arith.constant 16 : index
    %c1_45 = arith.constant 1 : index
    %45 = vector.load %arg19[%c16, %c1_45] : memref<48x256xf32, #tpu.memory_space<vmem>>, vector<16x128xf32>
    %46 = arith.addf %44, %45 : vector<16x128xf32>
    %c32 = arith.constant 32 : index
    %c2_46 = arith.constant 2 : index
    %47 = vector.load %arg19[%c32, %c2_46] : memref<48x256xf32, #tpu.memory_space<vmem>>, vector<16x128xf32>
    %48 = arith.addf %46, %47 : vector<16x128xf32>
    %c0_47 = arith.constant 0 : index
    %c0_48 = arith.constant 0 : index
    %49 = vector.load %arg10[%c0_47, %c0_48] : memref<16x1xf32, #tpu.memory_space<vmem>>, vector<16x1xf32>
    %50 = vector.broadcast %49 : vector<16x1xf32> to vector<16x128xf32>
    %51 = arith.addf %48, %50 : vector<16x128xf32>
    %cst_49 = arith.constant 0.000000e+00 : f32
    %52 = vector.broadcast %cst_49 : f32 to vector<16x128xf32>
    %53 = arith.maximumf %51, %52 : vector<16x128xf32>
    %54 = arith.truncf %53 : vector<16x128xf32> to vector<16x128xbf16>
    %c0_50 = arith.constant 0 : index
    %c0_51 = arith.constant 0 : index
    %55 = vector.load %arg7[%c0_50, %c0_51] : memref<128x768xbf16, #tpu.memory_space<vmem>>, vector<128x768xbf16>
    %cst_52 = arith.constant dense<0.000000e+00> : vector<16x768xf32>
    %56 = tpu.matmul %54, %55, %cst_52 {dimension_numbers = #tpu.dot_dimension_numbers<[1], [0], [0], [1], [0, 0, 1, 1], [], []>} : vector<16x128xbf16>, vector<128x768xbf16>, vector<16x768xf32> -> vector<16x768xf32>
    %57 = arith.truncf %56 : vector<16x768xf32> to vector<16x768xbf16>
    %c0_53 = arith.constant 0 : index
    %c0_54 = arith.constant 0 : index
    %58 = vector.load %arg20[%c0_53, %c0_54] : memref<16x768xbf16, #tpu.memory_space<vmem>>, vector<16x768xbf16>
    tpu.vector_store %arg20[%c0_53, %c0_54], %57 {strides = array<i32>} : memref<16x768xbf16, #tpu.memory_space<vmem>>, vector<16x768xbf16>,
    %c0_55 = arith.constant 0 : index
    %c0_56 = arith.constant 0 : index
    %c0_57 = arith.constant 0 : index
    %59 = vector.load %arg11[%c0_55, %c0_56, %c0_57] : memref<3x48x16xbf16, #tpu.memory_space<vmem>>, vector<1x48x16xbf16>
    %60 = vector.shape_cast %59 : vector<1x48x16xbf16> to vector<48x16xbf16>
    %c0_58 = arith.constant 0 : index
    %c0_59 = arith.constant 0 : index
    %61 = vector.load %arg20[%c0_58, %c0_59] : memref<16x768xbf16, #tpu.memory_space<vmem>>, vector<16x640xbf16>
    %cst_60 = arith.constant dense<0.000000e+00> : vector<48x640xf32>
    %62 = tpu.matmul %60, %61, %cst_60 {dimension_numbers = #tpu.dot_dimension_numbers<[1], [0], [0], [1], [0, 0, 1, 1], [], []>} : vector<48x16xbf16>, vector<16x640xbf16>, vector<48x640xf32> -> vector<48x640xf32>
    %c0_61 = arith.constant 0 : index
    %c0_62 = arith.constant 0 : index
    %63 = vector.load %arg21[%c0_61, %c0_62] : memref<48x640xf32, #tpu.memory_space<vmem>>, vector<48x640xf32>
    tpu.vector_store %arg21[%c0_61, %c0_62], %62 {strides = array<i32>} : memref<48x640xf32, #tpu.memory_space<vmem>>, vector<48x640xf32>,
    %c0_63 = arith.constant 0 : index
    %c0_64 = arith.constant 0 : index
    %64 = vector.load %arg21[%c0_63, %c0_64] : memref<48x640xf32, #tpu.memory_space<vmem>>, vector<48x640xf32>
    %c1_65 = arith.constant 1 : index
    %c0_66 = arith.constant 0 : index
    %c0_67 = arith.constant 0 : index
    %65 = vector.load %arg11[%c1_65, %c0_66, %c0_67] : memref<3x48x16xbf16, #tpu.memory_space<vmem>>, vector<1x48x16xbf16>
    %66 = vector.shape_cast %65 : vector<1x48x16xbf16> to vector<48x16xbf16>
    %c0_68 = arith.constant 0 : index
    %c23 = arith.constant 23 : index
    %67 = vector.load %arg20[%c0_68, %c23] : memref<16x768xbf16, #tpu.memory_space<vmem>>, vector<16x640xbf16>
    %cst_69 = arith.constant dense<0.000000e+00> : vector<48x640xf32>
    %68 = tpu.matmul %66, %67, %cst_69 {dimension_numbers = #tpu.dot_dimension_numbers<[1], [0], [0], [1], [0, 0, 1, 1], [], []>} : vector<48x16xbf16>, vector<16x640xbf16>, vector<48x640xf32> -> vector<48x640xf32>
    %69 = arith.addf %64, %68 : vector<48x640xf32>
    %c0_70 = arith.constant 0 : index
    %c0_71 = arith.constant 0 : index
    %70 = vector.load %arg21[%c0_70, %c0_71] : memref<48x640xf32, #tpu.memory_space<vmem>>, vector<48x640xf32>
    tpu.vector_store %arg21[%c0_70, %c0_71], %69 {strides = array<i32>} : memref<48x640xf32, #tpu.memory_space<vmem>>, vector<48x640xf32>,
    %c0_72 = arith.constant 0 : index
    %c0_73 = arith.constant 0 : index
    %71 = vector.load %arg21[%c0_72, %c0_73] : memref<48x640xf32, #tpu.memory_space<vmem>>, vector<48x640xf32>
    %c2_74 = arith.constant 2 : index
    %c0_75 = arith.constant 0 : index
    %c0_76 = arith.constant 0 : index
    %72 = vector.load %arg11[%c2_74, %c0_75, %c0_76] : memref<3x48x16xbf16, #tpu.memory_space<vmem>>, vector<1x48x16xbf16>
    %73 = vector.shape_cast %72 : vector<1x48x16xbf16> to vector<48x16xbf16>
    %c0_77 = arith.constant 0 : index
    %c46 = arith.constant 46 : index
    %74 = vector.load %arg20[%c0_77, %c46] : memref<16x768xbf16, #tpu.memory_space<vmem>>, vector<16x640xbf16>
    %cst_78 = arith.constant dense<0.000000e+00> : vector<48x640xf32>
    %75 = tpu.matmul %73, %74, %cst_78 {dimension_numbers = #tpu.dot_dimension_numbers<[1], [0], [0], [1], [0, 0, 1, 1], [], []>} : vector<48x16xbf16>, vector<16x640xbf16>, vector<48x640xf32> -> vector<48x640xf32>
    %76 = arith.addf %71, %75 : vector<48x640xf32>
    %c0_79 = arith.constant 0 : index
    %c0_80 = arith.constant 0 : index
    %77 = vector.load %arg21[%c0_79, %c0_80] : memref<48x640xf32, #tpu.memory_space<vmem>>, vector<48x640xf32>
    tpu.vector_store %arg21[%c0_79, %c0_80], %76 {strides = array<i32>} : memref<48x640xf32, #tpu.memory_space<vmem>>, vector<48x640xf32>,
    %c0_81 = arith.constant 0 : index
    %c0_82 = arith.constant 0 : index
    %78 = vector.load %arg21[%c0_81, %c0_82] : memref<48x640xf32, #tpu.memory_space<vmem>>, vector<16x512xf32>
    %c16_83 = arith.constant 16 : index
    %c1_84 = arith.constant 1 : index
    %79 = vector.load %arg21[%c16_83, %c1_84] : memref<48x640xf32, #tpu.memory_space<vmem>>, vector<16x512xf32>
    %80 = arith.addf %78, %79 : vector<16x512xf32>
    %c32_85 = arith.constant 32 : index
    %c2_86 = arith.constant 2 : index
    %81 = vector.load %arg21[%c32_85, %c2_86] : memref<48x640xf32, #tpu.memory_space<vmem>>, vector<16x512xf32>
    %82 = arith.addf %80, %81 : vector<16x512xf32>
    %c0_87 = arith.constant 0 : index
    %c0_88 = arith.constant 0 : index
    %83 = vector.load %arg12[%c0_87, %c0_88] : memref<16x1xf32, #tpu.memory_space<vmem>>, vector<16x1xf32>
    %84 = vector.broadcast %83 : vector<16x1xf32> to vector<16x512xf32>
    %85 = arith.addf %82, %84 : vector<16x512xf32>
    %cst_89 = arith.constant 0.000000e+00 : f32
    %86 = vector.broadcast %cst_89 : f32 to vector<16x512xf32>
    %87 = arith.maximumf %85, %86 : vector<16x512xf32>
    %88 = arith.truncf %87 : vector<16x512xf32> to vector<16x512xbf16>
    %c0_90 = arith.constant 0 : index
    %c0_91 = arith.constant 0 : index
    %89 = vector.load %arg8[%c0_90, %c0_91] : memref<512x2304xbf16, #tpu.memory_space<vmem>>, vector<512x2304xbf16>
    %cst_92 = arith.constant dense<0.000000e+00> : vector<16x2304xf32>
    %90 = tpu.matmul %88, %89, %cst_92 {dimension_numbers = #tpu.dot_dimension_numbers<[1], [0], [0], [1], [0, 0, 1, 1], [], []>} : vector<16x512xbf16>, vector<512x2304xbf16>, vector<16x2304xf32> -> vector<16x2304xf32>
    %91 = arith.truncf %90 : vector<16x2304xf32> to vector<16x2304xbf16>
    %c0_93 = arith.constant 0 : index
    %c0_94 = arith.constant 0 : index
    %92 = vector.load %arg22[%c0_93, %c0_94] : memref<16x2304xbf16, #tpu.memory_space<vmem>>, vector<16x2304xbf16>
    tpu.vector_store %arg22[%c0_93, %c0_94], %91 {strides = array<i32>} : memref<16x2304xbf16, #tpu.memory_space<vmem>>, vector<16x2304xbf16>,
    %c0_95 = arith.constant 0 : index
    %c0_96 = arith.constant 0 : index
    %c0_97 = arith.constant 0 : index
    %93 = vector.load %arg13[%c0_95, %c0_96, %c0_97] : memref<3x24x16xbf16, #tpu.memory_space<vmem>>, vector<1x24x16xbf16>
    %94 = vector.shape_cast %93 : vector<1x24x16xbf16> to vector<24x16xbf16>
    %c0_98 = arith.constant 0 : index
    %c0_99 = arith.constant 0 : index
    %95 = vector.load %arg22[%c0_98, %c0_99] : memref<16x2304xbf16, #tpu.memory_space<vmem>>, vector<16x2176xbf16>
    %cst_100 = arith.constant dense<0.000000e+00> : vector<24x2176xf32>
    %96 = tpu.matmul %94, %95, %cst_100 {dimension_numbers = #tpu.dot_dimension_numbers<[1], [0], [0], [1], [0, 0, 1, 1], [], []>} : vector<24x16xbf16>, vector<16x2176xbf16>, vector<24x2176xf32> -> vector<24x2176xf32>
    %c0_101 = arith.constant 0 : index
    %c0_102 = arith.constant 0 : index
    %97 = vector.load %arg23[%c0_101, %c0_102] : memref<24x2176xf32, #tpu.memory_space<vmem>>, vector<24x2176xf32>
    tpu.vector_store %arg23[%c0_101, %c0_102], %96 {strides = array<i32>} : memref<24x2176xf32, #tpu.memory_space<vmem>>, vector<24x2176xf32>,
    %c0_103 = arith.constant 0 : index
    %c0_104 = arith.constant 0 : index
    %98 = vector.load %arg23[%c0_103, %c0_104] : memref<24x2176xf32, #tpu.memory_space<vmem>>, vector<24x2176xf32>
    %c1_105 = arith.constant 1 : index
    %c0_106 = arith.constant 0 : index
    %c0_107 = arith.constant 0 : index
    %99 = vector.load %arg13[%c1_105, %c0_106, %c0_107] : memref<3x24x16xbf16, #tpu.memory_space<vmem>>, vector<1x24x16xbf16>
    %100 = vector.shape_cast %99 : vector<1x24x16xbf16> to vector<24x16xbf16>
    %c0_108 = arith.constant 0 : index
    %c44 = arith.constant 44 : index
    %101 = vector.load %arg22[%c0_108, %c44] : memref<16x2304xbf16, #tpu.memory_space<vmem>>, vector<16x2176xbf16>
    %cst_109 = arith.constant dense<0.000000e+00> : vector<24x2176xf32>
    %102 = tpu.matmul %100, %101, %cst_109 {dimension_numbers = #tpu.dot_dimension_numbers<[1], [0], [0], [1], [0, 0, 1, 1], [], []>} : vector<24x16xbf16>, vector<16x2176xbf16>, vector<24x2176xf32> -> vector<24x2176xf32>
    %103 = arith.addf %98, %102 : vector<24x2176xf32>
    %c0_110 = arith.constant 0 : index
    %c0_111 = arith.constant 0 : index
    %104 = vector.load %arg23[%c0_110, %c0_111] : memref<24x2176xf32, #tpu.memory_space<vmem>>, vector<24x2176xf32>
    tpu.vector_store %arg23[%c0_110, %c0_111], %103 {strides = array<i32>} : memref<24x2176xf32, #tpu.memory_space<vmem>>, vector<24x2176xf32>,
    %c0_112 = arith.constant 0 : index
    %c0_113 = arith.constant 0 : index
    %105 = vector.load %arg23[%c0_112, %c0_113] : memref<24x2176xf32, #tpu.memory_space<vmem>>, vector<24x2176xf32>
    %c2_114 = arith.constant 2 : index
    %c0_115 = arith.constant 0 : index
    %c0_116 = arith.constant 0 : index
    %106 = vector.load %arg13[%c2_114, %c0_115, %c0_116] : memref<3x24x16xbf16, #tpu.memory_space<vmem>>, vector<1x24x16xbf16>
    %107 = vector.shape_cast %106 : vector<1x24x16xbf16> to vector<24x16xbf16>
    %c0_117 = arith.constant 0 : index
    %c88 = arith.constant 88 : index
    %108 = vector.load %arg22[%c0_117, %c88] : memref<16x2304xbf16, #tpu.memory_space<vmem>>, vector<16x2176xbf16>
    %cst_118 = arith.constant dense<0.000000e+00> : vector<24x2176xf32>
    %109 = tpu.matmul %107, %108, %cst_118 {dimension_numbers = #tpu.dot_dimension_numbers<[1], [0], [0], [1], [0, 0, 1, 1], [], []>} : vector<24x16xbf16>, vector<16x2176xbf16>, vector<24x2176xf32> -> vector<24x2176xf32>
    %110 = arith.addf %105, %109 : vector<24x2176xf32>
    %c0_119 = arith.constant 0 : index
    %c0_120 = arith.constant 0 : index
    %111 = vector.load %arg23[%c0_119, %c0_120] : memref<24x2176xf32, #tpu.memory_space<vmem>>, vector<24x2176xf32>
    tpu.vector_store %arg23[%c0_119, %c0_120], %110 {strides = array<i32>} : memref<24x2176xf32, #tpu.memory_space<vmem>>, vector<24x2176xf32>,
    %c0_121 = arith.constant 0 : index
    %c0_122 = arith.constant 0 : index
    %112 = vector.load %arg23[%c0_121, %c0_122] : memref<24x2176xf32, #tpu.memory_space<vmem>>, vector<8x2048xf32>
    %c8 = arith.constant 8 : index
    %c1_123 = arith.constant 1 : index
    %113 = vector.load %arg23[%c8, %c1_123] : memref<24x2176xf32, #tpu.memory_space<vmem>>, vector<8x2048xf32>
    %114 = arith.addf %112, %113 : vector<8x2048xf32>
    %c16_124 = arith.constant 16 : index
    %c2_125 = arith.constant 2 : index
    %115 = vector.load %arg23[%c16_124, %c2_125] : memref<24x2176xf32, #tpu.memory_space<vmem>>, vector<8x2048xf32>
    %116 = arith.addf %114, %115 : vector<8x2048xf32>
    %c0_126 = arith.constant 0 : index
    %c0_127 = arith.constant 0 : index
    %117 = vector.load %arg14[%c0_126, %c0_127] : memref<8x1xf32, #tpu.memory_space<vmem>>, vector<8x1xf32>
    %118 = vector.broadcast %117 : vector<8x1xf32> to vector<8x2048xf32>
    %119 = arith.addf %116, %118 : vector<8x2048xf32>
    %cst_128 = arith.constant 0.000000e+00 : f32
    %120 = vector.broadcast %cst_128 : f32 to vector<8x2048xf32>
    %121 = arith.maximumf %119, %120 : vector<8x2048xf32>
    %122 = arith.truncf %121 : vector<8x2048xf32> to vector<8x2048xbf16>
    %c0_129 = arith.constant 0 : index
    %c0_130 = arith.constant 0 : index
    %123 = vector.load %arg24[%c0_129, %c0_130] : memref<8x2048xbf16, #tpu.memory_space<vmem>>, vector<8x2048xbf16>
    tpu.vector_store %arg24[%c0_129, %c0_130], %122 {strides = array<i32>} : memref<8x2048xbf16, #tpu.memory_space<vmem>>, vector<8x2048xbf16>,
    %c0_131 = arith.constant 0 : index
    %c0_132 = arith.constant 0 : index
    %c0_133 = arith.constant 0 : index
    %124 = vector.load %arg15[%c0_131, %c0_132, %c0_133] : memref<3x24x8xbf16, #tpu.memory_space<vmem>>, vector<1x24x8xbf16>
    %125 = vector.shape_cast %124 : vector<1x24x8xbf16> to vector<24x8xbf16>
    %c0_134 = arith.constant 0 : index
    %c0_135 = arith.constant 0 : index
    %126 = vector.load %arg24[%c0_134, %c0_135] : memref<8x2048xbf16, #tpu.memory_space<vmem>>, vector<8x1920xbf16>
    %cst_136 = arith.constant dense<0.000000e+00> : vector<24x1920xf32>
    %127 = tpu.matmul %125, %126, %cst_136 {dimension_numbers = #tpu.dot_dimension_numbers<[1], [0], [0], [1], [0, 0, 1, 1], [], []>} : vector<24x8xbf16>, vector<8x1920xbf16>, vector<24x1920xf32> -> vector<24x1920xf32>
    %c0_137 = arith.constant 0 : index
    %c0_138 = arith.constant 0 : index
    %128 = vector.load %arg25[%c0_137, %c0_138] : memref<24x1920xf32, #tpu.memory_space<vmem>>, vector<24x1920xf32>
    tpu.vector_store %arg25[%c0_137, %c0_138], %127 {strides = array<i32>} : memref<24x1920xf32, #tpu.memory_space<vmem>>, vector<24x1920xf32>,
    %c0_139 = arith.constant 0 : index
    %c0_140 = arith.constant 0 : index
    %129 = vector.load %arg25[%c0_139, %c0_140] : memref<24x1920xf32, #tpu.memory_space<vmem>>, vector<24x1920xf32>
    %c1_141 = arith.constant 1 : index
    %c0_142 = arith.constant 0 : index
    %c0_143 = arith.constant 0 : index
    %130 = vector.load %arg15[%c1_141, %c0_142, %c0_143] : memref<3x24x8xbf16, #tpu.memory_space<vmem>>, vector<1x24x8xbf16>
    %131 = vector.shape_cast %130 : vector<1x24x8xbf16> to vector<24x8xbf16>
    %c0_144 = arith.constant 0 : index
    %c44_145 = arith.constant 44 : index
    %132 = vector.load %arg24[%c0_144, %c44_145] : memref<8x2048xbf16, #tpu.memory_space<vmem>>, vector<8x1920xbf16>
    %cst_146 = arith.constant dense<0.000000e+00> : vector<24x1920xf32>
    %133 = tpu.matmul %131, %132, %cst_146 {dimension_numbers = #tpu.dot_dimension_numbers<[1], [0], [0], [1], [0, 0, 1, 1], [], []>} : vector<24x8xbf16>, vector<8x1920xbf16>, vector<24x1920xf32> -> vector<24x1920xf32>
    %134 = arith.addf %129, %133 : vector<24x1920xf32>
    %c0_147 = arith.constant 0 : index
    %c0_148 = arith.constant 0 : index
    %135 = vector.load %arg25[%c0_147, %c0_148] : memref<24x1920xf32, #tpu.memory_space<vmem>>, vector<24x1920xf32>
    tpu.vector_store %arg25[%c0_147, %c0_148], %134 {strides = array<i32>} : memref<24x1920xf32, #tpu.memory_space<vmem>>, vector<24x1920xf32>,
    %c0_149 = arith.constant 0 : index
    %c0_150 = arith.constant 0 : index
    %136 = vector.load %arg25[%c0_149, %c0_150] : memref<24x1920xf32, #tpu.memory_space<vmem>>, vector<24x1920xf32>
    %c2_151 = arith.constant 2 : index
    %c0_152 = arith.constant 0 : index
    %c0_153 = arith.constant 0 : index
    %137 = vector.load %arg15[%c2_151, %c0_152, %c0_153] : memref<3x24x8xbf16, #tpu.memory_space<vmem>>, vector<1x24x8xbf16>
    %138 = vector.shape_cast %137 : vector<1x24x8xbf16> to vector<24x8xbf16>
    %c0_154 = arith.constant 0 : index
    %c88_155 = arith.constant 88 : index
    %139 = vector.load %arg24[%c0_154, %c88_155] : memref<8x2048xbf16, #tpu.memory_space<vmem>>, vector<8x1920xbf16>
    %cst_156 = arith.constant dense<0.000000e+00> : vector<24x1920xf32>
    %140 = tpu.matmul %138, %139, %cst_156 {dimension_numbers = #tpu.dot_dimension_numbers<[1], [0], [0], [1], [0, 0, 1, 1], [], []>} : vector<24x8xbf16>, vector<8x1920xbf16>, vector<24x1920xf32> -> vector<24x1920xf32>
    %141 = arith.addf %136, %140 : vector<24x1920xf32>
    %c0_157 = arith.constant 0 : index
    %c0_158 = arith.constant 0 : index
    %142 = vector.load %arg25[%c0_157, %c0_158] : memref<24x1920xf32, #tpu.memory_space<vmem>>, vector<24x1920xf32>
    tpu.vector_store %arg25[%c0_157, %c0_158], %141 {strides = array<i32>} : memref<24x1920xf32, #tpu.memory_space<vmem>>, vector<24x1920xf32>,
    %c0_159 = arith.constant 0 : index
    %c0_160 = arith.constant 0 : index
    %143 = vector.load %arg25[%c0_159, %c0_160] : memref<24x1920xf32, #tpu.memory_space<vmem>>, vector<8x1792xf32>
    %c8_161 = arith.constant 8 : index
    %c1_162 = arith.constant 1 : index
    %144 = vector.load %arg25[%c8_161, %c1_162] : memref<24x1920xf32, #tpu.memory_space<vmem>>, vector<8x1792xf32>
    %145 = arith.addf %143, %144 : vector<8x1792xf32>
    %c16_163 = arith.constant 16 : index
    %c2_164 = arith.constant 2 : index
    %146 = vector.load %arg25[%c16_163, %c2_164] : memref<24x1920xf32, #tpu.memory_space<vmem>>, vector<8x1792xf32>
    %147 = arith.addf %145, %146 : vector<8x1792xf32>
    %c0_165 = arith.constant 0 : index
    %c0_166 = arith.constant 0 : index
    %148 = vector.load %arg16[%c0_165, %c0_166] : memref<8x1xf32, #tpu.memory_space<vmem>>, vector<8x1xf32>
    %149 = vector.broadcast %148 : vector<8x1xf32> to vector<8x1792xf32>
    %150 = arith.addf %147, %149 : vector<8x1792xf32>
    %151 = math.tanh %150 : vector<8x1792xf32>
    %c0_167 = arith.constant 0 : index
    %c0_168 = arith.constant 0 : index
    %c0_169 = arith.constant 0 : index
    %152 = vector.load %arg17[%c0_167, %c0_168, %c0_169] : memref<1x8x1792xf32, #tpu.memory_space<vmem>>, vector<1x8x1792xf32>
    %153 = vector.shape_cast %152 : vector<1x8x1792xf32> to vector<8x1792xf32>
    %154 = vector.shape_cast %151 : vector<8x1792xf32> to vector<1x8x1792xf32>
    tpu.vector_store %arg17[%c0_167, %c0_168, %c0_169], %154 {strides = array<i32>} : memref<1x8x1792xf32, #tpu.memory_space<vmem>>, vector<1x8x1792xf32>,
    return
  }
  func.func @transform_0(%arg0: i32) -> (i32, i32, i32) {
    %c0_i32 = arith.constant 0 : i32
    %c0_i32_0 = arith.constant 0 : i32
    %c0_i32_1 = arith.constant 0 : i32
    return %arg0, %c0_i32, %c0_i32_0 : i32, i32, i32
  }
  func.func @transform_1(%arg0: i32) -> (i32, i32) {
    %c0_i32 = arith.constant 0 : i32
    %c0_i32_0 = arith.constant 0 : i32
    %c0_i32_1 = arith.constant 0 : i32
    return %c0_i32, %c0_i32_0 : i32, i32
  }
  func.func @transform_2(%arg0: i32) -> (i32, i32) {
    %c0_i32 = arith.constant 0 : i32
    %c0_i32_0 = arith.constant 0 : i32
    %c0_i32_1 = arith.constant 0 : i32
    return %c0_i32, %c0_i32_0 : i32, i32
  }
  func.func @transform_3(%arg0: i32) -> (i32, i32, i32) {
    %c0_i32 = arith.constant 0 : i32
    %c0_i32_0 = arith.constant 0 : i32
    %c0_i32_1 = arith.constant 0 : i32
    %c0_i32_2 = arith.constant 0 : i32
    return %c0_i32, %c0_i32_0, %c0_i32_1 : i32, i32, i32
  }
  func.func @transform_4(%arg0: i32) -> (i32, i32) {
    %c0_i32 = arith.constant 0 : i32
    %c0_i32_0 = arith.constant 0 : i32
    %c0_i32_1 = arith.constant 0 : i32
    return %c0_i32, %c0_i32_0 : i32, i32
  }
  func.func @transform_5(%arg0: i32) -> (i32, i32) {
    %c0_i32 = arith.constant 0 : i32
    %c0_i32_0 = arith.constant 0 : i32
    %c0_i32_1 = arith.constant 0 : i32
    return %c0_i32, %c0_i32_0 : i32, i32
  }
  func.func @transform_6(%arg0: i32) -> (i32, i32) {
    %c0_i32 = arith.constant 0 : i32
    %c0_i32_0 = arith.constant 0 : i32
    %c0_i32_1 = arith.constant 0 : i32
    return %c0_i32, %c0_i32_0 : i32, i32
  }
  func.func @transform_7(%arg0: i32) -> (i32, i32) {
    %c0_i32 = arith.constant 0 : i32
    %c0_i32_0 = arith.constant 0 : i32
    %c0_i32_1 = arith.constant 0 : i32
    return %c0_i32, %c0_i32_0 : i32, i32
  }
  func.func @transform_8(%arg0: i32) -> (i32, i32, i32) {
    %c0_i32 = arith.constant 0 : i32
    %c0_i32_0 = arith.constant 0 : i32
    %c0_i32_1 = arith.constant 0 : i32
    %c0_i32_2 = arith.constant 0 : i32
    return %c0_i32, %c0_i32_0, %c0_i32_1 : i32, i32, i32
  }
  func.func @transform_9(%arg0: i32) -> (i32, i32) {
    %c0_i32 = arith.constant 0 : i32
    %c0_i32_0 = arith.constant 0 : i32
    %c0_i32_1 = arith.constant 0 : i32
    return %c0_i32, %c0_i32_0 : i32, i32
  }
  func.func @transform_10(%arg0: i32) -> (i32, i32, i32) {
    %c0_i32 = arith.constant 0 : i32
    %c0_i32_0 = arith.constant 0 : i32
    %c0_i32_1 = arith.constant 0 : i32
    %c0_i32_2 = arith.constant 0 : i32
    return %c0_i32, %c0_i32_0, %c0_i32_1 : i32, i32, i32
  }
  func.func @transform_11(%arg0: i32) -> (i32, i32) {
    %c0_i32 = arith.constant 0 : i32
    %c0_i32_0 = arith.constant 0 : i32
    %c0_i32_1 = arith.constant 0 : i32
    return %c0_i32, %c0_i32_0 : i32, i32
  }
  func.func @transform_12(%arg0: i32) -> (i32, i32, i32) {
    %c0_i32 = arith.constant 0 : i32
    %c0_i32_0 = arith.constant 0 : i32
    %c0_i32_1 = arith.constant 0 : i32
    %c0_i32_2 = arith.constant 0 : i32
    return %c0_i32, %c0_i32_0, %c0_i32_1 : i32, i32, i32
  }
  func.func @transform_13(%arg0: i32) -> (i32, i32) {
    %c0_i32 = arith.constant 0 : i32
    %c0_i32_0 = arith.constant 0 : i32
    %c0_i32_1 = arith.constant 0 : i32
    return %c0_i32, %c0_i32_0 : i32, i32
  }
  func.func @transform_14(%arg0: i32) -> (i32, i32, i32) {
    %c0_i32 = arith.constant 0 : i32
    %c0_i32_0 = arith.constant 0 : i32
    %c0_i32_1 = arith.constant 0 : i32
    %c0_i32_2 = arith.constant 0 : i32
    return %c0_i32, %c0_i32_0, %c0_i32_1 : i32, i32, i32
  }
  func.func @transform_15(%arg0: i32) -> (i32, i32) {
    %c0_i32 = arith.constant 0 : i32
    %c0_i32_0 = arith.constant 0 : i32
    %c0_i32_1 = arith.constant 0 : i32
    return %c0_i32, %c0_i32_0 : i32, i32
  }
  func.func @transform_16(%arg0: i32) -> (i32, i32, i32) {
    %c0_i32 = arith.constant 0 : i32
    %c0_i32_0 = arith.constant 0 : i32
    %c0_i32_1 = arith.constant 0 : i32
    return %arg0, %c0_i32, %c0_i32_0 : i32, i32, i32
  }
}

</mosaic_0001>

<bundles_post_ra>
// kernel: small_decoder40_forward.1
= control target key start
LH: loop header
LB: loop body
LE: loop exit
PB: predicated region body
PF: predicated region fallthrough
CT: control target
= control target key end

     0   :  { %s19803_s0 = inlined_call_operand.hbm [shape: f32[2,1,32], index: 0, kind: input, shape index: {}]   ;;  %s19804_s1 = inlined_call_operand.vmem [shape: f32[50,32], index: 1, kind: input, shape index: {}]   ;;  %s19805_s2 = inlined_call_operand.vmem [shape: f32[50,1], index: 2, kind: input, shape index: {}]   ;;  %s19806_s3 = inlined_call_operand.vmem [shape: f32[18,50,25], index: 3, kind: input, shape index: {}]   ;;  %s19807_s4 = inlined_call_operand.hbm [shape: f32[18,25], index: 4, kind: input, shape index: {}]   ;;  %s19808_s5 = inlined_call_operand.hbm [shape: bf16[25,384], index: 5, kind: input, shape index: {}]   ;;  %s19809_s6 = inlined_call_operand.hbm [shape: bf16[128,768], index: 6, kind: input, shape index: {}]   ;;  %s19810_s7 = inlined_call_operand.hbm [shape: bf16[512,2304], index: 7, kind: input, shape index: {}]   ;;  %s19811_s8 = inlined_call_operand.vmem [shape: bf16[3,48,18], index: 8, kind: input, shape index: {}]   ;;  %s19812_s9 = inlined_call_operand.vmem [shape: f32[16,1], index: 9, kind: input, shape index: {}]   ;;  %s19813_s10 = inlined_call_operand.vmem [shape: bf16[3,48,16], index: 10, kind: input, shape index: {}]   ;;  %s19814_s11 = inlined_call_operand.vmem [shape: f32[16,1], index: 11, kind: input, shape index: {}]   ;;  %s19815_s12 = inlined_call_operand.vmem [shape: bf16[3,24,16], index: 12, kind: input, shape index: {}]   ;;  %s19816_s13 = inlined_call_operand.vmem [shape: f32[8,1], index: 13, kind: input, shape index: {}]   ;;  %s19817_s14 = inlined_call_operand.vmem [shape: bf16[3,24,8], index: 14, kind: input, shape index: {}]   ;;  %s19818_s15 = inlined_call_operand.vmem [shape: f32[8,1], index: 15, kind: input, shape index: {}]   ;;  %s19819_s16 = inlined_call_operand.vmem [shape: f32[2,8,1792], index: 16, kind: output, shape index: {}]  }
   0x1   :  { %19843 = sst [smem:[#allocation62_spill]] %s19803_s0 }
   0x2   :  { %19844 = sst [smem:[#allocation63_spill]] %s19807_s4 }
   0x3   :  { %19845 = sst [smem:[#allocation64_spill]] %s19808_s5 }
   0x4   :  { %19846 = sst [smem:[#allocation65_spill]] %s19809_s6 }
   0x5   :  { %19847 = sst [smem:[#allocation66_spill]] %s19817_s14 }
   0x6   :  { %19848 = sst [smem:[#allocation67_spill]] %s19818_s15 }
   0x7   :  { %19849 = sst [smem:[#allocation68_spill]] %s19819_s16 }
   0x8   :  { %21 = vsyncpa [#allocation11], 0 }
   0x9   :  { %23 = vsyncpa [#allocation11 + $0x1], 0 }
   0xa   :  { %24 = vsyncpa [#allocation13], 0 }
   0xb   :  { %25 = vsyncpa [#allocation16], 0  ;;  %s16334_s21 = smov 0   ;;  %s16336_s22 = smov 0  }
   0xc   :  { %s16338_s23 = smov 0   ;;  %s16340_s24 = smov 0  }
   0xd LB: > { %s19850_s4 = sld [smem:[#allocation63_spill]]  ;;  %s16358_s28 = sadd.s32 4294967295, %s16225_s24   ;;  %s16225_s24 = sphi %s16340_s24, %s20076_s24   ;;  %s16221_s23 = sphi %s16338_s23, %s20075_s23   ;;  %s16217_s22 = sphi %s16336_s22, %s20074_s22   ;;  %s16213_s21 = sphi %s16334_s21, %s20073_s21  }
   0xe   : > { %p11929_p0 = scmp.ge.s32.totalorder %s16225_s24, 1  ;;  %p52_p1 = scmp.eq.s32.totalorder %s16358_s28, 0 }
   0xf   : > { %p403_p2 = scmp.lt.s32.totalorder %s16225_s24, 3  ;;  %s16227_s30 = smov [#allocation12]  }
  0x10   : > { %s425_s0 = sshll.u32 %s16227_s30, 4  ;;  %s19852_s6 = sld [smem:[#allocation65_spill]]  ;;  %s426_s0 = int_to_ptr.vmem [resolvable:$true] %s425_s0 }
  0x11   : > { %p16363_p3 = pnand %p11929_p0, %p403_p2  ;;  %s16228_s25 = smov [#allocation15]  }
  0x12   : > { %s453_s26 = sshll.u32 %s16228_s25, 4  ;;  %s16230_s30 = smov 8   ;;  %s454_s26 = int_to_ptr.vmem [resolvable:$true] %s453_s26 }
  0x13   : > { %s423_s27 = sshll.u32 %s19850_s4, 4  ;;  %p15921_p4 = pneg %p16363_p3  ;;  %s424_s27 = int_to_ptr.hbm [resolvable:$true] %s423_s27 }
  0x14   : > { %s16229_s4 = smov 128   ;;  %s16231_s16 = smov 384  }
  0x15   : > { %p16374_p5 = pnand %p15921_p4, %p52_p1  ;;  %s16232_s15 = smov 24  }
  0x16   : > { %s451_s19 = sshll.u32 %s19852_s6, 4  ;;  %s19854_s5 = sld [smem:[#allocation64_spill]]  ;;  %s452_s19 = int_to_ptr.hbm [resolvable:$true] %s451_s19 }
  0x17   : > { %15924 = dma.hbm_to_vmem [thread:$0]  (!%p16374_p5), %s424_s27, 384, %s426_s0, [#allocation13], %s16229_s4, %s16229_s4, %s16230_s30  }
  0x18   : > { %15930 = dma.hbm_to_vmem [thread:$0]  (!%p16374_p5), %s452_s19, 6144, %s454_s26, [#allocation16], %s16231_s16, %s16231_s16, %s16232_s15  }
  0x19   : > { %s16233_s14 = smov [#allocation14]   ;;  %s465_s0 = sshll.u32 %s19810_s7, 4  ;;  %s466_s0 = int_to_ptr.hbm [resolvable:$true] %s465_s0 }
  0x1a   : > { %s439_s25 = sshll.u32 %s16233_s14, 4  ;;  %s16234_s15 = smov 192   ;;  %s440_s25 = int_to_ptr.vmem [resolvable:$true] %s439_s25 }
  0x1b   : > { %s16235_s16 = smov 12   ;;  %s16236_s19 = smov [#allocation17]  }
  0x1c   : > { %s437_s6 = sshll.u32 %s19854_s5, 4  ;;  %s467_s14 = sshll.u32 %s16236_s19, 4  ;;  %s438_s6 = int_to_ptr.hbm [resolvable:$true] %s437_s6  ;;  %s468_s14 = int_to_ptr.vmem [resolvable:$true] %s467_s14 }
  0x1d   : > { %15927 = dma.hbm_to_vmem [thread:$0]  (!%p16374_p5), %s438_s6, 768, %s440_s25, [#allocation13], %s16234_s15, %s16234_s15, %s16235_s16  }
  0x1e   : > { %s16237_s26 = smov 1152   ;;  %s16238_s30 = smov 72  }
  0x1f   : > { %15933 = dma.hbm_to_vmem [thread:$0]  (!%p16374_p5), %s466_s0, 73728, %s468_s14, [#allocation16], %s16237_s26, %s16237_s26, %s16238_s30  }
  0x20   : > { %s16393_s17 = sadd.s32 1, %s16225_s24   ;;  %s38_s18 = sadd.s32 1, %s16221_s23 }
  0x21   : > { %s35_s4 = ssub.s32 %s16225_s24, %s16393_s17  ;;  %p45_p6 = scmp.ne.s32.totalorder %s16221_s23, %s16217_s22 }
  0x22   : > { %p36_p7 = scmp.eq.s32.totalorder %s35_s4, 0  ;;  %p46_p8 = scmp.eq.s32.totalorder %s16225_s24, 0 }
  0x23   : > { %p51_p9 = scmp.ne.s32.totalorder %s16217_s22, %s16213_s21  ;;  %p15942_p10 = scmp.lt.s32.totalorder %s16225_s24, 2 }
  0x24   : > { %s16405_s6 = scalar_select %p36_p7, %s16221_s23, %s38_s18  }
  0x25   : > { %p47_p11 = por %p46_p8, %p45_p6  ;;  %p16409_p12 = por %p52_p1, %p51_p9 }
  0x26   : > { %s505_s20 = sand.u32 1, %s16221_s23   ;;  %s19856_s15 = sld [smem:[#allocation62_spill]] }
  0x27   : > { %s508_s14 = scalar_lea.vmem [#allocation10], %s505_s20  ;;  %p16418_p13 = pnand %p15942_p10, %p47_p11 }
  0x28   : > { %s515_s26 = sshll.u32 %s508_s14, 4  ;;  %s506_s30 = scalar_lea.sflag [#allocation11], %s505_s20  ;;  %s516_s26 = int_to_ptr.vmem [resolvable:$true] %s515_s26 }
  0x29   : > { %p16157_p2 = pneg %p16418_p13 }
  0x2c   : > { %s511_s16 = scalar_lea.hbm %s19856_s15, %s16225_s24  ;;  %s16160_s0 = scalar_lea.hbm %s19856_s15, 2 }
  0x2d   : > { %s513_s19 = sshll.u32 %s511_s16, 4  ;;  %s514_s19 = int_to_ptr.hbm [resolvable:$true] %s513_s19 }
  0x2e   : > { %s16153_s18 = sshra.s32 %s514_s19, 4  ;;  %s16154_s18 = int_to_ptr.hbm [resolvable:$true] %s16153_s18 }
  0x2f   : > { %s16155_s4 = scalar_lea.hbm %s16154_s18, 1  ;;  %p16161_p6 = scmp.lt.s32.totalorder %s16154_s18, %s19856_s15 }
  0x30   : > { %p16156_p0 = scmp.ne.s32.totalorder %s16154_s18, %s16155_s4  ;;  %p16162_p7 = scmp.lt.s32.totalorder %s16160_s0, %s16155_s4 }
  0x32   : > { %p16158_p4 = pnand %p16157_p2, %p16156_p0  ;;  %p16163_p8 = por %p16162_p7, %p16161_p6 }
  0x34   : > { %p16159_p5 = pneg %p16158_p4 }
  0x36   : > { %p16164_p9 = pnand %p16163_p8, %p16159_p5 }
  0x38   : > { %16167 = shalt.err (!%p16164_p9)
}
  0x39   : > { %15937 = dma.hbm_to_vmem [thread:$0]  (!%p16418_p13), %s514_s19, 16, %s516_s26, %s506_s30  }
  0x3a   : > { %524 = sbr.rel (%p16363_p3) target bundleno = 3465 (0xd89), region = 84 }
  0x3f   : > { %s526_s20 = sand.u32 1, %s16217_s22  }
  0x40   : > { %s527_s5 = scalar_lea.sflag [#allocation11], %s526_s20  ;;  %s529_s24 = scalar_lea.vmem [#allocation10], %s526_s20 }
  0x41   : > { %16200 = dma.done.wait (%p16409_p12), %s527_s5, 16  }
  0x42   : > { %16202 = vsyncadd (%p16409_p12), %s527_s5, 4294967280 }
  0x43   : > { %16204 = dma.done.wait (%p52_p1), [#allocation13], 1152  }
  0x44   : > { %16206 = vsyncadd (%p52_p1), [#allocation13], 4294966144 }
  0x45   : > { %16208 = dma.done.wait (%p52_p1), [#allocation16], 79872  }
  0x46   : > { %16210 = vsyncadd (%p52_p1), [#allocation16], 4294887424  ;;  %v605_v0 = vld [vmem:[%s19804_s1] sm:$0xff]  ;;  %vm622_vm0 = vcmask 261120   ;;  %v607_v2 = vld [vmem:[%s19804_s1 + $0x10] sm:$0xff]  ;;  %vm641_vm1 = vcmask 254976  }
  0x47   : > { %v16004_v1 = vld [vmem:[%s529_s24] ss:$0 sm:$0xff]  ;;  %v606_v7 = vld [vmem:[%s19804_s1 + $0x8] sm:$0xff]  ;;  %v608_v8 = vld [vmem:[%s19804_s1 + $0x18] sm:$0xff]  ;;  %v16239_v22 = vmov 0   ;;  %vm1508_vm2 = vcmask 1043456  }
  0x48   : > { %v609_v3 = vld [vmem:[%s19804_s1 + $0x20] sm:$0xff]  ;;  %v615_v4 = vmul.f32 %v16004_v1, %v605_v0  ;;  %v617_v5 = vmul.f32 %v16004_v1, %v607_v2  ;;  %v610_v12 = vld [vmem:[%s19804_s1 + $0x28] sm:$0xff]  ;;  %v616_v13 = vmul.f32 %v16004_v1, %v606_v7  ;;  %v618_v14 = vmul.f32 %v16004_v1, %v608_v8  ;;  %v611_v18 = vld [vmem:[%s19804_s1 + $0x30] sm:$0x3]  ;;  %16001 = vset.pattern.permute.xlu1 %v16239_v22  ;;  %s16241_s0 = smov 117   ;;  %s16242_s16 = smov 106  }
  0x49   : > { %v619_v6 = vmul.f32 %v16004_v1, %v609_v3  ;;  %v620_v15 = vmul.f32 %v16004_v1, %v610_v12  ;;  %v621_v20 = vmul.f32 %v16004_v1, %v611_v18  ;;  %16003 = vset.pattern.permute.xlu0 %v16239_v22  ;;  %16002 = vset.pattern.permute.xlu2 %v16239_v22  ;;  %v645_v23 = vld [vmem:[%s19805_s2] sm:$0xff]  ;;  %v647_v24 = vld [vmem:[%s19805_s2 + $0x10] sm:$0xff]  ;;  %v646_v34 = vld [vmem:[%s19805_s2 + $0x8] sm:$0xff]  ;;  %vm1509_vm3 = vcmask 1044480   ;;  %s16243_s29 = smov 127   ;;  %s16244_s19 = smov 126  }
  0x4a   : > { %v623_v9 = vsel %vm622_vm0, %v615_v4, 0.0  ;;  %v629_v10 = vsel %vm622_vm0, %v617_v5, 0.0  ;;  %v626_v16 = vsel %vm622_vm0, %v616_v13, 0.0  ;;  %v632_v17 = vsel %vm622_vm0, %v618_v14, 0.0  ;;  %v649_v29 = vld [vmem:[%s19805_s2 + $0x20] sm:$0xff]  ;;  %v648_v38 = vld [vmem:[%s19805_s2 + $0x18] sm:$0xff] }
  0x4b   : > { %v635_v11 = vsel %vm622_vm0, %v619_v6, 0.0  ;;  %624 = vadd.xlane.f32.xlu0 %v623_v9  ;;  %630 = vadd.xlane.f32.xlu1 %v629_v10  ;;  %v638_v19 = vsel %vm622_vm0, %v620_v15, 0.0  ;;  %v642_v21 = vsel %vm641_vm1, %v621_v20, 0.0  ;;  %v651_v42 = vld [vmem:[%s19805_s2 + $0x30] sm:$0x3]  ;;  %v650_v46 = vld [vmem:[%s19805_s2 + $0x28] sm:$0xff] }
  0x4c   : > { %636 = vadd.xlane.f32.xlu2 %v635_v11  ;;  %v11955_v52 = vld [vmem:[#allocation14 + $0x18] sm:$0xf]  ;;  %v15172_v53 = vld [vmem:[#allocation14 + $0x20] sm:$0x10]  ;;  %v16240_v55 = vmov 65535   ;;  %v667_v0 = vld [vmem:[%s19806_s3 + $0x8] sm:$0xff] }
  0x4d   : > { %v11956_v54 = vor.u32 %v15172_v53, %v11955_v52  ;;  %v1510_v56 = vsel %vm1508_vm2, 4294967295, %v16240_v55  ;;  %v15171_v57 = vld [vmem:[#allocation14 + $0x1c] sm:$0xf]  ;;  %v11957_v58 = vld [vmem:[#allocation14 + $0x24] sm:$0x10]  ;;  %v688_v5 = vld [vmem:[%s19806_s3 + $0xb0] sm:$0xff] }
  0x4e   : > { %v16498_v59 = vsel %vm1509_vm3, %v1510_v56, 0  ;;  %v11943_v60 = vld [vmem:[#allocation14] sm:$0xf]  ;;  %v15169_v61 = vld [vmem:[#allocation14 + $0x8] sm:$0xf0]  ;;  %v11960_v62 = vor.u32 %v15171_v57, %v11957_v58  ;;  %v744_v9 = vld [vmem:[%s19806_s3 + $0x270] sm:$0xff] }
  0x4f   : > { %19859 = vst [vmem:[#allocation22_spill] sm:$0xff] %v16498_v59  ;;  %v1513_v63 = vand.u32 %v11956_v54, %v16498_v59  ;;  %v674_v2 = vld [vmem:[%s19806_s3 + $0x40] sm:$0xff]  ;;  %v11944_v3 = vor.u32 %v15169_v61, %v11943_v60  ;;  %v681_v4 = vld [vmem:[%s19806_s3 + $0x78] sm:$0xff]  ;;  %v723_v6 = vld [vmem:[%s19806_s3 + $0x1c8] sm:$0xff]  ;;  %vm953_vm4 = vcmask 203776   ;;  %vm965_vm5 = vcmask 197632  }
  0x50   : > { %v1516_v1 = vand.u32 %v11960_v62, %v16498_v59  ;;  %v730_v7 = vld [vmem:[%s19806_s3 + $0x200] sm:$0xff]  ;;  %v737_v8 = vld [vmem:[%s19806_s3 + $0x238] sm:$0xff]  ;;  %v779_v13 = vld [vmem:[%s19806_s3 + $0x388] sm:$0xff]  ;;  %vm1435_vm6 = vcmask 1041409   ;;  %vm1438_vm7 = vcmask 1042434   ;;  %vm1441_vm8 = vcmask 1043459  }
  0x51   : > { %15900 = vmatpush.bf16.msra.mxu2 %v1513_v63  ;;  %1527 = vmatpush.bf16.msra.mxu0 %v1513_v63  ;;  %v669_v12 = vld [vmem:[%s19806_s3 + $0x18] sm:$0xff]  ;;  %v786_v14 = vld [vmem:[%s19806_s3 + $0x3c0] sm:$0xff]  ;;  %v739_v22 = vld [vmem:[%s19806_s3 + $0x248] sm:$0xff]  ;;  %vm1444_vm9 = vcmask 1044484   ;;  %vm1447_vm10 = vcmask 1045509   ;;  %vm1450_vm11 = vcmask 1046534  }
  0x52   : > { %1545 = vmatpush.bf16.msra.mxu1 %v1516_v1  ;;  %v690_v18 = vld [vmem:[%s19806_s3 + $0xc0] sm:$0xff]  ;;  %v725_v20 = vld [vmem:[%s19806_s3 + $0x1d8] sm:$0xff]  ;;  %v675_v52 = vld [vmem:[%s19806_s3 + $0x48] sm:$0xff]  ;;  %vm1453_vm12 = vcmask 1047559   ;;  %vm1636_vm13 = vcmask 1040384   ;;  %vm1626_vm14 = vcmask 146432  }
  0x53   : > { %627 = vadd.xlane.f32.xlu0 %v626_v16  ;;  %633 = vadd.xlane.f32.xlu1 %v632_v17  ;;  %v676_v16 = vld [vmem:[%s19806_s3 + $0x50] sm:$0xff]  ;;  %v683_v17 = vld [vmem:[%s19806_s3 + $0x88] sm:$0xff]  ;;  %v682_v54 = vld [vmem:[%s19806_s3 + $0x80] sm:$0xff]  ;;  %vm1776_vm15 = vcmask 957440   ;;  %vm1943_vm0 = vcmask 867328   ;;  %vm2055_vm1 = vcmask 1039360  }
  0x54   : > { %639 = vadd.xlane.f32.xlu2 %v638_v19  ;;  %v680_v53 = vld [vmem:[%s19806_s3 + $0x70] sm:$0xff]  ;;  %v685_v55 = vld [vmem:[%s19806_s3 + $0x98] sm:$0xff]  ;;  %v687_v63 = vld [vmem:[%s19806_s3 + $0xa8] sm:$0xff]  ;;  %vm2078_vm3 = vcmask 1031168   ;;  %s16245_s30 = smov 105   ;;  %s16246_s27 = smov 82  }
  0x55   : > { %15901 = vmatpush.bf16.msra.mxu2 %v11944_v3  ;;  %1528 = vmatpush.bf16.msra.mxu0 %v11944_v3  ;;  %v692_v1 = vld [vmem:[%s19806_s3 + $0xd0] sm:$0xff]  ;;  %s16247_s26 = smov 84   ;;  %s20071_s14 = sld [smem:[#allocation67_spill]] }
  0x56   : > { %p598_p1 = scmp.lt.s32.totalorder %s16358_s28, 1  ;;  %s20072_s20 = sld [smem:[#allocation68_spill]] }
  0x58   : > { %s20078_s28 = smov (!%p598_p1, %s16358_s28), 1 }
  0x5b   : > { %643 = vadd.xlane.f32.xlu0 %v642_v21  ;;  %v732_v21 = vld [vmem:[%s19806_s3 + $0x210] sm:$0xff] }
  0xbe   : > { %v625_v25 = vpop.xlane.xlu0 %624  ;;  %v631_v26 = vpop.xlane.xlu1 %630 }
  0xbf   : > { %v652_v27 = vadd.f32 %v645_v23, %v625_v25  ;;  %v654_v28 = vadd.f32 %v647_v24, %v631_v26  ;;  %v637_v30 = vpop.xlane.xlu2 %636 }
  0xc0   : > { %v656_v33 = vadd.f32 %v649_v29, %v637_v30 }
  0xc1   : > { %v659_v31 = vmax.f32 %v652_v27, 0.0  ;;  %v661_v32 = vmax.f32 %v654_v28, 0.0 }
  0xc2   : > { %v663_v36 = vmax.f32 %v656_v33, 0.0 }
  0xc3   : > { %794 = vperm.xlu1 %16001, %v659_v31   ;;  %804 = vperm.xlu0 %16003, %v661_v32   ;;  %v746_v31 = vld [vmem:[%s19806_s3 + $0x280] sm:$0xff]  ;;  %v781_v32 = vld [vmem:[%s19806_s3 + $0x398] sm:$0xff] }
  0xc6   : > { %v628_v35 = vpop.xlane.xlu0 %627  ;;  %v634_v39 = vpop.xlane.xlu1 %633 }
  0xc7   : > { %v653_v37 = vadd.f32 %v646_v34, %v628_v35  ;;  %v655_v41 = vadd.f32 %v648_v38, %v634_v39  ;;  %v640_v47 = vpop.xlane.xlu2 %639  ;;  %v671_v38 = vld [vmem:[%s19806_s3 + $0x28] sm:$0xff]  ;;  %v788_v39 = vld [vmem:[%s19806_s3 + $0x3d0] sm:$0xff] }
  0xc8   : > { %v657_v49 = vadd.f32 %v650_v46, %v640_v47 }
  0xc9   : > { %v660_v40 = vmax.f32 %v653_v37, 0.0  ;;  %v662_v44 = vmax.f32 %v655_v41, 0.0  ;;  %v666_v37 = vld [vmem:[%s19806_s3] sm:$0xff] }
  0xca   : > { %v664_v50 = vmax.f32 %v657_v49, 0.0 }
  0xcb   : > { %814 = vperm.xlu1 %16001, %v663_v36   ;;  %799 = vperm.xlu2 %16002, %v660_v40  }
  0xce   : > { %v644_v43 = vpop.xlane.xlu0 %643 }
  0xcf   : > { %v658_v45 = vadd.f32 %v651_v42, %v644_v43 }
  0xd1   : > { %v665_v48 = vmax.f32 %v658_v45, 0.0  ;;  %v678_v45 = vld [vmem:[%s19806_s3 + $0x60] sm:$0xff] }
  0xd3   : > { %809 = vperm.xlu2 %16002, %v662_v44   ;;  %824 = vperm.xlu1 %16001, %v665_v48   ;;  %v673_v44 = vld [vmem:[%s19806_s3 + $0x38] sm:$0xff] }
  0xdb   : > { %819 = vperm.xlu2 %16002, %v664_v50   ;;  %v668_v50 = vld [vmem:[%s19806_s3 + $0x10] sm:$0xff] }
 0x125   : > { %v16495_v51 = vpop.permute.xlu2 %799 }
 0x126   : > { %19858 = vst [vmem:[#allocation21_spill] sm:$0xff] %v16495_v51  ;;  %v828_v10 = vmul.f32 %v16495_v51, %v667_v0  ;;  %v835_v15 = vmul.f32 %v16495_v51, %v674_v2  ;;  %v842_v19 = vmul.f32 %v16495_v51, %v681_v4  ;;  %v849_v23 = vmul.f32 %v16495_v51, %v688_v5  ;;  %v689_v0 = vld [vmem:[%s19806_s3 + $0xb8] sm:$0xff] }
 0x127   : > { %v884_v24 = vmul.f32 %v16495_v51, %v723_v6  ;;  %v891_v25 = vmul.f32 %v16495_v51, %v730_v7  ;;  %v898_v26 = vmul.f32 %v16495_v51, %v737_v8  ;;  %v905_v27 = vmul.f32 %v16495_v51, %v744_v9  ;;  %v722_v7 = vld [vmem:[%s19806_s3 + $0x1c0] sm:$0xff]  ;;  %v724_v8 = vld [vmem:[%s19806_s3 + $0x1d0] sm:$0xff] }
 0x128   : > { %v940_v28 = vmul.f32 %v16495_v51, %v779_v13  ;;  %v947_v29 = vmul.f32 %v16495_v51, %v786_v14  ;;  %v16566_v30 = vsel %vm953_vm4, %v828_v10, 0.0  ;;  %v16578_v36 = vsel %vm953_vm4, %v835_v15, 0.0  ;;  %v727_v14 = vld [vmem:[%s19806_s3 + $0x1e8] sm:$0xff]  ;;  %v729_v15 = vld [vmem:[%s19806_s3 + $0x1f8] sm:$0xff] }
 0x129   : > { %v16600_v46 = vsel %vm953_vm4, %v842_v19, 0.0  ;;  %v16603_v47 = vsel %vm953_vm4, %v849_v23, 0.0  ;;  %v16606_v48 = vsel %vm953_vm4, %v884_v24, 0.0  ;;  %v16609_v49 = vsel %vm953_vm4, %v891_v25, 0.0  ;;  %v738_v23 = vld [vmem:[%s19806_s3 + $0x240] sm:$0xff]  ;;  %v733_v51 = vld [vmem:[%s19806_s3 + $0x218] sm:$0xff] }
 0x12a   : > { %v16633_v58 = vsel %vm953_vm4, %v898_v26, 0.0  ;;  %v16636_v60 = vsel %vm953_vm4, %v905_v27, 0.0  ;;  %v16697_v19 = vsel %vm953_vm4, %v940_v28, 0.0  ;;  %v741_v28 = vld [vmem:[%s19806_s3 + $0x258] sm:$0xff] }
 0x12b   : > { %19866 = vst [vmem:[#allocation29_spill] sm:$0xff] %v16697_v19 }
 0x12d   : > { %v16527_v11 = vpop.permute.xlu2 %809 }
 0x12e   : > { %19860 = vst [vmem:[#allocation23_spill] sm:$0xff] %v16527_v11  ;;  %v830_v33 = vmul.f32 %v16527_v11, %v669_v12  ;;  %v837_v34 = vmul.f32 %v16527_v11, %v676_v16  ;;  %v844_v35 = vmul.f32 %v16527_v11, %v683_v17  ;;  %v851_v40 = vmul.f32 %v16527_v11, %v690_v18  ;;  %v731_v16 = vld [vmem:[%s19806_s3 + $0x208] sm:$0xff] }
 0x12f   : > { %v886_v41 = vmul.f32 %v16527_v11, %v725_v20  ;;  %v893_v42 = vmul.f32 %v16527_v11, %v732_v21  ;;  %v900_v43 = vmul.f32 %v16527_v11, %v739_v22  ;;  %v16627_v56 = vmul.f32 %v16527_v11, %v746_v31  ;;  %v734_v21 = vld [vmem:[%s19806_s3 + $0x220] sm:$0xff]  ;;  %v736_v22 = vld [vmem:[%s19806_s3 + $0x230] sm:$0xff]  ;;  %v745_v31 = vld [vmem:[%s19806_s3 + $0x278] sm:$0xff] }
 0x130   : > { %v16630_v57 = vmul.f32 %v16527_v11, %v781_v32  ;;  %v16652_v2 = vmul.f32 %v16527_v11, %v788_v39  ;;  %v16655_v3 = vsel %vm953_vm4, %v830_v33, 0.0  ;;  %v16658_v4 = vsel %vm953_vm4, %v837_v34, 0.0  ;;  %v780_v39 = vld [vmem:[%s19806_s3 + $0x390] sm:$0xff] }
 0x131   : > { %v16661_v5 = vsel %vm953_vm4, %v844_v35, 0.0  ;;  %v16672_v9 = vsel %vm953_vm4, %v851_v40, 0.0  ;;  %v16675_v10 = vsel %vm953_vm4, %v886_v41, 0.0  ;;  %v16678_v12 = vsel %vm953_vm4, %v893_v42, 0.0 }
 0x132   : > { %19861 = vst [vmem:[#allocation24_spill] sm:$0xff] %v16630_v57  ;;  %v16681_v13 = vsel %vm953_vm4, %v900_v43, 0.0  ;;  %v16700_v20 = vsel %vm953_vm4, %v947_v29, 0.0  ;;  %v743_v29 = vld [vmem:[%s19806_s3 + $0x268] sm:$0xff] }
 0x133   : > { %19864 = vst [vmem:[#allocation27_spill] sm:$0xff] %v16652_v2  ;;  %v740_v2 = vld [vmem:[%s19806_s3 + $0x250] sm:$0xff] }
 0x134   : > { %19867 = vst [vmem:[#allocation30_spill] sm:$0xff] %v16700_v20 }
 0x135   : > { %v16638_v61 = vpop.permute.xlu1 %794  ;;  %v16640_v62 = vpop.permute.xlu2 %819 }
 0x136   : > { %19862 = vst [vmem:[#allocation25_spill] sm:$0xff] %v16638_v61  ;;  %v16663_v6 = vpop.permute.xlu0 %804  ;;  %v827_v17 = vmul.f32 %v16638_v61, %v666_v37  ;;  %v16694_v18 = vmul.f32 %v16640_v62, %v671_v38  ;;  %v834_v25 = vmul.f32 %v16638_v61, %v673_v44  ;;  %v16717_v27 = vmul.f32 %v16640_v62, %v678_v45  ;;  %v748_v37 = vld [vmem:[%s19806_s3 + $0x290] sm:$0xff]  ;;  %v778_v38 = vld [vmem:[%s19806_s3 + $0x380] sm:$0xff]  ;;  %v783_v44 = vld [vmem:[%s19806_s3 + $0x3a8] sm:$0xff] }
 0x137   : > { %19863 = vst [vmem:[#allocation26_spill] sm:$0xff] %v16640_v62  ;;  %v829_v24 = vmul.f32 %v16663_v6, %v668_v50  ;;  %v16714_v26 = vmul.f32 %v16663_v6, %v675_v52  ;;  %v841_v32 = vmul.f32 %v16638_v61, %v680_v53  ;;  %v16730_v33 = vmul.f32 %v16663_v6, %v682_v54  ;;  %v785_v45 = vld [vmem:[%s19806_s3 + $0x3b8] sm:$0xff]  ;;  %v787_v50 = vld [vmem:[%s19806_s3 + $0x3c8] sm:$0xff] }
 0x138   : > { %19865 = vst [vmem:[#allocation28_spill] sm:$0xff] %v16663_v6  ;;  %v16733_v34 = vmul.f32 %v16640_v62, %v685_v55  ;;  %v16736_v35 = vmul.f32 %v16638_v61, %v687_v63  ;;  %v16748_v40 = vmul.f32 %v16663_v6, %v689_v0  ;;  %v16751_v41 = vmul.f32 %v16640_v62, %v692_v1  ;;  %v670_v63 = vld [vmem:[%s19806_s3 + $0x20] sm:$0xff]  ;;  %v677_v0 = vld [vmem:[%s19806_s3 + $0x58] sm:$0xff] }
 0x139   : > { %v16754_v42 = vmul.f32 %v16638_v61, %v722_v7  ;;  %v16757_v43 = vmul.f32 %v16663_v6, %v724_v8  ;;  %v16769_v52 = vmul.f32 %v16640_v62, %v727_v14  ;;  %v16772_v53 = vmul.f32 %v16638_v61, %v729_v15  ;;  %v790_v1 = vld [vmem:[%s19806_s3 + $0x3e0] sm:$0xff] }
 0x13a   : > { %v16775_v54 = vmul.f32 %v16663_v6, %v731_v16  ;;  %v16778_v55 = vmul.f32 %v16640_v62, %v734_v21  ;;  %v16790_v7 = vmul.f32 %v16638_v61, %v736_v22  ;;  %v16793_v8 = vmul.f32 %v16663_v6, %v738_v23  ;;  %v684_v21 = vld [vmem:[%s19806_s3 + $0x90] sm:$0xff]  ;;  %v691_v22 = vld [vmem:[%s19806_s3 + $0xc8] sm:$0xff]  ;;  %v726_v23 = vld [vmem:[%s19806_s3 + $0x1e0] sm:$0xff] }
 0x13b   : > { %v16796_v14 = vmul.f32 %v16640_v62, %v741_v28  ;;  %v16799_v15 = vmul.f32 %v16638_v61, %v743_v29  ;;  %v16813_v28 = vmul.f32 %v16663_v6, %v745_v31  ;;  %v16816_v29 = vmul.f32 %v16640_v62, %v748_v37  ;;  %v747_v31 = vld [vmem:[%s19806_s3 + $0x288] sm:$0xff] }
 0x13c   : > { %v16819_v59 = vmul.f32 %v16638_v61, %v778_v38  ;;  %v954_v11 = vsel %vm953_vm4, %v827_v17, 0.0  ;;  %v16832_v37 = vmul.f32 %v16663_v6, %v780_v39  ;;  %v16835_v38 = vmul.f32 %v16640_v62, %v783_v44 }
 0x13d   : > { %v16801_v16 = vpop.permute.xlu1 %814  ;;  %19868 = vst [vmem:[#allocation31_spill] sm:$0xff] %v16816_v29  ;;  %v16838_v17 = vmul.f32 %v16638_v61, %v785_v45  ;;  %v16841_v20 = vmul.f32 %v16663_v6, %v787_v50  ;;  %v16846_v19 = vmul.f32 %v16640_v62, %v790_v1  ;;  %v957_v39 = vsel %vm953_vm4, %v829_v24, 0.0  ;;  %v672_v50 = vld [vmem:[%s19806_s3 + $0x30] sm:$0x3] }
 0x13e   : > { %19869 = vst [vmem:[#allocation32_spill] sm:$0xff] %v16832_v37  ;;  %v831_v57 = vmul.f32 %v16801_v16, %v670_v63  ;;  %v838_v29 = vmul.f32 %v16801_v16, %v677_v0  ;;  %v845_v37 = vmul.f32 %v16801_v16, %v684_v21  ;;  %v852_v44 = vmul.f32 %v16801_v16, %v691_v22  ;;  %v679_v21 = vld [vmem:[%s19806_s3 + $0x68] sm:$0x3] }
 0x13f   : > { %19870 = vst [vmem:[#allocation33_spill] sm:$0xff] %v16835_v38  ;;  %v887_v45 = vmul.f32 %v16801_v16, %v726_v23  ;;  %v956_v61 = vadd.f32 %v16566_v30, %v954_v11  ;;  %v16857_v63 = vmul.f32 %v16801_v16, %v733_v51  ;;  %v16860_v0 = vmul.f32 %v16801_v16, %v740_v2  ;;  %v686_v11 = vld [vmem:[%s19806_s3 + $0xa0] sm:$0x3] }
 0x140   : > { %19871 = vst [vmem:[#allocation34_spill] sm:$0xff] %v16841_v20  ;;  %v16863_v24 = vmul.f32 %v16801_v16, %v747_v31  ;;  %v974_v1 = vsel %vm953_vm4, %v834_v25, 0.0  ;;  %v977_v2 = vsel %vm953_vm4, %v16714_v26, 0.0  ;;  %v993_v22 = vsel %vm953_vm4, %v841_v32, 0.0  ;;  %v693_v25 = vld [vmem:[%s19806_s3 + $0xd8] sm:$0x3] }
 0x141   : > { %19872 = vst [vmem:[#allocation35_spill] sm:$0xff] %v16846_v19  ;;  %v958_v30 = vadd.f32 %v957_v39, %v956_v61  ;;  %v976_v51 = vadd.f32 %v16578_v36, %v974_v1  ;;  %v961_v23 = vsel %vm953_vm4, %v831_v57, 0.0  ;;  %v963_v31 = vsel %vm953_vm4, %v16694_v18, 0.0  ;;  %v728_v36 = vld [vmem:[%s19806_s3 + $0x1f0] sm:$0x3] }
 0x142   : > { %v995_v62 = vadd.f32 %v16600_v46, %v993_v22  ;;  %v996_v61 = vsel %vm953_vm4, %v16730_v33, 0.0  ;;  %v981_v26 = vsel %vm953_vm4, %v838_v29, 0.0  ;;  %v983_v32 = vsel %vm953_vm4, %v16717_v27, 0.0  ;;  %v735_v46 = vld [vmem:[%s19806_s3 + $0x228] sm:$0x3] }
 0x143   : > { %v1000_v39 = vsel %vm953_vm4, %v845_v37, 0.0  ;;  %v1012_v57 = vsel %vm953_vm4, %v16736_v35, 0.0  ;;  %v742_v33 = vld [vmem:[%s19806_s3 + $0x260] sm:$0x3]  ;;  %v960_v29 = vadd.f32 %v16655_v3, %v958_v30  ;;  %v978_v1 = vadd.f32 %v977_v2, %v976_v51 }
 0x144   : > { %v997_v22 = vadd.f32 %v996_v61, %v995_v62  ;;  %v1002_v27 = vsel %vm953_vm4, %v16733_v34, 0.0  ;;  %v1014_v19 = vadd.f32 %v16603_v47, %v1012_v57  ;;  %v1015_v20 = vsel %vm953_vm4, %v16748_v40, 0.0 }
 0x145   : > { %v16894_v18 = vpop.permute.xlu1 %824  ;;  %v1019_v3 = vsel %vm953_vm4, %v852_v44, 0.0  ;;  %v1021_v62 = vsel %vm953_vm4, %v16751_v41, 0.0  ;;  %v980_v30 = vadd.f32 %v16658_v4, %v978_v1 }
 0x146   : > { %v833_v37 = vmul.f32 %v16894_v18, %v672_v50  ;;  %v840_v35 = vmul.f32 %v16894_v18, %v679_v21  ;;  %v847_v6 = vmul.f32 %v16894_v18, %v686_v11  ;;  %v854_v38 = vmul.f32 %v16894_v18, %v693_v25 }
 0x147   : > { %v889_v34 = vmul.f32 %v16894_v18, %v728_v36  ;;  %v896_v50 = vmul.f32 %v16894_v18, %v735_v46  ;;  %v16918_v21 = vmul.f32 %v16894_v18, %v742_v33  ;;  %v962_v11 = vadd.f32 %v961_v23, %v960_v29 }
 0x148   : > { %v966_v47 = vsel %vm965_vm5, %v833_v37, 0.0  ;;  %v985_v51 = vsel %vm965_vm5, %v840_v35, 0.0  ;;  %v999_v40 = vadd.f32 %v16661_v5, %v997_v22  ;;  %v1004_v2 = vsel %vm965_vm5, %v847_v6, 0.0 }
 0x149   : > { %v964_v44 = vadd.f32 %v963_v31, %v962_v11  ;;  %v1016_v41 = vadd.f32 %v1015_v20, %v1014_v19  ;;  %v1107_v25 = vsel %vm953_vm4, %v16754_v42, 0.0  ;;  %v982_v61 = vadd.f32 %v981_v26, %v980_v30 }
 0x14a   : > { %v1001_v36 = vadd.f32 %v1000_v39, %v999_v40  ;;  %v1109_v57 = vadd.f32 %v16606_v48, %v1107_v25  ;;  %v1110_v23 = vsel %vm953_vm4, %v16757_v43, 0.0  ;;  %v1023_v33 = vsel %vm965_vm5, %v854_v38, 0.0  ;;  %v749_v40 = vld [vmem:[%s19806_s3 + $0x298] sm:$0x3] }
 0x14b   : > { %v967_v46 = vadd.f32 %v966_v47, %v964_v44  ;;  %v1018_v4 = vadd.f32 %v16672_v9, %v1016_v41  ;;  %v1114_v5 = vsel %vm953_vm4, %v887_v45, 0.0  ;;  %v984_v31 = vadd.f32 %v983_v32, %v982_v61 }
 0x14c   : > { %v1003_v6 = vadd.f32 %v1002_v27, %v1001_v36  ;;  %v1111_v19 = vadd.f32 %v1110_v23, %v1109_v57  ;;  %v1116_v20 = vsel %vm953_vm4, %v16769_v52, 0.0  ;;  %v1126_v48 = vsel %vm953_vm4, %v16772_v53, 0.0 }
 0x14d   : > { %v968_v42 = vrot.slane %v967_v46, 4  ;;  %v1020_v26 = vadd.f32 %v1019_v3, %v1018_v4  ;;  %v1129_v43 = vsel %vm953_vm4, %v16775_v54, 0.0  ;;  %v986_v39 = vadd.f32 %v985_v51, %v984_v31  ;;  %v784_v4 = vld [vmem:[%s19806_s3 + $0x3b0] sm:$0x3] }
 0x14e   : > { %v1005_v9 = vadd.f32 %v1004_v2, %v1003_v6  ;;  %v1113_v38 = vadd.f32 %v16675_v10, %v1111_v19  ;;  %v1128_v45 = vadd.f32 %v16609_v49, %v1126_v48  ;;  %v1118_v1 = vsel %vm965_vm5, %v889_v34, 0.0 }
 0x14f   : > { %v969_v32 = vadd.f32 %v968_v42, %v967_v46  ;;  %v1022_v29 = vadd.f32 %v1021_v62, %v1020_v26  ;;  %v1133_v52 = vsel %vm953_vm4, %v16857_v63, 0.0  ;;  %v987_v22 = vrot.slane %v986_v39, 4 }
 0x150   : > { %v1006_v27 = vrot.slane %v1005_v9, 4  ;;  %v1115_v37 = vadd.f32 %v1114_v5, %v1113_v38  ;;  %v1130_v53 = vadd.f32 %v1129_v43, %v1128_v45  ;;  %v1135_v54 = vsel %vm953_vm4, %v16778_v55, 0.0  ;;  %v782_v55 = vld [vmem:[%s19806_s3 + $0x3a0] sm:$0xff] }
 0x151   : > { %v970_v35 = vrot.slane %v969_v32, 2  ;;  %v1024_v3 = vadd.f32 %v1023_v33, %v1022_v29  ;;  %v1145_v10 = vsel %vm953_vm4, %v16790_v7, 0.0  ;;  %v988_v49 = vadd.f32 %v987_v22, %v986_v39  ;;  %v789_v7 = vld [vmem:[%s19806_s3 + $0x3d8] sm:$0xff] }
 0x152   : > { %v1007_v11 = vadd.f32 %v1006_v27, %v1005_v9  ;;  %v1117_v62 = vadd.f32 %v1116_v20, %v1115_v37  ;;  %v1132_v34 = vadd.f32 %v16678_v12, %v1130_v53  ;;  %v1147_v63 = vadd.f32 %v16633_v58, %v1145_v10 }
 0x153   : > { %v971_v47 = vadd.f32 %v970_v35, %v969_v32  ;;  %v1025_v30 = vrot.slane %v1024_v3, 4  ;;  %v1148_v51 = vsel %vm953_vm4, %v16793_v8, 0.0  ;;  %v989_v12 = vrot.slane %v988_v49, 2 }
 0x154   : > { %v1008_v44 = vrot.slane %v1007_v11, 2  ;;  %v1119_v2 = vadd.f32 %v1118_v1, %v1117_v62  ;;  %v1134_v41 = vadd.f32 %v1133_v52, %v1132_v34  ;;  %v1137_v25 = vsel %vm965_vm5, %v896_v50, 0.0  ;;  %v19874_v34 = vld [vmem:[#allocation32_spill] sm:$0xff] }
 0x155   : > { %v1026_v58 = vadd.f32 %v1025_v30, %v1024_v3  ;;  %v1149_v8 = vadd.f32 %v1148_v51, %v1147_v63  ;;  %v1152_v61 = vsel %vm953_vm4, %v16860_v0, 0.0  ;;  %v990_v36 = vadd.f32 %v989_v12, %v988_v49  ;;  %v791_v0 = vld [vmem:[%s19806_s3 + $0x3e8] sm:$0x3] }
 0x156   : > { %v1009_v57 = vadd.f32 %v1008_v44, %v1007_v11  ;;  %v1120_v23 = vrot.slane %v1119_v2, 4  ;;  %v1136_v46 = vadd.f32 %v1135_v54, %v1134_v41  ;;  %v910_v33 = vmul.f32 %v16894_v18, %v749_v40  ;;  %v19873_v11 = vld [vmem:[#allocation29_spill] sm:$0xff]  ;;  %v19875_v40 = vld [vmem:[#allocation31_spill] sm:$0xff]  ;;  %v19876_v44 = vld [vmem:[#allocation24_spill] sm:$0xff] }
 0x157   : > { %v943_v5 = vmul.f32 %v16801_v16, %v782_v55  ;;  %v950_v31 = vmul.f32 %v16801_v16, %v789_v7  ;;  %v1151_v50 = vadd.f32 %v16681_v13, %v1149_v8  ;;  %v972_v6 = vrot.slane %v971_v47, 1 }
 0x158   : > { %v1027_v19 = vrot.slane %v1026_v58, 2  ;;  %v1121_v20 = vadd.f32 %v1120_v23, %v1119_v2  ;;  %v1138_v42 = vadd.f32 %v1137_v25, %v1136_v46  ;;  %v991_v26 = vrot.slane %v990_v36, 1  ;;  %v17007_v46 = vld [vmem:[#allocation12] sm:$0xff] }
 0x159   : > { %v1010_v48 = vrot.slane %v1009_v57, 1  ;;  %v1153_v43 = vadd.f32 %v1152_v61, %v1151_v50  ;;  %v1164_v39 = vsel %vm953_vm4, %v16799_v15, 0.0  ;;  %v945_v9 = vmul.f32 %v16894_v18, %v784_v4  ;;  %19879 = vst [vmem:[#allocation29_spill] sm:$0xff] %v17007_v46 }
 0x15a   : > { %v1139_v38 = vrot.slane %v1138_v42, 4  ;;  %v1154_v13 = vsel %vm953_vm4, %v16796_v14, 0.0  ;;  %v1156_v45 = vsel %vm965_vm5, %v16918_v21, 0.0  ;;  %v952_v32 = vmul.f32 %v16894_v18, %v791_v0  ;;  %v19880_v0 = vld [vmem:[#allocation33_spill] sm:$0xff] }
 0x15b   : > { %v1155_v29 = vadd.f32 %v1154_v13, %v1153_v43  ;;  %v1166_v1 = vadd.f32 %v16636_v60, %v1164_v39  ;;  %v1167_v52 = vsel %vm953_vm4, %v16813_v28, 0.0  ;;  %v16985_v22 = vadd.f32 %v972_v6, %v971_v47 }
 0x15c   : > { %v1028_v15 = vadd.f32 %v1027_v19, %v1026_v58  ;;  %v1122_v27 = vrot.slane %v1121_v20, 2  ;;  %v1140_v37 = vadd.f32 %v1139_v38, %v1138_v42  ;;  %v992_v53 = vadd.f32 %v991_v26, %v990_v36  ;;  %v19877_v58 = vld [vmem:[#allocation34_spill] sm:$0xff]  ;;  %v19881_v26 = vld [vmem:[#allocation27_spill] sm:$0xff] }
 0x15d   : > { %v1011_v35 = vadd.f32 %v1010_v48, %v1009_v57  ;;  %v1157_v3 = vadd.f32 %v1156_v45, %v1155_v29  ;;  %v1168_v14 = vadd.f32 %v1167_v52, %v1166_v1  ;;  %v1169_v21 = vsel %vm953_vm4, %v16627_v56, 0.0  ;;  %v19878_v57 = vld [vmem:[#allocation30_spill] sm:$0xff]  ;;  %v17016_v1 = vld [vmem:[#allocation12 + $0x8] sm:$0xff] }
 0x15e   : > { %v1141_v54 = vrot.slane %v1140_v37, 2  ;;  %v1171_v10 = vsel %vm953_vm4, %v16863_v24, 0.0  ;;  %v1259_v60 = vsel %vm953_vm4, %v16819_v59, 0.0  ;;  %v1262_v47 = vsel %vm953_vm4, %v19874_v34, 0.0  ;;  %19882 = vst [vmem:[#allocation32_spill] sm:$0xff] %v17016_v1 }
 0x15f   : > { %v1158_v28 = vrot.slane %v1157_v3, 4  ;;  %v1170_v49 = vadd.f32 %v1169_v21, %v1168_v14  ;;  %v1261_v62 = vadd.f32 %v19873_v11, %v1259_v60  ;;  %v1029_v30 = vrot.slane %v1028_v15, 1 }
 0x160   : > { %v1123_v63 = vadd.f32 %v1122_v27, %v1121_v20  ;;  %v1142_v51 = vadd.f32 %v1141_v54, %v1140_v37  ;;  %v1173_v55 = vsel %vm953_vm4, %v19875_v40, 0.0  ;;  %v1175_v24 = vsel %vm965_vm5, %v910_v33, 0.0  ;;  %v19883_v54 = vld [vmem:[#allocation35_spill] sm:$0xff] }
 0x161   : > { %v1159_v56 = vadd.f32 %v1158_v28, %v1157_v3  ;;  %v1172_v7 = vadd.f32 %v1171_v10, %v1170_v49  ;;  %v1263_v12 = vadd.f32 %v1262_v47, %v1261_v62  ;;  %v1264_v59 = vsel %vm953_vm4, %v19876_v44, 0.0 }
 0x162   : > { %v1266_v2 = vsel %vm953_vm4, %v943_v5, 0.0  ;;  %v1278_v41 = vsel %vm953_vm4, %v16838_v17, 0.0  ;;  %v1281_v25 = vsel %vm953_vm4, %v19877_v58, 0.0  ;;  %v1030_v4 = vadd.f32 %v1029_v30, %v1028_v15 }
 0x163   : > { %v1160_v8 = vrot.slane %v1159_v56, 2  ;;  %v1174_v61 = vadd.f32 %v1173_v55, %v1172_v7  ;;  %v1265_v36 = vadd.f32 %v1264_v59, %v1263_v12  ;;  %v1280_v23 = vadd.f32 %v19878_v57, %v1278_v41 }
 0x164   : > { %v1124_v33 = vrot.slane %v1123_v63, 1  ;;  %v1143_v50 = vrot.slane %v1142_v51, 1  ;;  %v1268_v6 = vsel %vm953_vm4, %v19880_v0, 0.0  ;;  %v1270_v42 = vsel %vm965_vm5, %v945_v9, 0.0 }
 0x165   : > { %v1161_v5 = vadd.f32 %v1160_v8, %v1159_v56  ;;  %v1176_v19 = vadd.f32 %v1175_v24, %v1174_v61  ;;  %v1267_v20 = vadd.f32 %v1266_v2, %v1265_v36  ;;  %v1282_v17 = vadd.f32 %v1281_v25, %v1280_v23 }
 0x166   : > { %v1283_v48 = vsel %vm953_vm4, %v19881_v26, 0.0  ;;  %v1285_v43 = vsel %vm953_vm4, %v950_v31, 0.0  ;;  %v1303_v39 = vrot.slane %v17007_v46, 1  ;;  %v1125_v52 = vadd.f32 %v1124_v33, %v1123_v63 }
 0x167   : > { %v1162_v38 = vrot.slane %v1161_v5, 1  ;;  %v1177_v13 = vrot.slane %v1176_v19, 4  ;;  %v1269_v45 = vadd.f32 %v1268_v6, %v1267_v20  ;;  %v1284_v29 = vadd.f32 %v1283_v48, %v1282_v17  ;;  %v15168_v20 = vld [vmem:[#allocation14 + $0x4] sm:$0xf]  ;;  %v11945_v17 = vld [vmem:[#allocation14 + $0xc] sm:$0xf0] }
 0x168   : > { %v1144_v15 = vadd.f32 %v1143_v50, %v1142_v51  ;;  %v1304_v27 = vrot.slane %v17007_v46, 2  ;;  %v1305_v37 = vrot.slane %v17007_v46, 3  ;;  %v1287_v31 = vsel %vm953_vm4, %v19883_v54, 0.0 }
 0x169   : > { %v1178_v9 = vadd.f32 %v1177_v13, %v1176_v19  ;;  %v1271_v3 = vadd.f32 %v1270_v42, %v1269_v45  ;;  %v1286_v14 = vadd.f32 %v1285_v43, %v1284_v29  ;;  %v1289_v21 = vsel %vm965_vm5, %v952_v32, 0.0 }
 0x16a   : > { %v1310_v10 = vrot.slane %v17016_v1, 1  ;;  %v1311_v60 = vrot.slane %v17016_v1, 2  ;;  %v1337_v28 = vadd.f32 %v1303_v39, %v992_v53  ;;  %v1163_v49 = vadd.f32 %v1162_v38, %v1161_v5 }
 0x16b   : > { %v1179_v11 = vrot.slane %v1178_v9, 2  ;;  %v1272_v62 = vrot.slane %v1271_v3, 4  ;;  %v1288_v34 = vadd.f32 %v1287_v31, %v1286_v14  ;;  %v1338_v47 = vadd.f32 %v1304_v27, %v1011_v35  ;;  %v695_v14 = vld [vmem:[%s19806_s3 + $0xe8] sm:$0xff]  ;;  %v762_v31 = vld [vmem:[%s19806_s3 + $0x300] sm:$0xff] }
 0x16c   : > { %v1339_v30 = vadd.f32 %v1305_v37, %v1030_v4  ;;  %v1355_v63 = vmax.f32 %v1337_v28, 0.0  ;;  %v1336_v56 = vadd.f32 %v17007_v46, %v16985_v22  ;;  %v1344_v32 = vadd.f32 %v17016_v1, %v1125_v52  ;;  %v1299_v4 = vld [vmem:[#allocation12 + $0x10] sm:$0x3]  ;;  %v702_v28 = vld [vmem:[%s19806_s3 + $0x120] sm:$0xff] }
 0x16d   : > { %v1180_v51 = vadd.f32 %v1179_v11, %v1178_v9  ;;  %v1273_v40 = vadd.f32 %v1272_v62, %v1271_v3  ;;  %v1290_v55 = vadd.f32 %v1289_v21, %v1288_v34  ;;  %v1345_v7 = vadd.f32 %v1310_v10, %v1144_v15  ;;  %v694_v3 = vld [vmem:[%s19806_s3 + $0xe0] sm:$0xff]  ;;  %v696_v10 = vld [vmem:[%s19806_s3 + $0xf0] sm:$0xff] }
 0x16e   : > { %v1346_v53 = vadd.f32 %v1311_v60, %v1163_v49  ;;  %v1356_v59 = vmax.f32 %v1338_v47, 0.0  ;;  %v1357_v2 = vmax.f32 %v1339_v30, 0.0  ;;  %v1373_v41 = vpack.c.bf16 %v1355_v63, %v1355_v63  ;;  %v697_v60 = vld [vmem:[%s19806_s3 + $0xf8] sm:$0xff]  ;;  %v698_v47 = vld [vmem:[%s19806_s3 + $0x100] sm:$0xff]  ;;  %v699_v30 = vld [vmem:[%s19806_s3 + $0x108] sm:$0xff] }
 0x16f   : > { %v1181_v24 = vrot.slane %v1180_v51, 1  ;;  %v1274_v12 = vrot.slane %v1273_v40, 2  ;;  %v1291_v44 = vrot.slane %v1290_v55, 4  ;;  %v1312_v25 = vrot.slane %v17016_v1, 3  ;;  %v700_v63 = vld [vmem:[%s19806_s3 + $0x110] sm:$0x3] }
 0x170   : > { %v1354_v8 = vmax.f32 %v1336_v56, 0.0  ;;  %v1362_v61 = vmax.f32 %v1344_v32, 0.0  ;;  %v1363_v36 = vmax.f32 %v1345_v7, 0.0  ;;  %v1364_v33 = vmax.f32 %v1346_v53, 0.0  ;;  %v701_v56 = vld [vmem:[%s19806_s3 + $0x118] sm:$0xff]  ;;  %v703_v32 = vld [vmem:[%s19806_s3 + $0x128] sm:$0xff] }
 0x171   : > { %v1275_v58 = vadd.f32 %v1274_v12, %v1273_v40  ;;  %v1292_v35 = vadd.f32 %v1291_v44, %v1290_v55  ;;  %v1182_v57 = vadd.f32 %v1181_v24, %v1180_v51  ;;  %v1374_v50 = vpack.c.bf16 %v1356_v59, %v1356_v59  ;;  %v704_v7 = vld [vmem:[%s19806_s3 + $0x130] sm:$0xff]  ;;  %v709_v24 = vld [vmem:[%s19806_s3 + $0x158] sm:$0xff] }
 0x172   : > { %v1375_v0 = vpack.c.bf16 %v1357_v2, %v1357_v2  ;;  %v1417_v6 = vunpack.c.l.b16 %v1373_v41  ;;  %v1317_v42 = vrot.slane %v1299_v4, 1  ;;  %v1372_v26 = vpack.c.bf16 %v1354_v8, %v1354_v8  ;;  %v19891_v12 = vld [vmem:[#allocation25_spill] sm:$0xff]  ;;  %v705_v59 = vld [vmem:[%s19806_s3 + $0x138] sm:$0xff]  ;;  %v706_v2 = vld [vmem:[%s19806_s3 + $0x140] sm:$0xff] }
 0x173   : > { %v1276_v23 = vrot.slane %v1275_v58, 1  ;;  %v1293_v22 = vrot.slane %v1292_v35, 2  ;;  %v17029_v48 = vpack.c.bf16 %v1362_v61, %v1362_v61  ;;  %v17031_v43 = vpack.c.bf16 %v1363_v36, %v1363_v36  ;;  %v707_v41 = vld [vmem:[%s19806_s3 + $0x148] sm:$0x3]  ;;  %v19894_v61 = vld [vmem:[#allocation23_spill] sm:$0xff]  ;;  %v772_v1 = vld [vmem:[%s19806_s3 + $0x350] sm:$0xff] }
 0x174   : > { %v17033_v38 = vadd.f32 %v1312_v25, %v1182_v57  ;;  %v17035_v45 = vpack.c.bf16 %v1364_v33, %v1364_v33  ;;  %v1418_v29 = vunpack.c.l.b16 %v1374_v50  ;;  %v1419_v52 = vunpack.c.l.b16 %v1375_v0  ;;  %v19893_v25 = vld [vmem:[#allocation28_spill] sm:$0xff]  ;;  %v716_v33 = vld [vmem:[%s19806_s3 + $0x190] sm:$0xff] }
 0x175   : > { %v1277_v5 = vadd.f32 %v1276_v23, %v1275_v58  ;;  %v1294_v19 = vadd.f32 %v1293_v22, %v1292_v35  ;;  %19884 = vst [vmem:[#allocation31_spill] sm:$0xff] %v17029_v48  ;;  %v1434_v15 = vrot.slane %v1417_v6, 7  ;;  %v11948_v27 = vor.u32 %v15168_v20, %v11945_v17  ;;  %v19892_v58 = vld [vmem:[#allocation21_spill] sm:$0xff]  ;;  %v710_v22 = vld [vmem:[%s19806_s3 + $0x160] sm:$0xff]  ;;  %v19895_v0 = vld [vmem:[#allocation26_spill] sm:$0xff] }
 0x176   : > { %19885 = vst [vmem:[#allocation24_spill] sm:$0xff] %v17031_v43  ;;  %v1416_v54 = vunpack.c.l.b16 %v1372_v26  ;;  %v17070_v40 = vrot.slane %v1418_v29, 6  ;;  %v17072_v55 = vrot.slane %v1419_v52, 5  ;;  %v17087_v44 = vmul.f32 %v19891_v12, %v694_v3  ;;  %v708_v23 = vld [vmem:[%s19806_s3 + $0x150] sm:$0xff]  ;;  %v713_v17 = vld [vmem:[%s19806_s3 + $0x178] sm:$0xff]  ;;  %v715_v29 = vld [vmem:[%s19806_s3 + $0x188] sm:$0xff] }
 0x177   : > { %v1295_v39 = vrot.slane %v1294_v19, 1  ;;  %19886 = vst [vmem:[#allocation34_spill] sm:$0xff] %v17033_v38  ;;  %v1352_v13 = vadd.f32 %v1299_v4, %v1277_v5  ;;  %1546 = vmatpush.bf16.msra.mxu1 %v11948_v27  ;;  %v17099_v35 = vmul.f32 %v19892_v58, %v695_v14  ;;  %v17102_v8 = vmul.f32 %v19893_v25, %v696_v10  ;;  %v711_v4 = vld [vmem:[%s19806_s3 + $0x168] sm:$0xff]  ;;  %v712_v20 = vld [vmem:[%s19806_s3 + $0x170] sm:$0xff]  ;;  %v717_v52 = vld [vmem:[%s19806_s3 + $0x198] sm:$0xff] }
 0x178   : > { %19887 = vst [vmem:[#allocation30_spill] sm:$0xff] %v17035_v45  ;;  %v17068_v51 = vsel %vm1435_vm6, %v1434_v15, %v1416_v54  ;;  %v17105_v36 = vmul.f32 %v19894_v61, %v697_v60  ;;  %v17121_v50 = vmul.f32 %v16801_v16, %v698_v47  ;;  %v17124_v6 = vmul.f32 %v19895_v0, %v699_v30  ;;  %v718_v15 = vld [vmem:[%s19806_s3 + $0x1a0] sm:$0xff]  ;;  %v751_v27 = vld [vmem:[%s19806_s3 + $0x2a8] sm:$0xff]  ;;  %v720_v60 = vld [vmem:[%s19806_s3 + $0x1b0] sm:$0xff] }
 0x179   : > { %v1296_v37 = vadd.f32 %v1295_v39, %v1294_v19  ;;  %v1370_v9 = vmax.f32 %v1352_v13, 0.0  ;;  %19888 = vst [vmem:[#allocation33_spill] sm:$0xff] %v17068_v51  ;;  %v17127_v5 = vmul.f32 %v16894_v18, %v700_v63  ;;  %v17139_v26 = vmul.f32 %v19891_v12, %v701_v56  ;;  %v719_v10 = vld [vmem:[%s19806_s3 + $0x1a8] sm:$0xff]  ;;  %v750_v30 = vld [vmem:[%s19806_s3 + $0x2a0] sm:$0xff]  ;;  %v752_v63 = vld [vmem:[%s19806_s3 + $0x2b0] sm:$0xff] }
 0x17a   : > { %19889 = vst [vmem:[#allocation27_spill] sm:$0xff] %v17070_v40  ;;  %v17142_v39 = vmul.f32 %v19892_v58, %v702_v28  ;;  %v17145_v13 = vmul.f32 %v19893_v25, %v703_v32  ;;  %v17166_v3 = vmul.f32 %v19895_v0, %v706_v2  ;;  %v17169_v14 = vmul.f32 %v16894_v18, %v707_v41  ;;  %v721_v28 = vld [vmem:[%s19806_s3 + $0x1b8] sm:$0x3]  ;;  %v758_v32 = vld [vmem:[%s19806_s3 + $0x2e0] sm:$0xff]  ;;  %v767_v45 = vld [vmem:[%s19806_s3 + $0x328] sm:$0xff] }
 0x17b   : > { %v1353_v49 = vadd.f32 %v1317_v42, %v1296_v37  ;;  %v17055_v62 = vpack.c.bf16 %v1370_v9, %v1370_v9  ;;  %19890 = vst [vmem:[#allocation35_spill] sm:$0xff] %v17072_v55  ;;  %v714_v42 = vld [vmem:[%s19806_s3 + $0x180] sm:$0x3]  ;;  %v17160_v37 = vmul.f32 %v19894_v61, %v704_v7  ;;  %v17163_v9 = vmul.f32 %v16801_v16, %v705_v59  ;;  %v753_v56 = vld [vmem:[%s19806_s3 + $0x2b8] sm:$0xff]  ;;  %v768_v40 = vld [vmem:[%s19806_s3 + $0x330] sm:$0xff] }
 0x17c   : > { %v17187_v47 = vmul.f32 %v19893_v25, %v710_v22  ;;  %v17202_v7 = vmul.f32 %v19894_v61, %v711_v4  ;;  %v17211_v59 = vmul.f32 %v16894_v18, %v714_v42  ;;  %v754_v41 = vld [vmem:[%s19806_s3 + $0x2c0] sm:$0xff]  ;;  %v757_v22 = vld [vmem:[%s19806_s3 + $0x2d8] sm:$0xff]  ;;  %v760_v4 = vld [vmem:[%s19806_s3 + $0x2f0] sm:$0xff]  ;;  %v17253_v34 = vmul.f32 %v19895_v0, %v720_v60 }
 0x17d   : > { %v1371_v53 = vmax.f32 %v1353_v49, 0.0  ;;  %v1432_v57 = vunpack.c.l.b16 %v17055_v62  ;;  %v17181_v49 = vmul.f32 %v19891_v12, %v708_v23  ;;  %v17184_v62 = vmul.f32 %v19892_v58, %v709_v24  ;;  %v755_v23 = vld [vmem:[%s19806_s3 + $0x2c8] sm:$0xff]  ;;  %v756_v42 = vld [vmem:[%s19806_s3 + $0x2d0] sm:$0x3]  ;;  %v761_v55 = vld [vmem:[%s19806_s3 + $0x2f8] sm:$0xff] }
 0x17e   : > { %v17205_v24 = vmul.f32 %v16801_v16, %v712_v20  ;;  %v17229_v20 = vmul.f32 %v19892_v58, %v716_v33  ;;  %v765_v33 = vld [vmem:[%s19806_s3 + $0x318] sm:$0xff]  ;;  %v17256_v21 = vmul.f32 %v16894_v18, %v721_v28  ;;  %v17269_v60 = vmul.f32 %v19891_v12, %v750_v30  ;;  %v766_v48 = vld [vmem:[%s19806_s3 + $0x320] sm:$0xff]  ;;  %v771_v43 = vld [vmem:[%s19806_s3 + $0x348] sm:$0xff] }
 0x17f   : > { %v1389_v19 = vpack.c.bf16 %v1371_v53, %v1371_v53  ;;  %v17208_v53 = vmul.f32 %v19895_v0, %v713_v17  ;;  %v17232_v17 = vmul.f32 %v19893_v25, %v717_v52  ;;  %v17250_v52 = vmul.f32 %v16801_v16, %v719_v10  ;;  %v764_v10 = vld [vmem:[%s19806_s3 + $0x310] sm:$0xff]  ;;  %v769_v30 = vld [vmem:[%s19806_s3 + $0x338] sm:$0xff]  ;;  %v770_v51 = vld [vmem:[%s19806_s3 + $0x340] sm:$0x3] }
 0x180   : > { %v17272_v28 = vmul.f32 %v19892_v58, %v751_v27  ;;  %v17289_v27 = vmul.f32 %v19894_v61, %v753_v56  ;;  %v17307_v56 = vmul.f32 %v16894_v18, %v756_v42  ;;  %v17324_v46 = vmul.f32 %v19894_v61, %v760_v4  ;;  %v775_v4 = vld [vmem:[%s19806_s3 + $0x368] sm:$0xff] }
 0x181   : > { %v1433_v54 = vunpack.c.l.b16 %v1389_v19  ;;  %v17226_v19 = vmul.f32 %v19891_v12, %v715_v29  ;;  %v17247_v29 = vmul.f32 %v19894_v61, %v718_v15  ;;  %v763_v15 = vld [vmem:[%s19806_s3 + $0x308] sm:$0x3]  ;;  %v17327_v42 = vmul.f32 %v16801_v16, %v761_v55 }
 0x182   : > { %19897 = vst [vmem:[#allocation21_spill] sm:$0xff] %v17324_v46  ;;  %v17345_v55 = vmul.f32 %v19891_v12, %v764_v10  ;;  %v17363_v46 = vmul.f32 %v16894_v18, %v770_v51  ;;  %v17366_v10 = vmul.f32 %v19891_v12, %v771_v43  ;;  %v17384_v43 = vmul.f32 %v16801_v16, %v775_v4 }
 0x183   : > { %v1469_v2 = vrot.slane %v1433_v54, 7  ;;  %v759_v54 = vld [vmem:[%s19806_s3 + $0x2e8] sm:$0xff]  ;;  %19898 = vst [vmem:[#allocation28_spill] sm:$0xff] %v17327_v42  ;;  %v17360_v42 = vmul.f32 %v19895_v0, %v769_v30 }
 0x184   : > { %v17316_v38 = vmul.f32 %v19893_v25, %v759_v54  ;;  %v773_v54 = vld [vmem:[%s19806_s3 + $0x358] sm:$0xff] }
 0x185   : > { %v1470_v11 = vsel %vm1435_vm6, %v1469_v2, %v1432_v57  ;;  %v17275_v57 = vmul.f32 %v19893_v25, %v752_v63  ;;  %v17292_v63 = vmul.f32 %v16801_v16, %v754_v41  ;;  %v17310_v41 = vmul.f32 %v19891_v12, %v757_v22 }
 0x186   : > { %v17277_v2 = vpack.c.b16 %v1470_v11, %v1470_v11  ;;  %v17295_v11 = vmul.f32 %v19895_v0, %v755_v23  ;;  %v17313_v23 = vmul.f32 %v19892_v58, %v758_v32  ;;  %v17330_v22 = vmul.f32 %v19895_v0, %v762_v31 }
 0x187   : > { %v17333_v32 = vmul.f32 %v16894_v18, %v763_v15  ;;  %v17348_v31 = vmul.f32 %v19892_v58, %v765_v33  ;;  %v17351_v15 = vmul.f32 %v19893_v25, %v766_v48  ;;  %v17369_v33 = vmul.f32 %v19892_v58, %v772_v1 }
 0x188   : > { %19896 = vst [vmem:[#allocation25_spill] sm:$0xff] %v17277_v2  ;;  %11966 = vmatmul.msk.bf16.vlgmr.msra.gmra.mxu2 %vm953_vm4, %v17277_v2  ;;  %v774_v2 = vld [vmem:[%s19806_s3 + $0x360] sm:$0xff]  ;;  %v1031_v48 = vsel %vm953_vm4, %v17087_v44, 0.0  ;;  %v17378_v30 = vmul.f32 %v19893_v25, %v773_v54  ;;  %v1036_v12 = vsel %vm953_vm4, %v17105_v36, 0.0  ;;  %v1050_v44 = vsel %vm953_vm4, %v17139_v26, 0.0 }
 0x189   : > { %19899 = vst [vmem:[#allocation23_spill] sm:$0xff] %v17330_v22  ;;  %v17357_v22 = vmul.f32 %v16801_v16, %v768_v40  ;;  %v1034_v40 = vsel %vm953_vm4, %v17102_v8, 0.0  ;;  %v17381_v51 = vmul.f32 %v19894_v61, %v774_v2  ;;  %v1051_v58 = vsel %vm953_vm4, %v17142_v39, 0.0 }
 0x18a   : > { %19900 = vst [vmem:[#allocation26_spill] sm:$0xff] %v17333_v32  ;;  %v17354_v32 = vmul.f32 %v19894_v61, %v767_v45  ;;  %v1032_v45 = vsel %vm953_vm4, %v17099_v35, 0.0  ;;  %v1053_v35 = vsel %vm953_vm4, %v17145_v13, 0.0  ;;  %v1038_v8 = vsel %vm953_vm4, %v17121_v50, 0.0 }
 0x18b   : > { %v1033_v1 = vadd.f32 %v1032_v45, %v1031_v48  ;;  %v1040_v16 = vsel %vm953_vm4, %v17124_v6, 0.0  ;;  %v1052_v61 = vadd.f32 %v1051_v58, %v1050_v44  ;;  %v1042_v36 = vsel %vm965_vm5, %v17127_v5, 0.0 }
 0x18c   : > { %v1055_v26 = vsel %vm953_vm4, %v17160_v37, 0.0  ;;  %v1069_v39 = vsel %vm953_vm4, %v17181_v49, 0.0  ;;  %v1070_v13 = vsel %vm953_vm4, %v17184_v62, 0.0  ;;  %v1072_v50 = vsel %vm953_vm4, %v17187_v47, 0.0 }
 0x18d   : > { %v1035_v25 = vadd.f32 %v1034_v40, %v1033_v1  ;;  %v1054_v54 = vadd.f32 %v1053_v35, %v1052_v61  ;;  %v1071_v4 = vadd.f32 %v1070_v13, %v1069_v39  ;;  %v1057_v6 = vsel %vm953_vm4, %v17163_v9, 0.0 }
 0x18e   : > { %v1059_v5 = vsel %vm953_vm4, %v17166_v3, 0.0  ;;  %v1061_v37 = vsel %vm965_vm5, %v17169_v14, 0.0  ;;  %v1074_v49 = vsel %vm953_vm4, %v17202_v7, 0.0  ;;  %v1088_v40 = vsel %vm953_vm4, %v17226_v19, 0.0 }
 0x18f   : > { %v1037_v2 = vadd.f32 %v1036_v12, %v1035_v25  ;;  %v1056_v62 = vadd.f32 %v1055_v26, %v1054_v54  ;;  %v1073_v45 = vadd.f32 %v1072_v50, %v1071_v4  ;;  %v1076_v47 = vsel %vm953_vm4, %v17205_v24, 0.0 }
 0x190   : > { %v1078_v9 = vsel %vm953_vm4, %v17208_v53, 0.0  ;;  %v1089_v3 = vsel %vm953_vm4, %v17229_v20, 0.0  ;;  %v1091_v14 = vsel %vm953_vm4, %v17232_v17, 0.0  ;;  %v1080_v58 = vsel %vm965_vm5, %v17211_v59, 0.0 }
 0x191   : > { %v1039_v48 = vadd.f32 %v1038_v8, %v1037_v2  ;;  %v1058_v7 = vadd.f32 %v1057_v6, %v1056_v62  ;;  %v1075_v12 = vadd.f32 %v1074_v49, %v1073_v45  ;;  %v1090_v44 = vadd.f32 %v1089_v3, %v1088_v40 }
 0x192   : > { %v1093_v19 = vsel %vm953_vm4, %v17247_v29, 0.0  ;;  %v1183_v24 = vsel %vm953_vm4, %v17269_v60, 0.0  ;;  %v1184_v53 = vsel %vm953_vm4, %v17272_v28, 0.0  ;;  %v1095_v8 = vsel %vm953_vm4, %v17250_v52, 0.0 }
 0x193   : > { %v1041_v1 = vadd.f32 %v1040_v16, %v1039_v48  ;;  %v1060_v35 = vadd.f32 %v1059_v5, %v1058_v7  ;;  %v1077_v25 = vadd.f32 %v1076_v47, %v1075_v12  ;;  %v1092_v17 = vadd.f32 %v1091_v14, %v1090_v44  ;;  %v19902_v7 = vld [vmem:[#allocation28_spill] sm:$0xff] }
 0x194   : > { %v1097_v16 = vsel %vm953_vm4, %v17253_v34, 0.0  ;;  %v1185_v59 = vadd.f32 %v1184_v53, %v1183_v24  ;;  %v1186_v29 = vsel %vm953_vm4, %v17275_v57, 0.0  ;;  %v1188_v28 = vsel %vm953_vm4, %v17289_v27, 0.0 }
 0x195   : > { %v1043_v20 = vadd.f32 %v1042_v36, %v1041_v1  ;;  %v1062_v26 = vadd.f32 %v1061_v37, %v1060_v35  ;;  %v1079_v60 = vadd.f32 %v1078_v9, %v1077_v25  ;;  %v1094_v39 = vadd.f32 %v1093_v19, %v1092_v17  ;;  %v777_v9 = vld [vmem:[%s19806_s3 + $0x378] sm:$0x3]  ;;  %v19901_v1 = vld [vmem:[#allocation21_spill] sm:$0xff] }
 0x196   : > { %v1187_v13 = vadd.f32 %v1186_v29, %v1185_v59  ;;  %v1190_v36 = vsel %vm953_vm4, %v17292_v63, 0.0  ;;  %v1202_v52 = vsel %vm953_vm4, %v17310_v41, 0.0  ;;  %v1099_v57 = vsel %vm965_vm5, %v17256_v21, 0.0  ;;  %v776_v21 = vld [vmem:[%s19806_s3 + $0x370] sm:$0xff] }
 0x197   : > { %v1044_v61 = vrot.slane %v1043_v20, 4  ;;  %v1063_v34 = vrot.slane %v1062_v26, 4  ;;  %v1081_v54 = vadd.f32 %v1080_v58, %v1079_v60  ;;  %v1096_v4 = vadd.f32 %v1095_v8, %v1094_v39 }
 0x198   : > { %v1189_v50 = vadd.f32 %v1188_v28, %v1187_v13  ;;  %v1203_v6 = vsel %vm953_vm4, %v17313_v23, 0.0  ;;  %v1205_v27 = vsel %vm953_vm4, %v17316_v38, 0.0  ;;  %v1192_v41 = vsel %vm953_vm4, %v17295_v11, 0.0  ;;  %v19904_v13 = vld [vmem:[#allocation26_spill] sm:$0xff] }
 0x199   : > { %v1045_v2 = vadd.f32 %v1044_v61, %v1043_v20  ;;  %v1064_v37 = vadd.f32 %v1063_v34, %v1062_v26  ;;  %v1082_v63 = vrot.slane %v1081_v54, 4  ;;  %v1098_v49 = vadd.f32 %v1097_v16, %v1096_v4  ;;  %v19903_v61 = vld [vmem:[#allocation23_spill] sm:$0xff] }
 0x19a   : > { %v1191_v48 = vadd.f32 %v1190_v36, %v1189_v50  ;;  %v1194_v62 = vsel %vm965_vm5, %v17307_v56, 0.0  ;;  %v1204_v45 = vadd.f32 %v1203_v6, %v1202_v52  ;;  %v1207_v11 = vsel %vm953_vm4, %v19901_v1, 0.0  ;;  %v19906_v1 = vld [vmem:[#allocation32_spill] sm:$0xff] }
 0x19b   : > { %v1046_v5 = vrot.slane %v1045_v2, 2  ;;  %v1065_v40 = vrot.slane %v1064_v37, 2  ;;  %v1083_v47 = vadd.f32 %v1082_v63, %v1081_v54  ;;  %v1100_v38 = vadd.f32 %v1099_v57, %v1098_v49 }
 0x19c   : > { %v1193_v3 = vadd.f32 %v1192_v41, %v1191_v48  ;;  %v1206_v14 = vadd.f32 %v1205_v27, %v1204_v45  ;;  %v1209_v56 = vsel %vm953_vm4, %v19902_v7, 0.0  ;;  %v1221_v19 = vsel %vm953_vm4, %v17345_v55, 0.0 }
 0x19d   : > { %v1047_v23 = vadd.f32 %v1046_v5, %v1045_v2  ;;  %v1084_v44 = vrot.slane %v1083_v47, 2  ;;  %v1101_v58 = vrot.slane %v1100_v38, 4  ;;  %v937_v24 = vmul.f32 %v19895_v0, %v776_v21 }
 0x19e   : > { %v1066_v53 = vadd.f32 %v1065_v40, %v1064_v37  ;;  %v1195_v20 = vadd.f32 %v1194_v62, %v1193_v3  ;;  %v1208_v35 = vadd.f32 %v1207_v11, %v1206_v14  ;;  %v938_v25 = vmul.f32 %v16894_v18, %v777_v9 }
 0x19f   : > { %v1048_v12 = vrot.slane %v1047_v23, 1  ;;  %v1102_v17 = vadd.f32 %v1101_v58, %v1100_v38  ;;  %v1222_v8 = vsel %vm953_vm4, %v17348_v31, 0.0  ;;  %v1224_v16 = vsel %vm953_vm4, %v17351_v15, 0.0 }
 0x1a0   : > { %v1196_v59 = vrot.slane %v1195_v20, 4  ;;  %v1210_v29 = vadd.f32 %v1209_v56, %v1208_v35  ;;  %v1211_v26 = vsel %vm953_vm4, %v19903_v61, 0.0  ;;  %v1223_v55 = vadd.f32 %v1222_v8, %v1221_v19  ;;  %v19907_v61 = vld [vmem:[#allocation34_spill] sm:$0xff] }
 0x1a1   : > { %v1049_v60 = vadd.f32 %v1048_v12, %v1047_v23  ;;  %v1085_v0 = vadd.f32 %v1084_v44, %v1083_v47  ;;  %v1103_v39 = vrot.slane %v1102_v17, 2  ;;  %v1213_v28 = vsel %vm965_vm5, %v19904_v13, 0.0  ;;  %v19905_v23 = vld [vmem:[#allocation29_spill] sm:$0xff] }
 0x1a2   : > { %v1067_v18 = vrot.slane %v1066_v53, 1  ;;  %v1197_v36 = vadd.f32 %v1196_v59, %v1195_v20  ;;  %v1212_v52 = vadd.f32 %v1211_v26, %v1210_v29  ;;  %v1225_v2 = vadd.f32 %v1224_v16, %v1223_v55  ;;  %v19909_v55 = vld [vmem:[#allocation24_spill] sm:$0xff] }
 0x1a3   : > { %v1104_v31 = vadd.f32 %v1103_v39, %v1102_v17  ;;  %v1226_v15 = vsel %vm953_vm4, %v17354_v32, 0.0  ;;  %v1228_v34 = vsel %vm953_vm4, %v17357_v22, 0.0  ;;  %v1240_v54 = vsel %vm953_vm4, %v17366_v10, 0.0 }
 0x1a4   : > { %v1198_v4 = vrot.slane %v1197_v36, 2  ;;  %v1214_v57 = vadd.f32 %v1213_v28, %v1212_v52  ;;  %v1227_v50 = vadd.f32 %v1226_v15, %v1225_v2  ;;  %v1241_v6 = vsel %vm953_vm4, %v17369_v33, 0.0  ;;  %v19912_v52 = vld [vmem:[#allocation27_spill] sm:$0xff] }
 0x1a5   : > { %v1086_v27 = vrot.slane %v1085_v0, 1  ;;  %v1230_v5 = vsel %vm953_vm4, %v17360_v42, 0.0  ;;  %v1242_v37 = vadd.f32 %v1241_v6, %v1240_v54  ;;  %v1243_v32 = vsel %vm953_vm4, %v17378_v30, 0.0 }
 0x1a6   : > { %v1199_v63 = vadd.f32 %v1198_v4, %v1197_v36  ;;  %v1215_v22 = vrot.slane %v1214_v57, 4  ;;  %v1229_v49 = vadd.f32 %v1228_v34, %v1227_v50  ;;  %v1232_v10 = vsel %vm965_vm5, %v17363_v46, 0.0  ;;  %v19911_v36 = vld [vmem:[#allocation33_spill] sm:$0xff] }
 0x1a7   : > { %v1105_v48 = vrot.slane %v1104_v31, 1  ;;  %v1244_v41 = vadd.f32 %v1243_v32, %v1242_v37  ;;  %v1245_v33 = vsel %vm953_vm4, %v17381_v51, 0.0  ;;  %v1247_v62 = vsel %vm953_vm4, %v17384_v43, 0.0  ;;  %v19915_v37 = vld [vmem:[#allocation31_spill] sm:$0xff] }
 0x1a8   : > { %v1200_v42 = vrot.slane %v1199_v63, 1  ;;  %v1216_v45 = vadd.f32 %v1215_v22, %v1214_v57  ;;  %v1231_v21 = vadd.f32 %v1230_v5, %v1229_v49  ;;  %v1306_v30 = vrot.slane %v19905_v23, 4 }
 0x1a9   : > { %v1068_v40 = vadd.f32 %v1067_v18, %v1066_v53  ;;  %v1087_v47 = vadd.f32 %v1086_v27, %v1085_v0  ;;  %v1246_v38 = vadd.f32 %v1245_v33, %v1244_v41  ;;  %v1307_v9 = vrot.slane %v19905_v23, 5 }
 0x1aa   : > { %v1201_v3 = vadd.f32 %v1200_v42, %v1199_v63  ;;  %v1217_v46 = vrot.slane %v1216_v45, 2  ;;  %v1233_v14 = vadd.f32 %v1232_v10, %v1231_v21  ;;  %v1313_v11 = vrot.slane %v19906_v1, 4 }
 0x1ab   : > { %v1106_v7 = vadd.f32 %v1105_v48, %v1104_v31  ;;  %v1248_v51 = vadd.f32 %v1247_v62, %v1246_v38  ;;  %v1249_v56 = vsel %vm953_vm4, %v937_v24, 0.0  ;;  %v1308_v43 = vrot.slane %v19905_v23, 6  ;;  %v19913_v31 = vld [vmem:[#allocation30_spill] sm:$0xff]  ;;  %v15173_v38 = vld [vmem:[#allocation14 + $0x28] sm:$0x10] }
 0x1ac   : > { %v1218_v12 = vadd.f32 %v1217_v46, %v1216_v45  ;;  %v1234_v44 = vrot.slane %v1233_v14, 4  ;;  %v1251_v58 = vsel %vm965_vm5, %v938_v25, 0.0  ;;  %v1340_v19 = vadd.f32 %v1306_v30, %v1049_v60  ;;  %v19917_v45 = vld [vmem:[#allocation35_spill] sm:$0xff] }
 0x1ad   : > { %v1250_v53 = vadd.f32 %v1249_v56, %v1248_v51  ;;  %v1309_v20 = vrot.slane %v19905_v23, 7  ;;  %v1341_v35 = vadd.f32 %v1307_v9, %v1068_v40  ;;  %v1348_v17 = vadd.f32 %v1313_v11, %v1201_v3 }
 0x1ae   : > { %v1219_v8 = vrot.slane %v1218_v12, 1  ;;  %v1235_v16 = vadd.f32 %v1234_v44, %v1233_v14  ;;  %v1314_v59 = vrot.slane %v19906_v1, 5  ;;  %v1358_v29 = vmax.f32 %v1340_v19, 0.0 }
 0x1af   : > { %v19908_v26 = vmax.f32 %v19907_v61, 0.0  ;;  %v19910_v0 = vunpack.c.l.b16 %v19909_v55  ;;  %v1252_v13 = vadd.f32 %v1251_v58, %v1250_v53  ;;  %v1342_v25 = vadd.f32 %v1308_v43, %v1087_v47  ;;  %v11963_v47 = vld [vmem:[#allocation14 + $0x20] sm:$0xf] }
 0x1b0   : > { %v1220_v60 = vadd.f32 %v1219_v8, %v1218_v12  ;;  %v1236_v28 = vrot.slane %v1235_v16, 2  ;;  %v1366_v18 = vmax.f32 %v1348_v17, 0.0  ;;  %v1439_v2 = vsel %vm1438_vm7, %v19912_v52, %v19911_v36  ;;  %v15170_v17 = vld [vmem:[#allocation14 + $0x10] sm:$0xf0] }
 0x1b1   : > { %v1383_v24 = vpack.c.bf16 %v19908_v26, %v19908_v26  ;;  %v1455_v39 = vrot.slane %v19910_v0, 7  ;;  %v19914_v15 = vunpack.c.l.b16 %v19913_v31  ;;  %v1253_v54 = vrot.slane %v1252_v13, 4 }
 0x1b2   : > { %v1359_v4 = vmax.f32 %v1341_v35, 0.0  ;;  %v1237_v57 = vadd.f32 %v1236_v28, %v1235_v16  ;;  %v1343_v50 = vadd.f32 %v1309_v20, %v1106_v7  ;;  %v1349_v6 = vadd.f32 %v1314_v59, %v1220_v60  ;;  %v11951_v35 = vld [vmem:[#allocation14 + $0x8] sm:$0xf] }
 0x1b3   : > { %v1457_v34 = vrot.slane %v19914_v15, 6  ;;  %v1376_v27 = vpack.c.bf16 %v1358_v29, %v1358_v29  ;;  %v1427_v5 = vunpack.c.l.b16 %v1383_v24  ;;  %v19916_v32 = vunpack.c.l.b16 %v19915_v37  ;;  %v19918_v29 = vld [vmem:[#allocation22_spill] sm:$0xff]  ;;  %v19919_v37 = vld [vmem:[#allocation25_spill] sm:$0xff] }
 0x1b4   : > { %v1254_v22 = vadd.f32 %v1253_v54, %v1252_v13  ;;  %v1360_v49 = vmax.f32 %v1342_v25, 0.0  ;;  %v1238_v10 = vrot.slane %v1237_v57, 1  ;;  %v1315_v48 = vrot.slane %v19906_v1, 6 }
 0x1b5   : > { %v1456_v63 = vsel %vm1435_vm6, %v1455_v39, %v19916_v32  ;;  %v1367_v41 = vmax.f32 %v1349_v6, 0.0  ;;  %v1384_v33 = vpack.c.bf16 %v1366_v18, %v1366_v18  ;;  %v1377_v42 = vpack.c.bf16 %v1359_v4, %v1359_v4 }
 0x1b6   : > { %v1255_v62 = vrot.slane %v1254_v22, 2  ;;  %v1442_v21 = vsel %vm1441_vm8, %v19917_v45, %v1439_v2  ;;  %v1239_v23 = vadd.f32 %v1238_v10, %v1237_v57  ;;  %v1361_v30 = vmax.f32 %v1343_v50, 0.0 }
 0x1b7   : > { %v1420_v40 = vunpack.c.l.b16 %v1376_v27  ;;  %v1458_v9 = vsel %vm1438_vm7, %v1457_v34, %v1456_v63  ;;  %v1378_v46 = vpack.c.bf16 %v1360_v49, %v1360_v49  ;;  %v1385_v14 = vpack.c.bf16 %v1367_v41, %v1367_v41 }
 0x1b8   : > { %v1256_v3 = vadd.f32 %v1255_v62, %v1254_v22  ;;  %v1459_v11 = vrot.slane %v1427_v5, 5  ;;  %v1316_v7 = vrot.slane %v19906_v1, 7  ;;  %v1350_v51 = vadd.f32 %v1315_v48, %v1239_v23 }
 0x1b9   : > { %v1428_v56 = vunpack.c.l.b16 %v1384_v33  ;;  %v1421_v12 = vunpack.c.l.b16 %v1377_v42  ;;  %v11964_v44 = vor.u32 %v15173_v38, %v11963_v47  ;;  %v1379_v53 = vpack.c.bf16 %v1361_v30, %v1361_v30 }
 0x1ba   : > { %v1257_v43 = vrot.slane %v1256_v3, 1  ;;  %v1460_v58 = vsel %vm1441_vm8, %v1459_v11, %v1458_v9  ;;  %v1368_v19 = vmax.f32 %v1350_v51, 0.0  ;;  %v1443_v20 = vrot.slane %v1420_v40, 4 }
 0x1bb   : > { %v1422_v16 = vunpack.c.l.b16 %v1378_v46  ;;  %v1429_v59 = vunpack.c.l.b16 %v1385_v14  ;;  %v1519_v61 = vand.u32 %v11964_v44, %v19918_v29  ;;  %v1461_v24 = vrot.slane %v1428_v56, 4 }
 0x1bc   : > { %v1258_v8 = vadd.f32 %v1257_v43, %v1256_v3  ;;  %v1386_v26 = vpack.c.bf16 %v1368_v19, %v1368_v19  ;;  %v1445_v1 = vsel %vm1444_vm9, %v1443_v20, %v1442_v21  ;;  %v1446_v0 = vrot.slane %v1421_v12, 3 }
 0x1bd   : > { %1563 = vmatpush.bf16.msrb.mxu2 %v1519_v61  ;;  %v11952_v39 = vor.u32 %v15170_v17, %v11951_v35  ;;  %v1423_v13 = vunpack.c.l.b16 %v1379_v53  ;;  %v1462_v60 = vsel %vm1444_vm9, %v1461_v24, %v1460_v58  ;;  %v1463_v36 = vrot.slane %v1429_v59, 3 }
 0x1be   : > { %v1351_v55 = vadd.f32 %v1316_v7, %v1258_v8  ;;  %v1430_v25 = vunpack.c.l.b16 %v1386_v26  ;;  %v1448_v18 = vsel %vm1447_vm10, %v1446_v0, %v1445_v1  ;;  %v1449_v52 = vrot.slane %v1422_v16, 2 }
 0x1bf   : > { %v1464_v31 = vsel %vm1447_vm10, %v1463_v36, %v1462_v60  ;;  %v1452_v4 = vrot.slane %v1423_v13, 1  ;;  %vm2793_vm5 = vcmask 859136   ;;  %vm3087_vm6 = vcmask 670720  }
 0x1c0   : > { %v1369_v28 = vmax.f32 %v1351_v55, 0.0  ;;  %v1451_v15 = vsel %vm1450_vm11, %v1449_v52, %v1448_v18  ;;  %v1465_v34 = vrot.slane %v1430_v25, 2  ;;  %vm8622_vm7 = vcmask 687104  }
 0x1c1   : > { %1564 = vmatpush.bf16.msrb.mxu2 %v11952_v39  ;;  %v1454_v50 = vsel %vm1453_vm12, %v1452_v4, %v1451_v15  ;;  %vm9260_vm8 = vcmask 326656   ;;  %vm10068_vm9 = vcmask 64512  }
 0x1c2   : > { %v1387_v2 = vpack.c.bf16 %v1369_v28, %v1369_v28  ;;  %v1466_v57 = vsel %vm1450_vm11, %v1465_v34, %v1464_v31 }
 0x1c4   : > { %v1431_v54 = vunpack.c.l.b16 %v1387_v2 }
 0x1c6   : > { %v1467_v6 = vrot.slane %v1431_v54, 1 }
 0x1c8   : > { %v1468_v27 = vsel %vm1453_vm12, %v1467_v6, %v1466_v57 }
 0x1c9   : > { %v1471_v5 = vpack.c.b16 %v1468_v27, %v1454_v50 }
 0x1cb   : > { %11965 = vmatmul.msk.bf16.vlgmr.msra.gmra.mxu0 %vm953_vm4, %v1471_v5  ;;  %11967 = vmatmul.msk.bf16.vlgmr.msra.gmra.mxu1 %vm953_vm4, %v1471_v5 }
 0x1cc   : > { %11969 = vmatmul.msk.bf16.vlgmr.msrb.gmra.mxu2 %vm953_vm4, %v1471_v5 }
 0x1db   : > { %11968 = vmatmul.msk.bf16.gmra.mxu1 %vm953_vm4, %v19919_v37 }
 0x1dc   : > { %11970 = vmatmul.msk.bf16.gmra.mxu2 %vm953_vm4, %v19919_v37  ;;  %vm2539_vm4 = vcmask 130048  }
 0x20b   : > { %v1535_v32 = vpop.f32.mrf.mxu2 }
 0x213   : > { %v1537_v63 = vpop.f32.mrf.mxu2 }
 0x214   : > { %v15174_v63 = vld [vmem:[%s19811_s8] sm:$0xff] }
 0x248   : > { %v1530_v22 = vpop.f32.mrf.mxu0  ;;  %v1548_v49 = vpop.f32.mrf.mxu1 }
 0x249   : > { %v1575_v10 = vpack.c.bf16 %v1548_v49, %v1530_v22  ;;  %v15175_v22 = vld [vmem:[%s19811_s8 + $0x8] sm:$0xff] }
 0x24b   : > { %1581 = vst [vmem:[#allocation2] sm:$0xff] %v1575_v10  ;;  %v15176_v10 = vld [vmem:[%s19811_s8 + $0x10] sm:$0xff] }
 0x24f   : > { %v1566_v48 = vpop.f32.mrf.mxu2 }
 0x250   : > { %v1532_v41 = vpop.f32.mrf.mxu0  ;;  %v1550_v33 = vpop.f32.mrf.mxu1  ;;  %v1576_v62 = vpack.c.bf16 %v1566_v48, %v1566_v48 }
 0x251   : > { %v1577_v42 = vpack.c.bf16 %v1550_v33, %v1532_v41 }
 0x252   : > { %1582 = vst [vmem:[#allocation2 + $0x8] sm:$0xf] %v1576_v62  ;;  %v15182_v40 = vld [vmem:[#allocation2 + $0x4] sm:$0xf]  ;;  %v11985_v61 = vld [vmem:[#allocation2] sm:$0xf] }
 0x253   : > { %1583 = vst [vmem:[#allocation2 + $0xc] sm:$0xff] %v1577_v42  ;;  %v15177_v26 = vld [vmem:[#allocation2 + $0x4] sm:$0xf]  ;;  %v12053_v52 = vld [vmem:[#allocation2] sm:$0xf] }
 0x254   : > { %v15188_v2 = vld [vmem:[#allocation2 + $0x4] sm:$0xf]  ;;  %v12017_v6 = vld [vmem:[#allocation2] sm:$0xf] }
 0x257   : > { %v1568_v45 = vpop.f32.mrf.mxu2 }
 0x258   : > { %v1553_v21 = vpop.f32.mrf.mxu1  ;;  %v1578_v23 = vpack.c.bf16 %v1568_v45, %v1568_v45 }
 0x259   : > { %v1579_v30 = vpack.c.bf16 %v1553_v21, %v1535_v32  ;;  %v12025_v39 = vld [vmem:[#allocation2 + $0x8] sm:$0xf] }
 0x25a   : > { %v12019_v47 = vld [vmem:[#allocation2 + $0xc] sm:$0xf0]  ;;  %1584 = vst [vmem:[#allocation2 + $0x14] sm:$0xf] %v1578_v23  ;;  %v15178_v8 = vld [vmem:[#allocation2 + $0x8] sm:$0xf0] }
 0x25b   : > { %1585 = vst [vmem:[#allocation2 + $0x18] sm:$0x11] %v1579_v30  ;;  %v12022_v38 = vor.u32 %v15182_v40, %v12019_v47  ;;  %v11987_v16 = vld [vmem:[#allocation2 + $0xc] sm:$0xf0]  ;;  %v11986_v55 = vor.u32 %v15178_v8, %v11985_v61  ;;  %v15189_v18 = vld [vmem:[#allocation2 + $0x8] sm:$0xf0] }
 0x25c   : > { %v11990_v0 = vor.u32 %v15177_v26, %v11987_v16  ;;  %v12055_v36 = vld [vmem:[#allocation2 + $0xc] sm:$0xf0]  ;;  %v12054_v31 = vor.u32 %v15189_v18, %v12053_v52  ;;  %v15183_v57 = vld [vmem:[#allocation2 + $0x8] sm:$0xf0]  ;;  %v12061_v27 = vld [vmem:[#allocation2 + $0x8] sm:$0xf] }
 0x25d   : > { %1766 = vrot.lane.b32.xlu1 %v12022_v38, %s16241_s0  ;;  %v12058_v34 = vor.u32 %v15188_v2, %v12055_v36  ;;  %v12018_v5 = vor.u32 %v15183_v57, %v12017_v6 }
 0x25f   : > { %v1571_v9 = vpop.f32.mrf.mxu2 }
 0x260   : > { %v1555_v3 = vpop.f32.mrf.mxu1  ;;  %v1580_v46 = vpack.c.bf16 %v1571_v9, %v1571_v9 }
 0x261   : > { %v15184_v1 = vld [vmem:[#allocation2 + $0x10] sm:$0xf0] }
 0x262   : > { %v1893_v14 = vld [vmem:[#allocation2 + $0x18] sm:$0x11]  ;;  %1586 = vst [vmem:[#allocation2 + $0x20] sm:$0x1] %v1580_v46  ;;  %v12026_v25 = vor.u32 %v15184_v1, %v12025_v39  ;;  %v15190_v50 = vld [vmem:[#allocation2 + $0x10] sm:$0xf0] }
 0x263   : > { %v1726_v11 = vld [vmem:[#allocation2 + $0x18] sm:$0x11]  ;;  %v1922_v7 = vunpack.c.l.b16 %v1893_v14  ;;  %v1923_v59 = vunpack.c.h.b16 %v1893_v14  ;;  %v12062_v32 = vor.u32 %v15190_v50, %v12061_v27 }
 0x264   : > { %v1756_v51 = vunpack.c.h.b16 %v1726_v11  ;;  %v1595_v56 = vld [vmem:[#allocation2 + $0x18] sm:$0x11]  ;;  %v1755_v28 = vunpack.c.l.b16 %v1726_v11 }
 0x265   : > { %v1618_v43 = vunpack.c.l.b16 %v1595_v56  ;;  %v1619_v12 = vunpack.c.h.b16 %v1595_v56  ;;  %v1928_v44 = vpack.c.b16 %v1922_v7, %v1922_v7  ;;  %v1929_v60 = vpack.c.b16 %v1923_v59, %v1923_v59  ;;  %v15179_v11 = vld [vmem:[%s19811_s8 + $0x18] sm:$0xff] }
 0x266   : > { %v1762_v58 = vpack.c.b16 %v1756_v51, %v1756_v51  ;;  %v1761_v15 = vpack.c.b16 %v1755_v28, %v1755_v28 }
 0x267   : > { %v1622_v19 = vpack.c.b16 %v1618_v43, %v1618_v43  ;;  %v1623_v53 = vpack.c.b16 %v1619_v12, %v1619_v12  ;;  %1937 = vrot.lane.b32.xlu0 %v1928_v44, %s16242_s16  ;;  %v1573_v20 = vpop.f32.mrf.mxu2  ;;  %v15185_v43 = vld [vmem:[%s19811_s8 + $0x30] sm:$0xff] }
 0x268   : > { %1772 = vrot.lane.b32.xlu2 %v1762_v58, %s16241_s0  ;;  %v15186_v20 = vld [vmem:[%s19811_s8 + $0x38] sm:$0xff] }
 0x269   : > { %v1638_v35 = vsel %vm1636_vm13, %v1622_v19, 0  ;;  %v1641_v17 = vsel %vm1636_vm13, %v1623_v53, 0  ;;  %v1727_v29 = vld [vmem:[#allocation2 + $0x20] sm:$0x1] }
 0x26a   : > { %1649 = vmatpush.bf16.msra.mxu3 %v1638_v35  ;;  %1673 = vmatpush.bf16.msrb.mxu0 %v1641_v17  ;;  %v1757_v24 = vunpack.c.l.b16 %v1727_v29  ;;  %v1894_v54 = vld [vmem:[#allocation2 + $0x20] sm:$0x1]  ;;  %v15181_v35 = vld [vmem:[%s19811_s8 + $0x28] sm:$0xff] }
 0x26b   : > { %v1924_v4 = vunpack.c.l.b16 %v1894_v54  ;;  %v15180_v53 = vld [vmem:[%s19811_s8 + $0x20] sm:$0xff] }
 0x26c   : > { %v1763_v13 = vpack.c.b16 %v1757_v24, %v1757_v24  ;;  %v15187_v17 = vld [vmem:[%s19811_s8 + $0x40] sm:$0xff] }
 0x26d   : > { %v1930_v37 = vpack.c.b16 %v1924_v4, %v1924_v4 }
 0x26e   : > { %1650 = vmatpush.bf16.msra.mxu3 %v11986_v55  ;;  %1674 = vmatpush.bf16.msrb.mxu0 %v11990_v0 }
 0x26f   : > { %1774 = vrot.lane.b32.xlu1 %v1763_v13, %s16241_s0  ;;  %1768 = vrot.lane.b32.xlu0 %v12026_v25, %s16241_s0 }
 0x270   : > { %1939 = vrot.lane.b32.xlu2 %v1929_v60, %s16242_s16 }
 0x271   : > { %11991 = vmatmul.msk.bf16.vlgmr.msra.gmra.mxu3 %vm1626_vm14, %v15174_v63  ;;  %11994 = vmatmul.msk.bf16.vlgmr.msrb.gmra.mxu0 %vm1626_vm14, %v15174_v63 }
 0x277   : > { %1931 = vrot.lane.b32.xlu1 %v12054_v31, %s16242_s16  ;;  %1933 = vrot.lane.b32.xlu0 %v12058_v34, %s16242_s16 }
 0x278   : > { %1770 = vrot.lane.b32.xlu2 %v1761_v15, %s16241_s0 }
 0x27f   : > { %1764 = vrot.lane.b32.xlu1 %v12018_v5, %s16241_s0  ;;  %1935 = vrot.lane.b32.xlu0 %v12062_v32, %s16242_s16 }
 0x280   : > { %1941 = vrot.lane.b32.xlu2 %v1930_v37, %s16242_s16  ;;  %s20002_s16 = sld [smem:[#allocation66_spill]] }
 0x281   : > { %11992 = vmatmul.msk.bf16.gmra.mxu3 %vm1626_vm14, %v15175_v22  ;;  %11995 = vmatmul.msk.bf16.gmra.mxu0 %vm1626_vm14, %v15175_v22 }
 0x291   : > { %11993 = vmatmul.msk.bf16.gmra.mxu3 %vm1626_vm14, %v15176_v10  ;;  %11996 = vmatmul.msk.bf16.gmra.mxu0 %vm1626_vm14, %v15176_v10 }
 0x2c2   : > { %v1773_v49 = vpop.permute.xlu2 %1772 }
 0x2ca   : > { %v1940_v48 = vpop.permute.xlu2 %1939 }
 0x2cf   : > { %v1767_v42 = vpop.permute.xlu1 %1766 }
 0x2d2   : > { %v1771_v41 = vpop.permute.xlu2 %1770 }
 0x2d3   : > { %v1779_v33 = vsel %vm1776_vm15, %v1771_v41, %v1773_v49 }
 0x2d4   : > { %v1793_v62 = vsel %vm1636_vm13, %v1779_v33, 0 }
 0x2d5   : > { %1804 = vmatpush.bf16.msrb.mxu1 %v1793_v62 }
 0x2d9   : > { %v1938_v45 = vpop.permute.xlu0 %1937 }
 0x2da   : > { %v1942_v21 = vpop.permute.xlu2 %1941  ;;  %v1946_v30 = vsel %vm1943_vm0, %v1938_v45, %v1940_v48 }
 0x2db   : > { %v1947_v23 = vsel %vm1943_vm0, %v1940_v48, %v1942_v21  ;;  %v1960_v47 = vsel %vm1636_vm13, %v1946_v30, 0 }
 0x2dc   : > { %v1963_v40 = vsel %vm1636_vm13, %v1947_v23, 0  ;;  %1971 = vmatpush.bf16.msrb.mxu3 %v1960_v47 }
 0x2dd   : > { %1995 = vmatpush.bf16.msra.mxu0 %v1963_v40 }
 0x2e1   : > { %v1775_v38 = vpop.permute.xlu1 %1774  ;;  %v1769_v9 = vpop.permute.xlu0 %1768 }
 0x2e2   : > { %v1780_v3 = vsel %vm1776_vm15, %v1773_v49, %v1775_v38  ;;  %v1778_v14 = vsel %vm1776_vm15, %v1767_v42, %v1769_v9 }
 0x2e3   : > { %v1796_v46 = vsel %vm1636_vm13, %v1780_v3, 0  ;;  %v2085_v3 = vld [vmem:[%s19812_s9] sm:$0xff] }
 0x2e4   : > { %1828 = vmatpush.bf16.msra.mxu2 %v1796_v46 }
 0x2e8   : > { %1829 = vmatpush.bf16.msra.mxu2 %v1778_v14 }
 0x2e9   : > { %v1932_v7 = vpop.permute.xlu1 %1931  ;;  %v1934_v51 = vpop.permute.xlu0 %1933 }
 0x2ea   : > { %v1944_v56 = vsel %vm1943_vm0, %v1932_v7, %v1934_v51 }
 0x2eb   : > { %12030 = vmatmul.msk.bf16.vlgmr.msra.gmra.mxu2 %vm1626_vm14, %v15179_v11  ;;  %1972 = vmatpush.bf16.msrb.mxu3 %v1944_v56 }
 0x2ee   : > { %12063 = vmatmul.msk.bf16.vlgmr.msrb.gmra.mxu3 %vm1626_vm14, %v15185_v43  ;;  %v1676_v8 = vpop.f32.mrf.mxu0 }
 0x2ef   : > { %v15227_v8 = vld [vmem:[#allocation15 + $0x124] sm:$0xf] }
 0x2f1   : > { %v1765_v12 = vpop.permute.xlu1 %1764  ;;  %v1936_v44 = vpop.permute.xlu0 %1935 }
 0x2f2   : > { %v1777_v58 = vsel %vm1776_vm15, %v1765_v12, %v1767_v42  ;;  %v1945_v19 = vsel %vm1943_vm0, %v1934_v51, %v1936_v44  ;;  %v12239_v12 = vld [vmem:[#allocation15 + $0x150] sm:$0xf]  ;;  %v15236_v44 = vld [vmem:[#allocation15 + $0x164] sm:$0xf0] }
 0x2f3   : > { %1805 = vmatpush.bf16.msrb.mxu1 %v1777_v58  ;;  %1996 = vmatpush.bf16.msra.mxu0 %v1945_v19  ;;  %v15233_v58 = vld [vmem:[#allocation15 + $0x154] sm:$0xf]  ;;  %v12240_v19 = vor.u32 %v15236_v44, %v12239_v12  ;;  %v12175_v12 = vld [vmem:[#allocation15 + $0xc8] sm:$0xf]  ;;  %v15219_v44 = vld [vmem:[#allocation15 + $0xdc] sm:$0xf0] }
 0x2f4   : > { %v1652_v59 = vpop.f32.mrf.mxu3 }
 0x2f6   : > { %12027 = vmatmul.msk.bf16.vlgmr.msrb.gmra.mxu1 %vm1626_vm14, %v15179_v11  ;;  %12066 = vmatmul.msk.bf16.vlgmr.msra.gmra.mxu0 %vm1626_vm14, %v15185_v43  ;;  %v1678_v16 = vpop.f32.mrf.mxu0  ;;  %v2086_v43 = vld [vmem:[%s19812_s9 + $0x8] sm:$0xff] }
 0x2f7   : > { %2390 = vmatpush.bf16.msra.mxu1 %v12240_v19  ;;  %v12176_v19 = vor.u32 %v15219_v44, %v12175_v12 }
 0x2fb   : > { %12031 = vmatmul.msk.bf16.gmra.mxu2 %vm1626_vm14, %v15180_v53 }
 0x2fc   : > { %v17604_v29 = vpop.f32.mrf.mxu3 }
 0x2fe   : > { %12064 = vmatmul.msk.bf16.gmra.mxu3 %vm1626_vm14, %v15186_v20  ;;  %v1681_v26 = vpop.f32.mrf.mxu0 }
 0x304   : > { %v1657_v61 = vpop.f32.mrf.mxu3 }
 0x306   : > { %12028 = vmatmul.msk.bf16.gmra.mxu1 %vm1626_vm14, %v15180_v53  ;;  %12067 = vmatmul.msk.bf16.gmra.mxu0 %vm1626_vm14, %v15186_v20  ;;  %v1683_v24 = vpop.f32.mrf.mxu0  ;;  %v12241_v53 = vld [vmem:[#allocation15 + $0x168] sm:$0xf0] }
 0x307   : > { %v12244_v20 = vor.u32 %v15233_v58, %v12241_v53  ;;  %v15217_v58 = vld [vmem:[#allocation15 + $0xd4] sm:$0xf]  ;;  %v12185_v53 = vld [vmem:[#allocation15 + $0xe8] sm:$0xf0] }
 0x309   : > { %2404 = vmatpush.bf16.msrb.mxu2 %v12244_v20  ;;  %v12188_v20 = vor.u32 %v15217_v58, %v12185_v53  ;;  %v15210_v58 = vld [vmem:[#allocation15 + $0x9c] sm:$0xf] }
 0x30b   : > { %12032 = vmatmul.msk.bf16.gmra.mxu2 %vm1626_vm14, %v15181_v35 }
 0x30c   : > { %v1659_v1 = vpop.f32.mrf.mxu3 }
 0x30e   : > { %12065 = vmatmul.msk.bf16.gmra.mxu3 %vm1626_vm14, %v15187_v17  ;;  %v1686_v0 = vpop.f32.mrf.mxu0 }
 0x314   : > { %v1662_v55 = vpop.f32.mrf.mxu3 }
 0x316   : > { %12029 = vmatmul.msk.bf16.gmra.mxu1 %vm1626_vm14, %v15181_v35  ;;  %12068 = vmatmul.msk.bf16.gmra.mxu0 %vm1626_vm14, %v15187_v17  ;;  %v1688_v13 = vpop.f32.mrf.mxu0  ;;  %v12215_v35 = vld [vmem:[#allocation15 + $0x120] sm:$0xf]  ;;  %v15230_v17 = vld [vmem:[#allocation15 + $0x134] sm:$0xf0] }
 0x317   : > { %v12216_v16 = vor.u32 %v15230_v17, %v12215_v35  ;;  %v12071_v35 = vld [vmem:[#allocation15] sm:$0xf]  ;;  %v15194_v17 = vld [vmem:[#allocation15 + $0x14] sm:$0xf0] }
 0x319   : > { %2391 = vmatpush.bf16.msra.mxu1 %v12216_v16  ;;  %v12072_v16 = vor.u32 %v15194_v17, %v12071_v35  ;;  %v15214_v35 = vld [vmem:[#allocation15 + $0xb4] sm:$0xf0] }
 0x31c   : > { %v1664_v39 = vpop.f32.mrf.mxu3 }
 0x36e   : > { %v1831_v25 = vpop.f32.mrf.mxu2 }
 0x36f   : > { %v15218_v25 = vld [vmem:[#allocation15 + $0xd4] sm:$0xf0] }
 0x371   : > { %v1974_v60 = vpop.f32.mrf.mxu3 }
 0x373   : > { %v1807_v28 = vpop.f32.mrf.mxu1  ;;  %v1998_v18 = vpop.f32.mrf.mxu0 }
 0x374   : > { %v1846_v36 = vadd.f32 %v1807_v28, %v1652_v59  ;;  %v12217_v59 = vld [vmem:[#allocation15 + $0x138] sm:$0xf0] }
 0x375   : > { %v12169_v18 = vld [vmem:[#allocation15 + $0xd8] sm:$0xf0] }
 0x376   : > { %v17606_v52 = vadd.f32 %v1974_v60, %v1846_v36  ;;  %v1833_v2 = vpop.f32.mrf.mxu2  ;;  %v15215_v60 = vld [vmem:[#allocation15 + $0xc4] sm:$0xf]  ;;  %v12247_v36 = vld [vmem:[#allocation15 + $0x158] sm:$0xf] }
 0x377   : > { %v15237_v2 = vld [vmem:[#allocation15 + $0x16c] sm:$0xf0] }
 0x379   : > { %v17608_v31 = vpop.f32.mrf.mxu3 }
 0x37b   : > { %v17610_v15 = vpop.f32.mrf.mxu1  ;;  %v2000_v34 = vpop.f32.mrf.mxu0 }
 0x37c   : > { %v12172_v34 = vor.u32 %v15215_v60, %v12169_v18  ;;  %v15211_v60 = vld [vmem:[#allocation15 + $0xa4] sm:$0xf] }
 0x37e   : > { %v1836_v54 = vpop.f32.mrf.mxu2 }
 0x37f   : > { %v1851_v23 = vadd.f32 %v1836_v54, %v1681_v26  ;;  %v15224_v26 = vld [vmem:[#allocation15 + $0x104] sm:$0xf0]  ;;  %v12248_v54 = vor.u32 %v15237_v2, %v12247_v36 }
 0x380   : > { %v12127_v2 = vld [vmem:[#allocation15 + $0x68] sm:$0xf] }
 0x381   : > { %v1979_v4 = vpop.f32.mrf.mxu3  ;;  %2418 = vmatpush.bf16.msra.mxu3 %v12248_v54  ;;  %v15228_v54 = vld [vmem:[#allocation15 + $0x12c] sm:$0xf] }
 0x383   : > { %v1812_v57 = vpop.f32.mrf.mxu1  ;;  %v2003_v50 = vpop.f32.mrf.mxu0 }
 0x384   : > { %v1850_v6 = vadd.f32 %v1812_v57, %v1657_v61  ;;  %v2018_v38 = vadd.f32 %v2003_v50, %v1851_v23  ;;  %v12191_v61 = vld [vmem:[#allocation15 + $0xf0] sm:$0xf]  ;;  %v12257_v57 = vld [vmem:[#allocation15 + $0x178] sm:$0xf0] }
 0x385   : > { %v12143_v50 = vld [vmem:[#allocation15 + $0x90] sm:$0xf]  ;;  %v12121_v23 = vld [vmem:[#allocation15 + $0x78] sm:$0xf0] }
 0x386   : > { %v2017_v27 = vadd.f32 %v1979_v4, %v1850_v6  ;;  %v1838_v5 = vpop.f32.mrf.mxu2  ;;  %v15235_v4 = vld [vmem:[#allocation15 + $0x164] sm:$0xf] }
 0x387   : > { %v1853_v14 = vadd.f32 %v1838_v5, %v1683_v24  ;;  %v15221_v24 = vld [vmem:[#allocation15 + $0xf4] sm:$0xf]  ;;  %v12260_v6 = vor.u32 %v15235_v4, %v12257_v57  ;;  %v12225_v57 = vld [vmem:[#allocation15 + $0x140] sm:$0xf0] }
 0x388   : > { %2047 = vrot.lane.b32.xlu2 %v2017_v27, %s16243_s29  ;;  %v15212_v27 = vld [vmem:[#allocation15 + $0xa4] sm:$0xf0]  ;;  %v15209_v5 = vld [vmem:[#allocation15 + $0x94] sm:$0xf] }
 0x389   : > { %v1981_v37 = vpop.f32.mrf.mxu3  ;;  %2460 = vmatpush.bf16.msrb.mxu0 %v12260_v6  ;;  %v15232_v6 = vld [vmem:[#allocation15 + $0x144] sm:$0xf0] }
 0x38b   : > { %v1814_v32 = vpop.f32.mrf.mxu1  ;;  %v2005_v63 = vpop.f32.mrf.mxu0 }
 0x38c   : > { %v1852_v22 = vadd.f32 %v1814_v32, %v1659_v1  ;;  %v2020_v51 = vadd.f32 %v2005_v63, %v1853_v14  ;;  %v12220_v1 = vor.u32 %v15227_v8, %v12217_v59  ;;  %v12144_v32 = vor.u32 %v15212_v27, %v12143_v50  ;;  %v15191_v8 = vld [vmem:[#allocation15 + $0x4] sm:$0xf]  ;;  %v12073_v59 = vld [vmem:[#allocation15 + $0x18] sm:$0xf0]  ;;  %v12231_v50 = vld [vmem:[#allocation15 + $0x130] sm:$0xf] }
 0x38d   : > { %v12228_v27 = vor.u32 %v15228_v54, %v12225_v57  ;;  %v15192_v57 = vld [vmem:[#allocation15 + $0xc] sm:$0xf] }
 0x38e   : > { %v2019_v49 = vadd.f32 %v1981_v37, %v1852_v22  ;;  %v1841_v10 = vpop.f32.mrf.mxu2  ;;  %2405 = vmatpush.bf16.msrb.mxu2 %v12220_v1  ;;  %v12145_v37 = vld [vmem:[#allocation15 + $0xa8] sm:$0xf0]  ;;  %v12223_v22 = vld [vmem:[#allocation15 + $0x128] sm:$0xf]  ;;  %v12076_v1 = vor.u32 %v15191_v8, %v12073_v59 }
 0x38f   : > { %v1855_v48 = vadd.f32 %v1841_v10, %v1686_v0  ;;  %v12192_v0 = vor.u32 %v15224_v26, %v12191_v61  ;;  %v12148_v63 = vor.u32 %v15209_v5, %v12145_v37  ;;  %v15229_v10 = vld [vmem:[#allocation15 + $0x134] sm:$0xf]  ;;  %v12151_v61 = vld [vmem:[#allocation15 + $0x98] sm:$0xf]  ;;  %v15213_v26 = vld [vmem:[#allocation15 + $0xac] sm:$0xf0]  ;;  %v12232_v5 = vor.u32 %v15232_v6, %v12231_v50 }
 0x390   : > { %2051 = vrot.lane.b32.xlu0 %v2019_v49, %s16243_s29  ;;  %v15231_v49 = vld [vmem:[#allocation15 + $0x13c] sm:$0xf0]  ;;  %v15205_v37 = vld [vmem:[#allocation15 + $0x74] sm:$0xf]  ;;  %v15204_v59 = vld [vmem:[#allocation15 + $0x6c] sm:$0xf] }
 0x391   : > { %v1984_v41 = vpop.f32.mrf.mxu3  ;;  %2392 = vmatpush.bf16.msra.mxu1 %v12192_v0  ;;  %v12249_v0 = vld [vmem:[#allocation15 + $0x170] sm:$0xf0]  ;;  %v12081_v50 = vld [vmem:[#allocation15 + $0x20] sm:$0xf0]  ;;  %v12087_v6 = vld [vmem:[#allocation15 + $0x10] sm:$0xf] }
 0x393   : > { %v1817_v33 = vpop.f32.mrf.mxu1  ;;  %v2008_v62 = vpop.f32.mrf.mxu0 }
 0x394   : > { %v1854_v42 = vadd.f32 %v1817_v33, %v1662_v55  ;;  %v2022_v45 = vadd.f32 %v2008_v62, %v1855_v48  ;;  %v12193_v55 = vld [vmem:[#allocation15 + $0x108] sm:$0xf0]  ;;  %v12224_v48 = vor.u32 %v15231_v49, %v12223_v22  ;;  %v12119_v62 = vld [vmem:[#allocation15 + $0x60] sm:$0xf]  ;;  %v12103_v49 = vld [vmem:[#allocation15 + $0x38] sm:$0xf] }
 0x396   : > { %v2021_v21 = vadd.f32 %v1984_v41, %v1854_v42  ;;  %v1843_v46 = vpop.f32.mrf.mxu2  ;;  %v12233_v41 = vld [vmem:[#allocation15 + $0x148] sm:$0xf0]  ;;  %2419 = vmatpush.bf16.msra.mxu3 %v12224_v48  ;;  %v15206_v42 = vld [vmem:[#allocation15 + $0x74] sm:$0xf0]  ;;  %v15222_v48 = vld [vmem:[#allocation15 + $0xfc] sm:$0xf] }
 0x397   : > { %v1857_v11 = vadd.f32 %v1843_v46, %v1688_v13  ;;  %v12167_v13 = vld [vmem:[#allocation15 + $0xc0] sm:$0xf]  ;;  %v12236_v33 = vor.u32 %v15229_v10, %v12233_v41  ;;  %v12095_v46 = vld [vmem:[#allocation15 + $0x30] sm:$0xf] }
 0x398   : > { %2070 = vrot.lane.b32.xlu1 %v2021_v21, %s16244_s19  ;;  %2072 = vrot.lane.b32.xlu0 %v2022_v45, %s16244_s19  ;;  %v12168_v28 = vor.u32 %v15218_v25, %v12167_v13  ;;  %v15203_v45 = vld [vmem:[#allocation15 + $0x64] sm:$0xf]  ;;  %v12120_v21 = vor.u32 %v15206_v42, %v12119_v62  ;;  %v15238_v25 = vld [vmem:[#allocation15 + $0x174] sm:$0xf0]  ;;  %v15201_v10 = vld [vmem:[#allocation15 + $0x4c] sm:$0xf0] }
 0x399   : > { %v1986_v47 = vpop.f32.mrf.mxu3  ;;  %2461 = vmatpush.bf16.msrb.mxu0 %v12236_v33  ;;  %v12104_v41 = vor.u32 %v15201_v10, %v12103_v49  ;;  %v12201_v33 = vld [vmem:[#allocation15 + $0x110] sm:$0xf0]  ;;  %v12207_v62 = vld [vmem:[#allocation15 + $0x100] sm:$0xf]  ;;  %v15226_v42 = vld [vmem:[#allocation15 + $0x114] sm:$0xf0] }
 0x39a   : > { %2393 = vmatpush.bf16.msra.mxu1 %v12168_v28  ;;  %v12161_v28 = vld [vmem:[#allocation15 + $0xb8] sm:$0xf0] }
 0x39b   : > { %v1819_v30 = vpop.f32.mrf.mxu1  ;;  %v2010_v7 = vpop.f32.mrf.mxu0  ;;  %v12164_v36 = vor.u32 %v15211_v60, %v12161_v28  ;;  %v15202_v60 = vld [vmem:[#allocation15 + $0x54] sm:$0xf0] }
 0x39c   : > { %v1856_v40 = vadd.f32 %v1819_v30, %v1664_v39  ;;  %v2024_v56 = vadd.f32 %v2010_v7, %v1857_v11  ;;  %v12196_v39 = vor.u32 %v15221_v24, %v12193_v55  ;;  %v12199_v30 = vld [vmem:[#allocation15 + $0xf8] sm:$0xf]  ;;  %v15200_v11 = vld [vmem:[#allocation15 + $0x44] sm:$0xf0]  ;;  %v15197_v7 = vld [vmem:[#allocation15 + $0x34] sm:$0xf]  ;;  %v12152_v24 = vor.u32 %v15213_v26, %v12151_v61 }
 0x39d   : > { %v15234_v55 = vld [vmem:[#allocation15 + $0x15c] sm:$0xf]  ;;  %v12129_v61 = vld [vmem:[#allocation15 + $0x80] sm:$0xf0]  ;;  %v12135_v26 = vld [vmem:[#allocation15 + $0x70] sm:$0xf] }
 0x39e   : > { %v2023_v9 = vadd.f32 %v1986_v47, %v1856_v40  ;;  %2406 = vmatpush.bf16.msrb.mxu2 %v12196_v39  ;;  %2394 = vmatpush.bf16.msra.mxu1 %v12144_v32  ;;  %v15225_v40 = vld [vmem:[#allocation15 + $0x10c] sm:$0xf0]  ;;  %v12124_v47 = vor.u32 %v15203_v45, %v12121_v23  ;;  %v12255_v39 = vld [vmem:[#allocation15 + $0x160] sm:$0xf]  ;;  %v12252_v13 = vor.u32 %v15234_v55, %v12249_v0  ;;  %v12137_v32 = vld [vmem:[#allocation15 + $0x88] sm:$0xf0] }
 0x39f   : > { %v12256_v18 = vor.u32 %v15238_v25, %v12255_v39  ;;  %v12140_v22 = vor.u32 %v15205_v37, %v12137_v32  ;;  %v12204_v45 = vor.u32 %v15222_v48, %v12201_v33  ;;  %v15199_v23 = vld [vmem:[#allocation15 + $0x44] sm:$0xf]  ;;  %v15198_v0 = vld [vmem:[#allocation15 + $0x3c] sm:$0xf]  ;;  %v12105_v39 = vld [vmem:[#allocation15 + $0x50] sm:$0xf0]  ;;  %v12084_v32 = vor.u32 %v15192_v57, %v12081_v50 }
 0x3a0   : > { %2074 = vrot.lane.b32.xlu2 %v2023_v9, %s16244_s19  ;;  %2049 = vrot.lane.b32.xlu1 %v2018_v38, %s16243_s29  ;;  %v12200_v38 = vor.u32 %v15225_v40, %v12199_v30  ;;  %v15223_v9 = vld [vmem:[#allocation15 + $0x104] sm:$0xf]  ;;  %v12113_v30 = vld [vmem:[#allocation15 + $0x58] sm:$0xf0]  ;;  %v12079_v40 = vld [vmem:[#allocation15 + $0x8] sm:$0xf] }
 0x3a1   : > { %2089 = vperm.xlu0 %16003, %v2085_v3   ;;  %v12209_v3 = vld [vmem:[#allocation15 + $0x118] sm:$0xf0]  ;;  %v12111_v25 = vld [vmem:[#allocation15 + $0x40] sm:$0xf] }
 0x3a2   : > { %2407 = vmatpush.bf16.msrb.mxu2 %v12172_v34  ;;  %2395 = vmatpush.bf16.msra.mxu1 %v12120_v21  ;;  %v12212_v14 = vor.u32 %v15223_v9, %v12209_v3  ;;  %v15207_v34 = vld [vmem:[#allocation15 + $0x7c] sm:$0xf0]  ;;  %v12208_v21 = vor.u32 %v15226_v42, %v12207_v62  ;;  %v15216_v9 = vld [vmem:[#allocation15 + $0xcc] sm:$0xf]  ;;  %v12177_v3 = vld [vmem:[#allocation15 + $0xe0] sm:$0xf0] }
 0x3a3   : > { %2420 = vmatpush.bf16.msra.mxu3 %v12200_v38  ;;  %v12128_v4 = vor.u32 %v15207_v34, %v12127_v2  ;;  %v15195_v38 = vld [vmem:[#allocation15 + $0x1c] sm:$0xf0]  ;;  %v12108_v2 = vor.u32 %v15198_v0, %v12105_v39  ;;  %v1848_v34 = vadd.f32 %v17610_v15, %v17604_v29 }
 0x3a4   : > { %2462 = vmatpush.bf16.msrb.mxu0 %v12212_v14  ;;  %v12183_v14 = vld [vmem:[#allocation15 + $0xd0] sm:$0xf] }
 0x3a6   : > { %2408 = vmatpush.bf16.msrb.mxu2 %v12148_v63 }
 0x3a7   : > { %2421 = vmatpush.bf16.msra.mxu3 %v12176_v19  ;;  %v12153_v19 = vld [vmem:[#allocation15 + $0xb0] sm:$0xf0] }
 0x3a8   : > { %2053 = vrot.lane.b32.xlu2 %v2020_v51, %s16243_s29  ;;  %2076 = vrot.lane.b32.xlu1 %v2024_v56, %s16244_s19  ;;  %v12097_v51 = vld [vmem:[#allocation15 + $0x48] sm:$0xf0]  ;;  %v12096_v56 = vor.u32 %v15200_v11, %v12095_v46  ;;  %v12080_v46 = vor.u32 %v15195_v38, %v12079_v40  ;;  %v15220_v11 = vld [vmem:[#allocation15 + $0xe4] sm:$0xf0]  ;;  %v12156_v8 = vor.u32 %v15210_v58, %v12153_v19 }
 0x3a9   : > { %2463 = vmatpush.bf16.msrb.mxu0 %v12188_v20  ;;  %v12184_v12 = vor.u32 %v15220_v11, %v12183_v14  ;;  %v12159_v20 = vld [vmem:[#allocation15 + $0xa0] sm:$0xf] }
 0x3aa   : > { %2409 = vmatpush.bf16.msrb.mxu2 %v12124_v47  ;;  %2396 = vmatpush.bf16.msra.mxu1 %v12096_v56  ;;  %v12116_v47 = vor.u32 %v15199_v23, %v12113_v30  ;;  %v12180_v56 = vor.u32 %v15216_v9, %v12177_v3 }
 0x3ab   : > { %2422 = vmatpush.bf16.msra.mxu3 %v12152_v24  ;;  %v12132_v24 = vor.u32 %v15204_v59, %v12129_v61 }
 0x3ad   : > { %2464 = vmatpush.bf16.msrb.mxu0 %v12164_v36 }
 0x3ae   : > { %2397 = vmatpush.bf16.msra.mxu1 %v12072_v16  ;;  %v12160_v16 = vor.u32 %v15214_v35, %v12159_v20 }
 0x3af   : > { %2423 = vmatpush.bf16.msra.mxu3 %v12128_v4  ;;  %v12112_v4 = vor.u32 %v15202_v60, %v12111_v25 }
 0x3b0   : > { %2094 = vperm.xlu2 %16002, %v2086_v43   ;;  %v12100_v43 = vor.u32 %v15197_v7, %v12097_v51  ;;  %v15193_v7 = vld [vmem:[#allocation15 + $0x14] sm:$0xf] }
 0x3b1   : > { %2465 = vmatpush.bf16.msrb.mxu0 %v12140_v22 }
 0x3b2   : > { %2410 = vmatpush.bf16.msrb.mxu2 %v12100_v43  ;;  %2432 = vmatpush.bf16.msrb.mxu1 %v12252_v13  ;;  %v12089_v43 = vld [vmem:[#allocation15 + $0x28] sm:$0xf0] }
 0x3b3   : > { %2424 = vmatpush.bf16.msra.mxu3 %v12104_v41  ;;  %v12092_v44 = vor.u32 %v15193_v7, %v12089_v43 }
 0x3b5   : > { %2466 = vmatpush.bf16.msrb.mxu0 %v12116_v47 }
 0x3b6   : > { %2411 = vmatpush.bf16.msrb.mxu2 %v12076_v1  ;;  %2433 = vmatpush.bf16.msrb.mxu1 %v12228_v27  ;;  %v15208_v1 = vld [vmem:[#allocation15 + $0x84] sm:$0xf0] }
 0x3b7   : > { %2425 = vmatpush.bf16.msra.mxu3 %v12080_v46  ;;  %v12136_v55 = vor.u32 %v15208_v1, %v12135_v26  ;;  %v15196_v27 = vld [vmem:[#allocation15 + $0x24] sm:$0xf0]  ;;  %v17642_v26 = vld [vmem:[%s19813_s10] sm:$0xff] }
 0x3b8   : > { %v12088_v29 = vor.u32 %v15196_v27, %v12087_v6 }
 0x3b9   : > { %2467 = vmatpush.bf16.msrb.mxu0 %v12092_v44 }
 0x3ba   : > { %2446 = vmatpush.bf16.msra.mxu2 %v12256_v18  ;;  %2434 = vmatpush.bf16.msrb.mxu1 %v12204_v45 }
 0x3be   : > { %2447 = vmatpush.bf16.msra.mxu2 %v12232_v5  ;;  %2435 = vmatpush.bf16.msrb.mxu1 %v12180_v56 }
 0x3c2   : > { %2448 = vmatpush.bf16.msra.mxu2 %v12208_v21  ;;  %2436 = vmatpush.bf16.msrb.mxu1 %v12156_v8 }
 0x3c6   : > { %2449 = vmatpush.bf16.msra.mxu2 %v12184_v12  ;;  %2437 = vmatpush.bf16.msrb.mxu1 %v12132_v24 }
 0x3ca   : > { %2450 = vmatpush.bf16.msra.mxu2 %v12160_v16  ;;  %2438 = vmatpush.bf16.msrb.mxu1 %v12108_v2 }
 0x3ce   : > { %2451 = vmatpush.bf16.msra.mxu2 %v12136_v55  ;;  %2439 = vmatpush.bf16.msrb.mxu1 %v12084_v32 }
 0x3d2   : > { %2452 = vmatpush.bf16.msra.mxu2 %v12112_v4 }
 0x3d6   : > { %2453 = vmatpush.bf16.msra.mxu2 %v12088_v29 }
 0x3e2   : > { %v17626_v63 = vpop.permute.xlu2 %2047 }
 0x3fa   : > { %v2075_v53 = vpop.permute.xlu2 %2074 }
 0x402   : > { %v2052_v51 = vpop.permute.xlu0 %2051  ;;  %v2054_v18 = vpop.permute.xlu2 %2053 }
 0x403   : > { %v2057_v5 = vsel %vm2055_vm1, %v2052_v51, %v2054_v18 }
 0x40a   : > { %v2071_v17 = vpop.permute.xlu1 %2070  ;;  %v2073_v13 = vpop.permute.xlu0 %2072 }
 0x40b   : > { %v2079_v37 = vsel %vm2078_vm3, %v2071_v17, %v2073_v13  ;;  %v2095_v33 = vpop.permute.xlu2 %2094 }
 0x412   : > { %v2050_v28 = vpop.permute.xlu1 %2049 }
 0x413   : > { %v2056_v36 = vsel %vm2055_vm1, %v17626_v63, %v2050_v28  ;;  %v2015_v63 = vadd.f32 %v17608_v31, %v1848_v34 }
 0x414   : > { %v2060_v54 = vadd.f32 %v2056_v36, %v17606_v52  ;;  %v2090_v52 = vpop.permute.xlu0 %2089 }
 0x415   : > { %v2061_v15 = vadd.f32 %v2057_v5, %v2015_v63 }
 0x416   : > { %v2083_v22 = vadd.f32 %v2079_v37, %v2060_v54 }
 0x418   : > { %v2097_v48 = vadd.f32 %v2090_v52, %v2083_v22 }
 0x41a   : > { %v2077_v49 = vpop.permute.xlu1 %2076  ;;  %v2099_v42 = vmax.f32 %v2097_v48, 0.0 }
 0x41b   : > { %v2080_v10 = vsel %vm2078_vm3, %v2075_v53, %v2077_v49 }
 0x41c   : > { %v2084_v41 = vadd.f32 %v2080_v10, %v2061_v15 }
 0x41e   : > { %v2098_v62 = vadd.f32 %v2095_v33, %v2084_v41  ;;  %v15240_v41 = vld [vmem:[%s19813_s10 + $0x8] sm:$0xff] }
 0x420   : > { %v2100_v45 = vmax.f32 %v2098_v62, 0.0 }
 0x422   : > { %v2101_v21 = vpack.c.bf16 %v2100_v45, %v2099_v42 }
 0x424   : > { %2398 = vmatmul.bf16.vlgmr.msra.gmra.mxu1 %v2101_v21  ;;  %2412 = vmatmul.bf16.vlgmr.msrb.gmra.mxu2 %v2101_v21 }
 0x425   : > { %2426 = vmatmul.bf16.vlgmr.msra.gmra.mxu3 %v2101_v21  ;;  %2468 = vmatmul.bf16.vlgmr.msrb.gmra.mxu0 %v2101_v21 }
 0x434   : > { %2440 = vmatmul.bf16.vlgmr.msrb.gmra.mxu1 %v2101_v21  ;;  %2454 = vmatmul.bf16.vlgmr.msra.gmra.mxu2 %v2101_v21 }
 0x4a1   : > { %v2399_v31 = vpop.f32.mrf.mxu1 }
 0x4a2   : > { %v2469_v14 = vpop.f32.mrf.mxu0 }
 0x4a7   : > { %v2413_v23 = vpop.f32.mrf.mxu2 }
 0x4a8   : > { %v2474_v30 = vpack.c.bf16 %v2413_v23, %v2399_v31  ;;  %v2427_v47 = vpop.f32.mrf.mxu3 }
 0x4a9   : > { %v2401_v40 = vpop.f32.mrf.mxu1 }
 0x4aa   : > { %2480 = vst [vmem:[#allocation4] sm:$0xff] %v2474_v30  ;;  %v2471_v1 = vpop.f32.mrf.mxu0 }
 0x4af   : > { %v2415_v38 = vpop.f32.mrf.mxu2 }
 0x4b0   : > { %v2477_v9 = vpack.c.bf16 %v2415_v38, %v2401_v40  ;;  %v2429_v12 = vpop.f32.mrf.mxu3 }
 0x4b1   : > { %v2441_v3 = vpop.f32.mrf.mxu1  ;;  %v12328_v51 = vld [vmem:[#allocation4] sm:$0xf]  ;;  %v15250_v56 = vld [vmem:[#allocation4 + $0x4] sm:$0xf] }
 0x4b2   : > { %2483 = vst [vmem:[#allocation4 + $0x18] sm:$0xff] %v2477_v9  ;;  %v2475_v46 = vpack.c.bf16 %v2441_v3, %v2427_v47  ;;  %v12275_v43 = vld [vmem:[#allocation4] sm:$0xf]  ;;  %v15242_v16 = vld [vmem:[#allocation4 + $0x4] sm:$0xf] }
 0x4b3   : > { %v12385_v39 = vld [vmem:[#allocation4] sm:$0xf]  ;;  %v15259_v52 = vld [vmem:[#allocation4 + $0x4] sm:$0xf] }
 0x4b4   : > { %2481 = vst [vmem:[#allocation4 + $0x8] sm:$0xff] %v2475_v46  ;;  %v3423_v47 = vld [vmem:[%s19814_s11] sm:$0xff]  ;;  %v3424_v3 = vld [vmem:[%s19814_s11 + $0x8] sm:$0xff] }
 0x4b7   : > { %v2455_v11 = vpop.f32.mrf.mxu2 }
 0x4b8   : > { %v2476_v7 = vpack.c.bf16 %v2469_v14, %v2455_v11  ;;  %v15241_v14 = vld [vmem:[%s19813_s10 + $0x10] sm:$0xff] }
 0x4b9   : > { %v2443_v44 = vpop.f32.mrf.mxu1  ;;  %v15253_v58 = vld [vmem:[#allocation4 + $0x14] sm:$0xf0]  ;;  %v12330_v19 = vld [vmem:[#allocation4 + $0x18] sm:$0xf0] }
 0x4ba   : > { %v15244_v53 = vld [vmem:[#allocation4 + $0x14] sm:$0xf0]  ;;  %2482 = vst [vmem:[#allocation4 + $0x10] sm:$0xff] %v2476_v7  ;;  %v2478_v20 = vpack.c.bf16 %v2443_v44, %v2429_v12  ;;  %v12329_v35 = vor.u32 %v15253_v58, %v12328_v51  ;;  %v12333_v17 = vor.u32 %v15250_v56, %v12330_v19  ;;  %v12277_v59 = vld [vmem:[#allocation4 + $0x18] sm:$0xf0] }
 0x4bb   : > { %v12276_v8 = vor.u32 %v15244_v53, %v12275_v43  ;;  %v12280_v61 = vor.u32 %v15242_v16, %v12277_v59  ;;  %v15262_v55 = vld [vmem:[#allocation4 + $0x14] sm:$0xf0]  ;;  %v12336_v13 = vld [vmem:[#allocation4 + $0x8] sm:$0xf]  ;;  %v15251_v60 = vld [vmem:[#allocation4 + $0xc] sm:$0xf] }
 0x4bc   : > { %2484 = vst [vmem:[#allocation4 + $0x20] sm:$0xff] %v2478_v20  ;;  %2781 = vrot.lane.b32.xlu2 %v12329_v35, %s16245_s30  ;;  %2783 = vrot.lane.b32.xlu1 %v12333_v17, %s16245_s30  ;;  %v12386_v25 = vor.u32 %v15262_v55, %v12385_v39  ;;  %v12283_v28 = vld [vmem:[#allocation4 + $0x8] sm:$0xf]  ;;  %v15243_v57 = vld [vmem:[#allocation4 + $0xc] sm:$0xf]  ;;  %v15247_v56 = vld [vmem:[%s19813_s10 + $0x18] sm:$0xff] }
 0x4bd   : > { %2556 = vmatpush.bf16.msrb.mxu3 %v12276_v8  ;;  %2580 = vmatpush.bf16.msra.mxu1 %v12280_v61  ;;  %v12393_v5 = vld [vmem:[#allocation4 + $0x8] sm:$0xf]  ;;  %v12387_v37 = vld [vmem:[#allocation4 + $0x18] sm:$0xf0]  ;;  %v15260_v23 = vld [vmem:[#allocation4 + $0xc] sm:$0xf] }
 0x4be   : > { %v12390_v48 = vor.u32 %v15259_v52, %v12387_v37  ;;  %v15248_v20 = vld [vmem:[%s19813_s10 + $0x20] sm:$0xff]  ;;  %v15249_v39 = vld [vmem:[%s19813_s10 + $0x28] sm:$0xff] }
 0x4bf   : > { %v2457_v24 = vpop.f32.mrf.mxu2 }
 0x4c0   : > { %v2479_v0 = vpack.c.bf16 %v2471_v1, %v2457_v24  ;;  %12293 = vmatmul.msk.bf16.vlgmr.msrb.gmra.mxu3 %vm2539_vm4, %v17642_v26  ;;  %12296 = vmatmul.msk.bf16.vlgmr.msra.gmra.mxu1 %vm2539_vm4, %v17642_v26 }
 0x4c1   : > { %v12291_v32 = vld [vmem:[#allocation4 + $0x10] sm:$0xf]  ;;  %v15261_v62 = vld [vmem:[#allocation4 + $0x14] sm:$0xf] }
 0x4c2   : > { %2485 = vst [vmem:[#allocation4 + $0x28] sm:$0xff] %v2479_v0  ;;  %v12344_v49 = vld [vmem:[#allocation4 + $0x10] sm:$0xf]  ;;  %v15252_v31 = vld [vmem:[#allocation4 + $0x14] sm:$0xf] }
 0x4c3   : > { %v15254_v18 = vld [vmem:[#allocation4 + $0x1c] sm:$0xf0]  ;;  %v12338_v36 = vld [vmem:[#allocation4 + $0x20] sm:$0xf0]  ;;  %v12401_v9 = vld [vmem:[#allocation4 + $0x10] sm:$0xf] }
 0x4c4   : > { %v15245_v2 = vld [vmem:[#allocation4 + $0x1c] sm:$0xf0]  ;;  %3075 = vrot.lane.b32.xlu2 %v12386_v25, %s16246_s27  ;;  %v12337_v34 = vor.u32 %v15254_v18, %v12336_v13  ;;  %v12341_v54 = vor.u32 %v15251_v60, %v12338_v36  ;;  %v12285_v50 = vld [vmem:[#allocation4 + $0x20] sm:$0xf0] }
 0x4c5   : > { %v12284_v4 = vor.u32 %v15245_v2, %v12283_v28  ;;  %v12288_v6 = vor.u32 %v15243_v57, %v12285_v50  ;;  %v15263_v27 = vld [vmem:[#allocation4 + $0x1c] sm:$0xf0]  ;;  %v12395_v45 = vld [vmem:[#allocation4 + $0x20] sm:$0xf0]  ;;  %v15257_v50 = vld [vmem:[%s19813_s10 + $0x38] sm:$0xff] }
 0x4c6   : > { %2785 = vrot.lane.b32.xlu0 %v12337_v34, %s16245_s30  ;;  %2787 = vrot.lane.b32.xlu1 %v12341_v54, %s16245_s30  ;;  %v12394_v15 = vor.u32 %v15263_v27, %v12393_v5  ;;  %v12398_v40 = vor.u32 %v15260_v23, %v12395_v45  ;;  %v15256_v34 = vld [vmem:[%s19813_s10 + $0x30] sm:$0xff] }
 0x4c7   : > { %2604 = vmatpush.bf16.msrb.mxu2 %v12284_v4  ;;  %2628 = vmatpush.bf16.msra.mxu0 %v12288_v6 }
 0x4c9   : > { %v15246_v63 = vld [vmem:[#allocation4 + $0x24] sm:$0xf0]  ;;  %v12403_v33 = vld [vmem:[#allocation4 + $0x28] sm:$0xf0] }
 0x4ca   : > { %v15255_v22 = vld [vmem:[#allocation4 + $0x24] sm:$0xf0]  ;;  %v12292_v29 = vor.u32 %v15246_v63, %v12291_v32  ;;  %12299 = vmatmul.msk.bf16.vlgmr.msrb.gmra.mxu2 %vm2539_vm4, %v17642_v26  ;;  %12302 = vmatmul.msk.bf16.vlgmr.msra.gmra.mxu0 %vm2539_vm4, %v17642_v26  ;;  %v12346_v42 = vld [vmem:[#allocation4 + $0x28] sm:$0xf0]  ;;  %v12406_v21 = vor.u32 %v15261_v62, %v12403_v33 }
 0x4cb   : > { %v12345_v10 = vor.u32 %v15255_v22, %v12344_v49  ;;  %v12349_v30 = vor.u32 %v15252_v31, %v12346_v42  ;;  %v15264_v38 = vld [vmem:[#allocation4 + $0x24] sm:$0xf0]  ;;  %v15258_v22 = vld [vmem:[%s19813_s10 + $0x40] sm:$0xff] }
 0x4cc   : > { %2652 = vmatpush.bf16.msra.mxu3 %v12292_v29  ;;  %3079 = vrot.lane.b32.xlu2 %v12394_v15, %s16246_s27  ;;  %v12402_v46 = vor.u32 %v15264_v38, %v12401_v9 }
 0x4ce   : > { %2789 = vrot.lane.b32.xlu0 %v12345_v10, %s16245_s30  ;;  %3077 = vrot.lane.b32.xlu1 %v12390_v48, %s16246_s27 }
 0x4d0   : > { %12294 = vmatmul.msk.bf16.gmra.mxu3 %vm2539_vm4, %v15240_v41  ;;  %12297 = vmatmul.msk.bf16.gmra.mxu1 %vm2539_vm4, %v15240_v41 }
 0x4d4   : > { %3085 = vrot.lane.b32.xlu2 %v12406_v21, %s16246_s27 }
 0x4d6   : > { %2791 = vrot.lane.b32.xlu0 %v12349_v30, %s16245_s30  ;;  %3081 = vrot.lane.b32.xlu1 %v12398_v40, %s16246_s27 }
 0x4da   : > { %12300 = vmatmul.msk.bf16.gmra.mxu2 %vm2539_vm4, %v15240_v41  ;;  %12303 = vmatmul.msk.bf16.gmra.mxu0 %vm2539_vm4, %v15240_v41 }
 0x4dc   : > { %3427 = vperm.xlu2 %16002, %v3423_v47  }
 0x4de   : > { %3083 = vrot.lane.b32.xlu0 %v12402_v46, %s16246_s27  ;;  %3432 = vperm.xlu1 %16001, %v3424_v3   ;;  %s16248_s27 = smov 40  }
 0x4e0   : > { %12295 = vmatmul.msk.bf16.gmra.mxu3 %vm2539_vm4, %v15241_v14  ;;  %12298 = vmatmul.msk.bf16.gmra.mxu1 %vm2539_vm4, %v15241_v14 }
 0x4ea   : > { %12301 = vmatmul.msk.bf16.gmra.mxu2 %vm2539_vm4, %v15241_v14  ;;  %12304 = vmatmul.msk.bf16.gmra.mxu0 %vm2539_vm4, %v15241_v14 }
 0x4f0   : > { %12305 = vmatmul.msk.bf16.vlgmr.msra.gmra.mxu3 %vm2539_vm4, %v17642_v26 }
 0x500   : > { %12306 = vmatmul.msk.bf16.gmra.mxu3 %vm2539_vm4, %v15240_v41 }
 0x510   : > { %12307 = vmatmul.msk.bf16.gmra.mxu3 %vm2539_vm4, %v15241_v14 }
 0x516   : > { %v2782_v11 = vpop.permute.xlu2 %2781 }
 0x51e   : > { %v3076_v43 = vpop.permute.xlu2 %3075 }
 0x526   : > { %v3080_v53 = vpop.permute.xlu2 %3079 }
 0x52e   : > { %v2784_v7 = vpop.permute.xlu1 %2783  ;;  %v3086_v13 = vpop.permute.xlu2 %3085 }
 0x52f   : > { %v2794_v51 = vsel %vm2793_vm5, %v2782_v11, %v2784_v7 }
 0x530   : > { %2820 = vmatpush.bf16.msrb.mxu1 %v2794_v51 }
 0x533   : > { %12350 = vmatmul.msk.bf16.vlgmr.msrb.gmra.mxu1 %vm2539_vm4, %v15247_v56 }
 0x538   : > { %v2786_v12 = vpop.permute.xlu0 %2785  ;;  %v2788_v44 = vpop.permute.xlu1 %2787 }
 0x539   : > { %v2795_v58 = vsel %vm2793_vm5, %v2784_v7, %v2786_v12  ;;  %v2796_v19 = vsel %vm2793_vm5, %v2786_v12, %v2788_v44 }
 0x53a   : > { %2844 = vmatpush.bf16.msra.mxu2 %v2795_v58  ;;  %2868 = vmatpush.bf16.msrb.mxu0 %v2796_v19 }
 0x53d   : > { %12353 = vmatmul.msk.bf16.vlgmr.msra.gmra.mxu2 %vm2539_vm4, %v15247_v56  ;;  %12356 = vmatmul.msk.bf16.vlgmr.msrb.gmra.mxu0 %vm2539_vm4, %v15247_v56  ;;  %v17736_v4 = vpop.f32.mrf.mxu1 }
 0x540   : > { %v2790_v35 = vpop.permute.xlu0 %2789  ;;  %v3078_v17 = vpop.permute.xlu1 %3077 }
 0x541   : > { %v2797_v8 = vsel %vm2793_vm5, %v2788_v44, %v2790_v35  ;;  %v3088_v16 = vsel %vm3087_vm6, %v3076_v43, %v3078_v17  ;;  %v3089_v59 = vsel %vm3087_vm6, %v3078_v17, %v3080_v53 }
 0x542   : > { %2892 = vmatpush.bf16.msrb.mxu3 %v2797_v8  ;;  %3114 = vmatpush.bf16.msrb.mxu2 %v3088_v16 }
 0x543   : > { %3138 = vmatpush.bf16.msra.mxu0 %v3089_v59  ;;  %12351 = vmatmul.msk.bf16.gmra.mxu1 %vm2539_vm4, %v15248_v20  ;;  %v17703_v61 = vpop.f32.mrf.mxu3 }
 0x545   : > { %12359 = vmatmul.msk.bf16.vlgmr.msrb.gmra.mxu3 %vm2539_vm4, %v15247_v56  ;;  %v17744_v27 = vpop.f32.mrf.mxu1 }
 0x547   : > { %v17746_v5 = vpop.f32.mrf.mxu0 }
 0x548   : > { %v2792_v26 = vpop.permute.xlu0 %2791  ;;  %v3082_v1 = vpop.permute.xlu1 %3081 }
 0x549   : > { %v2798_v24 = vsel %vm2793_vm5, %v2790_v35, %v2792_v26  ;;  %v3090_v55 = vsel %vm3087_vm6, %v3080_v53, %v3082_v1 }
 0x54a   : > { %2916 = vmatpush.bf16.msra.mxu1 %v2798_v24  ;;  %3162 = vmatpush.bf16.msra.mxu3 %v3090_v55 }
 0x54b   : > { %v17709_v0 = vpop.f32.mrf.mxu3 }
 0x54d   : > { %12354 = vmatmul.msk.bf16.gmra.mxu2 %vm2539_vm4, %v15248_v20  ;;  %12357 = vmatmul.msk.bf16.gmra.mxu0 %vm2539_vm4, %v15248_v20  ;;  %v17750_v37 = vpop.f32.mrf.mxu2  ;;  %v17752_v32 = vpop.f32.mrf.mxu1 }
 0x54f   : > { %v17754_v63 = vpop.f32.mrf.mxu0 }
 0x550   : > { %v3084_v25 = vpop.permute.xlu0 %3083 }
 0x551   : > { %v3091_v60 = vsel %vm3087_vm6, %v3082_v1, %v3084_v25  ;;  %v3092_v28 = vsel %vm3087_vm6, %v3084_v25, %v3086_v13 }
 0x552   : > { %3186 = vmatpush.bf16.msrb.mxu1 %v3091_v60  ;;  %3210 = vmatpush.bf16.msra.mxu2 %v3092_v28 }
 0x553   : > { %12352 = vmatmul.msk.bf16.gmra.mxu1 %vm2539_vm4, %v15249_v39  ;;  %v17718_v18 = vpop.f32.mrf.mxu3 }
 0x555   : > { %12360 = vmatmul.msk.bf16.gmra.mxu3 %vm2539_vm4, %v15248_v20  ;;  %v17761_v29 = vpop.f32.mrf.mxu2  ;;  %v17763_v15 = vpop.f32.mrf.mxu1 }
 0x557   : > { %v17765_v49 = vpop.f32.mrf.mxu0 }
 0x55b   : > { %v17722_v36 = vpop.f32.mrf.mxu3 }
 0x55d   : > { %12355 = vmatmul.msk.bf16.gmra.mxu2 %vm2539_vm4, %v15249_v39  ;;  %12358 = vmatmul.msk.bf16.gmra.mxu0 %vm2539_vm4, %v15249_v39  ;;  %v17769_v52 = vpop.f32.mrf.mxu2  ;;  %v17771_v10 = vpop.f32.mrf.mxu1 }
 0x55f   : > { %v17773_v48 = vpop.f32.mrf.mxu0 }
 0x563   : > { %12362 = vmatmul.msk.bf16.vlgmr.msra.gmra.mxu1 %vm2539_vm4, %v15247_v56  ;;  %v17726_v2 = vpop.f32.mrf.mxu3 }
 0x565   : > { %12361 = vmatmul.msk.bf16.gmra.mxu3 %vm2539_vm4, %v15249_v39  ;;  %v17779_v33 = vpop.f32.mrf.mxu2  ;;  %v17781_v62 = vpop.f32.mrf.mxu1 }
 0x567   : > { %v17783_v42 = vpop.f32.mrf.mxu0 }
 0x56b   : > { %v17733_v54 = vpop.f32.mrf.mxu3 }
 0x56d   : > { %12407 = vmatmul.msk.bf16.vlgmr.msrb.gmra.mxu2 %vm2539_vm4, %v15256_v34  ;;  %12410 = vmatmul.msk.bf16.vlgmr.msra.gmra.mxu0 %vm2539_vm4, %v15256_v34  ;;  %v17788_v21 = vpop.f32.mrf.mxu2 }
 0x56f   : > { %v17790_v23 = vpop.f32.mrf.mxu0 }
 0x573   : > { %12363 = vmatmul.msk.bf16.gmra.mxu1 %vm2539_vm4, %v15248_v20  ;;  %v2654_v57 = vpop.f32.mrf.mxu3 }
 0x575   : > { %12413 = vmatmul.msk.bf16.vlgmr.msra.gmra.mxu3 %vm2539_vm4, %v15256_v34  ;;  %v17795_v40 = vpop.f32.mrf.mxu2 }
 0x57b   : > { %v2656_v6 = vpop.f32.mrf.mxu3 }
 0x57d   : > { %12408 = vmatmul.msk.bf16.gmra.mxu2 %vm2539_vm4, %v15257_v50  ;;  %12411 = vmatmul.msk.bf16.gmra.mxu0 %vm2539_vm4, %v15257_v50 }
 0x583   : > { %12364 = vmatmul.msk.bf16.gmra.mxu1 %vm2539_vm4, %v15249_v39  ;;  %v17776_v41 = vpop.f32.mrf.mxu3 }
 0x585   : > { %12414 = vmatmul.msk.bf16.gmra.mxu3 %vm2539_vm4, %v15257_v50 }
 0x58b   : > { %v17785_v45 = vpop.f32.mrf.mxu3 }
 0x58d   : > { %12409 = vmatmul.msk.bf16.gmra.mxu2 %vm2539_vm4, %v15258_v22  ;;  %12412 = vmatmul.msk.bf16.gmra.mxu0 %vm2539_vm4, %v15258_v22 }
 0x593   : > { %12416 = vmatmul.msk.bf16.vlgmr.msrb.gmra.mxu1 %vm2539_vm4, %v15256_v34  ;;  %v17793_v30 = vpop.f32.mrf.mxu3 }
 0x595   : > { %12415 = vmatmul.msk.bf16.gmra.mxu3 %vm2539_vm4, %v15258_v22 }
 0x59b   : > { %v17800_v9 = vpop.f32.mrf.mxu3 }
 0x59d   : > { %12419 = vmatmul.msk.bf16.vlgmr.msra.gmra.mxu2 %vm2539_vm4, %v15256_v34 }
 0x5a3   : > { %12417 = vmatmul.msk.bf16.gmra.mxu1 %vm2539_vm4, %v15257_v50 }
 0x5ad   : > { %12420 = vmatmul.msk.bf16.gmra.mxu2 %vm2539_vm4, %v15257_v50 }
 0x5b0   : > { %v2822_v31 = vpop.f32.mrf.mxu1 }
 0x5b1   : > { %v2933_v25 = vadd.f32 %v2822_v31, %v17703_v61 }
 0x5b3   : > { %12418 = vmatmul.msk.bf16.gmra.mxu1 %vm2539_vm4, %v15258_v22 }
 0x5b8   : > { %v17797_v47 = vpop.f32.mrf.mxu1 }
 0x5ba   : > { %v2870_v38 = vpop.f32.mrf.mxu0 }
 0x5bb   : > { %v2935_v6 = vadd.f32 %v2870_v38, %v17750_v37 }
 0x5bd   : > { %12421 = vmatmul.msk.bf16.gmra.mxu2 %vm2539_vm4, %v15258_v22 }
 0x5c0   : > { %v2827_v3 = vpop.f32.mrf.mxu1  ;;  %v2846_v46 = vpop.f32.mrf.mxu2 }
 0x5c1   : > { %v2934_v24 = vadd.f32 %v2846_v46, %v17736_v4 }
 0x5c2   : > { %v17802_v14 = vpop.f32.mrf.mxu0 }
 0x5c8   : > { %v2829_v11 = vpop.f32.mrf.mxu1  ;;  %v17804_v7 = vpop.f32.mrf.mxu2 }
 0x5c9   : > { %v2894_v51 = vpop.f32.mrf.mxu3 }
 0x5ca   : > { %v2875_v56 = vpop.f32.mrf.mxu0 }
 0x5d0   : > { %v2832_v43 = vpop.f32.mrf.mxu1  ;;  %v2851_v12 = vpop.f32.mrf.mxu2 }
 0x5d1   : > { %v17806_v44 = vpop.f32.mrf.mxu3  ;;  %v2944_v46 = vadd.f32 %v2851_v12, %v17752_v32  ;;  %v2948_v32 = vadd.f32 %v2829_v11, %v17722_v36  ;;  %v2936_v36 = vadd.f32 %v2894_v51, %v17746_v5 }
 0x5d2   : > { %v2877_v58 = vpop.f32.mrf.mxu0 }
 0x5d8   : > { %v17808_v19 = vpop.f32.mrf.mxu1  ;;  %v2853_v53 = vpop.f32.mrf.mxu2 }
 0x5d9   : > { %v17810_v20 = vpop.f32.mrf.mxu3  ;;  %v2949_v12 = vadd.f32 %v2853_v53, %v17763_v15  ;;  %v2953_v15 = vadd.f32 %v2832_v43, %v17726_v2 }
 0x5da   : > { %v2880_v35 = vpop.f32.mrf.mxu0 }
 0x5db   : > { %v2955_v5 = vadd.f32 %v2880_v35, %v17788_v21  ;;  %v2958_v21 = vadd.f32 %v17808_v19, %v17733_v54 }
 0x5e0   : > { %v2856_v17 = vpop.f32.mrf.mxu2  ;;  %v2918_v8 = vpop.f32.mrf.mxu1 }
 0x5e1   : > { %v17812_v16 = vpop.f32.mrf.mxu3 }
 0x5e2   : > { %v17814_v59 = vpop.f32.mrf.mxu0 }
 0x5e8   : > { %v2858_v26 = vpop.f32.mrf.mxu2  ;;  %v2920_v1 = vpop.f32.mrf.mxu1 }
 0x5e9   : > { %v17817_v55 = vpop.f32.mrf.mxu3  ;;  %v2959_v2 = vadd.f32 %v2858_v26, %v17781_v62  ;;  %v2960_v62 = vadd.f32 %v17814_v59, %v17795_v40  ;;  %v15544_v40 = vld [vmem:[#allocation17 + $0x8b4] sm:$0xf0]  ;;  %v15391_v59 = vld [vmem:[#allocation17 + $0x3f4] sm:$0xf] }
 0x5ea   : > { %v3140_v39 = vpop.f32.mrf.mxu0 }
 0x5eb   : > { %v17819_v13 = vadd.f32 %v3140_v39, %v2934_v24  ;;  %v2943_v24 = vadd.f32 %v2827_v3, %v17718_v18 }
 0x5f0   : > { %v17822_v60 = vpop.f32.mrf.mxu1  ;;  %v3116_v28 = vpop.f32.mrf.mxu2 }
 0x5f1   : > { %v17824_v34 = vpop.f32.mrf.mxu3  ;;  %v17826_v57 = vadd.f32 %v3116_v28, %v2933_v25 }
 0x5f2   : > { %v17828_v50 = vpop.f32.mrf.mxu0 }
 0x5f8   : > { %v17831_v22 = vpop.f32.mrf.mxu1  ;;  %v17833_v4 = vpop.f32.mrf.mxu2 }
 0x5f9   : > { %v3164_v8 = vpop.f32.mrf.mxu3 }
 0x5fa   : > { %v17836_v1 = vadd.f32 %v3164_v8, %v2935_v6  ;;  %v3145_v61 = vpop.f32.mrf.mxu0  ;;  %v2945_v6 = vadd.f32 %v2875_v56, %v17769_v52  ;;  %v2954_v52 = vadd.f32 %v2856_v17, %v17771_v10 }
 0x5fb   : > { %v3238_v31 = vadd.f32 %v3145_v61, %v2944_v46 }
 0x5fd   : > { %3317 = vrot.lane.b32.xlu0 %v3238_v31, %s16243_s29 }
 0x600   : > { %v17840_v39 = vpop.f32.mrf.mxu1  ;;  %v3121_v25 = vpop.f32.mrf.mxu2 }
 0x601   : > { %v3237_v28 = vadd.f32 %v3121_v25, %v2943_v24  ;;  %v17842_v37 = vpop.f32.mrf.mxu3 }
 0x602   : > { %v3147_v38 = vpop.f32.mrf.mxu0 }
 0x603   : > { %3315 = vrot.lane.b32.xlu1 %v3237_v28, %s16243_s29  ;;  %v3243_v61 = vadd.f32 %v3147_v38, %v2949_v12 }
 0x608   : > { %v17848_v46 = vpop.f32.mrf.mxu1  ;;  %v3123_v8 = vpop.f32.mrf.mxu2 }
 0x609   : > { %v3242_v18 = vadd.f32 %v3123_v8, %v2948_v32  ;;  %v3169_v3 = vpop.f32.mrf.mxu3  ;;  %v2950_v32 = vadd.f32 %v2877_v58, %v17779_v33  ;;  %v2946_v33 = vadd.f32 %v17810_v20, %v17765_v49  ;;  %v2951_v49 = vadd.f32 %v17812_v16, %v17773_v48 }
 0x60a   : > { %v3239_v31 = vadd.f32 %v3169_v3, %v2945_v6  ;;  %v3150_v24 = vpop.f32.mrf.mxu0 }
 0x60b   : > { %3325 = vrot.lane.b32.xlu2 %v3242_v18, %s16243_s29  ;;  %3327 = vrot.lane.b32.xlu1 %v3243_v61, %s16243_s29  ;;  %v3248_v53 = vadd.f32 %v3150_v24, %v2954_v52  ;;  %v2956_v52 = vadd.f32 %v17817_v55, %v17783_v42 }
 0x60c   : > { %3319 = vrot.lane.b32.xlu0 %v3239_v31, %s16243_s29  ;;  %v13504_v31 = vld [vmem:[#allocation17 + $0x870] sm:$0xf] }
 0x60d   : > { %v13505_v24 = vor.u32 %v15544_v40, %v13504_v31  ;;  %v15490_v40 = vld [vmem:[#allocation17 + $0x704] sm:$0xf0] }
 0x60f   : > { %6925 = vmatpush.bf16.msrb.mxu3 %v13505_v24  ;;  %v12714_v24 = vld [vmem:[#allocation17 + $0x288] sm:$0xf0] }
 0x610   : > { %v3126_v11 = vpop.f32.mrf.mxu2  ;;  %v3188_v56 = vpop.f32.mrf.mxu1 }
 0x611   : > { %v3247_v25 = vadd.f32 %v3126_v11, %v2953_v15  ;;  %v3171_v28 = vpop.f32.mrf.mxu3  ;;  %v17856_v38 = vadd.f32 %v3188_v56, %v2936_v36  ;;  %v12930_v36 = vld [vmem:[#allocation17 + $0x438] sm:$0xf0]  ;;  %v2947_v11 = vadd.f32 %v17822_v60, %v17776_v41  ;;  %v2957_v41 = vadd.f32 %v17840_v39, %v17793_v30 }
 0x612   : > { %v3152_v12 = vpop.f32.mrf.mxu0  ;;  %v3244_v43 = vadd.f32 %v3171_v28, %v2950_v32  ;;  %v12933_v15 = vor.u32 %v15391_v59, %v12930_v36  ;;  %v2952_v28 = vadd.f32 %v17831_v22, %v17785_v45  ;;  %v15382_v45 = vld [vmem:[#allocation17 + $0x3a4] sm:$0xf0]  ;;  %v13432_v22 = vld [vmem:[#allocation17 + $0x7e0] sm:$0xf]  ;;  %v15337_v59 = vld [vmem:[#allocation17 + $0x244] sm:$0xf] }
 0x613   : > { %3381 = vrot.lane.b32.xlu2 %v3248_v53, %s16244_s19  ;;  %v3253_v6 = vadd.f32 %v3152_v12, %v2959_v2  ;;  %v12928_v2 = vld [vmem:[#allocation17 + $0x3f0] sm:$0xf] }
 0x614   : > { %3379 = vrot.lane.b32.xlu0 %v3247_v25, %s16244_s19  ;;  %6967 = vmatpush.bf16.msrb.mxu2 %v12933_v15  ;;  %v2961_v25 = vadd.f32 %v17824_v34, %v17790_v23  ;;  %v15400_v23 = vld [vmem:[#allocation17 + $0x434] sm:$0xf0]  ;;  %v12856_v34 = vld [vmem:[#allocation17 + $0x360] sm:$0xf]  ;;  %v12717_v15 = vor.u32 %v15337_v59, %v12714_v24 }
 0x615   : > { %v12857_v30 = vor.u32 %v15382_v45, %v12856_v34  ;;  %v13072_v45 = vld [vmem:[#allocation17 + $0x510] sm:$0xf]  ;;  %v14008_v24 = vld [vmem:[#allocation17 + $0xc60] sm:$0xf] }
 0x618   : > { %v3128_v51 = vpop.f32.mrf.mxu2  ;;  %v17863_v10 = vpop.f32.mrf.mxu1 }
 0x619   : > { %v3174_v17 = vpop.f32.mrf.mxu3  ;;  %v3252_v18 = vadd.f32 %v3128_v51, %v2958_v21  ;;  %v12929_v51 = vor.u32 %v15400_v23, %v12928_v2  ;;  %v12570_v2 = vld [vmem:[#allocation17 + $0x168] sm:$0xf0] }
 0x61a   : > { %v3249_v8 = vadd.f32 %v3174_v17, %v2955_v5  ;;  %v2962_v17 = vadd.f32 %v17848_v46, %v17800_v9  ;;  %v12712_v46 = vld [vmem:[#allocation17 + $0x240] sm:$0xf] }
 0x61b   : > { %3329 = vrot.lane.b32.xlu2 %v3244_v43, %s16243_s29  ;;  %v15526_v43 = vld [vmem:[#allocation17 + $0x824] sm:$0xf0]  ;;  %6911 = vmatpush.bf16.msrb.mxu0 %v12929_v51  ;;  %v12496_v51 = vld [vmem:[#allocation17 + $0x90] sm:$0xf] }
 0x61c   : > { %3383 = vrot.lane.b32.xlu1 %v3249_v8, %s16244_s19  ;;  %3391 = vrot.lane.b32.xlu0 %v3253_v6, %s16244_s19  ;;  %v13433_v6 = vor.u32 %v15526_v43, %v13432_v22  ;;  %v15373_v8 = vld [vmem:[#allocation17 + $0x364] sm:$0xf]  ;;  %v15436_v22 = vld [vmem:[#allocation17 + $0x554] sm:$0xf0] }
 0x61d   : > { %v15292_v43 = vld [vmem:[#allocation17 + $0xd4] sm:$0xf0] }
 0x61e   : > { %6926 = vmatpush.bf16.msrb.mxu3 %v13433_v6  ;;  %v15283_v6 = vld [vmem:[#allocation17 + $0x94] sm:$0xf] }
 0x61f   : > { %6912 = vmatpush.bf16.msrb.mxu0 %v12857_v30  ;;  %v12424_v30 = vld [vmem:[#allocation17] sm:$0xf] }
 0x620   : > { %v3193_v58 = vpop.f32.mrf.mxu1  ;;  %v3212_v35 = vpop.f32.mrf.mxu2 }
 0x621   : > { %v3176_v26 = vpop.f32.mrf.mxu3  ;;  %v3240_v61 = vadd.f32 %v3193_v58, %v2946_v33  ;;  %v12858_v33 = vld [vmem:[#allocation17 + $0x3a8] sm:$0xf0]  ;;  %v13360_v58 = vld [vmem:[#allocation17 + $0x750] sm:$0xf]  ;;  %v15508_v35 = vld [vmem:[#allocation17 + $0x794] sm:$0xf0] }
 0x622   : > { %v3254_v3 = vadd.f32 %v3176_v26, %v2960_v62  ;;  %v12861_v39 = vor.u32 %v15373_v8, %v12858_v33  ;;  %v12784_v62 = vld [vmem:[#allocation17 + $0x2d0] sm:$0xf]  ;;  %v12498_v8 = vld [vmem:[#allocation17 + $0xd8] sm:$0xf0] }
 0x623   : > { %3321 = vrot.lane.b32.xlu2 %v3240_v61, %s16243_s29  ;;  %v15364_v61 = vld [vmem:[#allocation17 + $0x314] sm:$0xf0]  ;;  %v12501_v33 = vor.u32 %v15283_v6, %v12498_v8  ;;  %v13290_v6 = vld [vmem:[#allocation17 + $0x708] sm:$0xf0]  ;;  %v12720_v8 = vld [vmem:[#allocation17 + $0x248] sm:$0xf] }
 0x624   : > { %3389 = vrot.lane.b32.xlu1 %v3252_v18, %s16244_s19  ;;  %3393 = vrot.lane.b32.xlu0 %v3254_v3, %s16244_s19  ;;  %v13361_v18 = vor.u32 %v15508_v35, %v13360_v58  ;;  %v15355_v3 = vld [vmem:[#allocation17 + $0x2d4] sm:$0xf]  ;;  %v12785_v9 = vor.u32 %v15364_v61, %v12784_v62  ;;  %v13000_v62 = vld [vmem:[#allocation17 + $0x480] sm:$0xf]  ;;  %v15418_v58 = vld [vmem:[#allocation17 + $0x4c4] sm:$0xf0] }
 0x625   : > { %6968 = vmatpush.bf16.msrb.mxu2 %v12861_v39  ;;  %v15274_v39 = vld [vmem:[#allocation17 + $0x44] sm:$0xf0]  ;;  %v15265_v35 = vld [vmem:[#allocation17 + $0x4] sm:$0xf] }
 0x626   : > { %6927 = vmatpush.bf16.msrb.mxu3 %v13361_v18  ;;  %6913 = vmatpush.bf16.msrb.mxu0 %v12785_v9  ;;  %v12425_v61 = vor.u32 %v15274_v39, %v12424_v30  ;;  %v13001_v18 = vor.u32 %v15418_v58, %v13000_v62  ;;  %v15535_v9 = vld [vmem:[#allocation17 + $0x874] sm:$0xf]  ;;  %v14584_v58 = vld [vmem:[#allocation17 + $0x10e0] sm:$0xf] }
 0x628   : > { %v3195_v20 = vpop.f32.mrf.mxu1  ;;  %v3214_v54 = vpop.f32.mrf.mxu2 }
 0x629   : > { %v3245_v19 = vadd.f32 %v3195_v20, %v2951_v49  ;;  %v12786_v49 = vld [vmem:[#allocation17 + $0x318] sm:$0xf0]  ;;  %v15346_v54 = vld [vmem:[#allocation17 + $0x284] sm:$0xf0] }
 0x62a   : > { %v12789_v20 = vor.u32 %v15355_v3, %v12786_v49  ;;  %v12713_v31 = vor.u32 %v15346_v54, %v12712_v46  ;;  %v14080_v49 = vld [vmem:[#allocation17 + $0xcf0] sm:$0xf]  ;;  %v13506_v54 = vld [vmem:[#allocation17 + $0x8b8] sm:$0xf0] }
 0x62c   : > { %3331 = vrot.lane.b32.xlu1 %v3245_v19, %s16243_s29  ;;  %6969 = vmatpush.bf16.msrb.mxu2 %v12789_v20  ;;  %v13288_v19 = vld [vmem:[#allocation17 + $0x6c0] sm:$0xf]  ;;  %v15688_v20 = vld [vmem:[#allocation17 + $0xd34] sm:$0xf0] }
 0x62d   : > { %v13289_v36 = vor.u32 %v15490_v40, %v13288_v19  ;;  %6914 = vmatpush.bf16.msrb.mxu0 %v12713_v31  ;;  %v14081_v46 = vor.u32 %v15688_v20, %v14080_v49  ;;  %v12936_v19 = vld [vmem:[#allocation17 + $0x3f8] sm:$0xf]  ;;  %v15401_v31 = vld [vmem:[#allocation17 + $0x43c] sm:$0xf0]  ;;  %v13509_v40 = vor.u32 %v15535_v9, %v13506_v54  ;;  %v13218_v49 = vld [vmem:[#allocation17 + $0x678] sm:$0xf0] }
 0x62e   : > { %v12937_v59 = vor.u32 %v15401_v31, %v12936_v19  ;;  %v15329_v54 = vld [vmem:[#allocation17 + $0x1fc] sm:$0xf0]  ;;  %v14512_v19 = vld [vmem:[#allocation17 + $0x1050] sm:$0xf] }
 0x62f   : > { %6928 = vmatpush.bf16.msrb.mxu3 %v13289_v36  ;;  %v15670_v36 = vld [vmem:[#allocation17 + $0xca4] sm:$0xf0] }
 0x630   : > { %v3198_v48 = vpop.f32.mrf.mxu1  ;;  %v3217_v16 = vpop.f32.mrf.mxu2  ;;  %6970 = vmatpush.bf16.msrb.mxu2 %v12717_v15  ;;  %v15517_v15 = vld [vmem:[#allocation17 + $0x7e4] sm:$0xf] }
 0x631   : > { %v3250_v56 = vadd.f32 %v3198_v48, %v2956_v52  ;;  %v3241_v53 = vadd.f32 %v3217_v16, %v2947_v11  ;;  %v13216_v52 = vld [vmem:[#allocation17 + $0x630] sm:$0xf]  ;;  %v15472_v11 = vld [vmem:[#allocation17 + $0x674] sm:$0xf0]  ;;  %v15319_v48 = vld [vmem:[#allocation17 + $0x1b4] sm:$0xf] }
 0x632   : > { %v12642_v16 = vld [vmem:[#allocation17 + $0x1f8] sm:$0xf0] }
 0x633   : > { %3323 = vrot.lane.b32.xlu0 %v3241_v53, %s16243_s29  ;;  %v12645_v53 = vor.u32 %v15319_v48, %v12642_v16  ;;  %v12864_v48 = vld [vmem:[#allocation17 + $0x368] sm:$0xf]  ;;  %v15383_v16 = vld [vmem:[#allocation17 + $0x3ac] sm:$0xf0] }
 0x634   : > { %3385 = vrot.lane.b32.xlu1 %v3250_v56, %s16244_s19  ;;  %v13217_v56 = vor.u32 %v15472_v11, %v13216_v52  ;;  %v14009_v52 = vor.u32 %v15670_v36, %v14008_v24  ;;  %v13434_v11 = vld [vmem:[#allocation17 + $0x828] sm:$0xf0] }
 0x635   : > { %6971 = vmatpush.bf16.msrb.mxu2 %v12645_v53  ;;  %v12865_v53 = vor.u32 %v15383_v16, %v12864_v48  ;;  %v15445_v48 = vld [vmem:[#allocation17 + $0x5a4] sm:$0xf]  ;;  %v13146_v16 = vld [vmem:[#allocation17 + $0x5e8] sm:$0xf0] }
 0x636   : > { %6929 = vmatpush.bf16.msrb.mxu3 %v13217_v56  ;;  %v13437_v56 = vor.u32 %v15517_v15, %v13434_v11  ;;  %v15598_v11 = vld [vmem:[#allocation17 + $0xa64] sm:$0xf0] }
 0x638   : > { %v3200_v32 = vpop.f32.mrf.mxu1  ;;  %v3219_v42 = vpop.f32.mrf.mxu2 }
 0x639   : > { %v3255_v55 = vadd.f32 %v3200_v32, %v2961_v25  ;;  %v3246_v12 = vadd.f32 %v3219_v42, %v2952_v28  ;;  %v12640_v25 = vld [vmem:[#allocation17 + $0x1b0] sm:$0xf]  ;;  %v15328_v28 = vld [vmem:[#allocation17 + $0x1f4] sm:$0xf0]  ;;  %v12568_v32 = vld [vmem:[#allocation17 + $0x120] sm:$0xf] }
 0x63a   : > { %v12641_v42 = vor.u32 %v15328_v28, %v12640_v25  ;;  %v13936_v25 = vld [vmem:[#allocation17 + $0xbd0] sm:$0xf]  ;;  %v15652_v28 = vld [vmem:[#allocation17 + $0xc14] sm:$0xf0] }
 0x63b   : > { %3333 = vrot.lane.b32.xlu2 %v3246_v12, %s16243_s29  ;;  %3395 = vrot.lane.b32.xlu0 %v3255_v55, %s16244_s19  ;;  %v15310_v55 = vld [vmem:[#allocation17 + $0x164] sm:$0xf0]  ;;  %v13144_v12 = vld [vmem:[#allocation17 + $0x5a0] sm:$0xf] }
 0x63c   : > { %6915 = vmatpush.bf16.msrb.mxu0 %v12641_v42  ;;  %v12569_v23 = vor.u32 %v15310_v55, %v12568_v32  ;;  %v15499_v32 = vld [vmem:[#allocation17 + $0x754] sm:$0xf]  ;;  %v13937_v42 = vor.u32 %v15652_v28, %v13936_v25  ;;  %v13362_v55 = vld [vmem:[#allocation17 + $0x798] sm:$0xf0]  ;;  %v13149_v28 = vor.u32 %v15445_v48, %v13146_v16 }
 0x640   : > { %v3222_v60 = vpop.f32.mrf.mxu2  ;;  %6916 = vmatpush.bf16.msrb.mxu0 %v12569_v23  ;;  %v15832_v23 = vld [vmem:[#allocation17 + $0x11b4] sm:$0xf0] }
 0x641   : > { %v3251_v5 = vadd.f32 %v3222_v60, %v2957_v41  ;;  %v15454_v41 = vld [vmem:[#allocation17 + $0x5e4] sm:$0xf0] }
 0x642   : > { %v13145_v60 = vor.u32 %v15454_v41, %v13144_v12  ;;  %v12792_v12 = vld [vmem:[#allocation17 + $0x2d8] sm:$0xf]  ;;  %v15365_v41 = vld [vmem:[#allocation17 + $0x31c] sm:$0xf0] }
 0x643   : > { %3387 = vrot.lane.b32.xlu2 %v3251_v5, %s16244_s19  ;;  %v15301_v5 = vld [vmem:[#allocation17 + $0x124] sm:$0xf] }
 0x644   : > { %v12573_v34 = vor.u32 %v15301_v5, %v12570_v2  ;;  %6930 = vmatpush.bf16.msrb.mxu3 %v13145_v60  ;;  %v13365_v60 = vor.u32 %v15499_v32, %v13362_v55  ;;  %v12793_v5 = vor.u32 %v15365_v41, %v12792_v12  ;;  %v14656_v2 = vld [vmem:[#allocation17 + $0x1170] sm:$0xf]  ;;  %v14440_v32 = vld [vmem:[#allocation17 + $0xfc0] sm:$0xf] }
 0x645   : > { %v13648_v55 = vld [vmem:[#allocation17 + $0x990] sm:$0xf] }
 0x646   : > { %6972 = vmatpush.bf16.msrb.mxu2 %v12573_v34  ;;  %v14657_v34 = vor.u32 %v15832_v23, %v14656_v2  ;;  %v13074_v2 = vld [vmem:[#allocation17 + $0x558] sm:$0xf0] }
 0x648   : > { %v3224_v21 = vpop.f32.mrf.mxu2  ;;  %6953 = vmatpush.bf16.msra.mxu1 %v14657_v34 }
 0x649   : > { %v3256_v26 = vadd.f32 %v3224_v21, %v2962_v17  ;;  %v13073_v17 = vor.u32 %v15436_v22, %v13072_v45  ;;  %v12497_v21 = vor.u32 %v15292_v43, %v12496_v51  ;;  %v17898_v51 = vpop.permute.xlu1 %3432  ;;  %v13864_v45 = vld [vmem:[#allocation17 + $0xb40] sm:$0xf]  ;;  %v15634_v22 = vld [vmem:[#allocation17 + $0xb84] sm:$0xf0]  ;;  %v15481_v43 = vld [vmem:[#allocation17 + $0x6c4] sm:$0xf] }
 0x64a   : > { %6973 = vmatpush.bf16.msrb.mxu2 %v12501_v33  ;;  %v15347_v33 = vld [vmem:[#allocation17 + $0x28c] sm:$0xf0]  ;;  %v13293_v39 = vor.u32 %v15481_v43, %v13290_v6  ;;  %v15760_v6 = vld [vmem:[#allocation17 + $0xf74] sm:$0xf0] }
 0x64b   : > { %3397 = vrot.lane.b32.xlu1 %v3256_v26, %s16244_s19  ;;  %6931 = vmatpush.bf16.msrb.mxu3 %v13073_v17  ;;  %v12426_v26 = vld [vmem:[#allocation17 + $0x48] sm:$0xf0]  ;;  %v13865_v17 = vor.u32 %v15634_v22, %v13864_v45  ;;  %v12721_v62 = vor.u32 %v15347_v33, %v12720_v8  ;;  %v12504_v45 = vld [vmem:[#allocation17 + $0x98] sm:$0xf]  ;;  %v15293_v22 = vld [vmem:[#allocation17 + $0xdc] sm:$0xf0] }
 0x64c   : > { %6917 = vmatpush.bf16.msrb.mxu0 %v12497_v21  ;;  %v12429_v3 = vor.u32 %v15265_v35, %v12426_v26  ;;  %v17900_v21 = vpop.permute.xlu2 %3427  ;;  %v15814_v35 = vld [vmem:[#allocation17 + $0x1124] sm:$0xf0]  ;;  %v13792_v26 = vld [vmem:[#allocation17 + $0xab0] sm:$0xf]  ;;  %v13576_v8 = vld [vmem:[#allocation17 + $0x900] sm:$0xf] }
 0x64d   : > { %v14368_v43 = vld [vmem:[#allocation17 + $0xf30] sm:$0xf]  ;;  %v15562_v33 = vld [vmem:[#allocation17 + $0x944] sm:$0xf0] }
 0x64e   : > { %6974 = vmatpush.bf16.msrb.mxu2 %v12429_v3  ;;  %v15463_v3 = vld [vmem:[#allocation17 + $0x634] sm:$0xf] }
 0x64f   : > { %6932 = vmatpush.bf16.msrb.mxu3 %v13001_v18  ;;  %v15616_v18 = vld [vmem:[#allocation17 + $0xaf4] sm:$0xf0]  ;;  %v13221_v9 = vor.u32 %v15463_v3, %v13218_v49  ;;  %v13577_v3 = vor.u32 %v15562_v33, %v13576_v8  ;;  %v15787_v33 = vld [vmem:[#allocation17 + $0x1054] sm:$0xf] }
 0x650   : > { %6918 = vmatpush.bf16.msrb.mxu0 %v12425_v61  ;;  %v14585_v61 = vor.u32 %v15814_v35, %v14584_v58  ;;  %v13793_v20 = vor.u32 %v15616_v18, %v13792_v26  ;;  %v13002_v58 = vld [vmem:[#allocation17 + $0x4c8] sm:$0xf0]  ;;  %v12432_v35 = vld [vmem:[#allocation17 + $0x8] sm:$0xf]  ;;  %v15275_v26 = vld [vmem:[#allocation17 + $0x4c] sm:$0xf0] }
 0x652   : > { %7023 = vmatpush.bf16.msra.mxu2 %v12937_v59  ;;  %6954 = vmatpush.bf16.msra.mxu1 %v14585_v61 }
 0x653   : > { %6981 = vmatpush.bf16.msra.mxu3 %v13509_v40  ;;  %v15796_v40 = vld [vmem:[#allocation17 + $0x1094] sm:$0xf0] }
 0x654   : > { %6939 = vmatpush.bf16.msra.mxu0 %v14081_v46  ;;  %v12648_v46 = vld [vmem:[#allocation17 + $0x1b8] sm:$0xf]  ;;  %v14513_v59 = vor.u32 %v15796_v40, %v14512_v19 }
 0x655   : > { %v12649_v31 = vor.u32 %v15329_v54, %v12648_v46  ;;  %v15742_v46 = vld [vmem:[#allocation17 + $0xee4] sm:$0xf0]  ;;  %v15724_v40 = vld [vmem:[#allocation17 + $0xe54] sm:$0xf0] }
 0x656   : > { %7024 = vmatpush.bf16.msra.mxu2 %v12865_v53  ;;  %6955 = vmatpush.bf16.msra.mxu1 %v14513_v59  ;;  %v15311_v53 = vld [vmem:[#allocation17 + $0x16c] sm:$0xf0] }
 0x657   : > { %6982 = vmatpush.bf16.msra.mxu3 %v13437_v56  ;;  %v12576_v56 = vld [vmem:[#allocation17 + $0x128] sm:$0xf] }
 0x658   : > { %6940 = vmatpush.bf16.msra.mxu0 %v14009_v52  ;;  %v13720_v52 = vld [vmem:[#allocation17 + $0xa20] sm:$0xf]  ;;  %v12577_v12 = vor.u32 %v15311_v53, %v12576_v56  ;;  %v15706_v53 = vld [vmem:[#allocation17 + $0xdc4] sm:$0xf0] }
 0x659   : > { %v13721_v25 = vor.u32 %v15598_v11, %v13720_v52  ;;  %v14152_v56 = vld [vmem:[#allocation17 + $0xd80] sm:$0xf] }
 0x65a   : > { %7025 = vmatpush.bf16.msra.mxu2 %v12793_v5  ;;  %v15427_v5 = vld [vmem:[#allocation17 + $0x514] sm:$0xf] }
 0x65b   : > { %6983 = vmatpush.bf16.msra.mxu3 %v13365_v60  ;;  %v15580_v60 = vld [vmem:[#allocation17 + $0x9d4] sm:$0xf0]  ;;  %v13077_v34 = vor.u32 %v15427_v5, %v13074_v2 }
 0x65c   : > { %6941 = vmatpush.bf16.msra.mxu0 %v13937_v42  ;;  %v15778_v42 = vld [vmem:[#allocation17 + $0x1004] sm:$0xf0]  ;;  %v13649_v23 = vor.u32 %v15580_v60, %v13648_v55  ;;  %v14658_v55 = vld [vmem:[#allocation17 + $0x11b8] sm:$0xf0]  ;;  %v2939_v60 = vadd.f32 %v17804_v7, %v17744_v27 }
 0x65d   : > { %v14441_v41 = vor.u32 %v15778_v42, %v14440_v32  ;;  %v14153_v42 = vor.u32 %v15706_v53, %v14152_v56 }
 0x65e   : > { %7026 = vmatpush.bf16.msra.mxu2 %v12721_v62  ;;  %v15409_v62 = vld [vmem:[#allocation17 + $0x484] sm:$0xf] }
 0x65f   : > { %6984 = vmatpush.bf16.msra.mxu3 %v13293_v39  ;;  %6956 = vmatpush.bf16.msra.mxu1 %v14441_v41  ;;  %v14369_v39 = vor.u32 %v15760_v6, %v14368_v43  ;;  %v13005_v49 = vor.u32 %v15409_v62, %v13002_v58  ;;  %v14514_v62 = vld [vmem:[#allocation17 + $0x1098] sm:$0xf0]  ;;  %v15679_v58 = vld [vmem:[#allocation17 + $0xcf4] sm:$0xf] }
 0x660   : > { %6942 = vmatpush.bf16.msra.mxu0 %v13865_v17  ;;  %v12505_v17 = vor.u32 %v15293_v22, %v12504_v45 }
 0x662   : > { %7027 = vmatpush.bf16.msra.mxu2 %v12649_v31  ;;  %v14224_v31 = vld [vmem:[#allocation17 + $0xe10] sm:$0xf] }
 0x663   : > { %6985 = vmatpush.bf16.msra.mxu3 %v13221_v9  ;;  %6957 = vmatpush.bf16.msra.mxu1 %v14369_v39  ;;  %v14296_v9 = vld [vmem:[#allocation17 + $0xea0] sm:$0xf]  ;;  %v14225_v59 = vor.u32 %v15724_v40, %v14224_v31  ;;  %v15769_v40 = vld [vmem:[#allocation17 + $0xfc4] sm:$0xf] }
 0x664   : > { %6943 = vmatpush.bf16.msra.mxu0 %v13793_v20  ;;  %v12433_v20 = vor.u32 %v15275_v26, %v12432_v35  ;;  %v14297_v19 = vor.u32 %v15742_v46, %v14296_v9  ;;  %v14517_v35 = vor.u32 %v15787_v33, %v14514_v62  ;;  %v15392_v46 = vld [vmem:[#allocation17 + $0x3fc] sm:$0xf]  ;;  %v15625_v62 = vld [vmem:[#allocation17 + $0xb44] sm:$0xf] }
 0x665   : > { %v17904_v36 = vpop.permute.xlu2 %3325 }
 0x666   : > { %7028 = vmatpush.bf16.msra.mxu2 %v12577_v12 }
 0x667   : > { %6986 = vmatpush.bf16.msra.mxu3 %v13149_v28  ;;  %6958 = vmatpush.bf16.msra.mxu1 %v14297_v19 }
 0x668   : > { %6944 = vmatpush.bf16.msra.mxu0 %v13721_v25  ;;  %v15823_v25 = vld [vmem:[#allocation17 + $0x1174] sm:$0xf] }
 0x669   : > { %v14661_v41 = vor.u32 %v15823_v25, %v14658_v55  ;;  %v15527_v55 = vld [vmem:[#allocation17 + $0x82c] sm:$0xf0] }
 0x66a   : > { %7029 = vmatpush.bf16.msra.mxu2 %v12505_v17 }
 0x66b   : > { %6987 = vmatpush.bf16.msra.mxu3 %v13077_v34  ;;  %6959 = vmatpush.bf16.msra.mxu1 %v14225_v59  ;;  %v14442_v59 = vld [vmem:[#allocation17 + $0x1008] sm:$0xf0] }
 0x66c   : > { %6945 = vmatpush.bf16.msra.mxu0 %v13649_v23 }
 0x66d   : > { %v3382_v54 = vpop.permute.xlu2 %3381 }
 0x66e   : > { %7030 = vmatpush.bf16.msra.mxu2 %v12433_v20 }
 0x66f   : > { %v17902_v30 = vpop.permute.xlu0 %3317  ;;  %6988 = vmatpush.bf16.msra.mxu3 %v13005_v49  ;;  %6960 = vmatpush.bf16.msra.mxu1 %v14153_v42  ;;  %v15545_v49 = vld [vmem:[#allocation17 + $0x8bc] sm:$0xf0]  ;;  %v13440_v42 = vld [vmem:[#allocation17 + $0x7e8] sm:$0xf] }
 0x670   : > { %6946 = vmatpush.bf16.msra.mxu0 %v13577_v3  ;;  %v13512_v3 = vld [vmem:[#allocation17 + $0x878] sm:$0xf] }
 0x671   : > { %v13513_v53 = vor.u32 %v15545_v49, %v13512_v3 }
 0x673   : > { %7009 = vmatpush.bf16.msrb.mxu1 %v14661_v41  ;;  %v14445_v41 = vor.u32 %v15769_v40, %v14442_v59  ;;  %v15607_v59 = vld [vmem:[#allocation17 + $0xab4] sm:$0xf] }
 0x675   : > { %v3316_v24 = vpop.permute.xlu1 %3315  ;;  %v17924_v5 = vpop.permute.xlu2 %3329 }
 0x676   : > { %v3335_v52 = vsel %vm2055_vm1, %v3316_v24, %v17902_v30 }
 0x677   : > { %v3351_v24 = vadd.f32 %v3335_v52, %v17826_v57 }
 0x67d   : > { %v3328_v61 = vpop.permute.xlu1 %3327 }
 0x67e   : > { %v17906_v15 = vpop.permute.xlu0 %3319  ;;  %v3339_v2 = vsel %vm2055_vm1, %v17904_v36, %v3328_v61  ;;  %v3340_v23 = vsel %vm2055_vm1, %v3328_v61, %v17924_v5 }
 0x67f   : > { %v3336_v11 = vsel %vm2055_vm1, %v17902_v30, %v17906_v15  ;;  %v2938_v30 = vadd.f32 %v17797_v47, %v17709_v0  ;;  %v15805_v0 = vld [vmem:[#allocation17 + $0x10e4] sm:$0xf]  ;;  %v14586_v47 = vld [vmem:[#allocation17 + $0x1128] sm:$0xf0] }
 0x680   : > { %v3352_v12 = vadd.f32 %v3336_v11, %v17819_v13  ;;  %v3233_v13 = vadd.f32 %v17828_v50, %v2939_v60  ;;  %v14589_v17 = vor.u32 %v15805_v0, %v14586_v47  ;;  %v14370_v60 = vld [vmem:[#allocation17 + $0xf78] sm:$0xf0]  ;;  %v17950_v0 = vpop.permute.xlu2 %3321  ;;  %v15509_v47 = vld [vmem:[#allocation17 + $0x79c] sm:$0xf0] }
 0x681   : > { %v3232_v57 = vadd.f32 %v17833_v4, %v2938_v30  ;;  %v15751_v30 = vld [vmem:[#allocation17 + $0xf34] sm:$0xf] }
 0x682   : > { %v3356_v27 = vadd.f32 %v3340_v23, %v3233_v13  ;;  %7010 = vmatpush.bf16.msrb.mxu1 %v14589_v17  ;;  %v13441_v23 = vor.u32 %v15527_v55, %v13440_v42  ;;  %v13938_v13 = vld [vmem:[#allocation17 + $0xc18] sm:$0xf0]  ;;  %v14154_v42 = vld [vmem:[#allocation17 + $0xdc8] sm:$0xf0] }
 0x683   : > { %v3355_v22 = vadd.f32 %v3339_v2, %v3232_v57  ;;  %v13368_v57 = vld [vmem:[#allocation17 + $0x758] sm:$0xf] }
 0x686   : > { %v3380_v18 = vpop.permute.xlu0 %3379  ;;  %7011 = vmatpush.bf16.msrb.mxu1 %v14517_v35  ;;  %v13296_v35 = vld [vmem:[#allocation17 + $0x6c8] sm:$0xf] }
 0x687   : > { %v3399_v28 = vsel %vm2078_vm3, %v3380_v18, %v3382_v54  ;;  %v14082_v18 = vld [vmem:[#allocation17 + $0xd38] sm:$0xf0] }
 0x688   : > { %v3415_v34 = vadd.f32 %v3399_v28, %v3351_v24  ;;  %v14085_v52 = vor.u32 %v15679_v58, %v14082_v18  ;;  %v15661_v28 = vld [vmem:[#allocation17 + $0xc64] sm:$0xf]  ;;  %v15374_v24 = vld [vmem:[#allocation17 + $0x36c] sm:$0xf]  ;;  %v12722_v18 = vld [vmem:[#allocation17 + $0x290] sm:$0xf0] }
 0x689   : > { %v13866_v58 = vld [vmem:[#allocation17 + $0xb88] sm:$0xf0] }
 0x68a   : > { %v3435_v36 = vadd.f32 %v17900_v21, %v3415_v34  ;;  %7012 = vmatpush.bf16.msrb.mxu1 %v14445_v41 }
 0x68c   : > { %v3443_v20 = vmax.f32 %v3435_v36, 0.0 }
 0x68e   : > { %v17913_v48 = vpop.permute.xlu1 %3383  ;;  %v3392_v16 = vpop.permute.xlu0 %3391 }
 0x68f   : > { %v3400_v32 = vsel %vm2078_vm3, %v3382_v54, %v17913_v48  ;;  %v12938_v54 = vld [vmem:[#allocation17 + $0x440] sm:$0xf0] }
 0x690   : > { %v3416_v45 = vadd.f32 %v3400_v32, %v3352_v12  ;;  %v12941_v25 = vor.u32 %v15392_v46, %v12938_v54  ;;  %v14010_v32 = vld [vmem:[#allocation17 + $0xca8] sm:$0xf0]  ;;  %v12866_v12 = vld [vmem:[#allocation17 + $0x3b0] sm:$0xf0]  ;;  %v13869_v54 = vor.u32 %v15625_v62, %v13866_v58  ;;  %v15284_v58 = vld [vmem:[#allocation17 + $0x9c] sm:$0xf] }
 0x691   : > { %v14013_v2 = vor.u32 %v15661_v28, %v14010_v32  ;;  %v12869_v34 = vor.u32 %v15374_v24, %v12866_v12  ;;  %v15473_v28 = vld [vmem:[#allocation17 + $0x67c] sm:$0xf0]  ;;  %v15697_v32 = vld [vmem:[#allocation17 + $0xd84] sm:$0xf] }
 0x692   : > { %v3436_v6 = vadd.f32 %v17900_v21, %v3416_v45  ;;  %v15643_v45 = vld [vmem:[#allocation17 + $0xbd4] sm:$0xf] }
 0x693   : > { %v13941_v36 = vor.u32 %v15643_v45, %v13938_v13  ;;  %v15455_v13 = vld [vmem:[#allocation17 + $0x5ec] sm:$0xf0] }
 0x694   : > { %v3444_v9 = vmax.f32 %v3436_v6, 0.0  ;;  %v15733_v6 = vld [vmem:[#allocation17 + $0xea4] sm:$0xf] }
 0x696   : > { %v3390_v7 = vpop.permute.xlu1 %3389  ;;  %v17932_v43 = vpop.permute.xlu0 %3393 }
 0x697   : > { %v3403_v8 = vsel %vm2078_vm3, %v3390_v7, %v3392_v16  ;;  %v3404_v50 = vsel %vm2078_vm3, %v3392_v16, %v17932_v43  ;;  %v14373_v7 = vor.u32 %v15751_v30, %v14370_v60  ;;  %v15589_v30 = vld [vmem:[#allocation17 + $0xa24] sm:$0xf]  ;;  %v13722_v60 = vld [vmem:[#allocation17 + $0xa68] sm:$0xf0] }
 0x698   : > { %v3419_v4 = vadd.f32 %v3403_v8, %v3355_v22  ;;  %v3420_v39 = vadd.f32 %v3404_v50, %v3356_v27  ;;  %v15356_v22 = vld [vmem:[#allocation17 + $0x2dc] sm:$0xf]  ;;  %v12794_v27 = vld [vmem:[#allocation17 + $0x320] sm:$0xf0]  ;;  %v14298_v8 = vld [vmem:[#allocation17 + $0xee8] sm:$0xf0]  ;;  %v3337_v50 = vsel %vm2055_vm1, %v17906_v15, %v17950_v0 }
 0x699   : > { %7013 = vmatpush.bf16.msrb.mxu1 %v14373_v7  ;;  %v14301_v3 = vor.u32 %v15733_v6, %v14298_v8  ;;  %v14226_v15 = vld [vmem:[#allocation17 + $0xe58] sm:$0xf0]  ;;  %v3353_v46 = vadd.f32 %v3337_v50, %v17836_v1  ;;  %v15571_v7 = vld [vmem:[#allocation17 + $0x994] sm:$0xf]  ;;  %v13080_v50 = vld [vmem:[#allocation17 + $0x518] sm:$0xf] }
 0x69a   : > { %v3439_v26 = vadd.f32 %v17898_v51, %v3419_v4  ;;  %v3440_v61 = vadd.f32 %v17898_v51, %v3420_v39  ;;  %v13369_v4 = vor.u32 %v15509_v47, %v13368_v57  ;;  %v12797_v39 = vor.u32 %v15356_v22, %v12794_v27  ;;  %v15302_v57 = vld [vmem:[#allocation17 + $0x12c] sm:$0xf]  ;;  %v12578_v47 = vld [vmem:[#allocation17 + $0x170] sm:$0xf0]  ;;  %v13650_v8 = vld [vmem:[#allocation17 + $0x9d8] sm:$0xf0] }
 0x69b   : > { %v14157_v22 = vor.u32 %v15697_v32, %v14154_v42  ;;  %v12581_v6 = vor.u32 %v15302_v57, %v12578_v47  ;;  %v15653_v47 = vld [vmem:[#allocation17 + $0xc1c] sm:$0xf0] }
 0x69c   : > { %v3447_v19 = vmax.f32 %v3439_v26, 0.0  ;;  %v3448_v31 = vmax.f32 %v3440_v61, 0.0  ;;  %v15491_v26 = vld [vmem:[#allocation17 + $0x70c] sm:$0xf0]  ;;  %v15338_v61 = vld [vmem:[#allocation17 + $0x24c] sm:$0xf] }
 0x69d   : > { %v12725_v40 = vor.u32 %v15338_v61, %v12722_v18  ;;  %7014 = vmatpush.bf16.msrb.mxu1 %v14301_v3  ;;  %v13653_v18 = vor.u32 %v15571_v7, %v13650_v8  ;;  %v15553_v3 = vld [vmem:[#allocation17 + $0x904] sm:$0xf]  ;;  %v15366_v7 = vld [vmem:[#allocation17 + $0x324] sm:$0xf0] }
 0x69e   : > { %v17941_v11 = vpack.c.bf16 %v3447_v19, %v3443_v20  ;;  %v17943_v16 = vpack.c.bf16 %v3448_v31, %v3444_v9  ;;  %v17945_v56 = vpop.permute.xlu1 %3331  ;;  %v15715_v20 = vld [vmem:[#allocation17 + $0xe14] sm:$0xf]  ;;  %v2940_v9 = vadd.f32 %v17802_v14, %v17761_v29  ;;  %v13297_v31 = vor.u32 %v15491_v26, %v13296_v35  ;;  %v15320_v29 = vld [vmem:[#allocation17 + $0x1bc] sm:$0xf]  ;;  %v12650_v14 = vld [vmem:[#allocation17 + $0x200] sm:$0xf0] }
 0x69f   : > { %v3341_v19 = vsel %vm2055_vm1, %v17924_v5, %v17945_v56  ;;  %v14229_v1 = vor.u32 %v15715_v20, %v14226_v15  ;;  %v12653_v41 = vor.u32 %v15320_v29, %v12650_v14  ;;  %v12506_v35 = vld [vmem:[#allocation17 + $0xe0] sm:$0xf0]  ;;  %v13578_v15 = vld [vmem:[#allocation17 + $0x948] sm:$0xf0]  ;;  %v15402_v29 = vld [vmem:[#allocation17 + $0x444] sm:$0xf0] }
 0x6a0   : > { %6919 = vmatmul.bf16.vlgmr.msrb.gmra.mxu0 %v17941_v11  ;;  %6933 = vmatmul.bf16.vlgmr.msrb.gmra.mxu3 %v17943_v16  ;;  %v12509_v20 = vor.u32 %v15284_v58, %v12506_v35  ;;  %v15635_v58 = vld [vmem:[#allocation17 + $0xb8c] sm:$0xf0]  ;;  %v15482_v35 = vld [vmem:[#allocation17 + $0x6cc] sm:$0xf] }
 0x6a1   : > { %6975 = vmatmul.bf16.vlgmr.msrb.gmra.mxu2 %v17941_v11  ;;  %6995 = vmatpush.bf16.msrb.mxu0 %v14085_v52  ;;  %v13794_v52 = vld [vmem:[#allocation17 + $0xaf8] sm:$0xf0] }
 0x6a2   : > { %7037 = vmatpush.bf16.msrb.mxu3 %v13513_v53  ;;  %7079 = vmatpush.bf16.msrb.mxu2 %v12941_v25  ;;  %v3234_v53 = vadd.f32 %v17842_v37, %v2940_v9  ;;  %v13797_v24 = vor.u32 %v15607_v59, %v13794_v52  ;;  %v13008_v9 = vld [vmem:[#allocation17 + $0x488] sm:$0xf]  ;;  %v13514_v59 = vld [vmem:[#allocation17 + $0x8c0] sm:$0xf0]  ;;  %v2941_v52 = vadd.f32 %v17806_v44, %v17754_v63 }
 0x6a3   : > { %7015 = vmatpush.bf16.msrb.mxu1 %v14229_v1  ;;  %v14016_v44 = vld [vmem:[#allocation17 + $0xc68] sm:$0xf] }
 0x6a4   : > { %v3357_v55 = vadd.f32 %v3341_v19, %v3234_v53  ;;  %v15266_v19 = vld [vmem:[#allocation17 + $0xc] sm:$0xf]  ;;  %v3235_v32 = vadd.f32 %v17863_v10, %v2941_v52  ;;  %v15330_v52 = vld [vmem:[#allocation17 + $0x204] sm:$0xf0] }
 0x6a5   : > { %6996 = vmatpush.bf16.msrb.mxu0 %v14013_v2  ;;  %v17952_v17 = vpop.permute.xlu0 %3323  ;;  %v13152_v2 = vld [vmem:[#allocation17 + $0x5a8] sm:$0xf] }
 0x6a6   : > { %7038 = vmatpush.bf16.msrb.mxu3 %v13441_v23  ;;  %7080 = vmatpush.bf16.msrb.mxu2 %v12869_v34  ;;  %v17957_v33 = vpop.permute.xlu1 %3385  ;;  %v3334_v23 = vpop.permute.xlu2 %3333  ;;  %v3338_v26 = vsel %vm2055_vm1, %v17950_v0, %v17952_v17  ;;  %v15689_v0 = vld [vmem:[#allocation17 + $0xd3c] sm:$0xf0]  ;;  %v15536_v17 = vld [vmem:[#allocation17 + $0x87c] sm:$0xf] }
 0x6a7   : > { %v3401_v49 = vsel %vm2078_vm3, %v17913_v48, %v17957_v33  ;;  %v13224_v48 = vld [vmem:[#allocation17 + $0x638] sm:$0xf]  ;;  %7016 = vmatpush.bf16.msrb.mxu1 %v14157_v22  ;;  %v13517_v63 = vor.u32 %v15536_v17, %v13514_v59  ;;  %v15500_v22 = vld [vmem:[#allocation17 + $0x75c] sm:$0xf]  ;;  %v12656_v59 = vld [vmem:[#allocation17 + $0x1c0] sm:$0xf] }
 0x6a8   : > { %v3417_v25 = vadd.f32 %v3401_v49, %v3353_v46  ;;  %v13225_v37 = vor.u32 %v15473_v28, %v13224_v48  ;;  %v15419_v46 = vld [vmem:[#allocation17 + $0x4cc] sm:$0xf0]  ;;  %v3342_v48 = vsel %vm2055_vm1, %v17945_v56, %v3334_v23  ;;  %v12944_v28 = vld [vmem:[#allocation17 + $0x400] sm:$0xf] }
 0x6a9   : > { %6997 = vmatpush.bf16.msrb.mxu0 %v13941_v36  ;;  %v13153_v36 = vor.u32 %v15455_v13, %v13152_v2  ;;  %v13009_v14 = vor.u32 %v15419_v46, %v13008_v9  ;;  %v12945_v56 = vor.u32 %v15402_v29, %v12944_v28  ;;  %v15384_v2 = vld [vmem:[#allocation17 + $0x3b4] sm:$0xf0]  ;;  %v13728_v29 = vld [vmem:[#allocation17 + $0xa28] sm:$0xf] }
 0x6aa   : > { %7039 = vmatpush.bf16.msrb.mxu3 %v13369_v4  ;;  %7081 = vmatpush.bf16.msrb.mxu2 %v12797_v39  ;;  %v3437_v34 = vadd.f32 %v17900_v21, %v3417_v25  ;;  %v15437_v4 = vld [vmem:[#allocation17 + $0x55c] sm:$0xf0]  ;;  %v13581_v25 = vor.u32 %v15553_v3, %v13578_v15  ;;  %v13944_v13 = vld [vmem:[#allocation17 + $0xbd8] sm:$0xf]  ;;  %v12728_v3 = vld [vmem:[#allocation17 + $0x250] sm:$0xf] }
 0x6ab   : > { %v13081_v49 = vor.u32 %v15437_v4, %v13080_v50  ;;  %v13945_v50 = vor.u32 %v15653_v47, %v13944_v13  ;;  %v15815_v15 = vld [vmem:[#allocation17 + $0x112c] sm:$0xf0]  ;;  %v13584_v47 = vld [vmem:[#allocation17 + $0x908] sm:$0xf] }
 0x6ac   : > { %v3445_v39 = vmax.f32 %v3437_v34, 0.0 }
 0x6ad   : > { %6998 = vmatpush.bf16.msrb.mxu0 %v13869_v54  ;;  %v17969_v5 = vpop.permute.xlu0 %3395  ;;  %v3354_v54 = vadd.f32 %v3338_v26, %v17856_v38 }
 0x6ae   : > { %7040 = vmatpush.bf16.msrb.mxu3 %v13297_v31  ;;  %7082 = vmatpush.bf16.msrb.mxu2 %v12725_v40  ;;  %v3405_v12 = vsel %vm2078_vm3, %v17932_v43, %v17969_v5  ;;  %v13725_v43 = vor.u32 %v15589_v30, %v13722_v60  ;;  %v12434_v31 = vld [vmem:[#allocation17 + $0x50] sm:$0xf0]  ;;  %v14088_v40 = vld [vmem:[#allocation17 + $0xcf8] sm:$0xf]  ;;  %v3388_v53 = vpop.permute.xlu2 %3387  ;;  %v12872_v60 = vld [vmem:[#allocation17 + $0x370] sm:$0xf] }
 0x6af   : > { %v3421_v45 = vadd.f32 %v3405_v12, %v3357_v55  ;;  %v3402_v38 = vsel %vm2078_vm3, %v17957_v33, %v3388_v53  ;;  %v12437_v1 = vor.u32 %v15266_v19, %v12434_v31  ;;  %v14089_v55 = vor.u32 %v15689_v0, %v14088_v40  ;;  %v15518_v12 = vld [vmem:[#allocation17 + $0x7ec] sm:$0xf]  ;;  %v15617_v31 = vld [vmem:[#allocation17 + $0xafc] sm:$0xf0]  ;;  %v15464_v40 = vld [vmem:[#allocation17 + $0x63c] sm:$0xf] }
 0x6b0   : > { %6989 = vmatmul.bf16.vlgmr.msra.gmra.mxu3 %v17943_v16  ;;  %v3418_v42 = vadd.f32 %v3402_v38, %v3354_v54  ;;  %v12873_v57 = vor.u32 %v15384_v2, %v12872_v60  ;;  %v13800_v54 = vld [vmem:[#allocation17 + $0xab8] sm:$0xf]  ;;  %v13226_v0 = vld [vmem:[#allocation17 + $0x680] sm:$0xf0]  ;;  %v15797_v53 = vld [vmem:[#allocation17 + $0x109c] sm:$0xf0]  ;;  %v12657_v38 = vor.u32 %v15330_v52, %v12656_v59 }
 0x6b1   : > { %v3441_v27 = vadd.f32 %v17898_v51, %v3421_v45  ;;  %6999 = vmatpush.bf16.msrb.mxu0 %v13797_v24  ;;  %7031 = vmatmul.bf16.vlgmr.msra.gmra.mxu2 %v17941_v11  ;;  %v15671_v24 = vld [vmem:[#allocation17 + $0xcac] sm:$0xf0]  ;;  %v13229_v28 = vor.u32 %v15464_v40, %v13226_v0  ;;  %v15428_v60 = vld [vmem:[#allocation17 + $0x51c] sm:$0xf]  ;;  %v13082_v2 = vld [vmem:[#allocation17 + $0x560] sm:$0xf0] }
 0x6b2   : > { %7041 = vmatpush.bf16.msrb.mxu3 %v13225_v37  ;;  %7083 = vmatpush.bf16.msrb.mxu2 %v12653_v41  ;;  %v13442_v37 = vld [vmem:[#allocation17 + $0x830] sm:$0xf0]  ;;  %v3358_v41 = vadd.f32 %v3342_v48, %v3235_v32  ;;  %v14017_v23 = vor.u32 %v15671_v24, %v14016_v44  ;;  %v3438_v10 = vadd.f32 %v17900_v21, %v3418_v42  ;;  %v15833_v21 = vld [vmem:[#allocation17 + $0x11bc] sm:$0xf0]  ;;  %v14520_v48 = vld [vmem:[#allocation17 + $0x1058] sm:$0xf] }
 0x6b3   : > { %v3449_v62 = vmax.f32 %v3441_v27, 0.0  ;;  %v13445_v45 = vor.u32 %v15518_v12, %v13442_v37  ;;  %v13370_v27 = vld [vmem:[#allocation17 + $0x7a0] sm:$0xf0]  ;;  %v13154_v32 = vld [vmem:[#allocation17 + $0x5f0] sm:$0xf0]  ;;  %v14521_v42 = vor.u32 %v15797_v53, %v14520_v48 }
 0x6b4   : > { %v13373_v4 = vor.u32 %v15500_v22, %v13370_v27  ;;  %v14448_v44 = vld [vmem:[#allocation17 + $0xfc8] sm:$0xf]  ;;  %v15779_v24 = vld [vmem:[#allocation17 + $0x100c] sm:$0xf0]  ;;  %v13656_v37 = vld [vmem:[#allocation17 + $0x998] sm:$0xf] }
 0x6b5   : > { %v17981_v61 = vpack.c.bf16 %v3449_v62, %v3445_v39  ;;  %7000 = vmatpush.bf16.msrb.mxu0 %v13725_v43  ;;  %v13872_v39 = vld [vmem:[#allocation17 + $0xb48] sm:$0xf]  ;;  %v15563_v22 = vld [vmem:[#allocation17 + $0x94c] sm:$0xf0]  ;;  %v15410_v27 = vld [vmem:[#allocation17 + $0x48c] sm:$0xf] }
 0x6b6   : > { %7042 = vmatpush.bf16.msrb.mxu3 %v13153_v36  ;;  %7084 = vmatpush.bf16.msrb.mxu2 %v12581_v6  ;;  %v14664_v36 = vld [vmem:[#allocation17 + $0x1178] sm:$0xf]  ;;  %v3446_v6 = vmax.f32 %v3438_v10, 0.0  ;;  %v13873_v9 = vor.u32 %v15635_v58, %v13872_v39  ;;  %v15294_v10 = vld [vmem:[#allocation17 + $0xe4] sm:$0xf0]  ;;  %v13585_v58 = vor.u32 %v15563_v22, %v13584_v47 }
 0x6b7   : > { %6947 = vmatmul.bf16.vlgmr.msra.gmra.mxu0 %v17981_v61  ;;  %v15393_v39 = vld [vmem:[#allocation17 + $0x404] sm:$0xf]  ;;  %v15375_v40 = vld [vmem:[#allocation17 + $0x374] sm:$0xf]  ;;  %v12874_v0 = vld [vmem:[#allocation17 + $0x3b8] sm:$0xf0] }
 0x6b8   : > { %v15725_v59 = vld [vmem:[#allocation17 + $0xe5c] sm:$0xf0]  ;;  %v12877_v53 = vor.u32 %v15375_v40, %v12874_v0  ;;  %v15608_v22 = vld [vmem:[#allocation17 + $0xabc] sm:$0xf]  ;;  %v15438_v0 = vld [vmem:[#allocation17 + $0x564] sm:$0xf0] }
 0x6b9   : > { %7001 = vmatpush.bf16.msrb.mxu0 %v13653_v18  ;;  %v14665_v18 = vor.u32 %v15833_v21, %v14664_v36  ;;  %v15276_v36 = vld [vmem:[#allocation17 + $0x54] sm:$0xf0]  ;;  %v13088_v40 = vld [vmem:[#allocation17 + $0x520] sm:$0xf] }
 0x6ba   : > { %7043 = vmatpush.bf16.msrb.mxu3 %v13081_v49  ;;  %7085 = vmatpush.bf16.msrb.mxu2 %v12509_v20  ;;  %v15348_v49 = vld [vmem:[#allocation17 + $0x294] sm:$0xf0]  ;;  %v14592_v20 = vld [vmem:[#allocation17 + $0x10e8] sm:$0xf] }
 0x6bb   : > { %v12729_v19 = vor.u32 %v15348_v49, %v12728_v3  ;;  %v14593_v17 = vor.u32 %v15815_v15, %v14592_v20 }
 0x6bd   : > { %7002 = vmatpush.bf16.msrb.mxu0 %v13581_v25  ;;  %v3398_v30 = vpop.permute.xlu1 %3397  ;;  %v13801_v25 = vor.u32 %v15617_v31, %v13800_v54  ;;  %v13448_v54 = vld [vmem:[#allocation17 + $0x7f0] sm:$0xf]  ;;  %v15528_v31 = vld [vmem:[#allocation17 + $0x834] sm:$0xf0] }
 0x6be   : > { %7044 = vmatpush.bf16.msrb.mxu3 %v13009_v14  ;;  %7086 = vmatpush.bf16.msrb.mxu2 %v12437_v1  ;;  %v3406_v33 = vsel %vm2078_vm3, %v17969_v5, %v3398_v30  ;;  %v12800_v5 = vld [vmem:[#allocation17 + $0x2e0] sm:$0xf]  ;;  %v15599_v14 = vld [vmem:[#allocation17 + $0xa6c] sm:$0xf0]  ;;  %v15446_v1 = vld [vmem:[#allocation17 + $0x5ac] sm:$0xf]  ;;  %v13449_v48 = vor.u32 %v15528_v31, %v13448_v54 }
 0x6bf   : > { %v3422_v34 = vadd.f32 %v3406_v33, %v3358_v41  ;;  %v12801_v62 = vor.u32 %v15366_v7, %v12800_v5  ;;  %v13157_v12 = vor.u32 %v15446_v1, %v13154_v32  ;;  %v15581_v30 = vld [vmem:[#allocation17 + $0x9dc] sm:$0xf0]  ;;  %v14449_v33 = vor.u32 %v15779_v24, %v14448_v44  ;;  %v13010_v5 = vld [vmem:[#allocation17 + $0x4d0] sm:$0xf0]  ;;  %v12440_v7 = vld [vmem:[#allocation17 + $0x10] sm:$0xf] }
 0x6c0   : > { %v13657_v13 = vor.u32 %v15581_v30, %v13656_v37  ;;  %v12441_v3 = vor.u32 %v15276_v36, %v12440_v7  ;;  %v15357_v1 = vld [vmem:[#allocation17 + $0x2e4] sm:$0xf]  ;;  %v12802_v32 = vld [vmem:[#allocation17 + $0x328] sm:$0xf0]  ;;  %v15824_v44 = vld [vmem:[#allocation17 + $0x117c] sm:$0xf] }
 0x6c1   : > { %7051 = vmatpush.bf16.msra.mxu0 %v14089_v55  ;;  %v3442_v43 = vadd.f32 %v17898_v51, %v3422_v34  ;;  %7045 = vmatmul.bf16.vlgmr.msrb.gmra.mxu3 %v17943_v16  ;;  %v13298_v51 = vld [vmem:[#allocation17 + $0x710] sm:$0xf0]  ;;  %v12584_v55 = vld [vmem:[#allocation17 + $0x130] sm:$0xf]  ;;  %v14376_v34 = vld [vmem:[#allocation17 + $0xf38] sm:$0xf] }
 0x6c2   : > { %7093 = vmatpush.bf16.msra.mxu3 %v13517_v63  ;;  %7135 = vmatpush.bf16.msra.mxu2 %v12945_v56  ;;  %v13301_v46 = vor.u32 %v15482_v35, %v13298_v51  ;;  %v15312_v63 = vld [vmem:[#allocation17 + $0x174] sm:$0xf0]  ;;  %v13729_v56 = vor.u32 %v15599_v14, %v13728_v29  ;;  %v13013_v35 = vor.u32 %v15410_v27, %v13010_v5  ;;  %v14304_v51 = vld [vmem:[#allocation17 + $0xea8] sm:$0xf]  ;;  %v13376_v29 = vld [vmem:[#allocation17 + $0x760] sm:$0xf] }
 0x6c3   : > { %7087 = vmatmul.bf16.vlgmr.msrb.gmra.mxu2 %v17941_v11  ;;  %v3450_v8 = vmax.f32 %v3442_v43, 0.0  ;;  %v12585_v41 = vor.u32 %v15312_v63, %v12584_v55  ;;  %v15510_v14 = vld [vmem:[#allocation17 + $0x7a4] sm:$0xf0]  ;;  %v15707_v55 = vld [vmem:[#allocation17 + $0xdcc] sm:$0xf0] }
 0x6c4   : > { %v14666_v24 = vld [vmem:[#allocation17 + $0x11c0] sm:$0xf0]  ;;  %v15626_v37 = vld [vmem:[#allocation17 + $0xb4c] sm:$0xf]  ;;  %v13304_v30 = vld [vmem:[#allocation17 + $0x6d0] sm:$0xf] }
 0x6c5   : > { %7052 = vmatpush.bf16.msra.mxu0 %v14017_v23  ;;  %v17998_v26 = vpack.c.bf16 %v3450_v8, %v3446_v6  ;;  %v12512_v23 = vld [vmem:[#allocation17 + $0xa0] sm:$0xf]  ;;  %v15680_v6 = vld [vmem:[#allocation17 + $0xcfc] sm:$0xf]  ;;  %v14090_v8 = vld [vmem:[#allocation17 + $0xd40] sm:$0xf0] }
 0x6c6   : > { %7094 = vmatpush.bf16.msra.mxu3 %v13445_v45  ;;  %7136 = vmatpush.bf16.msra.mxu2 %v12873_v57  ;;  %v15761_v45 = vld [vmem:[#allocation17 + $0xf7c] sm:$0xf0]  ;;  %v13085_v57 = vor.u32 %v15428_v60, %v13082_v2  ;;  %v12513_v43 = vor.u32 %v15294_v10, %v12512_v23  ;;  %v14093_v49 = vor.u32 %v15680_v6, %v14090_v8  ;;  %v15492_v2 = vld [vmem:[#allocation17 + $0x714] sm:$0xf0]  ;;  %v12730_v23 = vld [vmem:[#allocation17 + $0x298] sm:$0xf0] }
 0x6c7   : > { %6961 = vmatmul.bf16.vlgmr.msra.gmra.mxu1 %v17998_v26  ;;  %7003 = vmatmul.bf16.vlgmr.msrb.gmra.mxu0 %v17981_v61  ;;  %v14377_v21 = vor.u32 %v15761_v45, %v14376_v34  ;;  %v14669_v10 = vor.u32 %v15824_v44, %v14666_v24  ;;  %v15806_v45 = vld [vmem:[#allocation17 + $0x10ec] sm:$0xf]  ;;  %v13802_v27 = vld [vmem:[#allocation17 + $0xb00] sm:$0xf0]  ;;  %v15474_v5 = vld [vmem:[#allocation17 + $0x684] sm:$0xf0] }
 0x6c8   : > { %7065 = vmatpush.bf16.msra.mxu1 %v14665_v18  ;;  %v15743_v18 = vld [vmem:[#allocation17 + $0xeec] sm:$0xf0]  ;;  %v15321_v7 = vld [vmem:[#allocation17 + $0x1c4] sm:$0xf]  ;;  %v12658_v36 = vld [vmem:[#allocation17 + $0x208] sm:$0xf0]  ;;  %v13805_v6 = vor.u32 %v15608_v22, %v13802_v27 }
 0x6c9   : > { %7053 = vmatpush.bf16.msra.mxu0 %v13945_v50  ;;  %v13520_v50 = vld [vmem:[#allocation17 + $0x880] sm:$0xf]  ;;  %v15788_v8 = vld [vmem:[#allocation17 + $0x105c] sm:$0xf]  ;;  %v13658_v31 = vld [vmem:[#allocation17 + $0x9e0] sm:$0xf0] }
 0x6ca   : > { %7095 = vmatpush.bf16.msra.mxu3 %v13373_v4  ;;  %7137 = vmatpush.bf16.msra.mxu2 %v12801_v62  ;;  %v15546_v4 = vld [vmem:[#allocation17 + $0x8c4] sm:$0xf0]  ;;  %v12946_v62 = vld [vmem:[#allocation17 + $0x448] sm:$0xf0]  ;;  %v13450_v22 = vld [vmem:[#allocation17 + $0x838] sm:$0xf0] }
 0x6cb   : > { %v13521_v20 = vor.u32 %v15546_v4, %v13520_v50  ;;  %v12949_v15 = vor.u32 %v15393_v39, %v12946_v62  ;;  %v14522_v50 = vld [vmem:[#allocation17 + $0x10a0] sm:$0xf0]  ;;  %v12661_v39 = vor.u32 %v15321_v7, %v12658_v36  ;;  %v15590_v62 = vld [vmem:[#allocation17 + $0xa2c] sm:$0xf]  ;;  %v15690_v24 = vld [vmem:[#allocation17 + $0xd44] sm:$0xf0] }
 0x6cc   : > { %7066 = vmatpush.bf16.msra.mxu1 %v14593_v17  ;;  %v14232_v17 = vld [vmem:[#allocation17 + $0xe18] sm:$0xf]  ;;  %v15716_v7 = vld [vmem:[#allocation17 + $0xe1c] sm:$0xf]  ;;  %v14234_v36 = vld [vmem:[#allocation17 + $0xe60] sm:$0xf0] }
 0x6cd   : > { %7054 = vmatpush.bf16.msra.mxu0 %v13873_v9  ;;  %v15662_v9 = vld [vmem:[#allocation17 + $0xc6c] sm:$0xf] }
 0x6ce   : > { %7096 = vmatpush.bf16.msra.mxu3 %v13301_v46  ;;  %7138 = vmatpush.bf16.msra.mxu2 %v12729_v19  ;;  %v14018_v46 = vld [vmem:[#allocation17 + $0xcb0] sm:$0xf0]  ;;  %v14305_v19 = vor.u32 %v15743_v18, %v14304_v51  ;;  %v15456_v51 = vld [vmem:[#allocation17 + $0x5f4] sm:$0xf0] }
 0x6cf   : > { %v14021_v52 = vor.u32 %v15662_v9, %v14018_v46  ;;  %v15303_v18 = vld [vmem:[#allocation17 + $0x134] sm:$0xf] }
 0x6d0   : > { %7067 = vmatpush.bf16.msra.mxu1 %v14521_v42  ;;  %v14160_v42 = vld [vmem:[#allocation17 + $0xd88] sm:$0xf]  ;;  %v14450_v9 = vld [vmem:[#allocation17 + $0x1010] sm:$0xf0] }
 0x6d1   : > { %7055 = vmatpush.bf16.msra.mxu0 %v13801_v25  ;;  %v15644_v25 = vld [vmem:[#allocation17 + $0xbdc] sm:$0xf]  ;;  %v14161_v60 = vor.u32 %v15707_v55, %v14160_v42  ;;  %v15267_v42 = vld [vmem:[#allocation17 + $0x14] sm:$0xf] }
 0x6d2   : > { %7097 = vmatpush.bf16.msra.mxu3 %v13229_v28  ;;  %7139 = vmatpush.bf16.msra.mxu2 %v12657_v38  ;;  %v13946_v28 = vld [vmem:[#allocation17 + $0xc20] sm:$0xf0]  ;;  %v14233_v38 = vor.u32 %v15725_v59, %v14232_v17  ;;  %v12514_v59 = vld [vmem:[#allocation17 + $0xe8] sm:$0xf0]  ;;  %v12442_v55 = vld [vmem:[#allocation17 + $0x58] sm:$0xf0] }
 0x6d3   : > { %v13949_v63 = vor.u32 %v15644_v25, %v13946_v28  ;;  %v15285_v17 = vld [vmem:[#allocation17 + $0xa4] sm:$0xf]  ;;  %v15554_v28 = vld [vmem:[#allocation17 + $0x90c] sm:$0xf] }
 0x6d4   : > { %7068 = vmatpush.bf16.msra.mxu1 %v14449_v33  ;;  %v15339_v33 = vld [vmem:[#allocation17 + $0x254] sm:$0xf]  ;;  %v14378_v25 = vld [vmem:[#allocation17 + $0xf80] sm:$0xf0] }
 0x6d5   : > { %7056 = vmatpush.bf16.msra.mxu0 %v13729_v56  ;;  %v13377_v56 = vor.u32 %v15510_v14, %v13376_v29  ;;  %v12733_v47 = vor.u32 %v15339_v33, %v12730_v23  ;;  %v13089_v29 = vor.u32 %v15438_v0, %v13088_v40  ;;  %v13586_v14 = vld [vmem:[#allocation17 + $0x950] sm:$0xf0]  ;;  %v15734_v33 = vld [vmem:[#allocation17 + $0xeac] sm:$0xf]  ;;  %v13306_v40 = vld [vmem:[#allocation17 + $0x718] sm:$0xf0] }
 0x6d6   : > { %7098 = vmatpush.bf16.msra.mxu3 %v13157_v12  ;;  %7140 = vmatpush.bf16.msra.mxu2 %v12585_v41  ;;  %v12805_v12 = vor.u32 %v15357_v1, %v12802_v32  ;;  %v13874_v41 = vld [vmem:[#allocation17 + $0xb90] sm:$0xf0]  ;;  %v13016_v1 = vld [vmem:[#allocation17 + $0x490] sm:$0xf]  ;;  %v15420_v32 = vld [vmem:[#allocation17 + $0x4d4] sm:$0xf0] }
 0x6d7   : > { %7017 = vmatmul.bf16.vlgmr.msrb.gmra.mxu1 %v17998_v26  ;;  %v13877_v34 = vor.u32 %v15626_v37, %v13874_v41  ;;  %v13589_v37 = vor.u32 %v15554_v28, %v13586_v14  ;;  %v12952_v41 = vld [vmem:[#allocation17 + $0x408] sm:$0xf]  ;;  %v14306_v23 = vld [vmem:[#allocation17 + $0xef0] sm:$0xf0]  ;;  %v15816_v28 = vld [vmem:[#allocation17 + $0x1134] sm:$0xf0] }
 0x6d8   : > { %7069 = vmatpush.bf16.msra.mxu1 %v14377_v21  ;;  %v14309_v27 = vor.u32 %v15734_v33, %v14306_v23  ;;  %v15618_v14 = vld [vmem:[#allocation17 + $0xb04] sm:$0xf0]  ;;  %v12592_v33 = vld [vmem:[#allocation17 + $0x138] sm:$0xf]  ;;  %v15313_v23 = vld [vmem:[#allocation17 + $0x17c] sm:$0xf0] }
 0x6d9   : > { %7057 = vmatpush.bf16.msra.mxu0 %v13657_v13  ;;  %v14594_v13 = vld [vmem:[#allocation17 + $0x1130] sm:$0xf0] }
 0x6da   : > { %7099 = vmatpush.bf16.msra.mxu3 %v13085_v57  ;;  %7141 = vmatpush.bf16.msra.mxu2 %v12513_v43  ;;  %v13305_v57 = vor.u32 %v15492_v2, %v13304_v30  ;;  %v13232_v43 = vld [vmem:[#allocation17 + $0x640] sm:$0xf]  ;;  %v14597_v21 = vor.u32 %v15806_v45, %v14594_v13  ;;  %v15403_v30 = vld [vmem:[#allocation17 + $0x44c] sm:$0xf0]  ;;  %v12445_v2 = vor.u32 %v15267_v42, %v12442_v55  ;;  %v12664_v42 = vld [vmem:[#allocation17 + $0x1c8] sm:$0xf] }
 0x6db   : > { %v13233_v4 = vor.u32 %v15474_v5, %v13232_v43  ;;  %v14024_v45 = vld [vmem:[#allocation17 + $0xc70] sm:$0xf]  ;;  %v12953_v13 = vor.u32 %v15403_v30, %v12952_v41  ;;  %v12880_v43 = vld [vmem:[#allocation17 + $0x378] sm:$0xf]  ;;  %v15385_v5 = vld [vmem:[#allocation17 + $0x3bc] sm:$0xf0] }
 0x6dc   : > { %7070 = vmatpush.bf16.msra.mxu1 %v14305_v19  ;;  %v15572_v19 = vld [vmem:[#allocation17 + $0x99c] sm:$0xf]  ;;  %v15331_v55 = vld [vmem:[#allocation17 + $0x20c] sm:$0xf0]  ;;  %v15600_v30 = vld [vmem:[#allocation17 + $0xa74] sm:$0xf0] }
 0x6dd   : > { %7058 = vmatpush.bf16.msra.mxu0 %v13585_v58  ;;  %v13730_v58 = vld [vmem:[#allocation17 + $0xa70] sm:$0xf0]  ;;  %v12665_v41 = vor.u32 %v15331_v55, %v12664_v42  ;;  %v14240_v42 = vld [vmem:[#allocation17 + $0xe20] sm:$0xf]  ;;  %v15726_v55 = vld [vmem:[#allocation17 + $0xe64] sm:$0xf0] }
 0x6de   : > { %7100 = vmatpush.bf16.msra.mxu3 %v13013_v35  ;;  %7142 = vmatpush.bf16.msra.mxu2 %v12441_v3  ;;  %v13160_v35 = vld [vmem:[#allocation17 + $0x5b0] sm:$0xf]  ;;  %v12586_v3 = vld [vmem:[#allocation17 + $0x178] sm:$0xf0] }
 0x6df   : > { %v13161_v46 = vor.u32 %v15456_v51, %v13160_v35  ;;  %v12589_v54 = vor.u32 %v15303_v18, %v12586_v3  ;;  %v12808_v35 = vld [vmem:[#allocation17 + $0x2e8] sm:$0xf]  ;;  %v15367_v51 = vld [vmem:[#allocation17 + $0x32c] sm:$0xf0]  ;;  %v15698_v18 = vld [vmem:[#allocation17 + $0xd8c] sm:$0xf] }
 0x6e0   : > { %7059 = vmatmul.bf16.vlgmr.msra.gmra.mxu0 %v17981_v61  ;;  %7071 = vmatpush.bf16.msra.mxu1 %v14233_v38  ;;  %v12517_v38 = vor.u32 %v15285_v17, %v12514_v59  ;;  %v14162_v3 = vld [vmem:[#allocation17 + $0xdd0] sm:$0xf0]  ;;  %v12736_v17 = vld [vmem:[#allocation17 + $0x258] sm:$0xf]  ;;  %v15349_v59 = vld [vmem:[#allocation17 + $0x29c] sm:$0xf0] }
 0x6e1   : > { %7107 = vmatpush.bf16.msrb.mxu0 %v14093_v49  ;;  %7101 = vmatmul.bf16.vlgmr.msra.gmra.mxu3 %v17943_v16  ;;  %v14525_v49 = vor.u32 %v15788_v8, %v14522_v50  ;;  %v13952_v8 = vld [vmem:[#allocation17 + $0xbe0] sm:$0xf]  ;;  %v12881_v50 = vor.u32 %v15385_v5, %v12880_v43  ;;  %v14165_v0 = vor.u32 %v15698_v18, %v14162_v3  ;;  %v15429_v43 = vld [vmem:[#allocation17 + $0x524] sm:$0xf]  ;;  %v13090_v5 = vld [vmem:[#allocation17 + $0x568] sm:$0xf0] }
 0x6e2   : > { %7149 = vmatpush.bf16.msrb.mxu3 %v13521_v20  ;;  %7191 = vmatpush.bf16.msrb.mxu2 %v12949_v15  ;;  %v13733_v20 = vor.u32 %v15590_v62, %v13730_v58  ;;  %v15770_v15 = vld [vmem:[#allocation17 + $0xfcc] sm:$0xf]  ;;  %v14237_v58 = vor.u32 %v15716_v7, %v14234_v36  ;;  %v12520_v7 = vld [vmem:[#allocation17 + $0xa8] sm:$0xf]  ;;  %v15295_v36 = vld [vmem:[#allocation17 + $0xec] sm:$0xf0] }
 0x6e3   : > { %7143 = vmatmul.bf16.vlgmr.msra.gmra.mxu2 %v17941_v11  ;;  %v13378_v62 = vld [vmem:[#allocation17 + $0x7a8] sm:$0xf0]  ;;  %v12448_v18 = vld [vmem:[#allocation17 + $0x18] sm:$0xf]  ;;  %v15277_v3 = vld [vmem:[#allocation17 + $0x5c] sm:$0xf0] }
 0x6e4   : > { %7072 = vmatpush.bf16.msra.mxu1 %v14161_v60  ;;  %v13017_v60 = vor.u32 %v15420_v32, %v13016_v1  ;;  %v15465_v1 = vld [vmem:[#allocation17 + $0x644] sm:$0xf]  ;;  %v13234_v32 = vld [vmem:[#allocation17 + $0x688] sm:$0xf0] }
 0x6e5   : > { %7108 = vmatpush.bf16.msrb.mxu0 %v14021_v52  ;;  %v14453_v52 = vor.u32 %v15770_v15, %v14450_v9  ;;  %v14672_v15 = vld [vmem:[#allocation17 + $0x1180] sm:$0xf]  ;;  %v15834_v9 = vld [vmem:[#allocation17 + $0x11c4] sm:$0xf0] }
 0x6e6   : > { %7150 = vmatpush.bf16.msrb.mxu3 %v13449_v48  ;;  %7192 = vmatpush.bf16.msrb.mxu2 %v12877_v53  ;;  %v13661_v48 = vor.u32 %v15572_v19, %v13658_v31  ;;  %v15752_v53 = vld [vmem:[#allocation17 + $0xf3c] sm:$0xf]  ;;  %v15636_v19 = vld [vmem:[#allocation17 + $0xb94] sm:$0xf0]  ;;  %v15483_v31 = vld [vmem:[#allocation17 + $0x6d4] sm:$0xf] }
 0x6e7   : > { %7073 = vmatmul.bf16.vlgmr.msra.gmra.mxu1 %v17998_v26  ;;  %v14381_v44 = vor.u32 %v15752_v53, %v14378_v25  ;;  %v13309_v53 = vor.u32 %v15483_v31, %v13306_v40  ;;  %v14600_v25 = vld [vmem:[#allocation17 + $0x10f0] sm:$0xf] }
 0x6e8   : > { %7121 = vmatpush.bf16.msrb.mxu1 %v14669_v10 }
 0x6e9   : > { %7109 = vmatpush.bf16.msrb.mxu0 %v13949_v63  ;;  %v14096_v63 = vld [vmem:[#allocation17 + $0xd00] sm:$0xf] }
 0x6ea   : > { %7151 = vmatpush.bf16.msrb.mxu3 %v13377_v56  ;;  %7193 = vmatpush.bf16.msrb.mxu2 %v12805_v12  ;;  %v15537_v56 = vld [vmem:[#allocation17 + $0x884] sm:$0xf]  ;;  %v13522_v12 = vld [vmem:[#allocation17 + $0x8c8] sm:$0xf0]  ;;  %v14097_v10 = vor.u32 %v15690_v24, %v14096_v63  ;;  %v14601_v63 = vor.u32 %v15816_v28, %v14600_v25  ;;  %v13237_v24 = vor.u32 %v15465_v1, %v13234_v32  ;;  %v15663_v25 = vld [vmem:[#allocation17 + $0xc74] sm:$0xf] }
 0x6eb   : > { %v14026_v28 = vld [vmem:[#allocation17 + $0xcb8] sm:$0xf0]  ;;  %v12882_v32 = vld [vmem:[#allocation17 + $0x3c0] sm:$0xf0] }
 0x6ec   : > { %7122 = vmatpush.bf16.msrb.mxu1 %v14597_v21  ;;  %v15376_v1 = vld [vmem:[#allocation17 + $0x37c] sm:$0xf] }
 0x6ed   : > { %7110 = vmatpush.bf16.msrb.mxu0 %v13877_v34  ;;  %v13525_v34 = vor.u32 %v15537_v56, %v13522_v12  ;;  %v14528_v56 = vld [vmem:[#allocation17 + $0x1060] sm:$0xf]  ;;  %v15798_v12 = vld [vmem:[#allocation17 + $0x10a4] sm:$0xf0] }
 0x6ee   : > { %7152 = vmatpush.bf16.msrb.mxu3 %v13305_v57  ;;  %7194 = vmatpush.bf16.msrb.mxu2 %v12733_v47  ;;  %v15672_v57 = vld [vmem:[#allocation17 + $0xcb4] sm:$0xf0]  ;;  %v15519_v47 = vld [vmem:[#allocation17 + $0x7f4] sm:$0xf] }
 0x6ef   : > { %v14025_v21 = vor.u32 %v15672_v57, %v14024_v45  ;;  %v15780_v57 = vld [vmem:[#allocation17 + $0x1014] sm:$0xf0] }
 0x6f0   : > { %7123 = vmatpush.bf16.msrb.mxu1 %v14525_v49 }
 0x6f1   : > { %7111 = vmatpush.bf16.msrb.mxu0 %v13805_v6  ;;  %v13453_v6 = vor.u32 %v15519_v47, %v13450_v22  ;;  %v13664_v47 = vld [vmem:[#allocation17 + $0x9a0] sm:$0xf]  ;;  %v12593_v22 = vor.u32 %v15313_v23, %v12592_v33  ;;  %v14168_v33 = vld [vmem:[#allocation17 + $0xd90] sm:$0xf]  ;;  %v15708_v23 = vld [vmem:[#allocation17 + $0xdd4] sm:$0xf0] }
 0x6f2   : > { %7153 = vmatpush.bf16.msrb.mxu3 %v13233_v4  ;;  %7195 = vmatpush.bf16.msrb.mxu2 %v12661_v39  ;;  %v15654_v4 = vld [vmem:[#allocation17 + $0xc24] sm:$0xf0]  ;;  %v15501_v39 = vld [vmem:[#allocation17 + $0x764] sm:$0xf] }
 0x6f3   : > { %v13953_v49 = vor.u32 %v15654_v4, %v13952_v8  ;;  %v15762_v8 = vld [vmem:[#allocation17 + $0xf84] sm:$0xf0]  ;;  %v13093_v4 = vor.u32 %v15429_v43, %v13090_v5  ;;  %v14169_v43 = vor.u32 %v15708_v23, %v14168_v33  ;;  %v15493_v5 = vld [vmem:[#allocation17 + $0x71c] sm:$0xf0]  ;;  %v15268_v23 = vld [vmem:[#allocation17 + $0x1c] sm:$0xf] }
 0x6f4   : > { %7124 = vmatpush.bf16.msrb.mxu1 %v14453_v52  ;;  %v14673_v52 = vor.u32 %v15834_v9, %v14672_v15  ;;  %v13528_v15 = vld [vmem:[#allocation17 + $0x888] sm:$0xf]  ;;  %v15421_v33 = vld [vmem:[#allocation17 + $0x4dc] sm:$0xf0] }
 0x6f5   : > { %7112 = vmatpush.bf16.msrb.mxu0 %v13733_v20  ;;  %v13381_v20 = vor.u32 %v15501_v39, %v13378_v62  ;;  %v13592_v39 = vld [vmem:[#allocation17 + $0x910] sm:$0xf]  ;;  %v15564_v62 = vld [vmem:[#allocation17 + $0x954] sm:$0xf0] }
 0x6f6   : > { %7154 = vmatpush.bf16.msrb.mxu3 %v13161_v46  ;;  %7196 = vmatpush.bf16.msrb.mxu2 %v12589_v54  ;;  %v13880_v46 = vld [vmem:[#allocation17 + $0xb50] sm:$0xf]  ;;  %v12809_v54 = vor.u32 %v15367_v51, %v12808_v35  ;;  %v12521_v35 = vor.u32 %v15295_v36, %v12520_v7  ;;  %v13018_v51 = vld [vmem:[#allocation17 + $0x4d8] sm:$0xf0]  ;;  %v13593_v31 = vor.u32 %v15564_v62, %v13592_v39  ;;  %v12738_v36 = vld [vmem:[#allocation17 + $0x2a0] sm:$0xf0] }
 0x6f7   : > { %v15340_v7 = vld [vmem:[#allocation17 + $0x25c] sm:$0xf]  ;;  %v15609_v62 = vld [vmem:[#allocation17 + $0xac4] sm:$0xf] }
 0x6f8   : > { %7125 = vmatpush.bf16.msrb.mxu1 %v14381_v44  ;;  %v12741_v39 = vor.u32 %v15340_v7, %v12738_v36  ;;  %v15735_v36 = vld [vmem:[#allocation17 + $0xeb4] sm:$0xf] }
 0x6f9   : > { %7113 = vmatpush.bf16.msrb.mxu0 %v13661_v48  ;;  %v13881_v48 = vor.u32 %v15636_v19, %v13880_v46  ;;  %v15547_v46 = vld [vmem:[#allocation17 + $0x8cc] sm:$0xf0]  ;;  %v12954_v19 = vld [vmem:[#allocation17 + $0x450] sm:$0xf0] }
 0x6fa   : > { %7155 = vmatpush.bf16.msrb.mxu3 %v13089_v29  ;;  %7197 = vmatpush.bf16.msrb.mxu2 %v12517_v38  ;;  %v13808_v29 = vld [vmem:[#allocation17 + $0xac0] sm:$0xf]  ;;  %v12737_v38 = vor.u32 %v15349_v59, %v12736_v17  ;;  %v15744_v17 = vld [vmem:[#allocation17 + $0xef4] sm:$0xf0]  ;;  %v12449_v59 = vor.u32 %v15277_v3, %v12448_v18  ;;  %v15322_v18 = vld [vmem:[#allocation17 + $0x1cc] sm:$0xf] }
 0x6fb   : > { %v13809_v44 = vor.u32 %v15618_v14, %v13808_v29  ;;  %v13456_v29 = vld [vmem:[#allocation17 + $0x7f8] sm:$0xf]  ;;  %v15529_v14 = vld [vmem:[#allocation17 + $0x83c] sm:$0xf0]  ;;  %v12666_v3 = vld [vmem:[#allocation17 + $0x210] sm:$0xf0] }
 0x6fc   : > { %7126 = vmatpush.bf16.msrb.mxu1 %v14309_v27  ;;  %v15582_v27 = vld [vmem:[#allocation17 + $0x9e4] sm:$0xf0] }
 0x6fd   : > { %7114 = vmatpush.bf16.msrb.mxu0 %v13589_v37  ;;  %v13736_v37 = vld [vmem:[#allocation17 + $0xa30] sm:$0xf] }
 0x6fe   : > { %7156 = vmatpush.bf16.msrb.mxu3 %v13017_v60  ;;  %7198 = vmatpush.bf16.msrb.mxu2 %v12445_v2  ;;  %v15447_v60 = vld [vmem:[#allocation17 + $0x5b4] sm:$0xf]  ;;  %v13162_v2 = vld [vmem:[#allocation17 + $0x5f8] sm:$0xf0] }
 0x6ff   : > { %v13165_v45 = vor.u32 %v15447_v60, %v13162_v2  ;;  %v15358_v60 = vld [vmem:[#allocation17 + $0x2ec] sm:$0xf]  ;;  %v12810_v2 = vld [vmem:[#allocation17 + $0x330] sm:$0xf0] }
 0x700   : > { %7115 = vmatmul.bf16.vlgmr.msrb.gmra.mxu0 %v17981_v61  ;;  %7127 = vmatpush.bf16.msrb.mxu1 %v14237_v58  ;;  %v15411_v58 = vld [vmem:[#allocation17 + $0x494] sm:$0xf] }
 0x701   : > { %7163 = vmatpush.bf16.msra.mxu0 %v14097_v10  ;;  %7157 = vmatmul.bf16.vlgmr.msrb.gmra.mxu3 %v17943_v16  ;;  %v14529_v10 = vor.u32 %v15798_v12, %v14528_v56  ;;  %v13021_v40 = vor.u32 %v15411_v58, %v13018_v51  ;;  %v15645_v56 = vld [vmem:[#allocation17 + $0xbe4] sm:$0xf]  ;;  %v13954_v12 = vld [vmem:[#allocation17 + $0xc28] sm:$0xf0]  ;;  %v15475_v51 = vld [vmem:[#allocation17 + $0x68c] sm:$0xf0] }
 0x702   : > { %7205 = vmatpush.bf16.msra.mxu3 %v13525_v34  ;;  %7247 = vmatpush.bf16.msra.mxu2 %v12953_v13  ;;  %v13737_v34 = vor.u32 %v15600_v30, %v13736_v37  ;;  %v14456_v13 = vld [vmem:[#allocation17 + $0xfd0] sm:$0xf]  ;;  %v13384_v37 = vld [vmem:[#allocation17 + $0x768] sm:$0xf]  ;;  %v13810_v58 = vld [vmem:[#allocation17 + $0xb08] sm:$0xf0] }
 0x703   : > { %7199 = vmatmul.bf16.vlgmr.msrb.gmra.mxu2 %v17941_v11  ;;  %v15511_v30 = vld [vmem:[#allocation17 + $0x7ac] sm:$0xf0] }
 0x704   : > { %7128 = vmatpush.bf16.msrb.mxu1 %v14165_v0  ;;  %v14312_v0 = vld [vmem:[#allocation17 + $0xeb0] sm:$0xf] }
 0x705   : > { %7164 = vmatpush.bf16.msra.mxu0 %v14025_v21  ;;  %v14457_v21 = vor.u32 %v15780_v57, %v14456_v13  ;;  %v13385_v13 = vor.u32 %v15511_v30, %v13384_v37  ;;  %v12813_v57 = vor.u32 %v15358_v60, %v12810_v2  ;;  %v15555_v37 = vld [vmem:[#allocation17 + $0x914] sm:$0xf]  ;;  %v13594_v60 = vld [vmem:[#allocation17 + $0x958] sm:$0xf0]  ;;  %v13024_v2 = vld [vmem:[#allocation17 + $0x498] sm:$0xf] }
 0x706   : > { %7206 = vmatpush.bf16.msra.mxu3 %v13453_v6  ;;  %7248 = vmatpush.bf16.msra.mxu2 %v12881_v50  ;;  %v14384_v6 = vld [vmem:[#allocation17 + $0xf40] sm:$0xf]  ;;  %v13665_v50 = vor.u32 %v15582_v27, %v13664_v47  ;;  %v15627_v47 = vld [vmem:[#allocation17 + $0xb54] sm:$0xf]  ;;  %v13312_v27 = vld [vmem:[#allocation17 + $0x6d8] sm:$0xf] }
 0x707   : > { %7129 = vmatmul.bf16.vlgmr.msrb.gmra.mxu1 %v17998_v26  ;;  %v14385_v9 = vor.u32 %v15762_v8, %v14384_v6  ;;  %v15807_v8 = vld [vmem:[#allocation17 + $0x10f4] sm:$0xf] }
 0x708   : > { %7177 = vmatpush.bf16.msra.mxu1 %v14673_v52 }
 0x709   : > { %7165 = vmatpush.bf16.msra.mxu0 %v13953_v49  ;;  %v15681_v49 = vld [vmem:[#allocation17 + $0xd04] sm:$0xf] }
 0x70a   : > { %7207 = vmatpush.bf16.msra.mxu3 %v13381_v20  ;;  %7249 = vmatpush.bf16.msra.mxu2 %v12809_v54  ;;  %v14098_v20 = vld [vmem:[#allocation17 + $0xd48] sm:$0xf0] }
 0x70b   : > { %v15394_v54 = vld [vmem:[#allocation17 + $0x40c] sm:$0xf]  ;;  %v14101_v52 = vor.u32 %v15681_v49, %v14098_v20  ;;  %v13813_v20 = vor.u32 %v15609_v62, %v13810_v58  ;;  %v15520_v62 = vld [vmem:[#allocation17 + $0x7fc] sm:$0xf]  ;;  %v13458_v58 = vld [vmem:[#allocation17 + $0x840] sm:$0xf0] }
 0x70c   : > { %7178 = vmatpush.bf16.msra.mxu1 %v14601_v63  ;;  %v14029_v63 = vor.u32 %v15663_v25, %v14026_v28  ;;  %v14458_v25 = vld [vmem:[#allocation17 + $0x1018] sm:$0xf0] }
 0x70d   : > { %7166 = vmatpush.bf16.msra.mxu0 %v13881_v48  ;;  %v13529_v48 = vor.u32 %v15547_v46, %v13528_v15  ;;  %v15789_v15 = vld [vmem:[#allocation17 + $0x1064] sm:$0xf] }
 0x70e   : > { %7208 = vmatpush.bf16.msra.mxu3 %v13309_v53  ;;  %7250 = vmatpush.bf16.msra.mxu2 %v12737_v38  ;;  %v12957_v53 = vor.u32 %v15394_v54, %v12954_v19  ;;  %v14313_v38 = vor.u32 %v15744_v17, %v14312_v0  ;;  %v12669_v54 = vor.u32 %v15322_v18, %v12666_v3  ;;  %v15591_v19 = vld [vmem:[#allocation17 + $0xa34] sm:$0xf]  ;;  %v15457_v0 = vld [vmem:[#allocation17 + $0x5fc] sm:$0xf0]  ;;  %v15304_v17 = vld [vmem:[#allocation17 + $0x13c] sm:$0xf] }
 0x70f   : > { %v12888_v18 = vld [vmem:[#allocation17 + $0x380] sm:$0xf]  ;;  %v15386_v3 = vld [vmem:[#allocation17 + $0x3c4] sm:$0xf0] }
 0x710   : > { %7179 = vmatpush.bf16.msra.mxu1 %v14529_v10  ;;  %v13957_v10 = vor.u32 %v15645_v56, %v13954_v12  ;;  %v15753_v56 = vld [vmem:[#allocation17 + $0xf44] sm:$0xf]  ;;  %v14386_v12 = vld [vmem:[#allocation17 + $0xf88] sm:$0xf0] }
 0x711   : > { %7167 = vmatpush.bf16.msra.mxu0 %v13809_v44  ;;  %v13457_v44 = vor.u32 %v15529_v14, %v13456_v29  ;;  %v13666_v14 = vld [vmem:[#allocation17 + $0x9e8] sm:$0xf0] }
 0x712   : > { %7209 = vmatpush.bf16.msra.mxu3 %v13237_v24  ;;  %7251 = vmatpush.bf16.msra.mxu2 %v12665_v41  ;;  %v12885_v24 = vor.u32 %v15376_v1, %v12882_v32  ;;  %v14241_v41 = vor.u32 %v15726_v55, %v14240_v42  ;;  %v13096_v1 = vld [vmem:[#allocation17 + $0x528] sm:$0xf]  ;;  %v15439_v42 = vld [vmem:[#allocation17 + $0x56c] sm:$0xf0]  ;;  %v15286_v55 = vld [vmem:[#allocation17 + $0xac] sm:$0xf] }
 0x714   : > { %7180 = vmatpush.bf16.msra.mxu1 %v14457_v21 }
 0x715   : > { %7168 = vmatpush.bf16.msra.mxu0 %v13737_v34  ;;  %v15825_v34 = vld [vmem:[#allocation17 + $0x1184] sm:$0xf] }
 0x716   : > { %7210 = vmatpush.bf16.msra.mxu3 %v13165_v45  ;;  %7252 = vmatpush.bf16.msra.mxu2 %v12593_v22  ;;  %v14674_v45 = vld [vmem:[#allocation17 + $0x11c8] sm:$0xf0]  ;;  %v13882_v22 = vld [vmem:[#allocation17 + $0xb98] sm:$0xf0] }
 0x717   : > { %v14677_v21 = vor.u32 %v15825_v34, %v14674_v45  ;;  %v13885_v6 = vor.u32 %v15627_v47, %v13882_v22  ;;  %v14104_v34 = vld [vmem:[#allocation17 + $0xd08] sm:$0xf]  ;;  %v14389_v45 = vor.u32 %v15753_v56, %v14386_v12  ;;  %v13530_v47 = vld [vmem:[#allocation17 + $0x8d0] sm:$0xf0]  ;;  %v13597_v22 = vor.u32 %v15555_v37, %v13594_v60  ;;  %v12744_v56 = vld [vmem:[#allocation17 + $0x260] sm:$0xf] }
 0x718   : > { %7181 = vmatpush.bf16.msra.mxu1 %v14385_v9  ;;  %v14530_v9 = vld [vmem:[#allocation17 + $0x10a8] sm:$0xf0]  ;;  %v15350_v12 = vld [vmem:[#allocation17 + $0x2a4] sm:$0xf0]  ;;  %v14608_v60 = vld [vmem:[#allocation17 + $0x10f8] sm:$0xf] }
 0x719   : > { %7169 = vmatpush.bf16.msra.mxu0 %v13665_v50  ;;  %v14602_v50 = vld [vmem:[#allocation17 + $0x1138] sm:$0xf0] }
 0x71a   : > { %7211 = vmatpush.bf16.msra.mxu3 %v13093_v4  ;;  %7253 = vmatpush.bf16.msra.mxu2 %v12521_v35  ;;  %v13313_v4 = vor.u32 %v15493_v5, %v13312_v27  ;;  %v13240_v35 = vld [vmem:[#allocation17 + $0x648] sm:$0xf]  ;;  %v14605_v49 = vor.u32 %v15807_v8, %v14602_v50  ;;  %v12960_v27 = vld [vmem:[#allocation17 + $0x410] sm:$0xf]  ;;  %v13025_v5 = vor.u32 %v15421_v33, %v13024_v2  ;;  %v14032_v50 = vld [vmem:[#allocation17 + $0xc78] sm:$0xf] }
 0x71b   : > { %v13241_v46 = vor.u32 %v15475_v51, %v13240_v35  ;;  %v15817_v2 = vld [vmem:[#allocation17 + $0x113c] sm:$0xf0]  ;;  %v13816_v33 = vld [vmem:[#allocation17 + $0xac8] sm:$0xf] }
 0x71c   : > { %7182 = vmatpush.bf16.msra.mxu1 %v14313_v38  ;;  %v15573_v38 = vld [vmem:[#allocation17 + $0x9a4] sm:$0xf] }
 0x71d   : > { %7170 = vmatpush.bf16.msra.mxu0 %v13593_v31  ;;  %v13738_v31 = vld [vmem:[#allocation17 + $0xa78] sm:$0xf0]  ;;  %v18015_v32 = vpop.f32.mrf.mxu0 }
 0x71e   : > { %7212 = vmatpush.bf16.msra.mxu3 %v13021_v40  ;;  %7254 = vmatpush.bf16.msra.mxu2 %v12449_v59  ;;  %v13168_v40 = vld [vmem:[#allocation17 + $0x5b8] sm:$0xf]  ;;  %v12594_v59 = vld [vmem:[#allocation17 + $0x180] sm:$0xf0] }
 0x71f   : > { %v13169_v28 = vor.u32 %v15457_v0, %v13168_v40  ;;  %v12597_v29 = vor.u32 %v15304_v17, %v12594_v59  ;;  %v13386_v40 = vld [vmem:[#allocation17 + $0x7b0] sm:$0xf0]  ;;  %v12816_v17 = vld [vmem:[#allocation17 + $0x2f0] sm:$0xf]  ;;  %v15368_v59 = vld [vmem:[#allocation17 + $0x334] sm:$0xf0] }
 0x720   : > { %7171 = vmatmul.bf16.vlgmr.msra.gmra.mxu0 %v17981_v61  ;;  %7183 = vmatpush.bf16.msra.mxu1 %v14241_v41  ;;  %v13097_v41 = vor.u32 %v15439_v42, %v13096_v1  ;;  %v12817_v1 = vor.u32 %v15368_v59, %v12816_v17  ;;  %v15637_v42 = vld [vmem:[#allocation17 + $0xb9c] sm:$0xf0]  ;;  %v14392_v17 = vld [vmem:[#allocation17 + $0xf48] sm:$0xf]  ;;  %v15763_v59 = vld [vmem:[#allocation17 + $0xf8c] sm:$0xf0] }
 0x721   : > { %7219 = vmatpush.bf16.msrb.mxu0 %v14101_v52  ;;  %7213 = vmatmul.bf16.vlgmr.msra.gmra.mxu3 %v17943_v16  ;;  %v14533_v52 = vor.u32 %v15789_v15, %v14530_v9  ;;  %v13461_v9 = vor.u32 %v15520_v62, %v13458_v58 }
 0x722   : > { %7261 = vmatpush.bf16.msrb.mxu3 %v13529_v48  ;;  %7303 = vmatpush.bf16.msrb.mxu2 %v12957_v53  ;;  %v13741_v48 = vor.u32 %v15591_v19, %v13738_v31  ;;  %v15771_v53 = vld [vmem:[#allocation17 + $0xfd4] sm:$0xf]  ;;  %v15655_v19 = vld [vmem:[#allocation17 + $0xc2c] sm:$0xf0]  ;;  %v15502_v31 = vld [vmem:[#allocation17 + $0x76c] sm:$0xf] }
 0x723   : > { %7255 = vmatmul.bf16.vlgmr.msra.gmra.mxu2 %v17941_v11 }
 0x724   : > { %7184 = vmatpush.bf16.msra.mxu1 %v14169_v43  ;;  %v15404_v43 = vld [vmem:[#allocation17 + $0x454] sm:$0xf0] }
 0x725   : > { %7220 = vmatpush.bf16.msrb.mxu0 %v14029_v63  ;;  %v12522_v63 = vld [vmem:[#allocation17 + $0xf0] sm:$0xf0]  ;;  %v18017_v35 = vpop.f32.mrf.mxu0 }
 0x726   : > { %7262 = vmatpush.bf16.msrb.mxu3 %v13457_v44  ;;  %7304 = vmatpush.bf16.msrb.mxu2 %v12885_v24  ;;  %v14461_v44 = vor.u32 %v15771_v53, %v14458_v25  ;;  %v13669_v24 = vor.u32 %v15573_v38, %v13666_v14  ;;  %v12525_v30 = vor.u32 %v15286_v55, %v12522_v63  ;;  %v18022_v53 = vpop.f32.mrf.mxu3  ;;  %v15835_v38 = vld [vmem:[#allocation17 + $0x11cc] sm:$0xf0]  ;;  %v13888_v14 = vld [vmem:[#allocation17 + $0xb58] sm:$0xf]  ;;  %v15484_v55 = vld [vmem:[#allocation17 + $0x6dc] sm:$0xf] }
 0x727   : > { %7185 = vmatmul.bf16.vlgmr.msra.gmra.mxu1 %v17998_v26  ;;  %v13314_v63 = vld [vmem:[#allocation17 + $0x720] sm:$0xf0] }
 0x728   : > { %7233 = vmatpush.bf16.msrb.mxu1 %v14677_v21  ;;  %v14314_v21 = vld [vmem:[#allocation17 + $0xef8] sm:$0xf0] }
 0x729   : > { %7221 = vmatpush.bf16.msrb.mxu0 %v13957_v10  ;;  %v12450_v10 = vld [vmem:[#allocation17 + $0x60] sm:$0xf0]  ;;  %v14317_v51 = vor.u32 %v15735_v36, %v14314_v21  ;;  %v15601_v21 = vld [vmem:[#allocation17 + $0xa7c] sm:$0xf0] }
 0x72a   : > { %7263 = vmatpush.bf16.msrb.mxu3 %v13385_v13  ;;  %7305 = vmatpush.bf16.msrb.mxu2 %v12813_v57  ;;  %v15691_v13 = vld [vmem:[#allocation17 + $0xd4c] sm:$0xf0]  ;;  %v15538_v57 = vld [vmem:[#allocation17 + $0x88c] sm:$0xf]  ;;  %v12453_v7 = vor.u32 %v15268_v23, %v12450_v10  ;;  %v12745_v23 = vor.u32 %v15350_v12, %v12744_v56  ;;  %v14393_v56 = vor.u32 %v15763_v59, %v14392_v17  ;;  %v15548_v12 = vld [vmem:[#allocation17 + $0x8d4] sm:$0xf0] }
 0x72b   : > { %v13533_v8 = vor.u32 %v15538_v57, %v13530_v47  ;;  %v15619_v10 = vld [vmem:[#allocation17 + $0xb0c] sm:$0xf0]  ;;  %v15332_v57 = vld [vmem:[#allocation17 + $0x214] sm:$0xf0]  ;;  %v14609_v47 = vor.u32 %v15817_v2, %v14608_v60  ;;  %v15709_v17 = vld [vmem:[#allocation17 + $0xddc] sm:$0xf0] }
 0x72c   : > { %7234 = vmatpush.bf16.msrb.mxu1 %v14605_v49  ;;  %v15717_v49 = vld [vmem:[#allocation17 + $0xe24] sm:$0xf] }
 0x72d   : > { %7222 = vmatpush.bf16.msrb.mxu0 %v13885_v6  ;;  %v14105_v6 = vor.u32 %v15691_v13, %v14104_v34  ;;  %v15466_v34 = vld [vmem:[#allocation17 + $0x64c] sm:$0xf]  ;;  %v12672_v13 = vld [vmem:[#allocation17 + $0x1d0] sm:$0xf] }
 0x72e   : > { %7264 = vmatpush.bf16.msrb.mxu3 %v13313_v4  ;;  %7306 = vmatpush.bf16.msrb.mxu2 %v12741_v39  ;;  %v12961_v4 = vor.u32 %v15404_v43, %v12960_v27  ;;  %v15673_v39 = vld [vmem:[#allocation17 + $0xcbc] sm:$0xf0]  ;;  %v14536_v43 = vld [vmem:[#allocation17 + $0x1068] sm:$0xf]  ;;  %v12673_v36 = vor.u32 %v15332_v57, %v12672_v13  ;;  %v6976_v13 = vpop.f32.mrf.mxu2 }
 0x72f   : > { %v14033_v15 = vor.u32 %v15673_v39, %v14032_v50  ;;  %v18027_v50 = vpop.f32.mrf.mxu3  ;;  %v15314_v39 = vld [vmem:[#allocation17 + $0x184] sm:$0xf0] }
 0x730   : > { %7235 = vmatpush.bf16.msrb.mxu1 %v14533_v52  ;;  %v15699_v52 = vld [vmem:[#allocation17 + $0xd94] sm:$0xf] }
 0x731   : > { %7223 = vmatpush.bf16.msrb.mxu0 %v13813_v20  ;;  %v14242_v20 = vld [vmem:[#allocation17 + $0xe68] sm:$0xf0] }
 0x732   : > { %7265 = vmatpush.bf16.msrb.mxu3 %v13241_v46  ;;  %7307 = vmatpush.bf16.msrb.mxu2 %v12669_v54  ;;  %v13960_v46 = vld [vmem:[#allocation17 + $0xbe8] sm:$0xf]  ;;  %v12889_v54 = vor.u32 %v15386_v3, %v12888_v18  ;;  %v14245_v0 = vor.u32 %v15717_v49, %v14242_v20  ;;  %v14464_v49 = vld [vmem:[#allocation17 + $0xfd8] sm:$0xf]  ;;  %v15781_v20 = vld [vmem:[#allocation17 + $0x101c] sm:$0xf0] }
 0x733   : > { %v13961_v25 = vor.u32 %v15655_v19, %v13960_v46  ;;  %v15583_v46 = vld [vmem:[#allocation17 + $0x9ec] sm:$0xf0]  ;;  %v13098_v19 = vld [vmem:[#allocation17 + $0x570] sm:$0xf0] }
 0x734   : > { %7236 = vmatpush.bf16.msrb.mxu1 %v14461_v44  ;;  %v18024_v44 = vpop.f32.mrf.mxu0 }
 0x735   : > { %7224 = vmatpush.bf16.msrb.mxu0 %v13741_v48  ;;  %v14170_v48 = vld [vmem:[#allocation17 + $0xdd8] sm:$0xf0] }
 0x736   : > { %7266 = vmatpush.bf16.msrb.mxu3 %v13169_v28  ;;  %7308 = vmatpush.bf16.msrb.mxu2 %v12597_v29  ;;  %v13389_v28 = vor.u32 %v15502_v31, %v13386_v40  ;;  %v14680_v29 = vld [vmem:[#allocation17 + $0x1188] sm:$0xf]  ;;  %v12528_v31 = vld [vmem:[#allocation17 + $0xb0] sm:$0xf]  ;;  %v15296_v40 = vld [vmem:[#allocation17 + $0xf4] sm:$0xf0] }
 0x737   : > { %v14681_v37 = vor.u32 %v15835_v38, %v14680_v29  ;;  %v15412_v29 = vld [vmem:[#allocation17 + $0x49c] sm:$0xf]  ;;  %v12529_v38 = vor.u32 %v15296_v40, %v12528_v31  ;;  %v15512_v31 = vld [vmem:[#allocation17 + $0x7b4] sm:$0xf0] }
 0x738   : > { %7237 = vmatpush.bf16.msrb.mxu1 %v14389_v45  ;;  %v13242_v45 = vld [vmem:[#allocation17 + $0x690] sm:$0xf0] }
 0x739   : > { %7225 = vmatpush.bf16.msrb.mxu0 %v13669_v24  ;;  %v14173_v24 = vor.u32 %v15699_v52, %v14170_v48  ;;  %v13245_v27 = vor.u32 %v15466_v34, %v13242_v45 }
 0x73a   : > { %7267 = vmatpush.bf16.msrb.mxu3 %v13097_v41  ;;  %7309 = vmatpush.bf16.msrb.mxu2 %v12525_v30  ;;  %v13889_v41 = vor.u32 %v15637_v42, %v13888_v14  ;;  %v13317_v30 = vor.u32 %v15484_v55, %v13314_v63  ;;  %v13026_v14 = vld [vmem:[#allocation17 + $0x4e0] sm:$0xf0]  ;;  %v15278_v42 = vld [vmem:[#allocation17 + $0x64] sm:$0xf0]  ;;  %v15682_v55 = vld [vmem:[#allocation17 + $0xd0c] sm:$0xf] }
 0x73b   : > { %v14106_v63 = vld [vmem:[#allocation17 + $0xd50] sm:$0xf0] }
 0x73c   : > { %7238 = vmatpush.bf16.msrb.mxu1 %v14317_v51  ;;  %v18029_v58 = vpop.f32.mrf.mxu0  ;;  %v14109_v45 = vor.u32 %v15682_v55, %v14106_v63 }
 0x73d   : > { %7226 = vmatpush.bf16.msrb.mxu0 %v13597_v22  ;;  %v13817_v22 = vor.u32 %v15619_v10, %v13816_v33  ;;  %v13029_v33 = vor.u32 %v15412_v29, %v13026_v14  ;;  %v15745_v10 = vld [vmem:[#allocation17 + $0xefc] sm:$0xf0]  ;;  %v15628_v14 = vld [vmem:[#allocation17 + $0xb5c] sm:$0xf] }
 0x73e   : > { %7268 = vmatpush.bf16.msrb.mxu3 %v13025_v5  ;;  %7310 = vmatpush.bf16.msrb.mxu2 %v12453_v7  ;;  %v15799_v5 = vld [vmem:[#allocation17 + $0x10ac] sm:$0xf0]  ;;  %v13744_v7 = vld [vmem:[#allocation17 + $0xa38] sm:$0xf] }
 0x73f   : > { %v14537_v62 = vor.u32 %v15799_v5, %v14536_v43  ;;  %v13745_v18 = vor.u32 %v15601_v21, %v13744_v7  ;;  %v14034_v43 = vld [vmem:[#allocation17 + $0xcc0] sm:$0xf0]  ;;  %v13464_v5 = vld [vmem:[#allocation17 + $0x800] sm:$0xf] }
 0x740   : > { %7227 = vmatmul.bf16.vlgmr.msrb.gmra.mxu0 %v17981_v61  ;;  %7239 = vmatpush.bf16.msrb.mxu1 %v14245_v0  ;;  %v14465_v0 = vor.u32 %v15781_v20, %v14464_v49  ;;  %v15377_v21 = vld [vmem:[#allocation17 + $0x384] sm:$0xf]  ;;  %v15646_v20 = vld [vmem:[#allocation17 + $0xbec] sm:$0xf] }
 0x741   : > { %7275 = vmatpush.bf16.msra.mxu0 %v14105_v6  ;;  %7269 = vmatmul.bf16.vlgmr.msrb.gmra.mxu3 %v17943_v16  ;;  %v15448_v6 = vld [vmem:[#allocation17 + $0x5bc] sm:$0xf] }
 0x742   : > { %7317 = vmatpush.bf16.msra.mxu3 %v13533_v8  ;;  %7359 = vmatpush.bf16.msra.mxu2 %v12961_v4  ;;  %v13170_v8 = vld [vmem:[#allocation17 + $0x600] sm:$0xf0]  ;;  %v12600_v4 = vld [vmem:[#allocation17 + $0x140] sm:$0xf] }
 0x743   : > { %7311 = vmatmul.bf16.vlgmr.msrb.gmra.mxu2 %v17941_v11  ;;  %v13173_v3 = vor.u32 %v15448_v6, %v13170_v8  ;;  %v12890_v6 = vld [vmem:[#allocation17 + $0x3c8] sm:$0xf0]  ;;  %v14248_v8 = vld [vmem:[#allocation17 + $0xe28] sm:$0xf] }
 0x744   : > { %7240 = vmatpush.bf16.msrb.mxu1 %v14173_v24  ;;  %v18031_v51 = vpop.f32.mrf.mxu1  ;;  %v13536_v24 = vld [vmem:[#allocation17 + $0x890] sm:$0xf]  ;;  %v7004_v57 = vpop.f32.mrf.mxu0  ;;  %v12893_v49 = vor.u32 %v15377_v21, %v12890_v6 }
 0x745   : > { %7276 = vmatpush.bf16.msra.mxu0 %v14033_v15  ;;  %v13672_v15 = vld [vmem:[#allocation17 + $0x9a8] sm:$0xf] }
 0x746   : > { %7318 = vmatpush.bf16.msra.mxu3 %v13461_v9  ;;  %7360 = vmatpush.bf16.msra.mxu2 %v12889_v54  ;;  %v12601_v9 = vor.u32 %v15314_v39, %v12600_v4  ;;  %v15430_v54 = vld [vmem:[#allocation17 + $0x52c] sm:$0xf]  ;;  %v13673_v52 = vor.u32 %v15583_v46, %v13672_v15  ;;  %v15727_v4 = vld [vmem:[#allocation17 + $0xe6c] sm:$0xf0]  ;;  %v6935_v39 = vadd.f32 %v18022_v53, %v18015_v32  ;;  %v13962_v15 = vld [vmem:[#allocation17 + $0xc30] sm:$0xf0] }
 0x747   : > { %7241 = vmatmul.bf16.vlgmr.msrb.gmra.mxu1 %v17998_v26  ;;  %v13101_v48 = vor.u32 %v15430_v54, %v13098_v19  ;;  %v14249_v19 = vor.u32 %v15727_v4, %v14248_v8  ;;  %v15359_v32 = vld [vmem:[#allocation17 + $0x2f4] sm:$0xf]  ;;  %v12818_v53 = vld [vmem:[#allocation17 + $0x338] sm:$0xf0]  ;;  %v15790_v8 = vld [vmem:[#allocation17 + $0x106c] sm:$0xf] }
 0x748   : > { %7289 = vmatpush.bf16.msra.mxu1 %v14681_v37  ;;  %v15395_v37 = vld [vmem:[#allocation17 + $0x414] sm:$0xf]  ;;  %v6949_v46 = vadd.f32 %v18024_v44, %v6935_v39  ;;  %v13965_v44 = vor.u32 %v15646_v20, %v13962_v15  ;;  %v15458_v20 = vld [vmem:[#allocation17 + $0x604] sm:$0xf0]  ;;  %v15305_v15 = vld [vmem:[#allocation17 + $0x144] sm:$0xf] }
 0x749   : > { %7277 = vmatpush.bf16.msra.mxu0 %v13961_v25  ;;  %v13600_v25 = vld [vmem:[#allocation17 + $0x918] sm:$0xf]  ;;  %v14538_v4 = vld [vmem:[#allocation17 + $0x10b0] sm:$0xf0] }
 0x74a   : > { %7319 = vmatpush.bf16.msra.mxu3 %v13389_v28  ;;  %7361 = vmatpush.bf16.msra.mxu2 %v12817_v1  ;;  %v15565_v28 = vld [vmem:[#allocation17 + $0x95c] sm:$0xf0]  ;;  %v6963_v59 = vadd.f32 %v18031_v51, %v6949_v46  ;;  %v6978_v51 = vpop.f32.mrf.mxu2  ;;  %v15772_v46 = vld [vmem:[#allocation17 + $0xfdc] sm:$0xf] }
 0x74b   : > { %v12456_v1 = vld [vmem:[#allocation17 + $0x20] sm:$0xf]  ;;  %v13601_v2 = vor.u32 %v15565_v28, %v13600_v25  ;;  %v14682_v25 = vld [vmem:[#allocation17 + $0x11d0] sm:$0xf0] }
 0x74c   : > { %7290 = vmatpush.bf16.msra.mxu1 %v14609_v47  ;;  %v18033_v60 = vpop.f32.mrf.mxu1  ;;  %v12457_v34 = vor.u32 %v15278_v42, %v12456_v1  ;;  %v13537_v47 = vor.u32 %v15548_v12, %v13536_v24  ;;  %v13890_v1 = vld [vmem:[#allocation17 + $0xba0] sm:$0xf0]  ;;  %v13320_v42 = vld [vmem:[#allocation17 + $0x6e0] sm:$0xf]  ;;  %v15494_v24 = vld [vmem:[#allocation17 + $0x724] sm:$0xf0] }
 0x74d   : > { %7278 = vmatpush.bf16.msra.mxu0 %v13889_v41  ;;  %v12962_v41 = vld [vmem:[#allocation17 + $0x458] sm:$0xf0]  ;;  %v12746_v12 = vld [vmem:[#allocation17 + $0x2a8] sm:$0xf0] }
 0x74e   : > { %7320 = vmatpush.bf16.msra.mxu3 %v13317_v30  ;;  %7362 = vmatpush.bf16.msra.mxu2 %v12745_v23  ;;  %v6990_v30 = vpop.f32.mrf.mxu3  ;;  %v14320_v23 = vld [vmem:[#allocation17 + $0xeb8] sm:$0xf] }
 0x74f   : > { %v14321_v7 = vor.u32 %v15745_v10, %v14320_v23  ;;  %v15808_v23 = vld [vmem:[#allocation17 + $0x10fc] sm:$0xf]  ;;  %v14610_v10 = vld [vmem:[#allocation17 + $0x1140] sm:$0xf0] }
 0x750   : > { %7291 = vmatpush.bf16.msra.mxu1 %v14537_v62  ;;  %v6991_v62 = vadd.f32 %v6990_v30, %v6976_v13  ;;  %v6937_v30 = vadd.f32 %v18027_v50, %v18017_v35  ;;  %v15610_v13 = vld [vmem:[#allocation17 + $0xacc] sm:$0xf]  ;;  %v12674_v35 = vld [vmem:[#allocation17 + $0x218] sm:$0xf0] }
 0x751   : > { %7279 = vmatpush.bf16.msra.mxu0 %v13817_v22  ;;  %v12965_v22 = vor.u32 %v15395_v37, %v12962_v41  ;;  %v7006_v37 = vpop.f32.mrf.mxu0 }
 0x752   : > { %7321 = vmatpush.bf16.msra.mxu3 %v13245_v27  ;;  %7363 = vmatpush.bf16.msra.mxu2 %v12673_v36  ;;  %v15664_v27 = vld [vmem:[#allocation17 + $0xc7c] sm:$0xf]  ;;  %v15530_v36 = vld [vmem:[#allocation17 + $0x844] sm:$0xf0]  ;;  %v7005_v54 = vadd.f32 %v7004_v57, %v6991_v62  ;;  %v13818_v57 = vld [vmem:[#allocation17 + $0xb10] sm:$0xf0] }
 0x753   : > { %v13821_v6 = vor.u32 %v15610_v13, %v13818_v57  ;;  %v12968_v13 = vld [vmem:[#allocation17 + $0x418] sm:$0xf]  ;;  %v15405_v57 = vld [vmem:[#allocation17 + $0x45c] sm:$0xf0] }
 0x754   : > { %7292 = vmatpush.bf16.msra.mxu1 %v14465_v0  ;;  %v7018_v40 = vpop.f32.mrf.mxu1  ;;  %v14176_v0 = vld [vmem:[#allocation17 + $0xd98] sm:$0xf] }
 0x755   : > { %7280 = vmatpush.bf16.msra.mxu0 %v13745_v18  ;;  %v14037_v18 = vor.u32 %v15664_v27, %v14034_v43  ;;  %v14177_v63 = vor.u32 %v15709_v17, %v14176_v0  ;;  %v15476_v43 = vld [vmem:[#allocation17 + $0x694] sm:$0xf0]  ;;  %v13104_v0 = vld [vmem:[#allocation17 + $0x530] sm:$0xf] }
 0x756   : > { %7322 = vmatpush.bf16.msra.mxu3 %v13173_v3  ;;  %7364 = vmatpush.bf16.msra.mxu2 %v12601_v9  ;;  %v13465_v3 = vor.u32 %v15530_v36, %v13464_v5  ;;  %v13392_v9 = vld [vmem:[#allocation17 + $0x770] sm:$0xf]  ;;  %v6992_v28 = vpop.f32.mrf.mxu3  ;;  %v15323_v5 = vld [vmem:[#allocation17 + $0x1d4] sm:$0xf]  ;;  %v15440_v17 = vld [vmem:[#allocation17 + $0x574] sm:$0xf0] }
 0x757   : > { %v13393_v29 = vor.u32 %v15512_v31, %v13392_v9  ;;  %v12677_v62 = vor.u32 %v15323_v5, %v12674_v35  ;;  %v12602_v9 = vld [vmem:[#allocation17 + $0x188] sm:$0xf0]  ;;  %v15736_v5 = vld [vmem:[#allocation17 + $0xebc] sm:$0xf]  ;;  %v14322_v35 = vld [vmem:[#allocation17 + $0xf00] sm:$0xf0] }
 0x758   : > { %7293 = vmatpush.bf16.msra.mxu1 %v14393_v56  ;;  %v15341_v56 = vld [vmem:[#allocation17 + $0x264] sm:$0xf]  ;;  %v15574_v31 = vld [vmem:[#allocation17 + $0x9ac] sm:$0xf] }
 0x759   : > { %7281 = vmatpush.bf16.msra.mxu0 %v13673_v52  ;;  %v7019_v52 = vadd.f32 %v7018_v40, %v7005_v54  ;;  %v13674_v40 = vld [vmem:[#allocation17 + $0x9f0] sm:$0xf0] }
 0x75a   : > { %7323 = vmatpush.bf16.msra.mxu3 %v13101_v48  ;;  %7365 = vmatpush.bf16.msra.mxu2 %v12529_v38  ;;  %v15826_v48 = vld [vmem:[#allocation17 + $0x118c] sm:$0xf]  ;;  %v12821_v38 = vor.u32 %v15359_v32, %v12818_v53  ;;  %v12605_v53 = vor.u32 %v15305_v15, %v12602_v9  ;;  %v13968_v9 = vld [vmem:[#allocation17 + $0xbf0] sm:$0xf] }
 0x75b   : > { %v7919_v55 = vpack.c.bf16 %v7019_v52, %v6963_v59  ;;  %v14685_v41 = vor.u32 %v15826_v48, %v14682_v25  ;;  %v15287_v59 = vld [vmem:[#allocation17 + $0xb4] sm:$0xf]  ;;  %v12530_v52 = vld [vmem:[#allocation17 + $0xf8] sm:$0xf0] }
 0x75c   : > { %7294 = vmatpush.bf16.msra.mxu1 %v14321_v7  ;;  %v7020_v50 = vpop.f32.mrf.mxu1  ;;  %v14613_v7 = vor.u32 %v15808_v23, %v14610_v10  ;;  %v14394_v25 = vld [vmem:[#allocation17 + $0xf90] sm:$0xf0]  ;;  %v18047_v10 = vpop.f32.mrf.mxu2 }
 0x75d   : > { %7282 = vmatpush.bf16.msra.mxu0 %v13601_v2  ;;  %v6993_v2 = vadd.f32 %v6992_v28, %v6978_v51  ;;  %7937 = vst [vmem:[#allocation6] sm:$0xff] %v7919_v55  ;;  %v15556_v28 = vld [vmem:[#allocation17 + $0x91c] sm:$0xf]  ;;  %v13105_v55 = vor.u32 %v15440_v17, %v13104_v0  ;;  %v15539_v51 = vld [vmem:[#allocation17 + $0x894] sm:$0xf] }
 0x75e   : > { %7324 = vmatpush.bf16.msra.mxu3 %v13029_v33  ;;  %7366 = vmatpush.bf16.msra.mxu2 %v12457_v34  ;;  %v13893_v33 = vor.u32 %v15628_v14, %v13890_v1  ;;  %v13321_v34 = vor.u32 %v15494_v24, %v13320_v42  ;;  %v13032_v14 = vld [vmem:[#allocation17 + $0x4a0] sm:$0xf]  ;;  %v15422_v1 = vld [vmem:[#allocation17 + $0x4e4] sm:$0xf0]  ;;  %v15269_v42 = vld [vmem:[#allocation17 + $0x24] sm:$0xf] }
 0x75f   : > { %v7007_v27 = vadd.f32 %v7006_v37, %v6993_v2  ;;  %v12458_v24 = vld [vmem:[#allocation17 + $0x68] sm:$0xf0]  ;;  %v13538_v37 = vld [vmem:[#allocation17 + $0x8d8] sm:$0xf0]  ;;  %v14178_v17 = vld [vmem:[#allocation17 + $0xde0] sm:$0xf0] }
 0x760   : > { %7283 = vmatmul.bf16.vlgmr.msra.gmra.mxu0 %v17981_v61  ;;  %7295 = vmatpush.bf16.msra.mxu1 %v14249_v19  ;;  %v14466_v19 = vld [vmem:[#allocation17 + $0x1020] sm:$0xf0]  ;;  %v15700_v0 = vld [vmem:[#allocation17 + $0xd9c] sm:$0xf] }
 0x761   : > { %7331 = vmatpush.bf16.msrb.mxu0 %v14109_v45  ;;  %7325 = vmatmul.bf16.vlgmr.msra.gmra.mxu3 %v17943_v16  ;;  %v12749_v45 = vor.u32 %v15341_v56, %v12746_v12  ;;  %v7021_v21 = vadd.f32 %v7020_v50, %v7007_v27  ;;  %v14469_v48 = vor.u32 %v15772_v46, %v14466_v19  ;;  %v14112_v56 = vld [vmem:[#allocation17 + $0xd10] sm:$0xf]  ;;  %v15692_v12 = vld [vmem:[#allocation17 + $0xd54] sm:$0xf0]  ;;  %v18051_v50 = vpop.f32.mrf.mxu0  ;;  %v13394_v19 = vld [vmem:[#allocation17 + $0x7b8] sm:$0xf0] }
 0x762   : > { %7373 = vmatpush.bf16.msrb.mxu3 %v13537_v47  ;;  %7415 = vmatpush.bf16.msrb.mxu2 %v12965_v22  ;;  %v13248_v47 = vld [vmem:[#allocation17 + $0x650] sm:$0xf]  ;;  %v6951_v22 = vadd.f32 %v18029_v58, %v6937_v30  ;;  %v15592_v58 = vld [vmem:[#allocation17 + $0xa3c] sm:$0xf]  ;;  %v13033_v27 = vor.u32 %v15422_v1, %v13032_v14  ;;  %v15656_v46 = vld [vmem:[#allocation17 + $0xc34] sm:$0xf0] }
 0x763   : > { %7367 = vmatmul.bf16.vlgmr.msra.gmra.mxu2 %v17941_v11  ;;  %v13249_v39 = vor.u32 %v15476_v43, %v13248_v47  ;;  %v12461_v43 = vor.u32 %v15269_v42, %v12458_v24  ;;  %v15638_v14 = vld [vmem:[#allocation17 + $0xba4] sm:$0xf0]  ;;  %v15485_v1 = vld [vmem:[#allocation17 + $0x6e4] sm:$0xf]  ;;  %v13322_v42 = vld [vmem:[#allocation17 + $0x728] sm:$0xf0] }
 0x764   : > { %7296 = vmatpush.bf16.msra.mxu1 %v14177_v63  ;;  %v6965_v36 = vadd.f32 %v18033_v60, %v6951_v22  ;;  %v14541_v60 = vor.u32 %v15790_v8, %v14538_v4  ;;  %v12533_v63 = vor.u32 %v15287_v59, %v12530_v52  ;;  %v15674_v8 = vld [vmem:[#allocation17 + $0xcc4] sm:$0xf0]  ;;  %v15521_v4 = vld [vmem:[#allocation17 + $0x804] sm:$0xf]  ;;  %v18060_v59 = vpop.f32.mrf.mxu2 }
 0x765   : > { %7332 = vmatpush.bf16.msrb.mxu0 %v14037_v18  ;;  %v13746_v18 = vld [vmem:[#allocation17 + $0xa80] sm:$0xf0]  ;;  %v12752_v24 = vld [vmem:[#allocation17 + $0x268] sm:$0xf] }
 0x766   : > { %7374 = vmatpush.bf16.msrb.mxu3 %v13465_v3  ;;  %7416 = vmatpush.bf16.msrb.mxu2 %v12893_v49  ;;  %v13176_v3 = vld [vmem:[#allocation17 + $0x5c0] sm:$0xf]  ;;  %v7928_v49 = vpack.c.bf16 %v7021_v21, %v6965_v36  ;;  %v13749_v54 = vor.u32 %v15592_v58, %v13746_v18  ;;  %v13541_v36 = vor.u32 %v15539_v51, %v13538_v37  ;;  %v12896_v58 = vld [vmem:[#allocation17 + $0x388] sm:$0xf]  ;;  %v15387_v18 = vld [vmem:[#allocation17 + $0x3cc] sm:$0xf0] }
 0x767   : > { %7297 = vmatmul.bf16.vlgmr.msra.gmra.mxu1 %v17998_v26  ;;  %v13177_v32 = vor.u32 %v15458_v20, %v13176_v3  ;;  %v14040_v21 = vld [vmem:[#allocation17 + $0xc80] sm:$0xf]  ;;  %v15718_v3 = vld [vmem:[#allocation17 + $0xe2c] sm:$0xf]  ;;  %v13325_v37 = vor.u32 %v15485_v1, %v13322_v42  ;;  %v15566_v42 = vld [vmem:[#allocation17 + $0x964] sm:$0xf0] }
 0x768   : > { %7345 = vmatpush.bf16.msrb.mxu1 %v14685_v41  ;;  %7946 = vst [vmem:[#allocation6 + $0x48] sm:$0xff] %v7928_v49  ;;  %v14841_v41 = vld [vmem:[#allocation6] sm:$0xf]  ;;  %v14250_v49 = vld [vmem:[#allocation17 + $0xe70] sm:$0xf0]  ;;  %v14041_v20 = vor.u32 %v15674_v8, %v14040_v21 }
 0x769   : > { %7333 = vmatpush.bf16.msrb.mxu0 %v13965_v44  ;;  %v15754_v44 = vld [vmem:[#allocation17 + $0xf4c] sm:$0xf]  ;;  %v13752_v21 = vld [vmem:[#allocation17 + $0xa40] sm:$0xf]  ;;  %v15602_v8 = vld [vmem:[#allocation17 + $0xa84] sm:$0xf0] }
 0x76a   : > { %7375 = vmatpush.bf16.msrb.mxu3 %v13393_v29  ;;  %7417 = vmatpush.bf16.msrb.mxu2 %v12821_v38  ;;  %v13602_v29 = vld [vmem:[#allocation17 + $0x960] sm:$0xf0]  ;;  %v13677_v38 = vor.u32 %v15574_v31, %v13674_v40  ;;  %v14397_v30 = vor.u32 %v15754_v44, %v14394_v25  ;;  %v18056_v31 = vpop.f32.mrf.mxu1  ;;  %v15369_v40 = vld [vmem:[#allocation17 + $0x33c] sm:$0xf0]  ;;  %v13969_v44 = vor.u32 %v15656_v46, %v13968_v9  ;;  %v14688_v25 = vld [vmem:[#allocation17 + $0x1190] sm:$0xf] }
 0x76b   : > { %v14472_v9 = vld [vmem:[#allocation17 + $0xfe0] sm:$0xf]  ;;  %v13680_v46 = vld [vmem:[#allocation17 + $0x9b0] sm:$0xf] }
 0x76c   : > { %7346 = vmatpush.bf16.msrb.mxu1 %v14613_v7  ;;  %v14113_v7 = vor.u32 %v15692_v12, %v14112_v56  ;;  %v15351_v56 = vld [vmem:[#allocation17 + $0x2ac] sm:$0xf0] }
 0x76d   : > { %7334 = vmatpush.bf16.msrb.mxu0 %v13893_v33  ;;  %v15860_v33 = vld [vmem:[#allocation6 + $0x4] sm:$0xf] }
 0x76e   : > { %7376 = vmatpush.bf16.msrb.mxu3 %v13321_v34  ;;  %7418 = vmatpush.bf16.msrb.mxu2 %v12749_v45  ;;  %v18049_v34 = vpop.f32.mrf.mxu3  ;;  %v13605_v45 = vor.u32 %v15556_v28, %v13602_v29  ;;  %v15836_v28 = vld [vmem:[#allocation17 + $0x11d4] sm:$0xf0]  ;;  %v13896_v29 = vld [vmem:[#allocation17 + $0xb60] sm:$0xf] }
 0x76f   : > { %v15869_v2 = vld [vmem:[#allocation6 + $0x44] sm:$0xf0]  ;;  %v14843_v23 = vld [vmem:[#allocation6 + $0x48] sm:$0xf0]  ;;  %v14689_v12 = vor.u32 %v15836_v28, %v14688_v25  ;;  %v13897_v51 = vor.u32 %v15638_v14, %v13896_v29 }
 0x770   : > { %7347 = vmatpush.bf16.msrb.mxu1 %v14541_v60  ;;  %v14842_v47 = vor.u32 %v15869_v2, %v14841_v41  ;;  %v14846_v22 = vor.u32 %v15860_v33, %v14843_v23  ;;  %v12897_v60 = vor.u32 %v15387_v18, %v12896_v58  ;;  %v14616_v41 = vld [vmem:[#allocation17 + $0x1100] sm:$0xf]  ;;  %v13824_v2 = vld [vmem:[#allocation17 + $0xad0] sm:$0xf]  ;;  %v12753_v33 = vor.u32 %v15351_v56, %v12752_v24  ;;  %v15620_v23 = vld [vmem:[#allocation17 + $0xb14] sm:$0xf0] }
 0x771   : > { %7335 = vmatpush.bf16.msrb.mxu0 %v13821_v6  ;;  %v12969_v6 = vor.u32 %v15405_v57, %v12968_v13  ;;  %v13250_v13 = vld [vmem:[#allocation17 + $0x698] sm:$0xf0]  ;;  %v12680_v57 = vld [vmem:[#allocation17 + $0x1d8] sm:$0xf]  ;;  %v12608_v18 = vld [vmem:[#allocation17 + $0x148] sm:$0xf] }
 0x772   : > { %7377 = vmatpush.bf16.msrb.mxu3 %v13249_v39  ;;  %7419 = vmatpush.bf16.msrb.mxu2 %v12677_v62  ;;  %v13466_v39 = vld [vmem:[#allocation17 + $0x848] sm:$0xf0]  ;;  %v14325_v62 = vor.u32 %v15736_v5, %v14322_v35  ;;  %v13825_v5 = vor.u32 %v15620_v23, %v13824_v2  ;;  %v14400_v29 = vld [vmem:[#allocation17 + $0xf50] sm:$0xf]  ;;  %v14114_v2 = vld [vmem:[#allocation17 + $0xd58] sm:$0xf0] }
 0x773   : > { %8586 = vrot.lane.b32.xlu0 %v14842_v47, %s16247_s26  ;;  %8588 = vrot.lane.b32.xlu2 %v14846_v22, %s16247_s26  ;;  %v13469_v15 = vor.u32 %v15521_v4, %v13466_v39  ;;  %v15333_v47 = vld [vmem:[#allocation17 + $0x21c] sm:$0xf0]  ;;  %v15449_v4 = vld [vmem:[#allocation17 + $0x5c4] sm:$0xf]  ;;  %v13178_v39 = vld [vmem:[#allocation17 + $0x608] sm:$0xf0] }
 0x774   : > { %7348 = vmatpush.bf16.msrb.mxu1 %v14469_v48 }
 0x775   : > { %7336 = vmatpush.bf16.msrb.mxu0 %v13749_v54  ;;  %v15503_v54 = vld [vmem:[#allocation17 + $0x774] sm:$0xf] }
 0x776   : > { %7378 = vmatpush.bf16.msrb.mxu3 %v13177_v32  ;;  %7420 = vmatpush.bf16.msrb.mxu2 %v12605_v53  ;;  %v14253_v32 = vor.u32 %v15718_v3, %v14250_v49  ;;  %v12824_v53 = vld [vmem:[#allocation17 + $0x2f8] sm:$0xf]  ;;  %v18062_v52 = vpop.f32.mrf.mxu3  ;;  %v13397_v48 = vor.u32 %v15503_v54, %v13394_v19  ;;  %v15315_v3 = vld [vmem:[#allocation17 + $0x18c] sm:$0xf0]  ;;  %v7047_v54 = vadd.f32 %v18049_v34, %v18047_v10  ;;  %v13608_v34 = vld [vmem:[#allocation17 + $0x920] sm:$0xf] }
 0x778   : > { %7349 = vmatpush.bf16.msrb.mxu1 %v14397_v30  ;;  %v15818_v30 = vld [vmem:[#allocation17 + $0x1144] sm:$0xf0] }
 0x779   : > { %7337 = vmatpush.bf16.msrb.mxu0 %v13677_v38  ;;  %v12825_v38 = vor.u32 %v15369_v40, %v12824_v53  ;;  %v14617_v22 = vor.u32 %v15818_v30, %v14616_v41  ;;  %v15584_v53 = vld [vmem:[#allocation17 + $0x9f4] sm:$0xf0]  ;;  %v15431_v40 = vld [vmem:[#allocation17 + $0x534] sm:$0xf] }
 0x77a   : > { %7379 = vmatpush.bf16.msrb.mxu3 %v13105_v55  ;;  %7421 = vmatpush.bf16.msrb.mxu2 %v12533_v63  ;;  %v18064_v55 = vpop.f32.mrf.mxu0  ;;  %v14181_v63 = vor.u32 %v15700_v0, %v14178_v17  ;;  %v13106_v0 = vld [vmem:[#allocation17 + $0x578] sm:$0xf0]  ;;  %v12536_v17 = vld [vmem:[#allocation17 + $0xb8] sm:$0xf]  ;;  %v13681_v1 = vor.u32 %v15584_v53, %v13680_v46  ;;  %v15683_v30 = vld [vmem:[#allocation17 + $0xd14] sm:$0xf] }
 0x77b   : > { %v13109_v10 = vor.u32 %v15431_v40, %v13106_v0  ;;  %v15728_v46 = vld [vmem:[#allocation17 + $0xe74] sm:$0xf0]  ;;  %v15647_v40 = vld [vmem:[#allocation17 + $0xbf4] sm:$0xf]  ;;  %v13970_v0 = vld [vmem:[#allocation17 + $0xc38] sm:$0xf0] }
 0x77c   : > { %7350 = vmatpush.bf16.msrb.mxu1 %v14325_v62  ;;  %v7088_v62 = vpop.f32.mrf.mxu2 }
 0x77d   : > { %7338 = vmatpush.bf16.msrb.mxu0 %v13605_v45  ;;  %v15467_v45 = vld [vmem:[#allocation17 + $0x654] sm:$0xf] }
 0x77e   : > { %7380 = vmatpush.bf16.msrb.mxu3 %v13033_v27  ;;  %7422 = vmatpush.bf16.msrb.mxu2 %v12461_v43  ;;  %v7102_v27 = vpop.f32.mrf.mxu3  ;;  %v18066_v43 = vpop.f32.mrf.mxu1  ;;  %v13253_v35 = vor.u32 %v15467_v45, %v13250_v13  ;;  %v15549_v13 = vld [vmem:[#allocation17 + $0x8dc] sm:$0xf0] }
 0x77f   : > { %v7103_v19 = vadd.f32 %v7102_v27, %v7088_v62  ;;  %v15665_v62 = vld [vmem:[#allocation17 + $0xc84] sm:$0xf] }
 0x780   : > { %7339 = vmatmul.bf16.vlgmr.msrb.gmra.mxu0 %v17981_v61  ;;  %7351 = vmatpush.bf16.msrb.mxu1 %v14253_v32  ;;  %v12609_v32 = vor.u32 %v15315_v3, %v12608_v18  ;;  %v13472_v18 = vld [vmem:[#allocation17 + $0x808] sm:$0xf] }
 0x781   : > { %7387 = vmatpush.bf16.msra.mxu0 %v14113_v7  ;;  %7381 = vmatmul.bf16.vlgmr.msrb.gmra.mxu3 %v17943_v16  ;;  %v14544_v7 = vld [vmem:[#allocation17 + $0x1070] sm:$0xf] }
 0x782   : > { %7429 = vmatpush.bf16.msra.mxu3 %v13541_v36  ;;  %7471 = vmatpush.bf16.msra.mxu2 %v12969_v6  ;;  %v15800_v36 = vld [vmem:[#allocation17 + $0x10b4] sm:$0xf0]  ;;  %v12681_v6 = vor.u32 %v15333_v47, %v12680_v57  ;;  %v7116_v58 = vpop.f32.mrf.mxu0  ;;  %v15396_v57 = vld [vmem:[#allocation17 + $0x41c] sm:$0xf]  ;;  %v12970_v47 = vld [vmem:[#allocation17 + $0x460] sm:$0xf0] }
 0x783   : > { %7423 = vmatmul.bf16.vlgmr.msrb.gmra.mxu2 %v17941_v11  ;;  %v14545_v49 = vor.u32 %v15800_v36, %v14544_v7  ;;  %v7117_v25 = vadd.f32 %v7116_v58, %v7103_v19  ;;  %v14328_v7 = vld [vmem:[#allocation17 + $0xec0] sm:$0xf]  ;;  %v15746_v36 = vld [vmem:[#allocation17 + $0xf04] sm:$0xf0]  ;;  %v14042_v58 = vld [vmem:[#allocation17 + $0xcc8] sm:$0xf0] }
 0x784   : > { %7352 = vmatpush.bf16.msrb.mxu1 %v14181_v63  ;;  %v15413_v63 = vld [vmem:[#allocation17 + $0x4a4] sm:$0xf]  ;;  %v14329_v3 = vor.u32 %v15746_v36, %v14328_v7 }
 0x785   : > { %7388 = vmatpush.bf16.msra.mxu0 %v14041_v20  ;;  %v13753_v20 = vor.u32 %v15602_v8, %v13752_v21  ;;  %v14117_v8 = vor.u32 %v15683_v30, %v14114_v2  ;;  %v15809_v2 = vld [vmem:[#allocation17 + $0x1104] sm:$0xf] }
 0x786   : > { %7430 = vmatpush.bf16.msra.mxu3 %v13469_v15  ;;  %7472 = vmatpush.bf16.msra.mxu2 %v12897_v60  ;;  %v13181_v15 = vor.u32 %v15449_v4, %v13178_v39  ;;  %v15782_v60 = vld [vmem:[#allocation17 + $0x1024] sm:$0xf0]  ;;  %v7130_v14 = vpop.f32.mrf.mxu1  ;;  %v7104_v41 = vpop.f32.mrf.mxu3  ;;  %v12973_v39 = vor.u32 %v15396_v57, %v12970_v47  ;;  %v13826_v57 = vld [vmem:[#allocation17 + $0xb18] sm:$0xf0]  ;;  %v13256_v47 = vld [vmem:[#allocation17 + $0x658] sm:$0xf] }
 0x787   : > { %7353 = vmatmul.bf16.vlgmr.msrb.gmra.mxu1 %v17998_v26  ;;  %v14473_v28 = vor.u32 %v15782_v60, %v14472_v9  ;;  %v7131_v56 = vadd.f32 %v7130_v14, %v7117_v25  ;;  %v14256_v60 = vld [vmem:[#allocation17 + $0xe30] sm:$0xf]  ;;  %v15513_v25 = vld [vmem:[#allocation17 + $0x7bc] sm:$0xf0]  ;;  %v13973_v14 = vor.u32 %v15647_v40, %v13970_v0  ;;  %v13112_v40 = vld [vmem:[#allocation17 + $0x538] sm:$0xf] }
 0x788   : > { %7401 = vmatpush.bf16.msra.mxu1 %v14689_v12  ;;  %v15441_v0 = vld [vmem:[#allocation17 + $0x57c] sm:$0xf0] }
 0x789   : > { %7389 = vmatpush.bf16.msra.mxu0 %v13969_v44  ;;  %v15297_v44 = vld [vmem:[#allocation17 + $0xfc] sm:$0xf0] }
 0x78a   : > { %7431 = vmatpush.bf16.msra.mxu3 %v13397_v48  ;;  %7473 = vmatpush.bf16.msra.mxu2 %v12825_v38  ;;  %v7061_v48 = vadd.f32 %v18051_v50, %v7047_v54  ;;  %v15764_v38 = vld [vmem:[#allocation17 + $0xf94] sm:$0xf0]  ;;  %v12537_v12 = vor.u32 %v15297_v44, %v12536_v17  ;;  %v12464_v50 = vld [vmem:[#allocation17 + $0x28] sm:$0xf]  ;;  %v7118_v27 = vpop.f32.mrf.mxu0 }
 0x78b   : > { %v14401_v45 = vor.u32 %v15764_v38, %v14400_v29  ;;  %v13400_v17 = vld [vmem:[#allocation17 + $0x778] sm:$0xf]  ;;  %v12826_v29 = vld [vmem:[#allocation17 + $0x340] sm:$0xf0]  ;;  %v15710_v38 = vld [vmem:[#allocation17 + $0xde4] sm:$0xf0] }
 0x78c   : > { %7402 = vmatpush.bf16.msra.mxu1 %v14617_v22  ;;  %v7075_v24 = vadd.f32 %v18056_v31, %v7061_v48  ;;  %v7049_v22 = vadd.f32 %v18062_v52, %v18060_v59  ;;  %v7090_v31 = vpop.f32.mrf.mxu2  ;;  %v14257_v48 = vor.u32 %v15728_v46, %v14256_v60  ;;  %v15773_v46 = vld [vmem:[#allocation17 + $0xfe4] sm:$0xf] }
 0x78d   : > { %7390 = vmatpush.bf16.msra.mxu0 %v13897_v51  ;;  %v13034_v51 = vld [vmem:[#allocation17 + $0x4e8] sm:$0xf0]  ;;  %v7105_v21 = vadd.f32 %v7104_v41, %v7090_v31  ;;  %v15324_v31 = vld [vmem:[#allocation17 + $0x1dc] sm:$0xf] }
 0x78e   : > { %7432 = vmatpush.bf16.msra.mxu3 %v13325_v37  ;;  %7474 = vmatpush.bf16.msra.mxu2 %v12753_v33  ;;  %v15279_v37 = vld [vmem:[#allocation17 + $0x6c] sm:$0xf0]  ;;  %v13544_v33 = vld [vmem:[#allocation17 + $0x898] sm:$0xf]  ;;  %v7920_v23 = vpack.c.bf16 %v7131_v56, %v7075_v24  ;;  %v7063_v59 = vadd.f32 %v18064_v55, %v7049_v22  ;;  %v7132_v9 = vpop.f32.mrf.mxu1  ;;  %v13898_v24 = vld [vmem:[#allocation17 + $0xba8] sm:$0xf0] }
 0x78f   : > { %v13545_v4 = vor.u32 %v15549_v13, %v13544_v33  ;;  %v7119_v52 = vadd.f32 %v7118_v27, %v7105_v21  ;;  %v13328_v56 = vld [vmem:[#allocation17 + $0x6e8] sm:$0xf]  ;;  %v14618_v33 = vld [vmem:[#allocation17 + $0x1148] sm:$0xf0]  ;;  %v15477_v22 = vld [vmem:[#allocation17 + $0x69c] sm:$0xf0] }
 0x790   : > { %7403 = vmatpush.bf16.msra.mxu1 %v14545_v49  ;;  %7938 = vst [vmem:[#allocation6 + $0x8] sm:$0xff] %v7920_v23  ;;  %v15531_v49 = vld [vmem:[#allocation17 + $0x84c] sm:$0xf0]  ;;  %v7077_v54 = vadd.f32 %v18066_v43, %v7063_v59  ;;  %v14184_v43 = vld [vmem:[#allocation17 + $0xda0] sm:$0xf] }
 0x791   : > { %7391 = vmatpush.bf16.msra.mxu0 %v13825_v5  ;;  %v13609_v5 = vor.u32 %v15566_v42, %v13608_v34  ;;  %v7133_v19 = vadd.f32 %v7132_v9, %v7119_v52  ;;  %v13473_v55 = vor.u32 %v15531_v49, %v13472_v18  ;;  %v13401_v34 = vor.u32 %v15513_v25, %v13400_v17  ;;  %v15611_v23 = vld [vmem:[#allocation17 + $0xad4] sm:$0xf]  ;;  %v12682_v27 = vld [vmem:[#allocation17 + $0x220] sm:$0xf0]  ;;  %v13754_v52 = vld [vmem:[#allocation17 + $0xa88] sm:$0xf0] }
 0x792   : > { %7433 = vmatpush.bf16.msra.mxu3 %v13253_v35  ;;  %7475 = vmatpush.bf16.msra.mxu2 %v12681_v6  ;;  %v13037_v35 = vor.u32 %v15413_v63, %v13034_v51  ;;  %v12465_v6 = vor.u32 %v15279_v37, %v12464_v50  ;;  %v15629_v63 = vld [vmem:[#allocation17 + $0xb64] sm:$0xf]  ;;  %v15495_v51 = vld [vmem:[#allocation17 + $0x72c] sm:$0xf0]  ;;  %v15342_v50 = vld [vmem:[#allocation17 + $0x26c] sm:$0xf]  ;;  %v12685_v18 = vor.u32 %v15324_v31, %v12682_v27 }
 0x793   : > { %v7929_v44 = vpack.c.bf16 %v7133_v19, %v7077_v54  ;;  %v12754_v37 = vld [vmem:[#allocation17 + $0x2b0] sm:$0xf0]  ;;  %v13901_v30 = vor.u32 %v15629_v63, %v13898_v24  ;;  %v15593_v59 = vld [vmem:[#allocation17 + $0xa44] sm:$0xf]  ;;  %v15459_v49 = vld [vmem:[#allocation17 + $0x60c] sm:$0xf0] }
 0x794   : > { %7404 = vmatpush.bf16.msra.mxu1 %v14473_v28  ;;  %v15360_v28 = vld [vmem:[#allocation17 + $0x2fc] sm:$0xf]  ;;  %v12757_v13 = vor.u32 %v15342_v50, %v12754_v37  ;;  %v13757_v60 = vor.u32 %v15593_v59, %v13754_v52  ;;  %v14474_v54 = vld [vmem:[#allocation17 + $0x1028] sm:$0xf0]  ;;  %v12466_v63 = vld [vmem:[#allocation17 + $0x70] sm:$0xf0]  ;;  %v18083_v37 = vpop.f32.mrf.mxu3 }
 0x795   : > { %7392 = vmatpush.bf16.msra.mxu0 %v13753_v20  ;;  %v15378_v20 = vld [vmem:[#allocation17 + $0x38c] sm:$0xf]  ;;  %7947 = vst [vmem:[#allocation6 + $0x50] sm:$0xff] %v7929_v44  ;;  %v12829_v42 = vor.u32 %v15360_v28, %v12826_v29  ;;  %v15288_v17 = vld [vmem:[#allocation17 + $0xbc] sm:$0xf] }
 0x796   : > { %7434 = vmatpush.bf16.msra.mxu3 %v13181_v15  ;;  %7476 = vmatpush.bf16.msra.mxu2 %v12609_v32  ;;  %v12898_v15 = vld [vmem:[#allocation17 + $0x3d0] sm:$0xf0]  ;;  %v14045_v32 = vor.u32 %v15665_v62, %v14042_v58  ;;  %v14546_v62 = vld [vmem:[#allocation17 + $0x10b8] sm:$0xf0]  ;;  %v13257_v58 = vor.u32 %v15477_v22, %v13256_v47  ;;  %v12538_v44 = vld [vmem:[#allocation17 + $0x100] sm:$0xf0] }
 0x797   : > { %v12901_v53 = vor.u32 %v15378_v20, %v12898_v15  ;;  %v15861_v36 = vld [vmem:[#allocation6 + $0xc] sm:$0xf]  ;;  %v15306_v20 = vld [vmem:[#allocation17 + $0x14c] sm:$0xf]  ;;  %v14402_v29 = vld [vmem:[#allocation17 + $0xf98] sm:$0xf0] }
 0x798   : > { %7405 = vmatpush.bf16.msra.mxu1 %v14401_v45  ;;  %v13329_v45 = vor.u32 %v15495_v51, %v13328_v56  ;;  %v12610_v15 = vld [vmem:[#allocation17 + $0x190] sm:$0xf0]  ;;  %v14120_v24 = vld [vmem:[#allocation17 + $0xd18] sm:$0xf]  ;;  %v15540_v51 = vld [vmem:[#allocation17 + $0x89c] sm:$0xf] }
 0x799   : > { %7393 = vmatpush.bf16.msra.mxu0 %v13681_v1  ;;  %v15827_v1 = vld [vmem:[#allocation17 + $0x1194] sm:$0xf]  ;;  %v13546_v50 = vld [vmem:[#allocation17 + $0x8e0] sm:$0xf0]  ;;  %v14048_v27 = vld [vmem:[#allocation17 + $0xc88] sm:$0xf] }
 0x79a   : > { %7435 = vmatpush.bf16.msra.mxu3 %v13109_v10  ;;  %7477 = vmatpush.bf16.msra.mxu2 %v12537_v12  ;;  %v14690_v10 = vld [vmem:[#allocation17 + $0x11d8] sm:$0xf0]  ;;  %v14185_v12 = vor.u32 %v15710_v38, %v14184_v43  ;;  %v15755_v28 = vld [vmem:[#allocation17 + $0xf54] sm:$0xf]  ;;  %v15557_v43 = vld [vmem:[#allocation17 + $0x924] sm:$0xf]  ;;  %v13113_v38 = vor.u32 %v15441_v0, %v13112_v40  ;;  %v13549_v31 = vor.u32 %v15540_v51, %v13546_v50 }
 0x79b   : > { %v14693_v41 = vor.u32 %v15827_v1, %v14690_v10  ;;  %v13610_v1 = vld [vmem:[#allocation17 + $0x968] sm:$0xf0]  ;;  %v13040_v10 = vld [vmem:[#allocation17 + $0x4a8] sm:$0xf]  ;;  %v14405_v56 = vor.u32 %v15755_v28, %v14402_v29  ;;  %v15657_v52 = vld [vmem:[#allocation17 + $0xc3c] sm:$0xf0] }
 0x79c   : > { %7406 = vmatpush.bf16.msra.mxu1 %v14329_v3  ;;  %v15870_v7 = vld [vmem:[#allocation6 + $0x4c] sm:$0xf0]  ;;  %v14851_v21 = vld [vmem:[#allocation6 + $0x50] sm:$0xf0]  ;;  %v13184_v3 = vld [vmem:[#allocation17 + $0x5c8] sm:$0xf] }
 0x79d   : > { %7394 = vmatpush.bf16.msra.mxu0 %v13609_v5  ;;  %v14849_v5 = vld [vmem:[#allocation6 + $0x8] sm:$0xf]  ;;  %v13185_v19 = vor.u32 %v15459_v49, %v13184_v3  ;;  %v18087_v47 = vpop.f32.mrf.mxu0  ;;  %v15504_v3 = vld [vmem:[#allocation17 + $0x77c] sm:$0xf]  ;;  %v13402_v49 = vld [vmem:[#allocation17 + $0x7c0] sm:$0xf0] }
 0x79e   : > { %7436 = vmatpush.bf16.msra.mxu3 %v13037_v35  ;;  %7478 = vmatpush.bf16.msra.mxu2 %v12465_v6  ;;  %v14621_v35 = vor.u32 %v15809_v2, %v14618_v33  ;;  %v13829_v6 = vor.u32 %v15611_v23, %v13826_v57  ;;  %v15406_v2 = vld [vmem:[#allocation17 + $0x464] sm:$0xf0]  ;;  %v18085_v57 = vpop.f32.mrf.mxu2  ;;  %v15837_v40 = vld [vmem:[#allocation17 + $0x11dc] sm:$0xf0]  ;;  %v15468_v51 = vld [vmem:[#allocation17 + $0x65c] sm:$0xf] }
 0x79f   : > { %v13904_v0 = vld [vmem:[#allocation17 + $0xb68] sm:$0xf]  ;;  %v13258_v50 = vld [vmem:[#allocation17 + $0x6a0] sm:$0xf0] }
 0x7a0   : > { %7395 = vmatmul.bf16.vlgmr.msra.gmra.mxu0 %v17981_v61  ;;  %7407 = vmatpush.bf16.msra.mxu1 %v14257_v48  ;;  %v14477_v48 = vor.u32 %v15773_v46, %v14474_v54  ;;  %v15701_v46 = vld [vmem:[#allocation17 + $0xda4] sm:$0xf]  ;;  %v14186_v54 = vld [vmem:[#allocation17 + $0xde8] sm:$0xf0] }
 0x7a1   : > { %7443 = vmatpush.bf16.msrb.mxu0 %v14117_v8  ;;  %7437 = vmatmul.bf16.vlgmr.msra.gmra.mxu3 %v17943_v16  ;;  %v14850_v8 = vor.u32 %v15870_v7, %v14849_v5  ;;  %v15522_v7 = vld [vmem:[#allocation17 + $0x80c] sm:$0xf] }
 0x7a2   : > { %7485 = vmatpush.bf16.msrb.mxu3 %v13545_v4  ;;  %7527 = vmatpush.bf16.msrb.mxu2 %v12973_v39  ;;  %v14854_v4 = vor.u32 %v15861_v36, %v14851_v21  ;;  %v15791_v39 = vld [vmem:[#allocation17 + $0x1074] sm:$0xf] }
 0x7a3   : > { %7479 = vmatmul.bf16.vlgmr.msra.gmra.mxu2 %v17941_v11  ;;  %8590 = vrot.lane.b32.xlu1 %v14850_v8, %s16247_s26  ;;  %v14549_v9 = vor.u32 %v15791_v39, %v14546_v62  ;;  %v13474_v36 = vld [vmem:[#allocation17 + $0x850] sm:$0xf0]  ;;  %v15388_v8 = vld [vmem:[#allocation17 + $0x3d4] sm:$0xf0]  ;;  %v14258_v39 = vld [vmem:[#allocation17 + $0xe78] sm:$0xf0] }
 0x7a4   : > { %7408 = vmatpush.bf16.msra.mxu1 %v14185_v12  ;;  %8592 = vrot.lane.b32.xlu0 %v14854_v4, %s16247_s26  ;;  %v15693_v12 = vld [vmem:[#allocation17 + $0xd5c] sm:$0xf0]  ;;  %v15719_v4 = vld [vmem:[#allocation17 + $0xe34] sm:$0xf] }
 0x7a5   : > { %7444 = vmatpush.bf16.msrb.mxu0 %v14045_v32  ;;  %v12613_v32 = vor.u32 %v15306_v20, %v12610_v15  ;;  %v14121_v22 = vor.u32 %v15693_v12, %v14120_v24  ;;  %v18090_v20 = vpop.f32.mrf.mxu1  ;;  %v14261_v15 = vor.u32 %v15719_v4, %v14258_v39  ;;  %v18098_v29 = vpop.f32.mrf.mxu0  ;;  %v13832_v24 = vld [vmem:[#allocation17 + $0xad8] sm:$0xf]  ;;  %v15621_v12 = vld [vmem:[#allocation17 + $0xb1c] sm:$0xf0] }
 0x7a6   : > { %7486 = vmatpush.bf16.msrb.mxu3 %v13473_v55  ;;  %7528 = vmatpush.bf16.msrb.mxu2 %v12901_v53  ;;  %v15575_v55 = vld [vmem:[#allocation17 + $0x9b4] sm:$0xf]  ;;  %v13682_v53 = vld [vmem:[#allocation17 + $0x9f8] sm:$0xf0]  ;;  %v18096_v28 = vpop.f32.mrf.mxu2  ;;  %v15316_v4 = vld [vmem:[#allocation17 + $0x194] sm:$0xf0] }
 0x7a7   : > { %7409 = vmatmul.bf16.vlgmr.msra.gmra.mxu1 %v17998_v26  ;;  %v13685_v25 = vor.u32 %v15575_v55, %v13682_v53  ;;  %v13405_v55 = vor.u32 %v15504_v3, %v13402_v49  ;;  %v14696_v53 = vld [vmem:[#allocation17 + $0x1198] sm:$0xf]  ;;  %v7159_v3 = vadd.f32 %v18083_v37, %v18085_v57  ;;  %v13616_v57 = vld [vmem:[#allocation17 + $0x928] sm:$0xf] }
 0x7a8   : > { %7457 = vmatpush.bf16.msrb.mxu1 %v14693_v41  ;;  %v13613_v41 = vor.u32 %v15557_v43, %v13610_v1  ;;  %v14189_v43 = vor.u32 %v15701_v46, %v14186_v54  ;;  %v14697_v1 = vor.u32 %v15837_v40, %v14696_v53  ;;  %v13114_v46 = vld [vmem:[#allocation17 + $0x580] sm:$0xf0]  ;;  %v12544_v54 = vld [vmem:[#allocation17 + $0xc0] sm:$0xf] }
 0x7a9   : > { %7445 = vmatpush.bf16.msrb.mxu0 %v13973_v14  ;;  %v12541_v14 = vor.u32 %v15288_v17, %v12538_v44  ;;  %v15639_v44 = vld [vmem:[#allocation17 + $0xbac] sm:$0xf0] }
 0x7aa   : > { %7487 = vmatpush.bf16.msrb.mxu3 %v13401_v34  ;;  %7529 = vmatpush.bf16.msrb.mxu2 %v12829_v42  ;;  %v15423_v34 = vld [vmem:[#allocation17 + $0x4ec] sm:$0xf0]  ;;  %v15270_v42 = vld [vmem:[#allocation17 + $0x2c] sm:$0xf] }
 0x7ab   : > { %v13041_v33 = vor.u32 %v15423_v34, %v13040_v10  ;;  %v12469_v23 = vor.u32 %v15270_v42, %v12466_v63  ;;  %v13905_v10 = vor.u32 %v15639_v44, %v13904_v0  ;;  %v14624_v42 = vld [vmem:[#allocation17 + $0x1108] sm:$0xf]  ;;  %v15819_v63 = vld [vmem:[#allocation17 + $0x114c] sm:$0xf0]  ;;  %v14408_v0 = vld [vmem:[#allocation17 + $0xf58] sm:$0xf] }
 0x7ac   : > { %7458 = vmatpush.bf16.msrb.mxu1 %v14621_v35  ;;  %v15675_v35 = vld [vmem:[#allocation17 + $0xccc] sm:$0xf0] }
 0x7ad   : > { %7446 = vmatpush.bf16.msrb.mxu0 %v13901_v30  ;;  %v12976_v30 = vld [vmem:[#allocation17 + $0x420] sm:$0xf]  ;;  %v14049_v62 = vor.u32 %v15675_v35, %v14048_v27  ;;  %v13760_v27 = vld [vmem:[#allocation17 + $0xa48] sm:$0xf]  ;;  %v15603_v35 = vld [vmem:[#allocation17 + $0xa8c] sm:$0xf0] }
 0x7ae   : > { %7488 = vmatpush.bf16.msrb.mxu3 %v13329_v45  ;;  %7530 = vmatpush.bf16.msrb.mxu2 %v12757_v13  ;;  %v15737_v45 = vld [vmem:[#allocation17 + $0xec4] sm:$0xf]  ;;  %v14330_v13 = vld [vmem:[#allocation17 + $0xf08] sm:$0xf0]  ;;  %v12977_v5 = vor.u32 %v15406_v2, %v12976_v30  ;;  %v15334_v30 = vld [vmem:[#allocation17 + $0x224] sm:$0xf0]  ;;  %v14625_v2 = vor.u32 %v15819_v63, %v14624_v42 }
 0x7af   : > { %v14333_v21 = vor.u32 %v15737_v45, %v14330_v13  ;;  %v13833_v45 = vor.u32 %v15621_v12, %v13832_v24  ;;  %v13261_v13 = vor.u32 %v15468_v51, %v13258_v50  ;;  %v15684_v63 = vld [vmem:[#allocation17 + $0xd1c] sm:$0xf]  ;;  %v14122_v24 = vld [vmem:[#allocation17 + $0xd60] sm:$0xf0]  ;;  %v15550_v50 = vld [vmem:[#allocation17 + $0x8e4] sm:$0xf0] }
 0x7b0   : > { %7459 = vmatpush.bf16.msrb.mxu1 %v14549_v9  ;;  %v12832_v9 = vld [vmem:[#allocation17 + $0x300] sm:$0xf] }
 0x7b1   : > { %7447 = vmatpush.bf16.msrb.mxu0 %v13829_v6  ;;  %v12904_v6 = vld [vmem:[#allocation17 + $0x390] sm:$0xf] }
 0x7b2   : > { %7489 = vmatpush.bf16.msrb.mxu3 %v13257_v58  ;;  %7531 = vmatpush.bf16.msrb.mxu2 %v12685_v18  ;;  %v13477_v58 = vor.u32 %v15522_v7, %v13474_v36  ;;  %v13976_v18 = vld [vmem:[#allocation17 + $0xbf8] sm:$0xf]  ;;  %v12905_v59 = vor.u32 %v15388_v8, %v12904_v6  ;;  %v15450_v7 = vld [vmem:[#allocation17 + $0x5cc] sm:$0xf]  ;;  %v13186_v36 = vld [vmem:[#allocation17 + $0x610] sm:$0xf0] }
 0x7b3   : > { %v12616_v8 = vld [vmem:[#allocation17 + $0x150] sm:$0xf] }
 0x7b4   : > { %7460 = vmatpush.bf16.msrb.mxu1 %v14477_v48  ;;  %v15486_v48 = vld [vmem:[#allocation17 + $0x6ec] sm:$0xf] }
 0x7b5   : > { %7448 = vmatpush.bf16.msrb.mxu0 %v13757_v60  ;;  %v15370_v60 = vld [vmem:[#allocation17 + $0x344] sm:$0xf0] }
 0x7b6   : > { %7490 = vmatpush.bf16.msrb.mxu3 %v13185_v19  ;;  %7532 = vmatpush.bf16.msrb.mxu2 %v12613_v32  ;;  %v18094_v19 = vpop.f32.mrf.mxu3  ;;  %v13977_v32 = vor.u32 %v15657_v52, %v13976_v18  ;;  %v12833_v17 = vor.u32 %v15370_v60, %v12832_v9  ;;  %v14480_v18 = vld [vmem:[#allocation17 + $0xfe8] sm:$0xf]  ;;  %v13688_v52 = vld [vmem:[#allocation17 + $0x9b8] sm:$0xf]  ;;  %v15585_v9 = vld [vmem:[#allocation17 + $0x9fc] sm:$0xf0] }
 0x7b7   : > { %v15432_v60 = vld [vmem:[#allocation17 + $0x53c] sm:$0xf] }
 0x7b8   : > { %7461 = vmatpush.bf16.msrb.mxu1 %v14405_v56  ;;  %v13117_v37 = vor.u32 %v15432_v60, %v13114_v46  ;;  %v15648_v60 = vld [vmem:[#allocation17 + $0xbfc] sm:$0xf]  ;;  %v13978_v46 = vld [vmem:[#allocation17 + $0xc40] sm:$0xf0] }
 0x7b9   : > { %7449 = vmatpush.bf16.msrb.mxu0 %v13685_v25  ;;  %v13330_v25 = vld [vmem:[#allocation17 + $0x730] sm:$0xf0] }
 0x7ba   : > { %7491 = vmatpush.bf16.msrb.mxu3 %v13113_v38  ;;  %7533 = vmatpush.bf16.msrb.mxu2 %v12541_v14  ;;  %v12760_v38 = vld [vmem:[#allocation17 + $0x270] sm:$0xf]  ;;  %v15352_v14 = vld [vmem:[#allocation17 + $0x2b4] sm:$0xf0]  ;;  %v13333_v34 = vor.u32 %v15486_v48, %v13330_v25  ;;  %v13689_v48 = vor.u32 %v15585_v9, %v13688_v52  ;;  %v15729_v52 = vld [vmem:[#allocation17 + $0xe7c] sm:$0xf0] }
 0x7bb   : > { %v12761_v56 = vor.u32 %v15352_v14, %v12760_v38  ;;  %v15567_v25 = vld [vmem:[#allocation17 + $0x96c] sm:$0xf0] }
 0x7bc   : > { %7462 = vmatpush.bf16.msrb.mxu1 %v14333_v21  ;;  %v7200_v21 = vpop.f32.mrf.mxu2 }
 0x7bd   : > { %7450 = vmatpush.bf16.msrb.mxu0 %v13613_v41  ;;  %v12688_v41 = vld [vmem:[#allocation17 + $0x1e0] sm:$0xf]  ;;  %v7228_v6 = vpop.f32.mrf.mxu0 }
 0x7be   : > { %7492 = vmatpush.bf16.msrb.mxu3 %v13041_v33  ;;  %7534 = vmatpush.bf16.msrb.mxu2 %v12469_v23  ;;  %v7214_v33 = vpop.f32.mrf.mxu3  ;;  %v18100_v23 = vpop.f32.mrf.mxu1 }
 0x7bf   : > { %v7215_v49 = vadd.f32 %v7214_v33, %v7200_v21  ;;  %v15666_v21 = vld [vmem:[#allocation17 + $0xc8c] sm:$0xf] }
 0x7c0   : > { %7451 = vmatmul.bf16.vlgmr.msrb.gmra.mxu0 %v17981_v61  ;;  %7463 = vmatpush.bf16.msrb.mxu1 %v14261_v15  ;;  %v12617_v15 = vor.u32 %v15316_v4, %v12616_v8  ;;  %v13480_v8 = vld [vmem:[#allocation17 + $0x810] sm:$0xf] }
 0x7c1   : > { %7499 = vmatpush.bf16.msra.mxu0 %v14121_v22  ;;  %7493 = vmatmul.bf16.vlgmr.msrb.gmra.mxu3 %v17943_v16  ;;  %v14552_v22 = vld [vmem:[#allocation17 + $0x1078] sm:$0xf]  ;;  %v7229_v53 = vadd.f32 %v7228_v6, %v7215_v49  ;;  %v14050_v6 = vld [vmem:[#allocation17 + $0xcd0] sm:$0xf0] }
 0x7c2   : > { %7541 = vmatpush.bf16.msra.mxu3 %v13549_v31  ;;  %7583 = vmatpush.bf16.msra.mxu2 %v12977_v5  ;;  %v15801_v31 = vld [vmem:[#allocation17 + $0x10bc] sm:$0xf0]  ;;  %v12689_v5 = vor.u32 %v15334_v30, %v12688_v41  ;;  %v15397_v41 = vld [vmem:[#allocation17 + $0x424] sm:$0xf]  ;;  %v12978_v30 = vld [vmem:[#allocation17 + $0x468] sm:$0xf0] }
 0x7c3   : > { %7535 = vmatmul.bf16.vlgmr.msrb.gmra.mxu2 %v17941_v11  ;;  %v14553_v39 = vor.u32 %v15801_v31, %v14552_v22  ;;  %v14336_v22 = vld [vmem:[#allocation17 + $0xec8] sm:$0xf]  ;;  %v15747_v31 = vld [vmem:[#allocation17 + $0xf0c] sm:$0xf0] }
 0x7c4   : > { %7464 = vmatpush.bf16.msrb.mxu1 %v14189_v43  ;;  %v15414_v43 = vld [vmem:[#allocation17 + $0x4ac] sm:$0xf]  ;;  %v14337_v4 = vor.u32 %v15747_v31, %v14336_v22 }
 0x7c5   : > { %7500 = vmatpush.bf16.msra.mxu0 %v14049_v62  ;;  %v13761_v62 = vor.u32 %v15603_v35, %v13760_v27  ;;  %v7230_v33 = vpop.f32.mrf.mxu0  ;;  %v14125_v35 = vor.u32 %v15684_v63, %v14122_v24  ;;  %v15810_v24 = vld [vmem:[#allocation17 + $0x110c] sm:$0xf] }
 0x7c6   : > { %7542 = vmatpush.bf16.msra.mxu3 %v13477_v58  ;;  %7584 = vmatpush.bf16.msra.mxu2 %v12905_v59  ;;  %v13189_v58 = vor.u32 %v15450_v7, %v13186_v36  ;;  %v15783_v59 = vld [vmem:[#allocation17 + $0x102c] sm:$0xf0]  ;;  %v7242_v44 = vpop.f32.mrf.mxu1  ;;  %v7216_v42 = vpop.f32.mrf.mxu3  ;;  %v12981_v36 = vor.u32 %v15397_v41, %v12978_v30  ;;  %v13834_v41 = vld [vmem:[#allocation17 + $0xb20] sm:$0xf0]  ;;  %v13264_v30 = vld [vmem:[#allocation17 + $0x660] sm:$0xf] }
 0x7c7   : > { %7465 = vmatmul.bf16.vlgmr.msrb.gmra.mxu1 %v17998_v26  ;;  %v14481_v40 = vor.u32 %v15783_v59, %v14480_v18  ;;  %v7243_v14 = vadd.f32 %v7242_v44, %v7229_v53  ;;  %v14264_v59 = vld [vmem:[#allocation17 + $0xe38] sm:$0xf]  ;;  %v15514_v53 = vld [vmem:[#allocation17 + $0x7c4] sm:$0xf0]  ;;  %v13981_v44 = vor.u32 %v15648_v60, %v13978_v46  ;;  %v13120_v60 = vld [vmem:[#allocation17 + $0x540] sm:$0xf] }
 0x7c8   : > { %7513 = vmatpush.bf16.msra.mxu1 %v14697_v1  ;;  %v15442_v46 = vld [vmem:[#allocation17 + $0x584] sm:$0xf0] }
 0x7c9   : > { %7501 = vmatpush.bf16.msra.mxu0 %v13977_v32  ;;  %v15298_v32 = vld [vmem:[#allocation17 + $0x104] sm:$0xf0] }
 0x7ca   : > { %7543 = vmatpush.bf16.msra.mxu3 %v13405_v55  ;;  %7585 = vmatpush.bf16.msra.mxu2 %v12833_v17  ;;  %v7173_v55 = vadd.f32 %v18087_v47, %v7159_v3  ;;  %v15765_v17 = vld [vmem:[#allocation17 + $0xf9c] sm:$0xf0]  ;;  %v12545_v1 = vor.u32 %v15298_v32, %v12544_v54  ;;  %v12472_v47 = vld [vmem:[#allocation17 + $0x30] sm:$0xf] }
 0x7cb   : > { %v14409_v51 = vor.u32 %v15765_v17, %v14408_v0  ;;  %v13408_v54 = vld [vmem:[#allocation17 + $0x780] sm:$0xf]  ;;  %v12834_v0 = vld [vmem:[#allocation17 + $0x348] sm:$0xf0]  ;;  %v15711_v17 = vld [vmem:[#allocation17 + $0xdec] sm:$0xf0] }
 0x7cc   : > { %7514 = vmatpush.bf16.msra.mxu1 %v14625_v2  ;;  %v7187_v38 = vadd.f32 %v18090_v20, %v7173_v55  ;;  %v7161_v2 = vadd.f32 %v18094_v19, %v18096_v28  ;;  %v7202_v20 = vpop.f32.mrf.mxu2  ;;  %v14265_v55 = vor.u32 %v15729_v52, %v14264_v59  ;;  %v15774_v52 = vld [vmem:[#allocation17 + $0xfec] sm:$0xf] }
 0x7cd   : > { %7502 = vmatpush.bf16.msra.mxu0 %v13905_v10  ;;  %v13042_v10 = vld [vmem:[#allocation17 + $0x4f0] sm:$0xf0]  ;;  %v7217_v27 = vadd.f32 %v7216_v42, %v7202_v20  ;;  %v15325_v20 = vld [vmem:[#allocation17 + $0x1e4] sm:$0xf] }
 0x7ce   : > { %7544 = vmatpush.bf16.msra.mxu3 %v13333_v34  ;;  %7586 = vmatpush.bf16.msra.mxu2 %v12761_v56  ;;  %v15280_v34 = vld [vmem:[#allocation17 + $0x74] sm:$0xf0]  ;;  %v13552_v56 = vld [vmem:[#allocation17 + $0x8a0] sm:$0xf]  ;;  %v7921_v12 = vpack.c.bf16 %v7243_v14, %v7187_v38  ;;  %v7175_v19 = vadd.f32 %v18098_v29, %v7161_v2  ;;  %v7244_v18 = vpop.f32.mrf.mxu1  ;;  %v13906_v38 = vld [vmem:[#allocation17 + $0xbb0] sm:$0xf0] }
 0x7cf   : > { %v13553_v7 = vor.u32 %v15550_v50, %v13552_v56  ;;  %v7231_v28 = vadd.f32 %v7230_v33, %v7217_v27  ;;  %v13336_v14 = vld [vmem:[#allocation17 + $0x6f0] sm:$0xf]  ;;  %v14626_v56 = vld [vmem:[#allocation17 + $0x1150] sm:$0xf0]  ;;  %v15478_v2 = vld [vmem:[#allocation17 + $0x6a4] sm:$0xf0] }
 0x7d0   : > { %7515 = vmatpush.bf16.msra.mxu1 %v14553_v39  ;;  %7939 = vst [vmem:[#allocation6 + $0x10] sm:$0xff] %v7921_v12  ;;  %v15532_v39 = vld [vmem:[#allocation17 + $0x854] sm:$0xf0]  ;;  %v7189_v3 = vadd.f32 %v18100_v23, %v7175_v19  ;;  %v14192_v23 = vld [vmem:[#allocation17 + $0xda8] sm:$0xf] }
 0x7d1   : > { %7503 = vmatpush.bf16.msra.mxu0 %v13833_v45  ;;  %v13617_v45 = vor.u32 %v15567_v25, %v13616_v57  ;;  %v7245_v49 = vadd.f32 %v7244_v18, %v7231_v28  ;;  %v13481_v29 = vor.u32 %v15532_v39, %v13480_v8  ;;  %v13409_v57 = vor.u32 %v15514_v53, %v13408_v54  ;;  %v15612_v12 = vld [vmem:[#allocation17 + $0xadc] sm:$0xf]  ;;  %v12690_v33 = vld [vmem:[#allocation17 + $0x228] sm:$0xf0]  ;;  %v13762_v28 = vld [vmem:[#allocation17 + $0xa90] sm:$0xf0] }
 0x7d2   : > { %7545 = vmatpush.bf16.msra.mxu3 %v13261_v13  ;;  %7587 = vmatpush.bf16.msra.mxu2 %v12689_v5  ;;  %v13045_v13 = vor.u32 %v15414_v43, %v13042_v10  ;;  %v12473_v5 = vor.u32 %v15280_v34, %v12472_v47  ;;  %v15630_v43 = vld [vmem:[#allocation17 + $0xb6c] sm:$0xf]  ;;  %v15496_v10 = vld [vmem:[#allocation17 + $0x734] sm:$0xf0]  ;;  %v15343_v47 = vld [vmem:[#allocation17 + $0x274] sm:$0xf]  ;;  %v12693_v8 = vor.u32 %v15325_v20, %v12690_v33 }
 0x7d3   : > { %v7930_v32 = vpack.c.bf16 %v7245_v49, %v7189_v3  ;;  %v12762_v34 = vld [vmem:[#allocation17 + $0x2b8] sm:$0xf0]  ;;  %v13909_v63 = vor.u32 %v15630_v43, %v13906_v38  ;;  %v15594_v19 = vld [vmem:[#allocation17 + $0xa4c] sm:$0xf]  ;;  %v15460_v39 = vld [vmem:[#allocation17 + $0x614] sm:$0xf0] }
 0x7d4   : > { %7516 = vmatpush.bf16.msra.mxu1 %v14481_v40  ;;  %v15361_v40 = vld [vmem:[#allocation17 + $0x304] sm:$0xf]  ;;  %v12765_v50 = vor.u32 %v15343_v47, %v12762_v34  ;;  %v13765_v59 = vor.u32 %v15594_v19, %v13762_v28  ;;  %v14482_v3 = vld [vmem:[#allocation17 + $0x1030] sm:$0xf0]  ;;  %v12474_v43 = vld [vmem:[#allocation17 + $0x78] sm:$0xf0]  ;;  %v18117_v34 = vpop.f32.mrf.mxu3 }
 0x7d5   : > { %7504 = vmatpush.bf16.msra.mxu0 %v13761_v62  ;;  %v15379_v62 = vld [vmem:[#allocation17 + $0x394] sm:$0xf]  ;;  %7948 = vst [vmem:[#allocation6 + $0x58] sm:$0xff] %v7930_v32  ;;  %v12837_v25 = vor.u32 %v15361_v40, %v12834_v0  ;;  %v15289_v54 = vld [vmem:[#allocation17 + $0xc4] sm:$0xf] }
 0x7d6   : > { %7546 = vmatpush.bf16.msra.mxu3 %v13189_v58  ;;  %7588 = vmatpush.bf16.msra.mxu2 %v12617_v15  ;;  %v12906_v58 = vld [vmem:[#allocation17 + $0x3d8] sm:$0xf0]  ;;  %v14053_v15 = vor.u32 %v15666_v21, %v14050_v6  ;;  %v14554_v21 = vld [vmem:[#allocation17 + $0x10c0] sm:$0xf0]  ;;  %v13265_v6 = vor.u32 %v15478_v2, %v13264_v30  ;;  %v12546_v32 = vld [vmem:[#allocation17 + $0x108] sm:$0xf0] }
 0x7d7   : > { %v12909_v9 = vor.u32 %v15379_v62, %v12906_v58  ;;  %v14857_v31 = vld [vmem:[#allocation6 + $0x10] sm:$0xf]  ;;  %v12618_v58 = vld [vmem:[#allocation17 + $0x198] sm:$0xf0]  ;;  %v14410_v0 = vld [vmem:[#allocation17 + $0xfa0] sm:$0xf0] }
 0x7d8   : > { %7517 = vmatpush.bf16.msra.mxu1 %v14409_v51  ;;  %v13337_v51 = vor.u32 %v15496_v10, %v13336_v14  ;;  %v15307_v62 = vld [vmem:[#allocation17 + $0x154] sm:$0xf]  ;;  %v15756_v40 = vld [vmem:[#allocation17 + $0xf5c] sm:$0xf]  ;;  %v14128_v38 = vld [vmem:[#allocation17 + $0xd20] sm:$0xf] }
 0x7d9   : > { %7505 = vmatpush.bf16.msra.mxu0 %v13689_v48  ;;  %v15828_v48 = vld [vmem:[#allocation17 + $0x119c] sm:$0xf]  ;;  %v14413_v14 = vor.u32 %v15756_v40, %v14410_v0  ;;  %v15541_v10 = vld [vmem:[#allocation17 + $0x8a4] sm:$0xf]  ;;  %v13554_v47 = vld [vmem:[#allocation17 + $0x8e8] sm:$0xf0] }
 0x7da   : > { %7547 = vmatpush.bf16.msra.mxu3 %v13117_v37  ;;  %7589 = vmatpush.bf16.msra.mxu2 %v12545_v1  ;;  %v14698_v37 = vld [vmem:[#allocation17 + $0x11e0] sm:$0xf0]  ;;  %v14193_v1 = vor.u32 %v15711_v17, %v14192_v23  ;;  %v15558_v23 = vld [vmem:[#allocation17 + $0x92c] sm:$0xf]  ;;  %v13121_v17 = vor.u32 %v15442_v46, %v13120_v60  ;;  %v13557_v20 = vor.u32 %v15541_v10, %v13554_v47  ;;  %v14056_v33 = vld [vmem:[#allocation17 + $0xc90] sm:$0xf] }
 0x7db   : > { %v14701_v42 = vor.u32 %v15828_v48, %v14698_v37  ;;  %v13618_v48 = vld [vmem:[#allocation17 + $0x970] sm:$0xf0]  ;;  %v13048_v37 = vld [vmem:[#allocation17 + $0x4b0] sm:$0xf]  ;;  %v15658_v28 = vld [vmem:[#allocation17 + $0xc44] sm:$0xf0] }
 0x7dc   : > { %7518 = vmatpush.bf16.msra.mxu1 %v14337_v4  ;;  %v14859_v22 = vld [vmem:[#allocation6 + $0x58] sm:$0xf0]  ;;  %v15871_v27 = vld [vmem:[#allocation6 + $0x54] sm:$0xf0]  ;;  %v13192_v4 = vld [vmem:[#allocation17 + $0x5d0] sm:$0xf] }
 0x7dd   : > { %7506 = vmatpush.bf16.msra.mxu0 %v13617_v45  ;;  %v15862_v45 = vld [vmem:[#allocation6 + $0x14] sm:$0xf]  ;;  %v13193_v49 = vor.u32 %v15460_v39, %v13192_v4  ;;  %v18121_v30 = vpop.f32.mrf.mxu0  ;;  %v15505_v4 = vld [vmem:[#allocation17 + $0x784] sm:$0xf]  ;;  %v13410_v39 = vld [vmem:[#allocation17 + $0x7c8] sm:$0xf0] }
 0x7de   : > { %7548 = vmatpush.bf16.msra.mxu3 %v13045_v13  ;;  %7590 = vmatpush.bf16.msra.mxu2 %v12473_v5  ;;  %v14629_v13 = vor.u32 %v15810_v24, %v14626_v56  ;;  %v13837_v5 = vor.u32 %v15612_v12, %v13834_v41  ;;  %v15407_v24 = vld [vmem:[#allocation17 + $0x46c] sm:$0xf0]  ;;  %v18119_v41 = vpop.f32.mrf.mxu2  ;;  %v15838_v60 = vld [vmem:[#allocation17 + $0x11e4] sm:$0xf0]  ;;  %v15469_v10 = vld [vmem:[#allocation17 + $0x664] sm:$0xf] }
 0x7df   : > { %v13912_v46 = vld [vmem:[#allocation17 + $0xb70] sm:$0xf]  ;;  %v13266_v47 = vld [vmem:[#allocation17 + $0x6a8] sm:$0xf0] }
 0x7e0   : > { %7507 = vmatmul.bf16.vlgmr.msra.gmra.mxu0 %v17981_v61  ;;  %7519 = vmatpush.bf16.msra.mxu1 %v14265_v55  ;;  %v14485_v55 = vor.u32 %v15774_v52, %v14482_v3  ;;  %v15702_v52 = vld [vmem:[#allocation17 + $0xdac] sm:$0xf]  ;;  %v14194_v3 = vld [vmem:[#allocation17 + $0xdf0] sm:$0xf0] }
 0x7e1   : > { %7555 = vmatpush.bf16.msrb.mxu0 %v14125_v35  ;;  %7549 = vmatmul.bf16.vlgmr.msra.gmra.mxu3 %v17943_v16  ;;  %v14862_v35 = vor.u32 %v15862_v45, %v14859_v22  ;;  %v15523_v22 = vld [vmem:[#allocation17 + $0x814] sm:$0xf] }
 0x7e2   : > { %7597 = vmatpush.bf16.msrb.mxu3 %v13553_v7  ;;  %7639 = vmatpush.bf16.msrb.mxu2 %v12981_v36  ;;  %v14858_v7 = vor.u32 %v15871_v27, %v14857_v31  ;;  %v15792_v36 = vld [vmem:[#allocation17 + $0x107c] sm:$0xf] }
 0x7e3   : > { %7591 = vmatmul.bf16.vlgmr.msra.gmra.mxu2 %v17941_v11  ;;  %8596 = vrot.lane.b32.xlu1 %v14862_v35, %s16247_s26  ;;  %v14557_v18 = vor.u32 %v15792_v36, %v14554_v21  ;;  %v13482_v31 = vld [vmem:[#allocation17 + $0x858] sm:$0xf0]  ;;  %v15389_v35 = vld [vmem:[#allocation17 + $0x3dc] sm:$0xf0]  ;;  %v14266_v36 = vld [vmem:[#allocation17 + $0xe80] sm:$0xf0] }
 0x7e4   : > { %7520 = vmatpush.bf16.msra.mxu1 %v14193_v1  ;;  %8594 = vrot.lane.b32.xlu2 %v14858_v7, %s16247_s26  ;;  %v15694_v1 = vld [vmem:[#allocation17 + $0xd64] sm:$0xf0]  ;;  %v15720_v7 = vld [vmem:[#allocation17 + $0xe3c] sm:$0xf] }
 0x7e5   : > { %7556 = vmatpush.bf16.msrb.mxu0 %v14053_v15  ;;  %v12621_v15 = vor.u32 %v15307_v62, %v12618_v58  ;;  %v14129_v2 = vor.u32 %v15694_v1, %v14128_v38  ;;  %v18124_v62 = vpop.f32.mrf.mxu1  ;;  %v14269_v58 = vor.u32 %v15720_v7, %v14266_v36  ;;  %v18132_v0 = vpop.f32.mrf.mxu0  ;;  %v13840_v38 = vld [vmem:[#allocation17 + $0xae0] sm:$0xf]  ;;  %v15622_v1 = vld [vmem:[#allocation17 + $0xb24] sm:$0xf0] }
 0x7e6   : > { %7598 = vmatpush.bf16.msrb.mxu3 %v13481_v29  ;;  %7640 = vmatpush.bf16.msrb.mxu2 %v12909_v9  ;;  %v15576_v29 = vld [vmem:[#allocation17 + $0x9bc] sm:$0xf]  ;;  %v13690_v9 = vld [vmem:[#allocation17 + $0xa00] sm:$0xf0]  ;;  %v18130_v40 = vpop.f32.mrf.mxu2  ;;  %v15317_v7 = vld [vmem:[#allocation17 + $0x19c] sm:$0xf0] }
 0x7e7   : > { %7521 = vmatmul.bf16.vlgmr.msra.gmra.mxu1 %v17998_v26  ;;  %v13693_v53 = vor.u32 %v15576_v29, %v13690_v9  ;;  %v13413_v29 = vor.u32 %v15505_v4, %v13410_v39  ;;  %v14704_v9 = vld [vmem:[#allocation17 + $0x11a0] sm:$0xf]  ;;  %v7271_v4 = vadd.f32 %v18117_v34, %v18119_v41  ;;  %v13624_v41 = vld [vmem:[#allocation17 + $0x930] sm:$0xf] }
 0x7e8   : > { %7569 = vmatpush.bf16.msrb.mxu1 %v14701_v42  ;;  %v13621_v42 = vor.u32 %v15558_v23, %v13618_v48  ;;  %v14197_v23 = vor.u32 %v15702_v52, %v14194_v3  ;;  %v14705_v48 = vor.u32 %v15838_v60, %v14704_v9  ;;  %v13122_v52 = vld [vmem:[#allocation17 + $0x588] sm:$0xf0]  ;;  %v12552_v3 = vld [vmem:[#allocation17 + $0xc8] sm:$0xf] }
 0x7e9   : > { %7557 = vmatpush.bf16.msrb.mxu0 %v13981_v44  ;;  %v12549_v44 = vor.u32 %v15289_v54, %v12546_v32  ;;  %v15640_v32 = vld [vmem:[#allocation17 + $0xbb4] sm:$0xf0] }
 0x7ea   : > { %7599 = vmatpush.bf16.msrb.mxu3 %v13409_v57  ;;  %7641 = vmatpush.bf16.msrb.mxu2 %v12837_v25  ;;  %v15424_v57 = vld [vmem:[#allocation17 + $0x4f4] sm:$0xf0]  ;;  %v15271_v25 = vld [vmem:[#allocation17 + $0x34] sm:$0xf] }
 0x7eb   : > { %v13049_v56 = vor.u32 %v15424_v57, %v13048_v37  ;;  %v12477_v12 = vor.u32 %v15271_v25, %v12474_v43  ;;  %v13913_v37 = vor.u32 %v15640_v32, %v13912_v46  ;;  %v14632_v25 = vld [vmem:[#allocation17 + $0x1110] sm:$0xf]  ;;  %v15820_v43 = vld [vmem:[#allocation17 + $0x1154] sm:$0xf0]  ;;  %v14416_v46 = vld [vmem:[#allocation17 + $0xf60] sm:$0xf] }
 0x7ec   : > { %7570 = vmatpush.bf16.msrb.mxu1 %v14629_v13  ;;  %v15676_v13 = vld [vmem:[#allocation17 + $0xcd4] sm:$0xf0] }
 0x7ed   : > { %7558 = vmatpush.bf16.msrb.mxu0 %v13909_v63  ;;  %v12984_v63 = vld [vmem:[#allocation17 + $0x428] sm:$0xf]  ;;  %v14057_v21 = vor.u32 %v15676_v13, %v14056_v33  ;;  %v13768_v33 = vld [vmem:[#allocation17 + $0xa50] sm:$0xf]  ;;  %v15604_v13 = vld [vmem:[#allocation17 + $0xa94] sm:$0xf0] }
 0x7ee   : > { %7600 = vmatpush.bf16.msrb.mxu3 %v13337_v51  ;;  %7642 = vmatpush.bf16.msrb.mxu2 %v12765_v50  ;;  %v15738_v51 = vld [vmem:[#allocation17 + $0xecc] sm:$0xf]  ;;  %v14338_v50 = vld [vmem:[#allocation17 + $0xf10] sm:$0xf0]  ;;  %v12985_v45 = vor.u32 %v15407_v24, %v12984_v63  ;;  %v15335_v63 = vld [vmem:[#allocation17 + $0x22c] sm:$0xf0]  ;;  %v14633_v24 = vor.u32 %v15820_v43, %v14632_v25 }
 0x7ef   : > { %v14341_v27 = vor.u32 %v15738_v51, %v14338_v50  ;;  %v13841_v51 = vor.u32 %v15622_v1, %v13840_v38  ;;  %v13269_v50 = vor.u32 %v15469_v10, %v13266_v47  ;;  %v15685_v43 = vld [vmem:[#allocation17 + $0xd24] sm:$0xf]  ;;  %v14130_v38 = vld [vmem:[#allocation17 + $0xd68] sm:$0xf0]  ;;  %v15551_v47 = vld [vmem:[#allocation17 + $0x8ec] sm:$0xf0] }
 0x7f0   : > { %7571 = vmatpush.bf16.msrb.mxu1 %v14557_v18  ;;  %v12840_v18 = vld [vmem:[#allocation17 + $0x308] sm:$0xf] }
 0x7f1   : > { %7559 = vmatpush.bf16.msrb.mxu0 %v13837_v5  ;;  %v12912_v5 = vld [vmem:[#allocation17 + $0x398] sm:$0xf] }
 0x7f2   : > { %7601 = vmatpush.bf16.msrb.mxu3 %v13265_v6  ;;  %7643 = vmatpush.bf16.msrb.mxu2 %v12693_v8  ;;  %v13485_v6 = vor.u32 %v15523_v22, %v13482_v31  ;;  %v13984_v8 = vld [vmem:[#allocation17 + $0xc00] sm:$0xf]  ;;  %v12913_v19 = vor.u32 %v15389_v35, %v12912_v5  ;;  %v15451_v22 = vld [vmem:[#allocation17 + $0x5d4] sm:$0xf]  ;;  %v13194_v31 = vld [vmem:[#allocation17 + $0x618] sm:$0xf0] }
 0x7f3   : > { %v12624_v35 = vld [vmem:[#allocation17 + $0x158] sm:$0xf] }
 0x7f4   : > { %7572 = vmatpush.bf16.msrb.mxu1 %v14485_v55  ;;  %v15487_v55 = vld [vmem:[#allocation17 + $0x6f4] sm:$0xf] }
 0x7f5   : > { %7560 = vmatpush.bf16.msrb.mxu0 %v13765_v59  ;;  %v15371_v59 = vld [vmem:[#allocation17 + $0x34c] sm:$0xf0] }
 0x7f6   : > { %7602 = vmatpush.bf16.msrb.mxu3 %v13193_v49  ;;  %7644 = vmatpush.bf16.msrb.mxu2 %v12621_v15  ;;  %v18128_v49 = vpop.f32.mrf.mxu3  ;;  %v13985_v15 = vor.u32 %v15658_v28, %v13984_v8  ;;  %v12841_v54 = vor.u32 %v15371_v59, %v12840_v18  ;;  %v14488_v8 = vld [vmem:[#allocation17 + $0xff0] sm:$0xf]  ;;  %v13696_v28 = vld [vmem:[#allocation17 + $0x9c0] sm:$0xf]  ;;  %v15586_v18 = vld [vmem:[#allocation17 + $0xa04] sm:$0xf0] }
 0x7f7   : > { %v15433_v59 = vld [vmem:[#allocation17 + $0x544] sm:$0xf] }
 0x7f8   : > { %7573 = vmatpush.bf16.msrb.mxu1 %v14413_v14  ;;  %v13125_v34 = vor.u32 %v15433_v59, %v13122_v52  ;;  %v15649_v59 = vld [vmem:[#allocation17 + $0xc04] sm:$0xf]  ;;  %v13986_v52 = vld [vmem:[#allocation17 + $0xc48] sm:$0xf0] }
 0x7f9   : > { %7561 = vmatpush.bf16.msrb.mxu0 %v13693_v53  ;;  %v13338_v53 = vld [vmem:[#allocation17 + $0x738] sm:$0xf0] }
 0x7fa   : > { %7603 = vmatpush.bf16.msrb.mxu3 %v13121_v17  ;;  %7645 = vmatpush.bf16.msrb.mxu2 %v12549_v44  ;;  %v12768_v17 = vld [vmem:[#allocation17 + $0x278] sm:$0xf]  ;;  %v15353_v44 = vld [vmem:[#allocation17 + $0x2bc] sm:$0xf0]  ;;  %v13341_v57 = vor.u32 %v15487_v55, %v13338_v53  ;;  %v13697_v55 = vor.u32 %v15586_v18, %v13696_v28  ;;  %v15730_v28 = vld [vmem:[#allocation17 + $0xe84] sm:$0xf0] }
 0x7fb   : > { %v12769_v14 = vor.u32 %v15353_v44, %v12768_v17  ;;  %v15568_v53 = vld [vmem:[#allocation17 + $0x974] sm:$0xf0] }
 0x7fc   : > { %7574 = vmatpush.bf16.msrb.mxu1 %v14341_v27  ;;  %v7312_v27 = vpop.f32.mrf.mxu2 }
 0x7fd   : > { %7562 = vmatpush.bf16.msrb.mxu0 %v13621_v42  ;;  %v12696_v42 = vld [vmem:[#allocation17 + $0x1e8] sm:$0xf]  ;;  %v7340_v5 = vpop.f32.mrf.mxu0 }
 0x7fe   : > { %7604 = vmatpush.bf16.msrb.mxu3 %v13049_v56  ;;  %7646 = vmatpush.bf16.msrb.mxu2 %v12477_v12  ;;  %v7326_v56 = vpop.f32.mrf.mxu3  ;;  %v18134_v12 = vpop.f32.mrf.mxu1 }
 0x7ff   : > { %v7327_v39 = vadd.f32 %v7326_v56, %v7312_v27  ;;  %v15667_v27 = vld [vmem:[#allocation17 + $0xc94] sm:$0xf] }
 0x800   : > { %7563 = vmatmul.bf16.vlgmr.msrb.gmra.mxu0 %v17981_v61  ;;  %7575 = vmatpush.bf16.msrb.mxu1 %v14269_v58  ;;  %v12625_v58 = vor.u32 %v15317_v7, %v12624_v35  ;;  %v13488_v35 = vld [vmem:[#allocation17 + $0x818] sm:$0xf] }
 0x801   : > { %7611 = vmatpush.bf16.msra.mxu0 %v14129_v2  ;;  %7605 = vmatmul.bf16.vlgmr.msrb.gmra.mxu3 %v17943_v16  ;;  %v14560_v2 = vld [vmem:[#allocation17 + $0x1080] sm:$0xf]  ;;  %v7341_v9 = vadd.f32 %v7340_v5, %v7327_v39  ;;  %v14058_v5 = vld [vmem:[#allocation17 + $0xcd8] sm:$0xf0] }
 0x802   : > { %7653 = vmatpush.bf16.msra.mxu3 %v13557_v20  ;;  %7695 = vmatpush.bf16.msra.mxu2 %v12985_v45  ;;  %v15802_v20 = vld [vmem:[#allocation17 + $0x10c4] sm:$0xf0]  ;;  %v12697_v45 = vor.u32 %v15335_v63, %v12696_v42  ;;  %v15398_v42 = vld [vmem:[#allocation17 + $0x42c] sm:$0xf]  ;;  %v12986_v63 = vld [vmem:[#allocation17 + $0x470] sm:$0xf0] }
 0x803   : > { %7647 = vmatmul.bf16.vlgmr.msrb.gmra.mxu2 %v17941_v11  ;;  %v14561_v36 = vor.u32 %v15802_v20, %v14560_v2  ;;  %v14344_v2 = vld [vmem:[#allocation17 + $0xed0] sm:$0xf]  ;;  %v15748_v20 = vld [vmem:[#allocation17 + $0xf14] sm:$0xf0] }
 0x804   : > { %7576 = vmatpush.bf16.msrb.mxu1 %v14197_v23  ;;  %v15415_v23 = vld [vmem:[#allocation17 + $0x4b4] sm:$0xf]  ;;  %v14345_v7 = vor.u32 %v15748_v20, %v14344_v2 }
 0x805   : > { %7612 = vmatpush.bf16.msra.mxu0 %v14057_v21  ;;  %v13769_v21 = vor.u32 %v15604_v13, %v13768_v33  ;;  %v7342_v56 = vpop.f32.mrf.mxu0  ;;  %v14133_v13 = vor.u32 %v15685_v43, %v14130_v38  ;;  %v15811_v38 = vld [vmem:[#allocation17 + $0x1114] sm:$0xf] }
 0x806   : > { %7654 = vmatpush.bf16.msra.mxu3 %v13485_v6  ;;  %7696 = vmatpush.bf16.msra.mxu2 %v12913_v19  ;;  %v13197_v6 = vor.u32 %v15451_v22, %v13194_v31  ;;  %v15784_v19 = vld [vmem:[#allocation17 + $0x1034] sm:$0xf0]  ;;  %v7354_v32 = vpop.f32.mrf.mxu1  ;;  %v7328_v25 = vpop.f32.mrf.mxu3  ;;  %v12989_v31 = vor.u32 %v15398_v42, %v12986_v63  ;;  %v13842_v42 = vld [vmem:[#allocation17 + $0xb28] sm:$0xf0]  ;;  %v13272_v63 = vld [vmem:[#allocation17 + $0x668] sm:$0xf] }
 0x807   : > { %7577 = vmatmul.bf16.vlgmr.msrb.gmra.mxu1 %v17998_v26  ;;  %v14489_v60 = vor.u32 %v15784_v19, %v14488_v8  ;;  %v7355_v44 = vadd.f32 %v7354_v32, %v7341_v9  ;;  %v14272_v19 = vld [vmem:[#allocation17 + $0xe40] sm:$0xf]  ;;  %v15515_v9 = vld [vmem:[#allocation17 + $0x7cc] sm:$0xf0]  ;;  %v13989_v32 = vor.u32 %v15649_v59, %v13986_v52  ;;  %v13128_v59 = vld [vmem:[#allocation17 + $0x548] sm:$0xf] }
 0x808   : > { %7625 = vmatpush.bf16.msra.mxu1 %v14705_v48  ;;  %v15443_v52 = vld [vmem:[#allocation17 + $0x58c] sm:$0xf0] }
 0x809   : > { %7613 = vmatpush.bf16.msra.mxu0 %v13985_v15  ;;  %v15299_v15 = vld [vmem:[#allocation17 + $0x10c] sm:$0xf0] }
 0x80a   : > { %7655 = vmatpush.bf16.msra.mxu3 %v13413_v29  ;;  %7697 = vmatpush.bf16.msra.mxu2 %v12841_v54  ;;  %v7285_v29 = vadd.f32 %v18121_v30, %v7271_v4  ;;  %v15766_v54 = vld [vmem:[#allocation17 + $0xfa4] sm:$0xf0]  ;;  %v12553_v48 = vor.u32 %v15299_v15, %v12552_v3  ;;  %v12480_v30 = vld [vmem:[#allocation17 + $0x38] sm:$0xf] }
 0x80b   : > { %v14417_v10 = vor.u32 %v15766_v54, %v14416_v46  ;;  %v13416_v3 = vld [vmem:[#allocation17 + $0x788] sm:$0xf]  ;;  %v12842_v46 = vld [vmem:[#allocation17 + $0x350] sm:$0xf0]  ;;  %v15712_v54 = vld [vmem:[#allocation17 + $0xdf4] sm:$0xf0] }
 0x80c   : > { %7626 = vmatpush.bf16.msra.mxu1 %v14633_v24  ;;  %v7299_v17 = vadd.f32 %v18124_v62, %v7285_v29  ;;  %v7273_v24 = vadd.f32 %v18128_v49, %v18130_v40  ;;  %v7314_v62 = vpop.f32.mrf.mxu2  ;;  %v14273_v29 = vor.u32 %v15730_v28, %v14272_v19  ;;  %v15775_v28 = vld [vmem:[#allocation17 + $0xff4] sm:$0xf] }
 0x80d   : > { %7614 = vmatpush.bf16.msra.mxu0 %v13913_v37  ;;  %v13050_v37 = vld [vmem:[#allocation17 + $0x4f8] sm:$0xf0]  ;;  %v7329_v33 = vadd.f32 %v7328_v25, %v7314_v62  ;;  %v15326_v62 = vld [vmem:[#allocation17 + $0x1ec] sm:$0xf] }
 0x80e   : > { %7656 = vmatpush.bf16.msra.mxu3 %v13341_v57  ;;  %7698 = vmatpush.bf16.msra.mxu2 %v12769_v14  ;;  %v15281_v57 = vld [vmem:[#allocation17 + $0x7c] sm:$0xf0]  ;;  %v13560_v14 = vld [vmem:[#allocation17 + $0x8a8] sm:$0xf]  ;;  %v7922_v1 = vpack.c.bf16 %v7355_v44, %v7299_v17  ;;  %v7287_v49 = vadd.f32 %v18132_v0, %v7273_v24  ;;  %v7356_v8 = vpop.f32.mrf.mxu1  ;;  %v13914_v17 = vld [vmem:[#allocation17 + $0xbb8] sm:$0xf0] }
 0x80f   : > { %v13561_v22 = vor.u32 %v15551_v47, %v13560_v14  ;;  %v7343_v40 = vadd.f32 %v7342_v56, %v7329_v33  ;;  %v13344_v44 = vld [vmem:[#allocation17 + $0x6f8] sm:$0xf]  ;;  %v14634_v14 = vld [vmem:[#allocation17 + $0x1158] sm:$0xf0]  ;;  %v15479_v24 = vld [vmem:[#allocation17 + $0x6ac] sm:$0xf0] }
 0x810   : > { %7627 = vmatpush.bf16.msra.mxu1 %v14561_v36  ;;  %7940 = vst [vmem:[#allocation6 + $0x18] sm:$0xff] %v7922_v1  ;;  %v15533_v36 = vld [vmem:[#allocation17 + $0x85c] sm:$0xf0]  ;;  %v7301_v4 = vadd.f32 %v18134_v12, %v7287_v49  ;;  %v14200_v12 = vld [vmem:[#allocation17 + $0xdb0] sm:$0xf] }
 0x811   : > { %7615 = vmatpush.bf16.msra.mxu0 %v13841_v51  ;;  %v13625_v51 = vor.u32 %v15568_v53, %v13624_v41  ;;  %v7357_v39 = vadd.f32 %v7356_v8, %v7343_v40  ;;  %v13489_v0 = vor.u32 %v15533_v36, %v13488_v35  ;;  %v13417_v41 = vor.u32 %v15515_v9, %v13416_v3  ;;  %v15613_v1 = vld [vmem:[#allocation17 + $0xae4] sm:$0xf]  ;;  %v12698_v56 = vld [vmem:[#allocation17 + $0x230] sm:$0xf0]  ;;  %v13770_v40 = vld [vmem:[#allocation17 + $0xa98] sm:$0xf0] }
 0x812   : > { %7657 = vmatpush.bf16.msra.mxu3 %v13269_v50  ;;  %7699 = vmatpush.bf16.msra.mxu2 %v12697_v45  ;;  %v13053_v50 = vor.u32 %v15415_v23, %v13050_v37  ;;  %v12481_v45 = vor.u32 %v15281_v57, %v12480_v30  ;;  %v15631_v23 = vld [vmem:[#allocation17 + $0xb74] sm:$0xf]  ;;  %v15497_v37 = vld [vmem:[#allocation17 + $0x73c] sm:$0xf0]  ;;  %v15344_v30 = vld [vmem:[#allocation17 + $0x27c] sm:$0xf]  ;;  %v12701_v35 = vor.u32 %v15326_v62, %v12698_v56 }
 0x813   : > { %v7931_v15 = vpack.c.bf16 %v7357_v39, %v7301_v4  ;;  %v12770_v57 = vld [vmem:[#allocation17 + $0x2c0] sm:$0xf0]  ;;  %v13917_v43 = vor.u32 %v15631_v23, %v13914_v17  ;;  %v15595_v49 = vld [vmem:[#allocation17 + $0xa54] sm:$0xf]  ;;  %v15461_v36 = vld [vmem:[#allocation17 + $0x61c] sm:$0xf0] }
 0x814   : > { %7628 = vmatpush.bf16.msra.mxu1 %v14489_v60  ;;  %v15362_v60 = vld [vmem:[#allocation17 + $0x30c] sm:$0xf]  ;;  %v12773_v47 = vor.u32 %v15344_v30, %v12770_v57  ;;  %v13773_v19 = vor.u32 %v15595_v49, %v13770_v40  ;;  %v14490_v4 = vld [vmem:[#allocation17 + $0x1038] sm:$0xf0]  ;;  %v12482_v23 = vld [vmem:[#allocation17 + $0x80] sm:$0xf0]  ;;  %v18151_v57 = vpop.f32.mrf.mxu3 }
 0x815   : > { %7616 = vmatpush.bf16.msra.mxu0 %v13769_v21  ;;  %v15380_v21 = vld [vmem:[#allocation17 + $0x39c] sm:$0xf]  ;;  %7949 = vst [vmem:[#allocation6 + $0x60] sm:$0xff] %v7931_v15  ;;  %v12845_v53 = vor.u32 %v15362_v60, %v12842_v46  ;;  %v15290_v3 = vld [vmem:[#allocation17 + $0xcc] sm:$0xf] }
 0x816   : > { %7658 = vmatpush.bf16.msra.mxu3 %v13197_v6  ;;  %7700 = vmatpush.bf16.msra.mxu2 %v12625_v58  ;;  %v12914_v6 = vld [vmem:[#allocation17 + $0x3e0] sm:$0xf0]  ;;  %v14061_v58 = vor.u32 %v15667_v27, %v14058_v5  ;;  %v14562_v27 = vld [vmem:[#allocation17 + $0x10c8] sm:$0xf0]  ;;  %v13273_v5 = vor.u32 %v15479_v24, %v13272_v63  ;;  %v12554_v15 = vld [vmem:[#allocation17 + $0x110] sm:$0xf0] }
 0x817   : > { %v12917_v18 = vor.u32 %v15380_v21, %v12914_v6  ;;  %v15863_v20 = vld [vmem:[#allocation6 + $0x1c] sm:$0xf]  ;;  %v15308_v21 = vld [vmem:[#allocation17 + $0x15c] sm:$0xf]  ;;  %v14418_v46 = vld [vmem:[#allocation17 + $0xfa8] sm:$0xf0] }
 0x818   : > { %7629 = vmatpush.bf16.msra.mxu1 %v14417_v10  ;;  %v13345_v10 = vor.u32 %v15497_v37, %v13344_v44  ;;  %v12626_v6 = vld [vmem:[#allocation17 + $0x1a0] sm:$0xf0]  ;;  %v14136_v17 = vld [vmem:[#allocation17 + $0xd28] sm:$0xf]  ;;  %v15542_v37 = vld [vmem:[#allocation17 + $0x8ac] sm:$0xf] }
 0x819   : > { %7617 = vmatpush.bf16.msra.mxu0 %v13697_v55  ;;  %v15829_v55 = vld [vmem:[#allocation17 + $0x11a4] sm:$0xf]  ;;  %v13562_v30 = vld [vmem:[#allocation17 + $0x8f0] sm:$0xf0]  ;;  %v14064_v56 = vld [vmem:[#allocation17 + $0xc98] sm:$0xf] }
 0x81a   : > { %7659 = vmatpush.bf16.msra.mxu3 %v13125_v34  ;;  %7701 = vmatpush.bf16.msra.mxu2 %v12553_v48  ;;  %v14706_v34 = vld [vmem:[#allocation17 + $0x11e8] sm:$0xf0]  ;;  %v14201_v48 = vor.u32 %v15712_v54, %v14200_v12  ;;  %v15757_v60 = vld [vmem:[#allocation17 + $0xf64] sm:$0xf]  ;;  %v15559_v12 = vld [vmem:[#allocation17 + $0x934] sm:$0xf]  ;;  %v13129_v54 = vor.u32 %v15443_v52, %v13128_v59  ;;  %v13565_v62 = vor.u32 %v15542_v37, %v13562_v30 }
 0x81b   : > { %v14709_v25 = vor.u32 %v15829_v55, %v14706_v34  ;;  %v13626_v55 = vld [vmem:[#allocation17 + $0x978] sm:$0xf0]  ;;  %v13056_v34 = vld [vmem:[#allocation17 + $0x4b8] sm:$0xf]  ;;  %v14421_v44 = vor.u32 %v15757_v60, %v14418_v46  ;;  %v15659_v40 = vld [vmem:[#allocation17 + $0xc4c] sm:$0xf0] }
 0x81c   : > { %7630 = vmatpush.bf16.msra.mxu1 %v14345_v7  ;;  %v15872_v2 = vld [vmem:[#allocation6 + $0x5c] sm:$0xf0]  ;;  %v14867_v33 = vld [vmem:[#allocation6 + $0x60] sm:$0xf0]  ;;  %v13200_v7 = vld [vmem:[#allocation17 + $0x5d8] sm:$0xf] }
 0x81d   : > { %7618 = vmatpush.bf16.msra.mxu0 %v13625_v51  ;;  %v14865_v51 = vld [vmem:[#allocation6 + $0x18] sm:$0xf]  ;;  %v13201_v39 = vor.u32 %v15461_v36, %v13200_v7  ;;  %v18155_v63 = vpop.f32.mrf.mxu0  ;;  %v15506_v7 = vld [vmem:[#allocation17 + $0x78c] sm:$0xf]  ;;  %v13418_v36 = vld [vmem:[#allocation17 + $0x7d0] sm:$0xf0] }
 0x81e   : > { %7660 = vmatpush.bf16.msra.mxu3 %v13053_v50  ;;  %7702 = vmatpush.bf16.msra.mxu2 %v12481_v45  ;;  %v14637_v50 = vor.u32 %v15811_v38, %v14634_v14  ;;  %v13845_v45 = vor.u32 %v15613_v1, %v13842_v42  ;;  %v15408_v38 = vld [vmem:[#allocation17 + $0x474] sm:$0xf0]  ;;  %v18153_v42 = vpop.f32.mrf.mxu2  ;;  %v15839_v59 = vld [vmem:[#allocation17 + $0x11ec] sm:$0xf0]  ;;  %v15470_v37 = vld [vmem:[#allocation17 + $0x66c] sm:$0xf] }
 0x81f   : > { %v13920_v52 = vld [vmem:[#allocation17 + $0xb78] sm:$0xf]  ;;  %v13274_v30 = vld [vmem:[#allocation17 + $0x6b0] sm:$0xf0] }
 0x820   : > { %7619 = vmatmul.bf16.vlgmr.msra.gmra.mxu0 %v17981_v61  ;;  %7631 = vmatpush.bf16.msra.mxu1 %v14273_v29  ;;  %v14493_v29 = vor.u32 %v15775_v28, %v14490_v4  ;;  %v15703_v28 = vld [vmem:[#allocation17 + $0xdb4] sm:$0xf]  ;;  %v14202_v4 = vld [vmem:[#allocation17 + $0xdf8] sm:$0xf0] }
 0x821   : > { %7667 = vmatpush.bf16.msrb.mxu0 %v14133_v13  ;;  %7661 = vmatmul.bf16.vlgmr.msra.gmra.mxu3 %v17943_v16  ;;  %v14866_v13 = vor.u32 %v15872_v2, %v14865_v51  ;;  %v15524_v2 = vld [vmem:[#allocation17 + $0x81c] sm:$0xf] }
 0x822   : > { %7709 = vmatpush.bf16.msrb.mxu3 %v13561_v22  ;;  %7751 = vmatpush.bf16.msrb.mxu2 %v12989_v31  ;;  %v14870_v22 = vor.u32 %v15863_v20, %v14867_v33  ;;  %v15793_v31 = vld [vmem:[#allocation17 + $0x1084] sm:$0xf] }
 0x823   : > { %7703 = vmatmul.bf16.vlgmr.msra.gmra.mxu2 %v17941_v11  ;;  %8598 = vrot.lane.b32.xlu0 %v14866_v13, %s16247_s26  ;;  %v14565_v8 = vor.u32 %v15793_v31, %v14562_v27  ;;  %v13490_v20 = vld [vmem:[#allocation17 + $0x860] sm:$0xf0]  ;;  %v15390_v13 = vld [vmem:[#allocation17 + $0x3e4] sm:$0xf0]  ;;  %v14274_v31 = vld [vmem:[#allocation17 + $0xe88] sm:$0xf0] }
 0x824   : > { %7632 = vmatpush.bf16.msra.mxu1 %v14201_v48  ;;  %8600 = vrot.lane.b32.xlu2 %v14870_v22, %s16247_s26  ;;  %v15695_v48 = vld [vmem:[#allocation17 + $0xd6c] sm:$0xf0]  ;;  %v15721_v22 = vld [vmem:[#allocation17 + $0xe44] sm:$0xf] }
 0x825   : > { %7668 = vmatpush.bf16.msrb.mxu0 %v14061_v58  ;;  %v12629_v58 = vor.u32 %v15308_v21, %v12626_v6  ;;  %v14137_v24 = vor.u32 %v15695_v48, %v14136_v17  ;;  %v18158_v21 = vpop.f32.mrf.mxu1  ;;  %v14277_v6 = vor.u32 %v15721_v22, %v14274_v31  ;;  %v18166_v46 = vpop.f32.mrf.mxu0  ;;  %v13848_v17 = vld [vmem:[#allocation17 + $0xae8] sm:$0xf]  ;;  %v15623_v48 = vld [vmem:[#allocation17 + $0xb2c] sm:$0xf0] }
 0x826   : > { %7710 = vmatpush.bf16.msrb.mxu3 %v13489_v0  ;;  %7752 = vmatpush.bf16.msrb.mxu2 %v12917_v18  ;;  %v15577_v0 = vld [vmem:[#allocation17 + $0x9c4] sm:$0xf]  ;;  %v13698_v18 = vld [vmem:[#allocation17 + $0xa08] sm:$0xf0]  ;;  %v18164_v60 = vpop.f32.mrf.mxu2  ;;  %v15318_v22 = vld [vmem:[#allocation17 + $0x1a4] sm:$0xf0] }
 0x827   : > { %7633 = vmatmul.bf16.vlgmr.msra.gmra.mxu1 %v17998_v26  ;;  %v13701_v9 = vor.u32 %v15577_v0, %v13698_v18  ;;  %v13421_v0 = vor.u32 %v15506_v7, %v13418_v36  ;;  %v14712_v18 = vld [vmem:[#allocation17 + $0x11a8] sm:$0xf]  ;;  %v7383_v7 = vadd.f32 %v18151_v57, %v18153_v42  ;;  %v13632_v42 = vld [vmem:[#allocation17 + $0x938] sm:$0xf] }
 0x828   : > { %7681 = vmatpush.bf16.msrb.mxu1 %v14709_v25  ;;  %v13629_v25 = vor.u32 %v15559_v12, %v13626_v55  ;;  %v14205_v12 = vor.u32 %v15703_v28, %v14202_v4  ;;  %v14713_v55 = vor.u32 %v15839_v59, %v14712_v18  ;;  %v13130_v28 = vld [vmem:[#allocation17 + $0x590] sm:$0xf0]  ;;  %v12560_v4 = vld [vmem:[#allocation17 + $0xd0] sm:$0xf] }
 0x829   : > { %7669 = vmatpush.bf16.msrb.mxu0 %v13989_v32  ;;  %v12557_v32 = vor.u32 %v15290_v3, %v12554_v15  ;;  %v15641_v15 = vld [vmem:[#allocation17 + $0xbbc] sm:$0xf0] }
 0x82a   : > { %7711 = vmatpush.bf16.msrb.mxu3 %v13417_v41  ;;  %7753 = vmatpush.bf16.msrb.mxu2 %v12845_v53  ;;  %v15425_v41 = vld [vmem:[#allocation17 + $0x4fc] sm:$0xf0]  ;;  %v15272_v53 = vld [vmem:[#allocation17 + $0x3c] sm:$0xf] }
 0x82b   : > { %v13057_v14 = vor.u32 %v15425_v41, %v13056_v34  ;;  %v12485_v1 = vor.u32 %v15272_v53, %v12482_v23  ;;  %v13921_v34 = vor.u32 %v15641_v15, %v13920_v52  ;;  %v14640_v53 = vld [vmem:[#allocation17 + $0x1118] sm:$0xf]  ;;  %v15821_v23 = vld [vmem:[#allocation17 + $0x115c] sm:$0xf0]  ;;  %v14424_v52 = vld [vmem:[#allocation17 + $0xf68] sm:$0xf] }
 0x82c   : > { %7682 = vmatpush.bf16.msrb.mxu1 %v14637_v50  ;;  %v15677_v50 = vld [vmem:[#allocation17 + $0xcdc] sm:$0xf0] }
 0x82d   : > { %7670 = vmatpush.bf16.msrb.mxu0 %v13917_v43  ;;  %v12992_v43 = vld [vmem:[#allocation17 + $0x430] sm:$0xf]  ;;  %v14065_v27 = vor.u32 %v15677_v50, %v14064_v56  ;;  %v13776_v56 = vld [vmem:[#allocation17 + $0xa58] sm:$0xf]  ;;  %v15605_v50 = vld [vmem:[#allocation17 + $0xa9c] sm:$0xf0] }
 0x82e   : > { %7712 = vmatpush.bf16.msrb.mxu3 %v13345_v10  ;;  %7754 = vmatpush.bf16.msrb.mxu2 %v12773_v47  ;;  %v15739_v10 = vld [vmem:[#allocation17 + $0xed4] sm:$0xf]  ;;  %v14346_v47 = vld [vmem:[#allocation17 + $0xf18] sm:$0xf0]  ;;  %v12993_v51 = vor.u32 %v15408_v38, %v12992_v43  ;;  %v15336_v43 = vld [vmem:[#allocation17 + $0x234] sm:$0xf0]  ;;  %v14641_v38 = vor.u32 %v15821_v23, %v14640_v53 }
 0x82f   : > { %v14349_v33 = vor.u32 %v15739_v10, %v14346_v47  ;;  %v13849_v10 = vor.u32 %v15623_v48, %v13848_v17  ;;  %v13277_v47 = vor.u32 %v15470_v37, %v13274_v30  ;;  %v15686_v23 = vld [vmem:[#allocation17 + $0xd2c] sm:$0xf]  ;;  %v14138_v17 = vld [vmem:[#allocation17 + $0xd70] sm:$0xf0]  ;;  %v15552_v30 = vld [vmem:[#allocation17 + $0x8f4] sm:$0xf0] }
 0x830   : > { %7683 = vmatpush.bf16.msrb.mxu1 %v14565_v8  ;;  %v12848_v8 = vld [vmem:[#allocation17 + $0x310] sm:$0xf] }
 0x831   : > { %7671 = vmatpush.bf16.msrb.mxu0 %v13845_v45  ;;  %v12920_v45 = vld [vmem:[#allocation17 + $0x3a0] sm:$0xf] }
 0x832   : > { %7713 = vmatpush.bf16.msrb.mxu3 %v13273_v5  ;;  %7755 = vmatpush.bf16.msrb.mxu2 %v12701_v35  ;;  %v13493_v5 = vor.u32 %v15524_v2, %v13490_v20  ;;  %v13992_v35 = vld [vmem:[#allocation17 + $0xc08] sm:$0xf]  ;;  %v12921_v49 = vor.u32 %v15390_v13, %v12920_v45  ;;  %v15452_v2 = vld [vmem:[#allocation17 + $0x5dc] sm:$0xf]  ;;  %v13202_v20 = vld [vmem:[#allocation17 + $0x620] sm:$0xf0] }
 0x833   : > { %v12632_v13 = vld [vmem:[#allocation17 + $0x160] sm:$0xf] }
 0x834   : > { %7684 = vmatpush.bf16.msrb.mxu1 %v14493_v29  ;;  %v15488_v29 = vld [vmem:[#allocation17 + $0x6fc] sm:$0xf] }
 0x835   : > { %7672 = vmatpush.bf16.msrb.mxu0 %v13773_v19  ;;  %v15372_v19 = vld [vmem:[#allocation17 + $0x354] sm:$0xf0] }
 0x836   : > { %7714 = vmatpush.bf16.msrb.mxu3 %v13201_v39  ;;  %7756 = vmatpush.bf16.msrb.mxu2 %v12629_v58  ;;  %v18162_v39 = vpop.f32.mrf.mxu3  ;;  %v13993_v58 = vor.u32 %v15659_v40, %v13992_v35  ;;  %v12849_v3 = vor.u32 %v15372_v19, %v12848_v8  ;;  %v14496_v35 = vld [vmem:[#allocation17 + $0xff8] sm:$0xf]  ;;  %v13704_v40 = vld [vmem:[#allocation17 + $0x9c8] sm:$0xf]  ;;  %v15587_v8 = vld [vmem:[#allocation17 + $0xa0c] sm:$0xf0] }
 0x837   : > { %v15434_v19 = vld [vmem:[#allocation17 + $0x54c] sm:$0xf] }
 0x838   : > { %7685 = vmatpush.bf16.msrb.mxu1 %v14421_v44  ;;  %v13133_v57 = vor.u32 %v15434_v19, %v13130_v28  ;;  %v15650_v19 = vld [vmem:[#allocation17 + $0xc0c] sm:$0xf]  ;;  %v13994_v28 = vld [vmem:[#allocation17 + $0xc50] sm:$0xf0] }
 0x839   : > { %7673 = vmatpush.bf16.msrb.mxu0 %v13701_v9  ;;  %v13346_v9 = vld [vmem:[#allocation17 + $0x740] sm:$0xf0] }
 0x83a   : > { %7715 = vmatpush.bf16.msrb.mxu3 %v13129_v54  ;;  %7757 = vmatpush.bf16.msrb.mxu2 %v12557_v32  ;;  %v12776_v54 = vld [vmem:[#allocation17 + $0x280] sm:$0xf]  ;;  %v15354_v32 = vld [vmem:[#allocation17 + $0x2c4] sm:$0xf0]  ;;  %v13349_v41 = vor.u32 %v15488_v29, %v13346_v9  ;;  %v13705_v29 = vor.u32 %v15587_v8, %v13704_v40  ;;  %v15731_v40 = vld [vmem:[#allocation17 + $0xe8c] sm:$0xf0] }
 0x83b   : > { %v12777_v44 = vor.u32 %v15354_v32, %v12776_v54  ;;  %v15569_v9 = vld [vmem:[#allocation17 + $0x97c] sm:$0xf0] }
 0x83c   : > { %7686 = vmatpush.bf16.msrb.mxu1 %v14349_v33  ;;  %v7424_v33 = vpop.f32.mrf.mxu2 }
 0x83d   : > { %7674 = vmatpush.bf16.msrb.mxu0 %v13629_v25  ;;  %v12704_v25 = vld [vmem:[#allocation17 + $0x1f0] sm:$0xf]  ;;  %v7452_v45 = vpop.f32.mrf.mxu0 }
 0x83e   : > { %7716 = vmatpush.bf16.msrb.mxu3 %v13057_v14  ;;  %7758 = vmatpush.bf16.msrb.mxu2 %v12485_v1  ;;  %v7438_v14 = vpop.f32.mrf.mxu3  ;;  %v18168_v1 = vpop.f32.mrf.mxu1 }
 0x83f   : > { %v7439_v36 = vadd.f32 %v7438_v14, %v7424_v33  ;;  %v15668_v33 = vld [vmem:[#allocation17 + $0xc9c] sm:$0xf] }
 0x840   : > { %7675 = vmatmul.bf16.vlgmr.msrb.gmra.mxu0 %v17981_v61  ;;  %7687 = vmatpush.bf16.msrb.mxu1 %v14277_v6  ;;  %v12633_v6 = vor.u32 %v15318_v22, %v12632_v13  ;;  %v13496_v13 = vld [vmem:[#allocation17 + $0x820] sm:$0xf] }
 0x841   : > { %7723 = vmatpush.bf16.msra.mxu0 %v14137_v24  ;;  %7717 = vmatmul.bf16.vlgmr.msrb.gmra.mxu3 %v17943_v16  ;;  %v14568_v24 = vld [vmem:[#allocation17 + $0x1088] sm:$0xf]  ;;  %v7453_v18 = vadd.f32 %v7452_v45, %v7439_v36  ;;  %v14066_v45 = vld [vmem:[#allocation17 + $0xce0] sm:$0xf0] }
 0x842   : > { %7765 = vmatpush.bf16.msra.mxu3 %v13565_v62  ;;  %7807 = vmatpush.bf16.msra.mxu2 %v12993_v51  ;;  %v15803_v62 = vld [vmem:[#allocation17 + $0x10cc] sm:$0xf0]  ;;  %v12705_v51 = vor.u32 %v15336_v43, %v12704_v25  ;;  %v15399_v25 = vld [vmem:[#allocation17 + $0x434] sm:$0xf]  ;;  %v12994_v43 = vld [vmem:[#allocation17 + $0x478] sm:$0xf0] }
 0x843   : > { %7759 = vmatmul.bf16.vlgmr.msrb.gmra.mxu2 %v17941_v11  ;;  %v14569_v31 = vor.u32 %v15803_v62, %v14568_v24  ;;  %v14352_v24 = vld [vmem:[#allocation17 + $0xed8] sm:$0xf]  ;;  %v15749_v62 = vld [vmem:[#allocation17 + $0xf1c] sm:$0xf0] }
 0x844   : > { %7688 = vmatpush.bf16.msrb.mxu1 %v14205_v12  ;;  %v15416_v12 = vld [vmem:[#allocation17 + $0x4bc] sm:$0xf]  ;;  %v14353_v22 = vor.u32 %v15749_v62, %v14352_v24 }
 0x845   : > { %7724 = vmatpush.bf16.msra.mxu0 %v14065_v27  ;;  %v13777_v27 = vor.u32 %v15605_v50, %v13776_v56  ;;  %v7454_v14 = vpop.f32.mrf.mxu0  ;;  %v14141_v50 = vor.u32 %v15686_v23, %v14138_v17  ;;  %v15812_v17 = vld [vmem:[#allocation17 + $0x111c] sm:$0xf] }
 0x846   : > { %7766 = vmatpush.bf16.msra.mxu3 %v13493_v5  ;;  %7808 = vmatpush.bf16.msra.mxu2 %v12921_v49  ;;  %v13205_v5 = vor.u32 %v15452_v2, %v13202_v20  ;;  %v15785_v49 = vld [vmem:[#allocation17 + $0x103c] sm:$0xf0]  ;;  %v7466_v15 = vpop.f32.mrf.mxu1  ;;  %v7440_v53 = vpop.f32.mrf.mxu3  ;;  %v12997_v20 = vor.u32 %v15399_v25, %v12994_v43  ;;  %v13850_v25 = vld [vmem:[#allocation17 + $0xb30] sm:$0xf0]  ;;  %v13280_v43 = vld [vmem:[#allocation17 + $0x670] sm:$0xf] }
 0x847   : > { %7689 = vmatmul.bf16.vlgmr.msrb.gmra.mxu1 %v17998_v26  ;;  %v14497_v59 = vor.u32 %v15785_v49, %v14496_v35  ;;  %v7467_v32 = vadd.f32 %v7466_v15, %v7453_v18  ;;  %v14280_v49 = vld [vmem:[#allocation17 + $0xe48] sm:$0xf]  ;;  %v15516_v18 = vld [vmem:[#allocation17 + $0x7d4] sm:$0xf0]  ;;  %v13997_v15 = vor.u32 %v15650_v19, %v13994_v28  ;;  %v13136_v19 = vld [vmem:[#allocation17 + $0x550] sm:$0xf] }
 0x848   : > { %7737 = vmatpush.bf16.msra.mxu1 %v14713_v55  ;;  %v15444_v28 = vld [vmem:[#allocation17 + $0x594] sm:$0xf0] }
 0x849   : > { %7725 = vmatpush.bf16.msra.mxu0 %v13993_v58  ;;  %v15300_v58 = vld [vmem:[#allocation17 + $0x114] sm:$0xf0] }
 0x84a   : > { %7767 = vmatpush.bf16.msra.mxu3 %v13421_v0  ;;  %7809 = vmatpush.bf16.msra.mxu2 %v12849_v3  ;;  %v7397_v0 = vadd.f32 %v18155_v63, %v7383_v7  ;;  %v15767_v3 = vld [vmem:[#allocation17 + $0xfac] sm:$0xf0]  ;;  %v12561_v55 = vor.u32 %v15300_v58, %v12560_v4  ;;  %v12488_v63 = vld [vmem:[#allocation17 + $0x40] sm:$0xf] }
 0x84b   : > { %v14425_v37 = vor.u32 %v15767_v3, %v14424_v52  ;;  %v13424_v4 = vld [vmem:[#allocation17 + $0x790] sm:$0xf]  ;;  %v12850_v52 = vld [vmem:[#allocation17 + $0x358] sm:$0xf0]  ;;  %v15713_v3 = vld [vmem:[#allocation17 + $0xdfc] sm:$0xf0] }
 0x84c   : > { %7738 = vmatpush.bf16.msra.mxu1 %v14641_v38  ;;  %v7411_v54 = vadd.f32 %v18158_v21, %v7397_v0  ;;  %v7385_v38 = vadd.f32 %v18162_v39, %v18164_v60  ;;  %v7426_v21 = vpop.f32.mrf.mxu2  ;;  %v14281_v0 = vor.u32 %v15731_v40, %v14280_v49  ;;  %v15776_v40 = vld [vmem:[#allocation17 + $0xffc] sm:$0xf] }
 0x84d   : > { %7726 = vmatpush.bf16.msra.mxu0 %v13921_v34  ;;  %v13058_v34 = vld [vmem:[#allocation17 + $0x500] sm:$0xf0]  ;;  %v7441_v56 = vadd.f32 %v7440_v53, %v7426_v21  ;;  %v15327_v21 = vld [vmem:[#allocation17 + $0x1f4] sm:$0xf] }
 0x84e   : > { %7768 = vmatpush.bf16.msra.mxu3 %v13349_v41  ;;  %7810 = vmatpush.bf16.msra.mxu2 %v12777_v44  ;;  %v15282_v41 = vld [vmem:[#allocation17 + $0x84] sm:$0xf0]  ;;  %v13568_v44 = vld [vmem:[#allocation17 + $0x8b0] sm:$0xf]  ;;  %v7923_v48 = vpack.c.bf16 %v7467_v32, %v7411_v54  ;;  %v7399_v39 = vadd.f32 %v18166_v46, %v7385_v38  ;;  %v7468_v35 = vpop.f32.mrf.mxu1  ;;  %v13922_v54 = vld [vmem:[#allocation17 + $0xbc0] sm:$0xf0] }
 0x84f   : > { %v13569_v2 = vor.u32 %v15552_v30, %v13568_v44  ;;  %v7455_v60 = vadd.f32 %v7454_v14, %v7441_v56  ;;  %v13352_v32 = vld [vmem:[#allocation17 + $0x700] sm:$0xf]  ;;  %v14642_v44 = vld [vmem:[#allocation17 + $0x1160] sm:$0xf0]  ;;  %v15480_v38 = vld [vmem:[#allocation17 + $0x6b4] sm:$0xf0] }
 0x850   : > { %7739 = vmatpush.bf16.msra.mxu1 %v14569_v31  ;;  %7941 = vst [vmem:[#allocation6 + $0x20] sm:$0xff] %v7923_v48  ;;  %v15534_v31 = vld [vmem:[#allocation17 + $0x864] sm:$0xf0]  ;;  %v7413_v7 = vadd.f32 %v18168_v1, %v7399_v39  ;;  %v14208_v1 = vld [vmem:[#allocation17 + $0xdb8] sm:$0xf] }
 0x851   : > { %7727 = vmatpush.bf16.msra.mxu0 %v13849_v10  ;;  %v13633_v10 = vor.u32 %v15569_v9, %v13632_v42  ;;  %v7469_v36 = vadd.f32 %v7468_v35, %v7455_v60  ;;  %v13497_v46 = vor.u32 %v15534_v31, %v13496_v13  ;;  %v13425_v42 = vor.u32 %v15516_v18, %v13424_v4  ;;  %v15614_v48 = vld [vmem:[#allocation17 + $0xaec] sm:$0xf]  ;;  %v12706_v14 = vld [vmem:[#allocation17 + $0x238] sm:$0xf0]  ;;  %v13778_v60 = vld [vmem:[#allocation17 + $0xaa0] sm:$0xf0] }
 0x852   : > { %7769 = vmatpush.bf16.msra.mxu3 %v13277_v47  ;;  %7811 = vmatpush.bf16.msra.mxu2 %v12705_v51  ;;  %v13061_v47 = vor.u32 %v15416_v12, %v13058_v34  ;;  %v12489_v51 = vor.u32 %v15282_v41, %v12488_v63  ;;  %v15632_v12 = vld [vmem:[#allocation17 + $0xb7c] sm:$0xf]  ;;  %v15498_v34 = vld [vmem:[#allocation17 + $0x744] sm:$0xf0]  ;;  %v15345_v63 = vld [vmem:[#allocation17 + $0x284] sm:$0xf]  ;;  %v12709_v13 = vor.u32 %v15327_v21, %v12706_v14 }
 0x853   : > { %v7932_v58 = vpack.c.bf16 %v7469_v36, %v7413_v7  ;;  %v12778_v41 = vld [vmem:[#allocation17 + $0x2c8] sm:$0xf0]  ;;  %v13925_v23 = vor.u32 %v15632_v12, %v13922_v54  ;;  %v15596_v39 = vld [vmem:[#allocation17 + $0xa5c] sm:$0xf]  ;;  %v15462_v31 = vld [vmem:[#allocation17 + $0x624] sm:$0xf0] }
 0x854   : > { %7740 = vmatpush.bf16.msra.mxu1 %v14497_v59  ;;  %v15363_v59 = vld [vmem:[#allocation17 + $0x314] sm:$0xf]  ;;  %v12781_v30 = vor.u32 %v15345_v63, %v12778_v41  ;;  %v13781_v49 = vor.u32 %v15596_v39, %v13778_v60  ;;  %v14498_v7 = vld [vmem:[#allocation17 + $0x1040] sm:$0xf0]  ;;  %v12490_v12 = vld [vmem:[#allocation17 + $0x88] sm:$0xf0]  ;;  %v18185_v41 = vpop.f32.mrf.mxu3 }
 0x855   : > { %7728 = vmatpush.bf16.msra.mxu0 %v13777_v27  ;;  %v15381_v27 = vld [vmem:[#allocation17 + $0x3a4] sm:$0xf]  ;;  %7950 = vst [vmem:[#allocation6 + $0x68] sm:$0xff] %v7932_v58  ;;  %v12853_v9 = vor.u32 %v15363_v59, %v12850_v52  ;;  %v15291_v4 = vld [vmem:[#allocation17 + $0xd4] sm:$0xf] }
 0x856   : > { %7770 = vmatpush.bf16.msra.mxu3 %v13205_v5  ;;  %7812 = vmatpush.bf16.msra.mxu2 %v12633_v6  ;;  %v12922_v5 = vld [vmem:[#allocation17 + $0x3e8] sm:$0xf0]  ;;  %v14069_v6 = vor.u32 %v15668_v33, %v14066_v45  ;;  %v14570_v33 = vld [vmem:[#allocation17 + $0x10d0] sm:$0xf0]  ;;  %v13281_v45 = vor.u32 %v15480_v38, %v13280_v43  ;;  %v12562_v58 = vld [vmem:[#allocation17 + $0x118] sm:$0xf0] }
 0x857   : > { %v12925_v8 = vor.u32 %v15381_v27, %v12922_v5  ;;  %v15864_v62 = vld [vmem:[#allocation6 + $0x24] sm:$0xf]  ;;  %v15309_v27 = vld [vmem:[#allocation17 + $0x164] sm:$0xf]  ;;  %v14426_v52 = vld [vmem:[#allocation17 + $0xfb0] sm:$0xf0] }
 0x858   : > { %7741 = vmatpush.bf16.msra.mxu1 %v14425_v37  ;;  %v13353_v37 = vor.u32 %v15498_v34, %v13352_v32  ;;  %v12634_v5 = vld [vmem:[#allocation17 + $0x1a8] sm:$0xf0]  ;;  %v14144_v54 = vld [vmem:[#allocation17 + $0xd30] sm:$0xf]  ;;  %v15543_v34 = vld [vmem:[#allocation17 + $0x8b4] sm:$0xf] }
 0x859   : > { %7729 = vmatpush.bf16.msra.mxu0 %v13705_v29  ;;  %v15830_v29 = vld [vmem:[#allocation17 + $0x11ac] sm:$0xf]  ;;  %v13570_v63 = vld [vmem:[#allocation17 + $0x8f8] sm:$0xf0]  ;;  %v14072_v21 = vld [vmem:[#allocation17 + $0xca0] sm:$0xf] }
 0x85a   : > { %7771 = vmatpush.bf16.msra.mxu3 %v13133_v57  ;;  %7813 = vmatpush.bf16.msra.mxu2 %v12561_v55  ;;  %v14714_v57 = vld [vmem:[#allocation17 + $0x11f0] sm:$0xf0]  ;;  %v14209_v55 = vor.u32 %v15713_v3, %v14208_v1  ;;  %v15758_v59 = vld [vmem:[#allocation17 + $0xf6c] sm:$0xf]  ;;  %v15560_v1 = vld [vmem:[#allocation17 + $0x93c] sm:$0xf]  ;;  %v13137_v3 = vor.u32 %v15444_v28, %v13136_v19  ;;  %v13573_v43 = vor.u32 %v15543_v34, %v13570_v63 }
 0x85b   : > { %v14717_v53 = vor.u32 %v15830_v29, %v14714_v57  ;;  %v13634_v29 = vld [vmem:[#allocation17 + $0x980] sm:$0xf0]  ;;  %v13064_v57 = vld [vmem:[#allocation17 + $0x4c0] sm:$0xf]  ;;  %v14429_v32 = vor.u32 %v15758_v59, %v14426_v52  ;;  %v15850_v38 = vld [vmem:[#allocation6 + $0x44] sm:$0xf0] }
 0x85c   : > { %7742 = vmatpush.bf16.msra.mxu1 %v14353_v22  ;;  %v15873_v24 = vld [vmem:[#allocation6 + $0x64] sm:$0xf0]  ;;  %v14875_v56 = vld [vmem:[#allocation6 + $0x68] sm:$0xf0]  ;;  %v13208_v22 = vld [vmem:[#allocation17 + $0x5e0] sm:$0xf] }
 0x85d   : > { %7730 = vmatpush.bf16.msra.mxu0 %v13633_v10  ;;  %v14873_v10 = vld [vmem:[#allocation6 + $0x20] sm:$0xf]  ;;  %v13209_v36 = vor.u32 %v15462_v31, %v13208_v22  ;;  %v15660_v39 = vld [vmem:[#allocation17 + $0xc54] sm:$0xf0]  ;;  %v14648_v52 = vld [vmem:[#allocation17 + $0x1120] sm:$0xf] }
 0x85e   : > { %7772 = vmatpush.bf16.msra.mxu3 %v13061_v47  ;;  %7814 = vmatpush.bf16.msra.mxu2 %v12489_v51  ;;  %v14645_v47 = vor.u32 %v15812_v17, %v14642_v44  ;;  %v13853_v51 = vor.u32 %v15614_v48, %v13850_v25  ;;  %v15740_v44 = vld [vmem:[#allocation17 + $0xedc] sm:$0xf]  ;;  %v14354_v48 = vld [vmem:[#allocation17 + $0xf20] sm:$0xf0]  ;;  %v15678_v14 = vld [vmem:[#allocation17 + $0xce4] sm:$0xf0] }
 0x85f   : > { %v15642_v19 = vld [vmem:[#allocation17 + $0xbc4] sm:$0xf0]  ;;  %v15804_v34 = vld [vmem:[#allocation17 + $0x10d4] sm:$0xf0] }
 0x860   : > { %7731 = vmatmul.bf16.vlgmr.msra.gmra.mxu0 %v17981_v61  ;;  %7743 = vmatpush.bf16.msra.mxu1 %v14281_v0  ;;  %v14501_v0 = vor.u32 %v15776_v40, %v14498_v7  ;;  %v18196_v40 = vpop.f32.mrf.mxu3 }
 0x861   : > { %7779 = vmatpush.bf16.msrb.mxu0 %v14141_v50  ;;  %7773 = vmatmul.bf16.vlgmr.msra.gmra.mxu3 %v17943_v16  ;;  %v14874_v50 = vor.u32 %v15873_v24, %v14873_v10  ;;  %v14732_v10 = vld [vmem:[#allocation6] sm:$0xf] }
 0x862   : > { %7821 = vmatpush.bf16.msrb.mxu3 %v13569_v2  ;;  %7863 = vmatpush.bf16.msrb.mxu2 %v12997_v20  ;;  %v14878_v2 = vor.u32 %v15864_v62, %v14875_v56  ;;  %v15794_v20 = vld [vmem:[#allocation17 + $0x108c] sm:$0xf]  ;;  %v15525_v24 = vld [vmem:[#allocation17 + $0x824] sm:$0xf]  ;;  %v14733_v56 = vor.u32 %v15850_v38, %v14732_v10  ;;  %v14504_v10 = vld [vmem:[#allocation17 + $0x1000] sm:$0xf] }
 0x863   : > { %7815 = vmatmul.bf16.vlgmr.msra.gmra.mxu2 %v17941_v11  ;;  %8602 = vrot.lane.b32.xlu1 %v14874_v50, %s16247_s26  ;;  %v14573_v35 = vor.u32 %v15794_v20, %v14570_v33  ;;  %v13498_v62 = vld [vmem:[#allocation17 + $0x868] sm:$0xf0]  ;;  %v14073_v20 = vor.u32 %v15678_v14, %v14072_v21  ;;  %v14748_v33 = vld [vmem:[#allocation6 + $0x10] sm:$0xf] }
 0x864   : > { %7744 = vmatpush.bf16.msra.mxu1 %v14209_v55  ;;  %8604 = vrot.lane.b32.xlu0 %v14878_v2, %s16247_s26  ;;  %v15696_v55 = vld [vmem:[#allocation17 + $0xd74] sm:$0xf0]  ;;  %v15722_v50 = vld [vmem:[#allocation17 + $0xe4c] sm:$0xf]  ;;  %v14282_v2 = vld [vmem:[#allocation17 + $0xe90] sm:$0xf0]  ;;  %v18192_v60 = vpop.f32.mrf.mxu1 }
 0x865   : > { %7780 = vmatpush.bf16.msrb.mxu0 %v14069_v6  ;;  %v12637_v6 = vor.u32 %v15309_v27, %v12634_v5  ;;  %v14145_v25 = vor.u32 %v15696_v55, %v14144_v54  ;;  %v14285_v31 = vor.u32 %v15722_v50, %v14282_v2  ;;  %v15507_v27 = vld [vmem:[#allocation17 + $0x794] sm:$0xf]  ;;  %v13426_v5 = vld [vmem:[#allocation17 + $0x7d8] sm:$0xf0]  ;;  %v14576_v55 = vld [vmem:[#allocation17 + $0x1090] sm:$0xf] }
 0x866   : > { %7822 = vmatpush.bf16.msrb.mxu3 %v13497_v46  ;;  %7864 = vmatpush.bf16.msrb.mxu2 %v12925_v8  ;;  %v15578_v46 = vld [vmem:[#allocation17 + $0x9cc] sm:$0xf]  ;;  %v13706_v8 = vld [vmem:[#allocation17 + $0xa10] sm:$0xf0]  ;;  %v14577_v21 = vor.u32 %v15804_v34, %v14576_v55  ;;  %v13712_v50 = vld [vmem:[#allocation17 + $0x9d0] sm:$0xf] }
 0x867   : > { %7745 = vmatmul.bf16.vlgmr.msra.gmra.mxu1 %v17998_v26  ;;  %v13709_v18 = vor.u32 %v15578_v46, %v13706_v8  ;;  %v13429_v46 = vor.u32 %v15507_v27, %v13426_v5  ;;  %v13928_v8 = vld [vmem:[#allocation17 + $0xb80] sm:$0xf]  ;;  %v15854_v38 = vld [vmem:[#allocation6 + $0x64] sm:$0xf0]  ;;  %v15588_v2 = vld [vmem:[#allocation17 + $0xa14] sm:$0xf0] }
 0x868   : > { %7793 = vmatpush.bf16.msrb.mxu1 %v14717_v53  ;;  %v13637_v53 = vor.u32 %v15560_v1, %v13634_v29  ;;  %v13929_v59 = vor.u32 %v15642_v19, %v13928_v8  ;;  %v15822_v1 = vld [vmem:[#allocation17 + $0x1164] sm:$0xf0]  ;;  %v15624_v29 = vld [vmem:[#allocation17 + $0xb34] sm:$0xf0]  ;;  %v15687_v8 = vld [vmem:[#allocation17 + $0xd34] sm:$0xf] }
 0x869   : > { %7781 = vmatpush.bf16.msrb.mxu0 %v13997_v15  ;;  %v12565_v15 = vor.u32 %v15291_v4, %v12562_v58  ;;  %v15768_v27 = vld [vmem:[#allocation17 + $0xfb4] sm:$0xf0]  ;;  %v14146_v19 = vld [vmem:[#allocation17 + $0xd78] sm:$0xf0]  ;;  %v15842_v55 = vld [vmem:[#allocation6 + $0x4] sm:$0xf] }
 0x86a   : > { %7823 = vmatpush.bf16.msrb.mxu3 %v13425_v42  ;;  %7865 = vmatpush.bf16.msrb.mxu2 %v12853_v9  ;;  %v15426_v42 = vld [vmem:[#allocation17 + $0x504] sm:$0xf0]  ;;  %v15273_v9 = vld [vmem:[#allocation17 + $0x44] sm:$0xf] }
 0x86b   : > { %v12493_v17 = vor.u32 %v15273_v9, %v12490_v12  ;;  %v14649_v9 = vor.u32 %v15822_v1, %v14648_v52  ;;  %v7550_v12 = vpop.f32.mrf.mxu3  ;;  %v14360_v52 = vld [vmem:[#allocation17 + $0xee0] sm:$0xf]  ;;  %v15750_v1 = vld [vmem:[#allocation17 + $0xf24] sm:$0xf0] }
 0x86c   : > { %7794 = vmatpush.bf16.msrb.mxu1 %v14645_v47  ;;  %v14357_v47 = vor.u32 %v15740_v44, %v14354_v48  ;;  %v18202_v54 = vpop.f32.mrf.mxu1  ;;  %v15453_v48 = vld [vmem:[#allocation17 + $0x5e4] sm:$0xf] }
 0x86d   : > { %7782 = vmatpush.bf16.msrb.mxu0 %v13925_v23  ;;  %v13065_v23 = vor.u32 %v15426_v42, %v13064_v57  ;;  %v15471_v57 = vld [vmem:[#allocation17 + $0x674] sm:$0xf]  ;;  %v13282_v42 = vld [vmem:[#allocation17 + $0x6b8] sm:$0xf0] }
 0x86e   : > { %7824 = vmatpush.bf16.msrb.mxu3 %v13353_v37  ;;  %7866 = vmatpush.bf16.msrb.mxu2 %v12781_v30  ;;  %v18187_v37 = vpop.f32.mrf.mxu2  ;;  %v18189_v30 = vpop.f32.mrf.mxu0  ;;  %v13285_v63 = vor.u32 %v15471_v57, %v13282_v42  ;;  %v14734_v57 = vld [vmem:[#allocation6 + $0x48] sm:$0xf0]  ;;  %v15669_v42 = vld [vmem:[#allocation17 + $0xca4] sm:$0xf] }
 0x870   : > { %7795 = vmatpush.bf16.msrb.mxu1 %v14573_v35  ;;  %v15704_v35 = vld [vmem:[#allocation17 + $0xdbc] sm:$0xf] }
 0x871   : > { %7783 = vmatpush.bf16.msrb.mxu0 %v13853_v51  ;;  %v15852_v51 = vld [vmem:[#allocation6 + $0x54] sm:$0xf0] }
 0x872   : > { %7825 = vmatpush.bf16.msrb.mxu3 %v13281_v45  ;;  %7867 = vmatpush.bf16.msrb.mxu2 %v12709_v13  ;;  %v13501_v45 = vor.u32 %v15525_v24, %v13498_v62  ;;  %v14000_v13 = vld [vmem:[#allocation17 + $0xc10] sm:$0xf]  ;;  %v14749_v22 = vor.u32 %v15852_v51, %v14748_v33  ;;  %v7495_v24 = vadd.f32 %v18185_v41, %v18187_v37  ;;  %v15435_v33 = vld [vmem:[#allocation17 + $0x554] sm:$0xf] }
 0x873   : > { %v14001_v7 = vor.u32 %v15660_v39, %v14000_v13  ;;  %v13713_v37 = vor.u32 %v15588_v2, %v13712_v50  ;;  %v14722_v50 = vld [vmem:[#allocation17 + $0x11f8] sm:$0xf0] }
 0x874   : > { %7796 = vmatpush.bf16.msrb.mxu1 %v14501_v0  ;;  %v13354_v0 = vld [vmem:[#allocation17 + $0x748] sm:$0xf0]  ;;  %v7509_v13 = vadd.f32 %v18189_v30, %v7495_v24  ;;  %v15417_v30 = vld [vmem:[#allocation17 + $0x4c4] sm:$0xf] }
 0x875   : > { %7784 = vmatpush.bf16.msrb.mxu0 %v13781_v49  ;;  %v14210_v49 = vld [vmem:[#allocation17 + $0xe00] sm:$0xf0] }
 0x876   : > { %7826 = vmatpush.bf16.msrb.mxu3 %v13209_v36  ;;  %7868 = vmatpush.bf16.msrb.mxu2 %v12637_v6  ;;  %v14720_v36 = vld [vmem:[#allocation17 + $0x11b0] sm:$0xf]  ;;  %v15840_v6 = vld [vmem:[#allocation17 + $0x11f4] sm:$0xf0]  ;;  %v18198_v28 = vpop.f32.mrf.mxu2  ;;  %v18200_v4 = vpop.f32.mrf.mxu0  ;;  %v14213_v58 = vor.u32 %v15704_v35, %v14210_v49  ;;  %v7523_v5 = vadd.f32 %v18192_v60, %v7509_v13 }
 0x878   : > { %7797 = vmatpush.bf16.msrb.mxu1 %v14429_v32 }
 0x879   : > { %7785 = vmatpush.bf16.msrb.mxu0 %v13709_v18  ;;  %v14721_v18 = vor.u32 %v15840_v6, %v14720_v36  ;;  %v15570_v36 = vld [vmem:[#allocation17 + $0x984] sm:$0xf0]  ;;  %v7552_v6 = vpop.f32.mrf.mxu3 }
 0x87a   : > { %7827 = vmatpush.bf16.msrb.mxu3 %v13137_v3  ;;  %7869 = vmatpush.bf16.msrb.mxu2 %v12565_v15  ;;  %v13856_v15 = vld [vmem:[#allocation17 + $0xaf0] sm:$0xf] }
 0x87b   : > { %v13857_v32 = vor.u32 %v15624_v29, %v13856_v15  ;;  %v14149_v29 = vor.u32 %v15687_v8, %v14146_v19  ;;  %v15597_v8 = vld [vmem:[#allocation17 + $0xa64] sm:$0xf]  ;;  %v13786_v19 = vld [vmem:[#allocation17 + $0xaa8] sm:$0xf0] }
 0x87c   : > { %7798 = vmatpush.bf16.msrb.mxu1 %v14357_v47  ;;  %v15786_v47 = vld [vmem:[#allocation17 + $0x1044] sm:$0xf0] }
 0x87d   : > { %7786 = vmatpush.bf16.msrb.mxu0 %v13637_v53  ;;  %v13784_v53 = vld [vmem:[#allocation17 + $0xa60] sm:$0xf] }
 0x87e   : > { %7828 = vmatpush.bf16.msrb.mxu3 %v13065_v23  ;;  %7870 = vmatpush.bf16.msrb.mxu2 %v12493_v17  ;;  %v15606_v23 = vld [vmem:[#allocation17 + $0xaa4] sm:$0xf0]  ;;  %v7536_v17 = vpop.f32.mrf.mxu2  ;;  %v7564_v44 = vpop.f32.mrf.mxu0 }
 0x87f   : > { %v13785_v14 = vor.u32 %v15606_v23, %v13784_v53  ;;  %v7551_v62 = vadd.f32 %v7550_v12, %v7536_v17  ;;  %v14288_v53 = vld [vmem:[#allocation17 + $0xe50] sm:$0xf]  ;;  %v15732_v23 = vld [vmem:[#allocation17 + $0xe94] sm:$0xf0] }
 0x880   : > { %7787 = vmatmul.bf16.vlgmr.msrb.gmra.mxu0 %v17981_v61  ;;  %7799 = vmatpush.bf16.msrb.mxu1 %v14285_v31  ;;  %v14432_v31 = vld [vmem:[#allocation17 + $0xf70] sm:$0xf]  ;;  %v14289_v24 = vor.u32 %v15732_v23, %v14288_v53 }
 0x881   : > { %7835 = vmatpush.bf16.msra.mxu0 %v14145_v25  ;;  %7829 = vmatmul.bf16.vlgmr.msrb.gmra.mxu3 %v17943_v16  ;;  %v13210_v25 = vld [vmem:[#allocation17 + $0x628] sm:$0xf0]  ;;  %v7565_v39 = vadd.f32 %v7564_v44, %v7551_v62  ;;  %v15714_v62 = vld [vmem:[#allocation17 + $0xe04] sm:$0xf0] }
 0x882   : > { %7877 = vmatpush.bf16.msra.mxu3 %v13573_v43  ;;  %8083 = vmatpush.bf16.msra.mxu2 %v14733_v56  ;;  %v18208_v43 = vld [vmem:[%s19815_s12] sm:$0xff]  ;;  %v14764_v56 = vld [vmem:[#allocation6 + $0x20] sm:$0xf]  ;;  %v13213_v51 = vor.u32 %v15453_v48, %v13210_v25  ;;  %v15844_v25 = vld [vmem:[#allocation6 + $0x14] sm:$0xf] }
 0x883   : > { %7871 = vmatmul.bf16.vlgmr.msrb.gmra.mxu2 %v17941_v11  ;;  %v15489_v11 = vld [vmem:[#allocation17 + $0x704] sm:$0xf] }
 0x884   : > { %v13357_v3 = vor.u32 %v15489_v11, %v13354_v0  ;;  %7800 = vmatpush.bf16.msrb.mxu1 %v14213_v58  ;;  %v7578_v41 = vpop.f32.mrf.mxu1  ;;  %v14433_v11 = vor.u32 %v15768_v27, %v14432_v31  ;;  %v7497_v0 = vadd.f32 %v18196_v40, %v18198_v28  ;;  %v14361_v40 = vor.u32 %v15750_v1, %v14360_v52  ;;  %v15579_v52 = vld [vmem:[#allocation17 + $0x9d4] sm:$0xf]  ;;  %v13714_v1 = vld [vmem:[#allocation17 + $0xa18] sm:$0xf0] }
 0x885   : > { %7836 = vmatpush.bf16.msra.mxu0 %v14073_v20  ;;  %v14765_v20 = vor.u32 %v15854_v38, %v14764_v56  ;;  %v7579_v35 = vadd.f32 %v7578_v41, %v7565_v39  ;;  %v14737_v28 = vor.u32 %v15842_v55, %v14734_v57  ;;  %v15651_v38 = vld [vmem:[#allocation17 + $0xc14] sm:$0xf]  ;;  %v15813_v39 = vld [vmem:[#allocation17 + $0x1124] sm:$0xf]  ;;  %v7606_v55 = vpop.f32.mrf.mxu3 }
 0x886   : > { %8155 = vmatpush.bf16.msrb.mxu2 %v14749_v22  ;;  %7878 = vmatpush.bf16.msra.mxu3 %v13501_v45  ;;  %v13138_v45 = vld [vmem:[#allocation17 + $0x598] sm:$0xf0]  ;;  %v14505_v22 = vor.u32 %v15786_v47, %v14504_v10  ;;  %v7511_v12 = vadd.f32 %v18200_v4, %v7497_v0  ;;  %v15615_v41 = vld [vmem:[#allocation17 + $0xaf4] sm:$0xf]  ;;  %v13789_v0 = vor.u32 %v15597_v8, %v13786_v19 }
 0x887   : > { %7801 = vmatmul.bf16.vlgmr.msrb.gmra.mxu1 %v17998_v26  ;;  %v13141_v49 = vor.u32 %v15435_v33, %v13138_v45  ;;  %v7924_v58 = vpack.c.bf16 %v7579_v35, %v7523_v5  ;;  %v7957_v4 = vld [vmem:[%s19815_s12 + $0x8] sm:$0xf]  ;;  %v13930_v33 = vld [vmem:[#allocation17 + $0xbc8] sm:$0xf0]  ;;  %v15759_v57 = vld [vmem:[#allocation17 + $0xf74] sm:$0xf] }
 0x888   : > { %7849 = vmatpush.bf16.msra.mxu1 %v14721_v18  ;;  %v7538_v18 = vpop.f32.mrf.mxu2  ;;  %v7525_v17 = vadd.f32 %v18202_v54, %v7511_v12  ;;  %v14216_v54 = vld [vmem:[#allocation17 + $0xdc0] sm:$0xf]  ;;  %v13642_v12 = vld [vmem:[#allocation17 + $0x988] sm:$0xf0] }
 0x889   : > { %7837 = vmatpush.bf16.msra.mxu0 %v14001_v7  ;;  %v13640_v7 = vld [vmem:[#allocation17 + $0x940] sm:$0xf]  ;;  %7942 = vst [vmem:[#allocation6 + $0x28] sm:$0xff] %v7924_v58  ;;  %v14217_v45 = vor.u32 %v15714_v62, %v14216_v54  ;;  %v14766_v58 = vld [vmem:[#allocation6 + $0x68] sm:$0xf0] }
 0x88a   : > { %7879 = vmatpush.bf16.msra.mxu3 %v13429_v46  ;;  %v13066_v46 = vld [vmem:[#allocation17 + $0x508] sm:$0xf0]  ;;  %v13641_v60 = vor.u32 %v15570_v36, %v13640_v7 }
 0x88b   : > { %v13069_v15 = vor.u32 %v15417_v30, %v13066_v46  ;;  %v14578_v46 = vld [vmem:[#allocation17 + $0x10d8] sm:$0xf0]  ;;  %v14218_v54 = vld [vmem:[#allocation17 + $0xe08] sm:$0xf0] }
 0x88c   : > { %7850 = vmatpush.bf16.msra.mxu1 %v14649_v9  ;;  %v14074_v9 = vld [vmem:[#allocation17 + $0xce8] sm:$0xf0]  ;;  %v7580_v34 = vpop.f32.mrf.mxu1 }
 0x88d   : > { %7838 = vmatpush.bf16.msra.mxu0 %v13929_v59  ;;  %v7566_v59 = vpop.f32.mrf.mxu0  ;;  %v14077_v48 = vor.u32 %v15669_v42, %v14074_v9  ;;  %v14434_v42 = vld [vmem:[#allocation17 + $0xfb8] sm:$0xf0]  ;;  %v15561_v9 = vld [vmem:[#allocation17 + $0x944] sm:$0xf]  ;;  %v7608_v62 = vpop.f32.mrf.mxu3 }
 0x88e   : > { %7880 = vmatpush.bf16.msra.mxu3 %v13357_v3  ;;  %v7553_v3 = vadd.f32 %v7552_v6, %v7538_v18  ;;  %v15795_v6 = vld [vmem:[#allocation17 + $0x1094] sm:$0xf]  ;;  %v15777_v18 = vld [vmem:[#allocation17 + $0x1004] sm:$0xf] }
 0x890   : > { %7851 = vmatpush.bf16.msra.mxu1 %v14577_v21  ;;  %v14002_v21 = vld [vmem:[#allocation17 + $0xc58] sm:$0xf0]  ;;  %v15865_v31 = vld [vmem:[#allocation6 + $0x2c] sm:$0xf]  ;;  %v14881_v35 = vld [vmem:[#allocation6 + $0x28] sm:$0xf]  ;;  %v7592_v53 = vpop.f32.mrf.mxu2 }
 0x891   : > { %7839 = vmatpush.bf16.msra.mxu0 %v13857_v32  ;;  %v7567_v32 = vadd.f32 %v7566_v59, %v7553_v3  ;;  %v14005_v56 = vor.u32 %v15651_v38, %v14002_v21  ;;  %v14506_v59 = vld [vmem:[#allocation17 + $0x1048] sm:$0xf0]  ;;  %v14290_v38 = vld [vmem:[#allocation17 + $0xe98] sm:$0xf0] }
 0x892   : > { %7881 = vmatpush.bf16.msra.mxu3 %v13285_v63  ;;  %v14750_v63 = vld [vmem:[#allocation6 + $0x58] sm:$0xf0]  ;;  %v14756_v21 = vld [vmem:[#allocation6 + $0x18] sm:$0xf] }
 0x893   : > { %14798 = vmatmul.msk.bf16.vlgmr.msra.gmra.mxu2 %vm2539_vm4, %v18208_v43  ;;  %v7581_v44 = vadd.f32 %v7580_v34, %v7567_v32  ;;  %v14753_v47 = vor.u32 %v15844_v25, %v14750_v63  ;;  %v14437_v32 = vor.u32 %v15759_v57, %v14434_v42  ;;  %v15741_v34 = vld [vmem:[#allocation17 + $0xee4] sm:$0xf]  ;;  %v14362_v63 = vld [vmem:[#allocation17 + $0xf28] sm:$0xf0]  ;;  %v15723_v25 = vld [vmem:[#allocation17 + $0xe54] sm:$0xf] }
 0x894   : > { %8227 = vmatpush.bf16.msra.mxu2 %v14765_v20  ;;  %7852 = vmatpush.bf16.msra.mxu1 %v14505_v22  ;;  %v15633_v20 = vld [vmem:[#allocation17 + $0xb84] sm:$0xf]  ;;  %v14650_v22 = vld [vmem:[#allocation17 + $0x1168] sm:$0xf0] }
 0x895   : > { %7840 = vmatpush.bf16.msra.mxu0 %v13785_v14  ;;  %v7981_v14 = vunpack.c.l.b16 %v7957_v4  ;;  %v7933_v10 = vpack.c.bf16 %v7581_v44, %v7525_v17  ;;  %v14653_v27 = vor.u32 %v15813_v39, %v14650_v22  ;;  %v14740_v17 = vld [vmem:[#allocation6 + $0x8] sm:$0xf]  ;;  %v15853_v4 = vld [vmem:[#allocation6 + $0x5c] sm:$0xf0] }
 0x896   : > { %7882 = vmatpush.bf16.msra.mxu3 %v13213_v51  ;;  %v15831_v51 = vld [vmem:[#allocation17 + $0x11b4] sm:$0xf] }
 0x897   : > { %7951 = vst [vmem:[#allocation6 + $0x70] sm:$0xff] %v7933_v10  ;;  %v18225_v2 = vpack.c.b16 %v7981_v14, %v7981_v14  ;;  %v14725_v13 = vor.u32 %v15831_v51, %v14722_v50  ;;  %v14757_v14 = vor.u32 %v15853_v4, %v14756_v21  ;;  %v14293_v10 = vor.u32 %v15723_v25, %v14290_v38  ;;  %v14742_v51 = vld [vmem:[#allocation6 + $0x50] sm:$0xf0]  ;;  %v18262_v4 = vpop.permute.xlu2 %8588 }
 0x898   : > { %7853 = vmatpush.bf16.msra.mxu1 %v14433_v11  ;;  %v14581_v11 = vor.u32 %v15795_v6, %v14578_v46  ;;  %v7594_v50 = vpop.f32.mrf.mxu2 }
 0x899   : > { %7841 = vmatpush.bf16.msra.mxu0 %v13713_v37  ;;  %v13858_v37 = vld [vmem:[#allocation17 + $0xb38] sm:$0xf0] }
 0x89a   : > { %7883 = vmatpush.bf16.msra.mxu3 %v13141_v49  ;;  %v13861_v7 = vor.u32 %v15615_v41, %v13858_v37 }
 0x89c   : > { %7854 = vmatpush.bf16.msra.mxu1 %v14361_v40  ;;  %v13645_v40 = vor.u32 %v15561_v9, %v13642_v12 }
 0x89d   : > { %7842 = vmatpush.bf16.msra.mxu0 %v13641_v60  ;;  %v15846_v60 = vld [vmem:[#allocation6 + $0x24] sm:$0xf]  ;;  %v7620_v23 = vpop.f32.mrf.mxu0 }
 0x89e   : > { %7884 = vmatpush.bf16.msra.mxu3 %v13069_v15  ;;  %v14883_v5 = vld [vmem:[#allocation6 + $0x70] sm:$0xf0]  ;;  %v15874_v49 = vld [vmem:[#allocation6 + $0x6c] sm:$0xf0]  ;;  %v14769_v3 = vor.u32 %v15846_v60, %v14766_v58  ;;  %v14509_v15 = vor.u32 %v15777_v18, %v14506_v59  ;;  %v15847_v59 = vld [vmem:[#allocation6 + $0x2c] sm:$0xf] }
 0x89f   : > { %v14886_v36 = vor.u32 %v15865_v31, %v14883_v5  ;;  %v14882_v30 = vor.u32 %v15874_v49, %v14881_v35  ;;  %v15855_v41 = vld [vmem:[#allocation6 + $0x6c] sm:$0xf0]  ;;  %v7607_v35 = vadd.f32 %v7606_v55, %v7592_v53 }
 0x8a0   : > { %7843 = vmatmul.bf16.vlgmr.msra.gmra.mxu0 %v17981_v61  ;;  %7855 = vmatpush.bf16.msra.mxu1 %v14289_v24  ;;  %v15705_v24 = vld [vmem:[#allocation17 + $0xdc4] sm:$0xf]  ;;  %v7648_v37 = vpop.f32.mrf.mxu2 }
 0x8a1   : > { %7891 = vmatpush.bf16.msrb.mxu0 %v14149_v29  ;;  %7885 = vmatmul.bf16.vlgmr.msra.gmra.mxu3 %v17943_v16  ;;  %v13933_v16 = vor.u32 %v15633_v20, %v13930_v33  ;;  %v13717_v29 = vor.u32 %v15579_v52, %v13714_v1  ;;  %v15843_v33 = vld [vmem:[#allocation6 + $0xc] sm:$0xf] }
 0x8a2   : > { %8101 = vmatpush.bf16.msrb.mxu3 %v14737_v28  ;;  %8608 = vrot.lane.b32.xlu1 %v14886_v36, %s16247_s26  ;;  %v15851_v28 = vld [vmem:[#allocation6 + $0x4c] sm:$0xf0] }
 0x8a3   : > { %14799 = vmatmul.msk.bf16.gmra.mxu2 %vm2539_vm4, %v18225_v2  ;;  %8606 = vrot.lane.b32.xlu2 %v14882_v30, %s16247_s26  ;;  %v14741_v44 = vor.u32 %v15851_v28, %v14740_v17 }
 0x8a4   : > { %7856 = vmatpush.bf16.msra.mxu1 %v14217_v45  ;;  %v14745_v45 = vor.u32 %v15843_v33, %v14742_v51  ;;  %v7662_v39 = vpop.f32.mrf.mxu3 }
 0x8a5   : > { %7892 = vmatpush.bf16.msrb.mxu0 %v14077_v48  ;;  %v14365_v48 = vor.u32 %v15741_v34, %v14362_v63  ;;  %v7622_v20 = vpop.f32.mrf.mxu0  ;;  %v7663_v49 = vadd.f32 %v7662_v39, %v7648_v37 }
 0x8a6   : > { %8173 = vmatpush.bf16.msra.mxu3 %v14753_v47  ;;  %v7634_v47 = vpop.f32.mrf.mxu1 }
 0x8a7   : > { %7857 = vmatmul.bf16.vlgmr.msra.gmra.mxu1 %v17998_v26 }
 0x8a8   : > { %7905 = vmatpush.bf16.msrb.mxu1 %v14725_v13  ;;  %v14758_v13 = vld [vmem:[#allocation6 + $0x60] sm:$0xf0]  ;;  %v7650_v19 = vpop.f32.mrf.mxu2 }
 0x8a9   : > { %7893 = vmatpush.bf16.msrb.mxu0 %v14005_v56  ;;  %v14221_v56 = vor.u32 %v15705_v24, %v14218_v54 }
 0x8ac   : > { %7906 = vmatpush.bf16.msrb.mxu1 %v14653_v27  ;;  %v14772_v27 = vld [vmem:[#allocation6 + $0x28] sm:$0xf]  ;;  %v7664_v46 = vpop.f32.mrf.mxu3 }
 0x8ad   : > { %7894 = vmatpush.bf16.msrb.mxu0 %v13933_v16  ;;  %v14773_v5 = vor.u32 %v15855_v41, %v14772_v27  ;;  %v7665_v18 = vadd.f32 %v7664_v46, %v7650_v19 }
 0x8ae   : > { %v7636_v22 = vpop.f32.mrf.mxu1 }
 0x8b0   : > { %7907 = vmatpush.bf16.msrb.mxu1 %v14581_v11  ;;  %v14774_v11 = vld [vmem:[#allocation6 + $0x70] sm:$0xf0]  ;;  %v7704_v38 = vpop.f32.mrf.mxu2 }
 0x8b1   : > { %7895 = vmatpush.bf16.msrb.mxu0 %v13861_v7  ;;  %14800 = vmatmul.msk.bf16.vlgmr.msrb.gmra.mxu3 %vm2539_vm4, %v18208_v43  ;;  %v7621_v7 = vadd.f32 %v7620_v23, %v7607_v35  ;;  %v14777_v1 = vor.u32 %v15847_v59, %v14774_v11 }
 0x8b2   : > { %8245 = vmatpush.bf16.msrb.mxu3 %v14769_v3 }
 0x8b3   : > { %14806 = vmatmul.msk.bf16.vlgmr.msrb.gmra.mxu2 %vm2539_vm4, %v18208_v43  ;;  %v7635_v6 = vadd.f32 %v7634_v47, %v7621_v7 }
 0x8b4   : > { %7908 = vmatpush.bf16.msrb.mxu1 %v14509_v15 }
 0x8b5   : > { %7896 = vmatpush.bf16.msrb.mxu0 %v13789_v0  ;;  %v7609_v0 = vadd.f32 %v7608_v62, %v7594_v50  ;;  %v8591_v50 = vpop.permute.xlu1 %8590 }
 0x8b7   : > { %v7623_v60 = vadd.f32 %v7622_v20, %v7609_v0 }
 0x8b8   : > { %7909 = vmatpush.bf16.msrb.mxu1 %v14437_v32  ;;  %v7706_v47 = vpop.f32.mrf.mxu2 }
 0x8b9   : > { %7897 = vmatpush.bf16.msrb.mxu0 %v13717_v29  ;;  %v7637_v15 = vadd.f32 %v7636_v22, %v7623_v60 }
 0x8bc   : > { %7910 = vmatpush.bf16.msrb.mxu1 %v14365_v48 }
 0x8bd   : > { %7898 = vmatpush.bf16.msrb.mxu0 %v13645_v40  ;;  %v7676_v31 = vpop.f32.mrf.mxu0  ;;  %v8597_v41 = vpop.permute.xlu1 %8596 }
 0x8be   : > { %v7677_v36 = vadd.f32 %v7676_v31, %v7663_v49 }
 0x8c0   : > { %7899 = vmatmul.bf16.vlgmr.msrb.gmra.mxu0 %v17981_v61  ;;  %7911 = vmatpush.bf16.msrb.mxu1 %v14293_v10  ;;  %v15845_v61 = vld [vmem:[#allocation6 + $0x1c] sm:$0xf] }
 0x8c1   : > { %8119 = vmatpush.bf16.msra.mxu0 %v14741_v44  ;;  %14801 = vmatmul.msk.bf16.gmra.mxu3 %vm2539_vm4, %v18225_v2  ;;  %v14761_v16 = vor.u32 %v15845_v61, %v14758_v13  ;;  %v8587_v44 = vpop.permute.xlu0 %8586 }
 0x8c2   : > { %v8623_v25 = vsel %vm8622_vm7, %v8587_v44, %v18262_v4 }
 0x8c3   : > { %14807 = vmatmul.msk.bf16.gmra.mxu2 %vm2539_vm4, %v18225_v2 }
 0x8c4   : > { %7912 = vmatpush.bf16.msrb.mxu1 %v14221_v56  ;;  %v7690_v30 = vpop.f32.mrf.mxu1  ;;  %v7718_v48 = vpop.f32.mrf.mxu3 }
 0x8c5   : > { %8191 = vmatpush.bf16.msrb.mxu0 %v14757_v14  ;;  %v7678_v58 = vpop.f32.mrf.mxu0  ;;  %v7719_v20 = vadd.f32 %v7718_v48, %v7704_v38 }
 0x8c6   : > { %v7679_v52 = vadd.f32 %v7678_v58, %v7665_v18  ;;  %v7760_v56 = vpop.f32.mrf.mxu2 }
 0x8c7   : > { %7913 = vmatmul.bf16.vlgmr.msrb.gmra.mxu1 %v17998_v26  ;;  %v7691_v26 = vadd.f32 %v7690_v30, %v7677_v36 }
 0x8c8   : > { %8137 = vmatpush.bf16.msra.mxu1 %v14745_v45 }
 0x8c9   : > { %v7925_v8 = vpack.c.bf16 %v7691_v26, %v7635_v6  ;;  %v18298_v0 = vpop.permute.xlu0 %8592 }
 0x8cb   : > { %7943 = vst [vmem:[#allocation6 + $0x30] sm:$0xff] %v7925_v8 }
 0x8cc   : > { %8209 = vmatpush.bf16.msrb.mxu1 %v14761_v16  ;;  %v7692_v3 = vpop.f32.mrf.mxu1  ;;  %v7720_v14 = vpop.f32.mrf.mxu3 }
 0x8cd   : > { %v7693_v29 = vadd.f32 %v7692_v3, %v7679_v52  ;;  %v7721_v35 = vadd.f32 %v7720_v14, %v7706_v47  ;;  %v14964_v14 = vld [vmem:[#allocation6 + $0x50] sm:$0xf0] }
 0x8ce   : > { %v7762_v37 = vpop.f32.mrf.mxu2 }
 0x8cf   : > { %v7934_v57 = vpack.c.bf16 %v7693_v29, %v7637_v15 }
 0x8d0   : > { %14802 = vmatmul.msk.bf16.vlgmr.msra.gmra.mxu0 %vm2539_vm4, %v18208_v43 }
 0x8d1   : > { %8263 = vmatpush.bf16.msra.mxu0 %v14773_v5  ;;  %14808 = vmatmul.msk.bf16.vlgmr.msra.gmra.mxu3 %vm2539_vm4, %v18208_v43  ;;  %7952 = vst [vmem:[#allocation6 + $0x78] sm:$0xff] %v7934_v57  ;;  %v18282_v5 = vpop.permute.xlu2 %8594 }
 0x8d2   : > { %v14889_v42 = vld [vmem:[#allocation6 + $0x30] sm:$0xf]  ;;  %v15866_v9 = vld [vmem:[#allocation6 + $0x34] sm:$0xf]  ;;  %v8627_v7 = vsel %vm8622_vm7, %v18282_v5, %v8597_v41 }
 0x8d3   : > { %14814 = vmatmul.msk.bf16.vlgmr.msra.gmra.mxu2 %vm2539_vm4, %v18208_v43  ;;  %v14780_v12 = vld [vmem:[#allocation6 + $0x30] sm:$0xf]  ;;  %v15848_v53 = vld [vmem:[#allocation6 + $0x34] sm:$0xf] }
 0x8d5   : > { %v18321_v38 = vpop.permute.xlu1 %8602 }
 0x8d7   : > { %14804 = vmatmul.msk.bf16.vlgmr.msra.gmra.mxu1 %vm2539_vm4, %v18208_v43 }
 0x8d8   : > { %8281 = vmatpush.bf16.msra.mxu1 %v14777_v1  ;;  %v15875_v32 = vld [vmem:[#allocation6 + $0x74] sm:$0xf0]  ;;  %v14891_v55 = vld [vmem:[#allocation6 + $0x78] sm:$0xf0] }
 0x8d9   : > { %v15856_v40 = vld [vmem:[#allocation6 + $0x74] sm:$0xf0]  ;;  %v14890_v28 = vor.u32 %v15875_v32, %v14889_v42  ;;  %v14894_v34 = vor.u32 %v15866_v9, %v14891_v55  ;;  %v14782_v23 = vld [vmem:[#allocation6 + $0x78] sm:$0xf0]  ;;  %v8624_v55 = vsel %vm8622_vm7, %v18262_v4, %v8591_v50 }
 0x8da   : > { %v14781_v63 = vor.u32 %v15856_v40, %v14780_v12  ;;  %v14785_v17 = vor.u32 %v15848_v53, %v14782_v23  ;;  %v8625_v40 = vsel %vm8622_vm7, %v8591_v50, %v18298_v0  ;;  %v15891_v50 = vld [vmem:[#allocation6 + $0x5c] sm:$0xf0] }
 0x8db   : > { %8610 = vrot.lane.b32.xlu0 %v14890_v28, %s16247_s26  ;;  %8612 = vrot.lane.b32.xlu2 %v14894_v34, %s16247_s26  ;;  %v8599_v34 = vpop.permute.xlu0 %8598 }
 0x8dc   : > { %8299 = vmatpush.bf16.msrb.mxu2 %v14781_v63  ;;  %8317 = vmatpush.bf16.msra.mxu3 %v14785_v17  ;;  %v15888_v63 = vld [vmem:[#allocation6 + $0x44] sm:$0xf0]  ;;  %v14954_v17 = vld [vmem:[#allocation6] sm:$0xf]  ;;  %v8628_v4 = vsel %vm8622_vm7, %v8597_v41, %v8599_v34 }
 0x8dd   : > { %v7732_v21 = vpop.f32.mrf.mxu0  ;;  %v14955_v44 = vor.u32 %v15888_v63, %v14954_v17 }
 0x8de   : > { %v7733_v45 = vadd.f32 %v7732_v21, %v7719_v20  ;;  %v14834_v20 = vld [vmem:[%s19815_s12 + $0x14] sm:$0xf] }
 0x8e0   : > { %14803 = vmatmul.msk.bf16.gmra.mxu0 %vm2539_vm4, %v18225_v2 }
 0x8e1   : > { %14809 = vmatmul.msk.bf16.gmra.mxu3 %vm2539_vm4, %v18225_v2 }
 0x8e3   : > { %14815 = vmatmul.msk.bf16.gmra.mxu2 %vm2539_vm4, %v18225_v2  ;;  %v8605_v21 = vpop.permute.xlu0 %8604 }
 0x8e4   : > { %v7746_v10 = vpop.f32.mrf.mxu1  ;;  %v7774_v54 = vpop.f32.mrf.mxu3  ;;  %v8631_v47 = vsel %vm8622_vm7, %v18321_v38, %v8605_v21 }
 0x8e5   : > { %v7734_v24 = vpop.f32.mrf.mxu0  ;;  %v7775_v33 = vadd.f32 %v7774_v54, %v7760_v56  ;;  %v7747_v39 = vadd.f32 %v7746_v10, %v7733_v45  ;;  %v15880_v10 = vld [vmem:[#allocation6 + $0xc] sm:$0xf] }
 0x8e6   : > { %v7735_v36 = vadd.f32 %v7734_v24, %v7721_v35  ;;  %v18290_v19 = vpop.f32.mrf.mxu2  ;;  %v14967_v24 = vor.u32 %v15880_v10, %v14964_v14  ;;  %v15883_v35 = vld [vmem:[#allocation6 + $0x24] sm:$0xf] }
 0x8e7   : > { %14805 = vmatmul.msk.bf16.gmra.mxu1 %vm2539_vm4, %v18225_v2 }
 0x8ec   : > { %v7748_v62 = vpop.f32.mrf.mxu1  ;;  %v7776_v13 = vpop.f32.mrf.mxu3 }
 0x8ed   : > { %v7777_v49 = vadd.f32 %v7776_v13, %v7762_v37  ;;  %v7749_v46 = vadd.f32 %v7748_v62, %v7735_v36  ;;  %v14978_v13 = vld [vmem:[#allocation6 + $0x18] sm:$0xf] }
 0x8ee   : > { %v18300_v15 = vpop.f32.mrf.mxu2 }
 0x8f0   : > { %14810 = vmatmul.msk.bf16.vlgmr.msrb.gmra.mxu0 %vm2539_vm4, %v18208_v43 }
 0x8f1   : > { %14816 = vmatmul.msk.bf16.vlgmr.msrb.gmra.mxu3 %vm2539_vm4, %v18208_v43 }
 0x8f2   : > { %8670 = vmatpush.bf16.msrb.mxu3 %v8623_v25  ;;  %v18319_v25 = vld [vmem:[%s19815_s12 + $0xc] sm:$0xff] }
 0x8f3   : > { %14822 = vmatmul.msk.bf16.vlgmr.msrb.gmra.mxu2 %vm2539_vm4, %v18208_v43 }
 0x8f7   : > { %14812 = vmatmul.msk.bf16.vlgmr.msrb.gmra.mxu1 %vm2539_vm4, %v18208_v43 }
 0x8fd   : > { %v7788_v51 = vpop.f32.mrf.mxu0 }
 0x8fe   : > { %v7789_v61 = vadd.f32 %v7788_v51, %v7775_v33  ;;  %v18333_v33 = vpop.permute.xlu2 %8600 }
 0x8ff   : > { %v8629_v45 = vsel %vm8622_vm7, %v8599_v34, %v18333_v33 }
 0x900   : > { %14811 = vmatmul.msk.bf16.gmra.mxu0 %vm2539_vm4, %v18225_v2 }
 0x901   : > { %14817 = vmatmul.msk.bf16.gmra.mxu3 %vm2539_vm4, %v18225_v2 }
 0x903   : > { %14823 = vmatmul.msk.bf16.gmra.mxu2 %vm2539_vm4, %v18225_v2 }
 0x904   : > { %v7802_v16 = vpop.f32.mrf.mxu1  ;;  %v18288_v30 = vpop.f32.mrf.mxu3 }
 0x905   : > { %v7803_v22 = vadd.f32 %v7802_v16, %v7789_v61  ;;  %v7790_v27 = vpop.f32.mrf.mxu0  ;;  %v14979_v61 = vor.u32 %v15891_v50, %v14978_v13  ;;  %v8511_v16 = vunpack.c.l.b16 %v14834_v20 }
 0x906   : > { %v7791_v6 = vadd.f32 %v7790_v27, %v7777_v49  ;;  %v7872_v53 = vpop.f32.mrf.mxu2  ;;  %v14988_v27 = vld [vmem:[#allocation6 + $0x68] sm:$0xf0] }
 0x907   : > { %14813 = vmatmul.msk.bf16.gmra.mxu1 %vm2539_vm4, %v18225_v2  ;;  %v7926_v31 = vpack.c.bf16 %v7803_v22, %v7747_v39  ;;  %v14991_v49 = vor.u32 %v15883_v35, %v14988_v27  ;;  %v8626_v35 = vsel %vm8622_vm7, %v18298_v0, %v18282_v5  ;;  %v14962_v5 = vld [vmem:[#allocation6 + $0x8] sm:$0xf]  ;;  %v15879_v0 = vld [vmem:[#allocation6 + $0x4] sm:$0xf] }
 0x909   : > { %7944 = vst [vmem:[#allocation6 + $0x38] sm:$0xff] %v7926_v31  ;;  %v18346_v31 = vpack.c.b16 %v8511_v16, %v8511_v16 }
 0x90c   : > { %v7804_v26 = vpop.f32.mrf.mxu1  ;;  %v18294_v11 = vpop.f32.mrf.mxu3 }
 0x90d   : > { %v7805_v8 = vadd.f32 %v7804_v26, %v7791_v6 }
 0x90e   : > { %v7874_v54 = vpop.f32.mrf.mxu2 }
 0x90f   : > { %v7935_v58 = vpack.c.bf16 %v7805_v8, %v7749_v46 }
 0x910   : > { %14818 = vmatmul.msk.bf16.vlgmr.msra.gmra.mxu0 %vm2539_vm4, %v18208_v43  ;;  %v14897_v18 = vld [vmem:[#allocation6 + $0x38] sm:$0xf]  ;;  %v15849_v60 = vld [vmem:[#allocation6 + $0x3c] sm:$0xf] }
 0x911   : > { %14824 = vmatmul.msk.bf16.vlgmr.msra.gmra.mxu3 %vm2539_vm4, %v18208_v43  ;;  %7953 = vst [vmem:[#allocation6 + $0x80] sm:$0xff] %v7935_v58  ;;  %v14788_v59 = vld [vmem:[#allocation6 + $0x38] sm:$0xf]  ;;  %v15867_v9 = vld [vmem:[#allocation6 + $0x3c] sm:$0xf] }
 0x912   : > { %8742 = vmatpush.bf16.msra.mxu3 %v8627_v7  ;;  %v7831_v7 = vadd.f32 %v18288_v30, %v18290_v19  ;;  %v8607_v30 = vpop.permute.xlu2 %8606 }
 0x916   : > { %v18339_v22 = vpop.f32.mrf.mxu2 }
 0x917   : > { %14820 = vmatmul.msk.bf16.vlgmr.msra.gmra.mxu1 %vm2539_vm4, %v18208_v43 }
 0x918   : > { %v15876_v52 = vld [vmem:[#allocation6 + $0x7c] sm:$0xf0]  ;;  %v14790_v3 = vld [vmem:[#allocation6 + $0x80] sm:$0xf0] }
 0x919   : > { %v15857_v1 = vld [vmem:[#allocation6 + $0x7c] sm:$0xf0]  ;;  %v14898_v29 = vor.u32 %v15876_v52, %v14897_v18  ;;  %v14793_v42 = vor.u32 %v15849_v60, %v14790_v3  ;;  %v14899_v12 = vld [vmem:[#allocation6 + $0x80] sm:$0xf0]  ;;  %v15894_v52 = vld [vmem:[#allocation6 + $0x74] sm:$0xf0] }
 0x91a   : > { %v14789_v57 = vor.u32 %v15857_v1, %v14788_v59  ;;  %v14902_v32 = vor.u32 %v15867_v9, %v14899_v12  ;;  %v15002_v3 = vld [vmem:[#allocation6 + $0x30] sm:$0xf] }
 0x91b   : > { %8614 = vrot.lane.b32.xlu1 %v14898_v29, %s16247_s26  ;;  %8353 = vmatpush.bf16.msrb.mxu1 %v14793_v42  ;;  %v15003_v19 = vor.u32 %v15894_v52, %v15002_v3  ;;  %v7833_v29 = vadd.f32 %v18294_v11, %v18300_v15  ;;  %v15012_v11 = vld [vmem:[#allocation6 + $0x80] sm:$0xf0]  ;;  %v15881_v52 = vld [vmem:[#allocation6 + $0x14] sm:$0xf] }
 0x91c   : > { %8335 = vmatpush.bf16.msrb.mxu0 %v14789_v57  ;;  %8616 = vrot.lane.b32.xlu0 %v14902_v32, %s16247_s26 }
 0x91d   : > { %v7844_v23 = vpop.f32.mrf.mxu0 }
 0x91e   : > { %v18352_v26 = vpop.f32.mrf.mxu2  ;;  %v7845_v46 = vadd.f32 %v7844_v23, %v7831_v7  ;;  %v15889_v7 = vld [vmem:[#allocation6 + $0x4c] sm:$0xf0] }
 0x91f   : > { %8706 = vmatpush.bf16.msra.mxu1 %v8625_v40  ;;  %v8632_v40 = vsel %vm8622_vm7, %v8605_v21, %v8607_v30 }
 0x920   : > { %14819 = vmatmul.msk.bf16.gmra.mxu0 %vm2539_vm4, %v18225_v2 }
 0x921   : > { %14825 = vmatmul.msk.bf16.gmra.mxu3 %vm2539_vm4, %v18225_v2  ;;  %8688 = vmatpush.bf16.msra.mxu0 %v8624_v55 }
 0x924   : > { %v7886_v28 = vpop.f32.mrf.mxu3  ;;  %9224 = vrot.lane.b32.xlu0 %v14955_v44, %s16248_s27  ;;  %v7858_v56 = vpop.f32.mrf.mxu1 }
 0x925   : > { %v7846_v62 = vpop.f32.mrf.mxu0  ;;  %v7887_v36 = vadd.f32 %v7886_v28, %v7872_v53  ;;  %v7859_v59 = vadd.f32 %v7858_v56, %v7845_v46  ;;  %v15886_v53 = vld [vmem:[#allocation6 + $0x3c] sm:$0xf] }
 0x926   : > { %v18363_v9 = vpop.f32.mrf.mxu2  ;;  %v7847_v12 = vadd.f32 %v7846_v62, %v7833_v29  ;;  %v15015_v23 = vor.u32 %v15886_v53, %v15012_v11 }
 0x927   : > { %14821 = vmatmul.msk.bf16.gmra.mxu1 %vm2539_vm4, %v18225_v2 }
 0x92c   : > { %v7888_v48 = vpop.f32.mrf.mxu3  ;;  %9230 = vrot.lane.b32.xlu0 %v14967_v24, %s16248_s27  ;;  %v7860_v37 = vpop.f32.mrf.mxu1 }
 0x92d   : > { %v7889_v57 = vadd.f32 %v7888_v48, %v7874_v54  ;;  %v7861_v34 = vadd.f32 %v7860_v37, %v7847_v12 }
 0x92e   : > { %v8092_v44 = vpop.f32.mrf.mxu2 }
 0x92f   : > { %v14996_v44 = vld [vmem:[#allocation6 + $0x70] sm:$0xf0] }
 0x930   : > { %14826 = vmatmul.msk.bf16.vlgmr.msrb.gmra.mxu0 %vm2539_vm4, %v18208_v43 }
 0x931   : > { %8760 = vmatpush.bf16.msrb.mxu0 %v8628_v4  ;;  %14911 = vmatmul.msk.bf16.vlgmr.msrb.gmra.mxu3 %vm2539_vm4, %v18319_v25  ;;  %v18376_v4 = vpop.permute.xlu1 %8608 }
 0x932   : > { %8814 = vmatpush.bf16.msrb.mxu3 %v8631_v47  ;;  %v8633_v14 = vsel %vm8622_vm7, %v8607_v30, %v18376_v4 }
 0x934   : > { %v18328_v51 = vpop.f32.mrf.mxu3  ;;  %9236 = vrot.lane.b32.xlu0 %v14979_v61, %s16248_s27 }
 0x935   : > { %v18384_v24 = vpop.permute.xlu2 %8612 }
 0x937   : > { %14828 = vmatmul.msk.bf16.vlgmr.msrb.gmra.mxu1 %vm2539_vm4, %v18208_v43 }
 0x938   : > { %8778 = vmatpush.bf16.msrb.mxu1 %v8629_v45 }
 0x93c   : > { %v18342_v41 = vpop.f32.mrf.mxu3  ;;  %9242 = vrot.lane.b32.xlu0 %v14991_v49, %s16248_s27 }
 0x93d   : > { %v7900_v39 = vpop.f32.mrf.mxu0 }
 0x93e   : > { %v7901_v8 = vadd.f32 %v7900_v39, %v7887_v36  ;;  %v18393_v39 = vpop.f32.mrf.mxu2  ;;  %v14956_v36 = vld [vmem:[#allocation6 + $0x48] sm:$0xf0] }
 0x940   : > { %14827 = vmatmul.msk.bf16.gmra.mxu0 %vm2539_vm4, %v18225_v2 }
 0x941   : > { %14912 = vmatmul.msk.bf16.gmra.mxu3 %vm2539_vm4, %v18346_v31 }
 0x944   : > { %v18355_v58 = vpop.f32.mrf.mxu3  ;;  %v7914_v18 = vpop.f32.mrf.mxu1  ;;  %9248 = vrot.lane.b32.xlu0 %v15003_v19, %s16248_s27 }
 0x945   : > { %v7902_v6 = vpop.f32.mrf.mxu0  ;;  %v7915_v60 = vadd.f32 %v7914_v18, %v7901_v8  ;;  %v14963_v8 = vor.u32 %v15889_v7, %v14962_v5  ;;  %v14959_v18 = vor.u32 %v15879_v0, %v14956_v36  ;;  %v15885_v7 = vld [vmem:[#allocation6 + $0x34] sm:$0xf] }
 0x946   : > { %v7903_v32 = vadd.f32 %v7902_v6, %v7889_v57  ;;  %v8630_v6 = vsel %vm8622_vm7, %v18333_v33, %v18321_v38  ;;  %v15890_v33 = vld [vmem:[#allocation6 + $0x54] sm:$0xf0] }
 0x947   : > { %v7927_v1 = vpack.c.bf16 %v7915_v60, %v7859_v59  ;;  %14829 = vmatmul.msk.bf16.gmra.mxu1 %vm2539_vm4, %v18225_v2  ;;  %v18413_v59 = vpop.f32.mrf.mxu2 }
 0x949   : > { %7945 = vst [vmem:[#allocation6 + $0x40] sm:$0xff] %v7927_v1  ;;  %v14970_v1 = vld [vmem:[#allocation6 + $0x10] sm:$0xf] }
 0x94a   : > { %v14971_v19 = vor.u32 %v15890_v33, %v14970_v1 }
 0x94c   : > { %v8110_v55 = vpop.f32.mrf.mxu3  ;;  %v7916_v28 = vpop.f32.mrf.mxu1  ;;  %9254 = vrot.lane.b32.xlu0 %v15015_v23, %s16248_s27 }
 0x94d   : > { %v18361_v42 = vpop.f32.mrf.mxu0  ;;  %v7917_v63 = vadd.f32 %v7916_v28, %v7903_v32  ;;  %v18386_v54 = vpop.permute.xlu0 %8610  ;;  %v15892_v32 = vld [vmem:[#allocation6 + $0x64] sm:$0xf0]  ;;  %v14980_v55 = vld [vmem:[#allocation6 + $0x60] sm:$0xf0]  ;;  %v15882_v28 = vld [vmem:[#allocation6 + $0x1c] sm:$0xf] }
 0x94e   : > { %v8635_v45 = vsel %vm8622_vm7, %v18386_v54, %v18384_v24  ;;  %v14983_v11 = vor.u32 %v15882_v28, %v14980_v55 }
 0x94f   : > { %v7936_v15 = vpack.c.bf16 %v7917_v63, %v7861_v34  ;;  %v18425_v29 = vpop.f32.mrf.mxu2 }
 0x950   : > { %14913 = vmatmul.msk.bf16.vlgmr.msra.gmra.mxu0 %vm2539_vm4, %v18319_v25  ;;  %v15868_v10 = vld [vmem:[#allocation6 + $0x44] sm:$0xf]  ;;  %v14905_v47 = vld [vmem:[#allocation6 + $0x40] sm:$0xf] }
 0x951   : > { %8832 = vmatpush.bf16.msra.mxu0 %v8632_v40  ;;  %14919 = vmatmul.msk.bf16.vlgmr.msra.gmra.mxu3 %vm2539_vm4, %v18319_v25  ;;  %7954 = vst [vmem:[#allocation6 + $0x88] sm:$0xff] %v7936_v15  ;;  %v14796_v16 = vld [vmem:[#allocation6 + $0x40] sm:$0xf] }
 0x952   : > { %8886 = vmatpush.bf16.msra.mxu3 %v8635_v45  ;;  %v14986_v40 = vld [vmem:[#allocation6 + $0x20] sm:$0xf] }
 0x953   : > { %v14987_v63 = vor.u32 %v15892_v32, %v14986_v40 }
 0x954   : > { %v18374_v48 = vpop.f32.mrf.mxu3  ;;  %v18378_v21 = vpop.f32.mrf.mxu1 }
 0x955   : > { %v18371_v17 = vpop.f32.mrf.mxu0 }
 0x957   : > { %14915 = vmatmul.msk.bf16.vlgmr.msra.gmra.mxu1 %vm2539_vm4, %v18319_v25  ;;  %v8164_v15 = vpop.f32.mrf.mxu2 }
 0x958   : > { %8850 = vmatpush.bf16.msra.mxu1 %v8633_v14  ;;  %v14907_v62 = vld [vmem:[#allocation6 + $0x88] sm:$0xf0]  ;;  %v15877_v56 = vld [vmem:[#allocation6 + $0x84] sm:$0xf0] }
 0x959   : > { %v15858_v50 = vld [vmem:[#allocation6 + $0x84] sm:$0xf0]  ;;  %v14910_v13 = vor.u32 %v15868_v10, %v14907_v62  ;;  %v14906_v61 = vor.u32 %v15877_v56, %v14905_v47  ;;  %v15884_v14 = vld [vmem:[#allocation6 + $0x2c] sm:$0xf] }
 0x95a   : > { %v14797_v37 = vor.u32 %v15858_v50, %v14796_v16  ;;  %v14994_v10 = vld [vmem:[#allocation6 + $0x28] sm:$0xf]  ;;  %v14999_v62 = vor.u32 %v15884_v14, %v14996_v44  ;;  %v15004_v16 = vld [vmem:[#allocation6 + $0x78] sm:$0xf0] }
 0x95b   : > { %8620 = vrot.lane.b32.xlu1 %v14910_v13, %s16247_s26  ;;  %8618 = vrot.lane.b32.xlu2 %v14906_v61, %s16247_s26  ;;  %v15895_v61 = vld [vmem:[#allocation6 + $0x7c] sm:$0xf0]  ;;  %v15007_v5 = vor.u32 %v15885_v7, %v15004_v16 }
 0x95c   : > { %v18395_v27 = vpop.f32.mrf.mxu3  ;;  %8371 = vmatpush.bf16.msra.mxu2 %v14797_v37  ;;  %v18402_v49 = vpop.f32.mrf.mxu1  ;;  %v8634_v37 = vsel %vm8622_vm7, %v18376_v4, %v18386_v54  ;;  %v15020_v54 = vld [vmem:[#allocation6 + $0x88] sm:$0xf0] }
 0x95d   : > { %v18388_v20 = vpop.f32.mrf.mxu0 }
 0x95f   : > { %14830 = vmatmul.msk.bf16.vlgmr.msra.gmra.mxu2 %vm2539_vm4, %v18208_v43  ;;  %v14972_v43 = vld [vmem:[#allocation6 + $0x58] sm:$0xf0]  ;;  %v18447_v50 = vpop.f32.mrf.mxu2 }
 0x960   : > { %14914 = vmatmul.msk.bf16.gmra.mxu0 %vm2539_vm4, %v18346_v31  ;;  %8724 = vmatpush.bf16.msrb.mxu2 %v8626_v35  ;;  %v14975_v30 = vor.u32 %v15881_v52, %v14972_v43  ;;  %v15010_v35 = vld [vmem:[#allocation6 + $0x38] sm:$0xf]  ;;  %v15018_v43 = vld [vmem:[#allocation6 + $0x40] sm:$0xf] }
 0x961   : > { %14920 = vmatmul.msk.bf16.gmra.mxu3 %vm2539_vm4, %v18346_v31 }
 0x963   : > { %9228 = vrot.lane.b32.xlu1 %v14963_v8, %s16248_s27  ;;  %9226 = vrot.lane.b32.xlu2 %v14959_v18, %s16248_s27  ;;  %v15896_v8 = vld [vmem:[#allocation6 + $0x84] sm:$0xf0]  ;;  %v15887_v18 = vld [vmem:[#allocation6 + $0x44] sm:$0xf] }
 0x964   : > { %8796 = vmatpush.bf16.msra.mxu2 %v8630_v6  ;;  %v18415_v60 = vpop.f32.mrf.mxu3  ;;  %v18419_v38 = vpop.f32.mrf.mxu1  ;;  %v15011_v6 = vor.u32 %v15895_v61, %v15010_v35  ;;  %v15023_v52 = vor.u32 %v15887_v18, %v15020_v54  ;;  %v15019_v1 = vor.u32 %v15896_v8, %v15018_v43 }
 0x965   : > { %v8128_v46 = vpop.f32.mrf.mxu0 }
 0x967   : > { %14916 = vmatmul.msk.bf16.gmra.mxu1 %vm2539_vm4, %v18346_v31  ;;  %v18464_v0 = vpop.f32.mrf.mxu2 }
 0x96b   : > { %9234 = vrot.lane.b32.xlu1 %v14975_v30, %s16248_s27  ;;  %9232 = vrot.lane.b32.xlu2 %v14971_v19, %s16248_s27 }
 0x96c   : > { %v8182_v57 = vpop.f32.mrf.mxu3  ;;  %v8146_v12 = vpop.f32.mrf.mxu1 }
 0x96d   : > { %v18423_v3 = vpop.f32.mrf.mxu0 }
 0x96f   : > { %14831 = vmatmul.msk.bf16.gmra.mxu2 %vm2539_vm4, %v18225_v2  ;;  %v15893_v2 = vld [vmem:[#allocation6 + $0x6c] sm:$0xf0]  ;;  %v18476_v30 = vpop.f32.mrf.mxu2 }
 0x970   : > { %14921 = vmatmul.msk.bf16.vlgmr.msrb.gmra.mxu0 %vm2539_vm4, %v18319_v25  ;;  %v14995_v56 = vor.u32 %v15893_v2, %v14994_v10  ;;  %19924 = vst [vmem:[#allocation29_spill] sm:$0xff] %v18476_v30 }
 0x971   : > { %14927 = vmatmul.msk.bf16.vlgmr.msrb.gmra.mxu3 %vm2539_vm4, %v18319_v25 }
 0x973   : > { %9240 = vrot.lane.b32.xlu1 %v14987_v63, %s16248_s27  ;;  %9238 = vrot.lane.b32.xlu2 %v14983_v11, %s16248_s27 }
 0x974   : > { %v18437_v53 = vpop.f32.mrf.mxu3  ;;  %v18441_v23 = vpop.f32.mrf.mxu1 }
 0x975   : > { %v18435_v34 = vpop.f32.mrf.mxu0 }
 0x977   : > { %14923 = vmatmul.msk.bf16.vlgmr.msrb.gmra.mxu1 %vm2539_vm4, %v18319_v25  ;;  %v8236_v32 = vpop.f32.mrf.mxu2 }
 0x97b   : > { %9246 = vrot.lane.b32.xlu1 %v14999_v62, %s16248_s27  ;;  %9244 = vrot.lane.b32.xlu2 %v14995_v56, %s16248_s27 }
 0x97c   : > { %v18449_v45 = vpop.f32.mrf.mxu3  ;;  %v18453_v13 = vpop.f32.mrf.mxu1 }
 0x97d   : > { %v18445_v47 = vpop.f32.mrf.mxu0  ;;  %19920 = vst [vmem:[#allocation21_spill] sm:$0xff] %v18453_v13 }
 0x97f   : > { %14917 = vmatmul.msk.bf16.vlgmr.msrb.gmra.mxu2 %vm2539_vm4, %v18319_v25  ;;  %v18499_v2 = vpop.f32.mrf.mxu2 }
 0x980   : > { %14922 = vmatmul.msk.bf16.gmra.mxu0 %vm2539_vm4, %v18346_v31  ;;  %8868 = vmatpush.bf16.msrb.mxu2 %v8634_v37 }
 0x981   : > { %14928 = vmatmul.msk.bf16.gmra.mxu3 %vm2539_vm4, %v18346_v31 }
 0x983   : > { %9252 = vrot.lane.b32.xlu1 %v15011_v6, %s16248_s27  ;;  %9250 = vrot.lane.b32.xlu2 %v15007_v5, %s16248_s27 }
 0x984   : > { %v18466_v46 = vpop.f32.mrf.mxu3  ;;  %v18470_v4 = vpop.f32.mrf.mxu1 }
 0x985   : > { %v8200_v36 = vpop.f32.mrf.mxu0  ;;  %19921 = vst [vmem:[#allocation28_spill] sm:$0xff] %v18466_v46 }
 0x986   : > { %19922 = vst [vmem:[#allocation23_spill] sm:$0xff] %v18470_v4 }
 0x987   : > { %14924 = vmatmul.msk.bf16.gmra.mxu1 %vm2539_vm4, %v18346_v31  ;;  %v18511_v62 = vpop.f32.mrf.mxu2 }
 0x988   : > { %19931 = vst [vmem:[#allocation31_spill] sm:$0xff] %v18511_v62 }
 0x98b   : > { %9258 = vrot.lane.b32.xlu1 %v15023_v52, %s16248_s27  ;;  %9256 = vrot.lane.b32.xlu2 %v15019_v1, %s16248_s27 }
 0x98c   : > { %v8254_v19 = vpop.f32.mrf.mxu3  ;;  %v8218_v57 = vpop.f32.mrf.mxu1 }
 0x98d   : > { %v18474_v33 = vpop.f32.mrf.mxu0  ;;  %v8615_v40 = vpop.permute.xlu1 %8614 }
 0x98e   : > { %19923 = vst [vmem:[#allocation26_spill] sm:$0xff] %v18474_v33  ;;  %v8636_v28 = vsel %vm8622_vm7, %v18384_v24, %v8615_v40  ;;  %v8617_v63 = vpop.permute.xlu0 %8616 }
 0x98f   : > { %14918 = vmatmul.msk.bf16.gmra.mxu2 %vm2539_vm4, %v18346_v31  ;;  %v8637_v15 = vsel %vm8622_vm7, %v8615_v40, %v8617_v63  ;;  %8904 = vmatpush.bf16.msrb.mxu0 %v8636_v28  ;;  %v18521_v37 = vpop.f32.mrf.mxu2 }
 0x990   : > { %14929 = vmatmul.msk.bf16.vlgmr.msra.gmra.mxu0 %vm2539_vm4, %v18319_v25  ;;  %8922 = vmatpush.bf16.msrb.mxu1 %v8637_v15  ;;  %19935 = vst [vmem:[#allocation36_spill] sm:$0xff] %v18521_v37  ;;  %v18556_v15 = vld [vmem:[%s19815_s12 + $0x18] sm:$0xff] }
 0x991   : > { %14935 = vmatmul.msk.bf16.vlgmr.msra.gmra.mxu3 %vm2539_vm4, %v18319_v25 }
 0x994   : > { %v18488_v55 = vpop.f32.mrf.mxu3  ;;  %v18492_v11 = vpop.f32.mrf.mxu1 }
 0x995   : > { %v18486_v12 = vpop.f32.mrf.mxu0  ;;  %19926 = vst [vmem:[#allocation34_spill] sm:$0xff] %v18488_v55 }
 0x996   : > { %19925 = vst [vmem:[#allocation32_spill] sm:$0xff] %v18486_v12  ;;  %v9225_v19 = vpop.permute.xlu0 %9224 }
 0x997   : > { %19927 = vst [vmem:[#allocation24_spill] sm:$0xff] %v18492_v11  ;;  %14931 = vmatmul.msk.bf16.vlgmr.msra.gmra.mxu1 %vm2539_vm4, %v18319_v25  ;;  %v8308_v6 = vpop.f32.mrf.mxu2 }
 0x99c   : > { %v18501_v14 = vpop.f32.mrf.mxu3  ;;  %v18503_v10 = vpop.f32.mrf.mxu1 }
 0x99d   : > { %v18497_v44 = vpop.f32.mrf.mxu0  ;;  %19929 = vst [vmem:[#allocation27_spill] sm:$0xff] %v18501_v14 }
 0x99e   : > { %19928 = vst [vmem:[#allocation33_spill] sm:$0xff] %v18497_v44 }
 0x99f   : > { %19930 = vst [vmem:[#allocation30_spill] sm:$0xff] %v18503_v10  ;;  %14925 = vmatmul.msk.bf16.vlgmr.msra.gmra.mxu2 %vm2539_vm4, %v18319_v25 }
 0x9a0   : > { %14930 = vmatmul.msk.bf16.gmra.mxu0 %vm2539_vm4, %v18346_v31 }
 0x9a1   : > { %14936 = vmatmul.msk.bf16.gmra.mxu3 %vm2539_vm4, %v18346_v31 }
 0x9a4   : > { %v18513_v56 = vpop.f32.mrf.mxu3  ;;  %v18515_v61 = vpop.f32.mrf.mxu1 }
 0x9a5   : > { %v8272_v24 = vpop.f32.mrf.mxu0  ;;  %19932 = vst [vmem:[#allocation35_spill] sm:$0xff] %v18513_v56 }
 0x9a6   : > { %19933 = vst [vmem:[#allocation22_spill] sm:$0xff] %v18515_v61 }
 0x9a7   : > { %14932 = vmatmul.msk.bf16.gmra.mxu1 %vm2539_vm4, %v18346_v31 }
 0x9ac   : > { %v8326_v35 = vpop.f32.mrf.mxu3  ;;  %v8290_v7 = vpop.f32.mrf.mxu1 }
 0x9ad   : > { %v18519_v16 = vpop.f32.mrf.mxu0  ;;  %v9231_v7 = vpop.permute.xlu0 %9230 }
 0x9ae   : > { %19934 = vst [vmem:[#allocation25_spill] sm:$0xff] %v18519_v16 }
 0x9af   : > { %14926 = vmatmul.msk.bf16.gmra.mxu2 %vm2539_vm4, %v18346_v31 }
 0x9b0   : > { %14937 = vmatmul.msk.bf16.vlgmr.msrb.gmra.mxu0 %vm2539_vm4, %v18319_v25 }
 0x9b4   : > { %v18529_v5 = vpop.f32.mrf.mxu3  ;;  %v18531_v54 = vpop.f32.mrf.mxu1 }
 0x9b5   : > { %v18527_v36 = vpop.f32.mrf.mxu0  ;;  %19937 = vst [vmem:[#allocation38_spill] sm:$0xff] %v18531_v54  ;;  %v8619_v8 = vpop.permute.xlu2 %8618 }
 0x9b6   : > { %19936 = vst [vmem:[#allocation37_spill] sm:$0xff] %v18527_v36  ;;  %v8638_v18 = vsel %vm8622_vm7, %v8617_v63, %v8619_v8 }
 0x9b7   : > { %14939 = vmatmul.msk.bf16.vlgmr.msrb.gmra.mxu1 %vm2539_vm4, %v18319_v25  ;;  %8940 = vmatpush.bf16.msra.mxu2 %v8638_v18 }
 0x9bc   : > { %v18538_v52 = vpop.f32.mrf.mxu3  ;;  %v18540_v1 = vpop.f32.mrf.mxu1 }
 0x9bd   : > { %v18536_v43 = vpop.f32.mrf.mxu0  ;;  %19939 = vst [vmem:[#allocation40_spill] sm:$0xff] %v18540_v1  ;;  %v9227_v57 = vpop.permute.xlu2 %9226 }
 0x9be   : > { %19938 = vst [vmem:[#allocation39_spill] sm:$0xff] %v18536_v43  ;;  %v9261_v32 = vsel %vm9260_vm8, %v9225_v19, %v9227_v57  ;;  %v9237_v43 = vpop.permute.xlu0 %9236 }
 0x9bf   : > { %14933 = vmatmul.msk.bf16.vlgmr.msrb.gmra.mxu2 %vm2539_vm4, %v18319_v25  ;;  %9308 = vmatpush.bf16.msra.mxu0 %v9261_v32 }
 0x9c0   : > { %14938 = vmatmul.msk.bf16.gmra.mxu0 %vm2539_vm4, %v18346_v31 }
 0x9c4   : > { %v18547_v28 = vpop.f32.mrf.mxu3  ;;  %v18549_v63 = vpop.f32.mrf.mxu1 }
 0x9c5   : > { %v8344_v40 = vpop.f32.mrf.mxu0  ;;  %19940 = vst [vmem:[#allocation41_spill] sm:$0xff] %v18549_v63  ;;  %v9233_v24 = vpop.permute.xlu2 %9232 }
 0x9c6   : > { %v9264_v40 = vsel %vm9260_vm8, %v9231_v7, %v9233_v24 }
 0x9c7   : > { %14940 = vmatmul.msk.bf16.gmra.mxu1 %vm2539_vm4, %v18346_v31 }
 0x9cc   : > { %v8679_v6 = vpop.f32.mrf.mxu3  ;;  %v8362_v18 = vpop.f32.mrf.mxu1 }
 0x9cd   : > { %v18558_v35 = vpop.f32.mrf.mxu0  ;;  %v8621_v19 = vpop.permute.xlu1 %8620  ;;  %v14947_v6 = vld [vmem:[%s19815_s12 + $0x20] sm:$0xf] }
 0x9ce   : > { %v8639_v32 = vsel %vm8622_vm7, %v8619_v8, %v8621_v19  ;;  %v9239_v18 = vpop.permute.xlu2 %9238  ;;  %v9149_v19 = vunpack.c.l.b16 %v14947_v6 }
 0x9cf   : > { %14934 = vmatmul.msk.bf16.gmra.mxu2 %vm2539_vm4, %v18346_v31  ;;  %8958 = vmatpush.bf16.msrb.mxu3 %v8639_v32 }
 0x9d0   : > { %15024 = vmatmul.msk.bf16.vlgmr.msra.gmra.mxu0 %vm2539_vm4, %v18556_v15  ;;  %v18579_v56 = vpack.c.b16 %v9149_v19, %v9149_v19  ;;  %v9243_v19 = vpop.permute.xlu0 %9242 }
 0x9d2   : > { %14943 = vmatmul.msk.bf16.vlgmr.msrb.gmra.mxu3 %vm2539_vm4, %v18319_v25 }
 0x9d3   : > { %9362 = vmatpush.bf16.msra.mxu3 %v9264_v40 }
 0x9d4   : > { %v18573_v1 = vpop.f32.mrf.mxu3  ;;  %v18575_v8 = vpop.f32.mrf.mxu1 }
 0x9d5   : > { %v18566_v63 = vpop.f32.mrf.mxu0  ;;  %v9229_v36 = vpop.permute.xlu1 %9228 }
 0x9d6   : > { %v9262_v32 = vsel %vm9260_vm8, %v9227_v57, %v9229_v36  ;;  %v9263_v40 = vsel %vm9260_vm8, %v9229_v36, %v9231_v7  ;;  %v9245_v6 = vpop.permute.xlu2 %9244 }
 0x9d7   : > { %9326 = vmatpush.bf16.msra.mxu1 %v9262_v32  ;;  %9344 = vmatpush.bf16.msrb.mxu2 %v9263_v40  ;;  %v9267_v32 = vsel %vm9260_vm8, %v9237_v43, %v9239_v18  ;;  %v9270_v40 = vsel %vm9260_vm8, %v9243_v19, %v9245_v6 }
 0x9da   : > { %15026 = vmatmul.msk.bf16.vlgmr.msra.gmra.mxu1 %vm2539_vm4, %v18556_v15 }
 0x9dc   : > { %v18585_v37 = vpop.f32.mrf.mxu3  ;;  %v18587_v61 = vpop.f32.mrf.mxu1 }
 0x9dd   : > { %v18581_v16 = vpop.f32.mrf.mxu0  ;;  %v9235_v57 = vpop.permute.xlu1 %9234 }
 0x9de   : > { %v9265_v36 = vsel %vm9260_vm8, %v9233_v24, %v9235_v57  ;;  %v9266_v7 = vsel %vm9260_vm8, %v9235_v57, %v9237_v43 }
 0x9df   : > { %14941 = vmatmul.msk.bf16.vlgmr.msra.gmra.mxu2 %vm2539_vm4, %v18319_v25  ;;  %9380 = vmatpush.bf16.msrb.mxu0 %v9265_v36  ;;  %v9251_v36 = vpop.permute.xlu2 %9250 }
 0x9e0   : > { %15025 = vmatmul.msk.bf16.gmra.mxu0 %vm2539_vm4, %v18579_v56  ;;  %9416 = vmatpush.bf16.msra.mxu2 %v9267_v32 }
 0x9e1   : > { %9398 = vmatpush.bf16.msrb.mxu1 %v9266_v7 }
 0x9e2   : > { %v8373_v10 = vpop.f32.mrf.mxu2  ;;  %14944 = vmatmul.msk.bf16.gmra.mxu3 %vm2539_vm4, %v18346_v31 }
 0x9e3   : > { %v9249_v10 = vpop.permute.xlu0 %9248 }
 0x9e4   : > { %v18599_v24 = vpop.f32.mrf.mxu3  ;;  %v18601_v57 = vpop.f32.mrf.mxu1 }
 0x9e5   : > { %9470 = vmatpush.bf16.msra.mxu1 %v9270_v40  ;;  %v8697_v54 = vpop.f32.mrf.mxu0  ;;  %v9241_v14 = vpop.permute.xlu1 %9240  ;;  %v9273_v40 = vsel %vm9260_vm8, %v9249_v10, %v9251_v36 }
 0x9e6   : > { %v9268_v43 = vsel %vm9260_vm8, %v9239_v18, %v9241_v14  ;;  %v9269_v25 = vsel %vm9260_vm8, %v9241_v14, %v9243_v19 }
 0x9e7   : > { %9434 = vmatpush.bf16.msrb.mxu3 %v9268_v43  ;;  %9452 = vmatpush.bf16.msra.mxu0 %v9269_v25 }
 0x9ea   : > { %v18607_v7 = vpop.f32.mrf.mxu2  ;;  %15027 = vmatmul.msk.bf16.gmra.mxu1 %vm2539_vm4, %v18579_v56 }
 0x9eb   : > { %19941 = vst [vmem:[#allocation42_spill] sm:$0xff] %v18607_v7  ;;  %v9255_v4 = vpop.permute.xlu0 %9254 }
 0x9ec   : > { %v8751_v54 = vpop.f32.mrf.mxu3  ;;  %v8715_v44 = vpop.f32.mrf.mxu1 }
 0x9ed   : > { %v18605_v32 = vpop.f32.mrf.mxu0  ;;  %v9247_v14 = vpop.permute.xlu1 %9246 }
 0x9ee   : > { %v9272_v19 = vsel %vm9260_vm8, %v9247_v14, %v9249_v10 }
 0x9ef   : > { %14942 = vmatmul.msk.bf16.gmra.mxu2 %vm2539_vm4, %v18346_v31 }
 0x9f0   : > { %15032 = vmatmul.msk.bf16.vlgmr.msrb.gmra.mxu0 %vm2539_vm4, %v18556_v15 }
 0x9f1   : > { %9524 = vmatpush.bf16.msrb.mxu0 %v9273_v40 }
 0x9f2   : > { %v18619_v43 = vpop.f32.mrf.mxu2  ;;  %15030 = vmatmul.msk.bf16.vlgmr.msra.gmra.mxu3 %vm2539_vm4, %v18556_v15 }
 0x9f3   : > { %19942 = vst [vmem:[#allocation43_spill] sm:$0xff] %v18619_v43  ;;  %9506 = vmatpush.bf16.msra.mxu3 %v9272_v19  ;;  %v9271_v19 = vsel %vm9260_vm8, %v9245_v6, %v9247_v14  ;;  %v9257_v6 = vpop.permute.xlu2 %9256 }
 0x9f4   : > { %v18623_v25 = vpop.f32.mrf.mxu3  ;;  %v18625_v44 = vpop.f32.mrf.mxu1  ;;  %v9276_v30 = vsel %vm9260_vm8, %v9255_v4, %v9257_v6 }
 0x9f5   : > { %v18616_v18 = vpop.f32.mrf.mxu0  ;;  %v9253_v54 = vpop.permute.xlu1 %9252 }
 0x9f6   : > { %v9274_v7 = vsel %vm9260_vm8, %v9251_v36, %v9253_v54 }
 0x9fa   : > { %v8380_v31 = vpop.f32.mrf.mxu2  ;;  %15034 = vmatmul.msk.bf16.vlgmr.msrb.gmra.mxu1 %vm2539_vm4, %v18556_v15 }
 0x9fb   : > { %9542 = vmatpush.bf16.msrb.mxu1 %v9274_v7 }
 0x9fc   : > { %v18632_v10 = vpop.f32.mrf.mxu3  ;;  %v18634_v43 = vpop.f32.mrf.mxu1 }
 0x9fd   : > { %v18627_v40 = vpop.f32.mrf.mxu0  ;;  %v9259_v62 = vpop.permute.xlu1 %9258 }
 0x9ff   : > { %15028 = vmatmul.msk.bf16.vlgmr.msrb.gmra.mxu2 %vm2539_vm4, %v18556_v15 }
 0xa00   : > { %15033 = vmatmul.msk.bf16.gmra.mxu0 %vm2539_vm4, %v18579_v56  ;;  %9488 = vmatpush.bf16.msrb.mxu2 %v9271_v19 }
 0xa02   : > { %v18641_v36 = vpop.f32.mrf.mxu2  ;;  %15031 = vmatmul.msk.bf16.gmra.mxu3 %vm2539_vm4, %v18579_v56 }
 0xa04   : > { %v18645_v31 = vpop.f32.mrf.mxu3  ;;  %v18647_v7 = vpop.f32.mrf.mxu1 }
 0xa05   : > { %v8769_v12 = vpop.f32.mrf.mxu0  ;;  %19943 = vst [vmem:[#allocation44_spill] sm:$0xff] %v18645_v31 }
 0xa06   : > { %v9277_v12 = vsel %vm9260_vm8, %v9257_v6, %v9259_v62  ;;  %v9275_v6 = vsel %vm9260_vm8, %v9253_v54, %v9255_v4 }
 0xa0a   : > { %v18651_v33 = vpop.f32.mrf.mxu2  ;;  %15035 = vmatmul.msk.bf16.gmra.mxu1 %vm2539_vm4, %v18579_v56 }
 0xa0c   : > { %v8823_v14 = vpop.f32.mrf.mxu3  ;;  %v8787_v19 = vpop.f32.mrf.mxu1 }
 0xa0d   : > { %v18649_v46 = vpop.f32.mrf.mxu0 }
 0xa0f   : > { %15029 = vmatmul.msk.bf16.gmra.mxu2 %vm2539_vm4, %v18579_v56 }
 0xa10   : > { %15040 = vmatmul.msk.bf16.vlgmr.msra.gmra.mxu0 %vm2539_vm4, %v18556_v15 }
 0xa11   : > { %9596 = vmatpush.bf16.msra.mxu0 %v9277_v12 }
 0xa12   : > { %v18663_v55 = vpop.f32.mrf.mxu2  ;;  %15038 = vmatmul.msk.bf16.vlgmr.msrb.gmra.mxu3 %vm2539_vm4, %v18556_v15 }
 0xa13   : > { %9578 = vmatpush.bf16.msrb.mxu3 %v9276_v30 }
 0xa14   : > { %v18667_v14 = vpop.f32.mrf.mxu3  ;;  %v18669_v62 = vpop.f32.mrf.mxu1 }
 0xa15   : > { %v18660_v31 = vpop.f32.mrf.mxu0  ;;  %19944 = vst [vmem:[#allocation45_spill] sm:$0xff] %v18669_v62 }
 0xa1a   : > { %v8733_v12 = vpop.f32.mrf.mxu2  ;;  %15042 = vmatmul.msk.bf16.vlgmr.msra.gmra.mxu1 %vm2539_vm4, %v18556_v15 }
 0xa1c   : > { %v18675_v11 = vpop.f32.mrf.mxu3  ;;  %v18677_v13 = vpop.f32.mrf.mxu1 }
 0xa1d   : > { %v18671_v19 = vpop.f32.mrf.mxu0  ;;  %19946 = vst [vmem:[#allocation47_spill] sm:$0xff] %v18675_v11 }
 0xa1e   : > { %19945 = vst [vmem:[#allocation46_spill] sm:$0xff] %v18671_v19 }
 0xa1f   : > { %19947 = vst [vmem:[#allocation48_spill] sm:$0xff] %v18677_v13  ;;  %15036 = vmatmul.msk.bf16.vlgmr.msra.gmra.mxu2 %vm2539_vm4, %v18556_v15 }
 0xa20   : > { %15041 = vmatmul.msk.bf16.gmra.mxu0 %vm2539_vm4, %v18579_v56  ;;  %9560 = vmatpush.bf16.msra.mxu2 %v9275_v6 }
 0xa22   : > { %v18684_v62 = vpop.f32.mrf.mxu2  ;;  %15039 = vmatmul.msk.bf16.gmra.mxu3 %vm2539_vm4, %v18579_v56 }
 0xa24   : > { %v18688_v12 = vpop.f32.mrf.mxu3  ;;  %v18690_v11 = vpop.f32.mrf.mxu1 }
 0xa25   : > { %v8841_v30 = vpop.f32.mrf.mxu0  ;;  %19948 = vst [vmem:[#allocation49_spill] sm:$0xff] %v18688_v12 }
 0xa26   : > { %19949 = vst [vmem:[#allocation50_spill] sm:$0xff] %v18690_v11 }
 0xa2a   : > { %v18694_v19 = vpop.f32.mrf.mxu2  ;;  %15043 = vmatmul.msk.bf16.gmra.mxu1 %vm2539_vm4, %v18579_v56 }
 0xa2b   : > { %19951 = vst [vmem:[#allocation52_spill] sm:$0xff] %v18694_v19 }
 0xa2c   : > { %v8895_v4 = vpop.f32.mrf.mxu3  ;;  %v8859_v54 = vpop.f32.mrf.mxu1 }
 0xa2d   : > { %v18692_v13 = vpop.f32.mrf.mxu0 }
 0xa2e   : > { %19950 = vst [vmem:[#allocation51_spill] sm:$0xff] %v18692_v13 }
 0xa2f   : > { %15037 = vmatmul.msk.bf16.gmra.mxu2 %vm2539_vm4, %v18579_v56 }
 0xa30   : > { %15048 = vmatmul.msk.bf16.vlgmr.msrb.gmra.mxu0 %vm2539_vm4, %v18556_v15 }
 0xa32   : > { %v18704_v30 = vpop.f32.mrf.mxu2  ;;  %15046 = vmatmul.msk.bf16.vlgmr.msra.gmra.mxu3 %vm2539_vm4, %v18556_v15 }
 0xa33   : > { %19953 = vst [vmem:[#allocation54_spill] sm:$0xff] %v18704_v30 }
 0xa34   : > { %v18708_v12 = vpop.f32.mrf.mxu1 }
 0xa35   : > { %v18702_v6 = vpop.f32.mrf.mxu0  ;;  %19954 = vst [vmem:[#allocation55_spill] sm:$0xff] %v18708_v12 }
 0xa36   : > { %19952 = vst [vmem:[#allocation53_spill] sm:$0xff] %v18702_v6 }
 0xa3a   : > { %v8805_v13 = vpop.f32.mrf.mxu2  ;;  %15050 = vmatmul.msk.bf16.vlgmr.msrb.gmra.mxu1 %vm2539_vm4, %v18556_v15 }
 0xa3b   : > { %v8969_v13 = vadd.f32 %v18529_v5, %v18339_v22 }
 0xa3c   : > { %v18714_v4 = vpop.f32.mrf.mxu1 }
 0xa3d   : > { %v18710_v11 = vpop.f32.mrf.mxu0  ;;  %19956 = vst [vmem:[#allocation57_spill] sm:$0xff] %v18714_v4 }
 0xa3e   : > { %19955 = vst [vmem:[#allocation56_spill] sm:$0xff] %v18710_v11 }
 0xa3f   : > { %15044 = vmatmul.msk.bf16.vlgmr.msrb.gmra.mxu2 %vm2539_vm4, %v18556_v15 }
 0xa40   : > { %15049 = vmatmul.msk.bf16.gmra.mxu0 %vm2539_vm4, %v18579_v56 }
 0xa42   : > { %v18720_v6 = vpop.f32.mrf.mxu2  ;;  %15047 = vmatmul.msk.bf16.gmra.mxu3 %vm2539_vm4, %v18579_v56 }
 0xa43   : > { %19957 = vst [vmem:[#allocation58_spill] sm:$0xff] %v18720_v6 }
 0xa44   : > { %v18724_v12 = vpop.f32.mrf.mxu1 }
 0xa45   : > { %v8913_v54 = vpop.f32.mrf.mxu0  ;;  %19958 = vst [vmem:[#allocation59_spill] sm:$0xff] %v18724_v12  ;;  %v8986_v12 = vadd.f32 %v18538_v52, %v18352_v26 }
 0xa4a   : > { %v18728_v30 = vpop.f32.mrf.mxu2  ;;  %15051 = vmatmul.msk.bf16.gmra.mxu1 %vm2539_vm4, %v18579_v56 }
 0xa4b   : > { %19959 = vst [vmem:[#allocation60_spill] sm:$0xff] %v18728_v30 }
 0xa4c   : > { %v8931_v54 = vpop.f32.mrf.mxu1 }
 0xa4d   : > { %v9310_v11 = vpop.f32.mrf.mxu0 }
 0xa4e   : > { %v18730_v4 = vadd.f32 %v9310_v11, %v8969_v13  ;;  %v8970_v13 = vadd.f32 %v18558_v35, %v18328_v51  ;;  %v9957_v35 = vld [vmem:[%s19816_s13] sm:$0xff] }
 0xa4f   : > { %15045 = vmatmul.msk.bf16.gmra.mxu2 %vm2539_vm4, %v18579_v56 }
 0xa50   : > { %19960 = vst [vmem:[#allocation61_spill] sm:$0xff] %v18730_v4  ;;  %15056 = vmatmul.msk.bf16.vlgmr.msra.gmra.mxu0 %vm2539_vm4, %v18556_v15  ;;  %v9003_v4 = vadd.f32 %v18547_v28, %v18363_v9 }
 0xa52   : > { %v18740_v22 = vpop.f32.mrf.mxu2  ;;  %15054 = vmatmul.msk.bf16.vlgmr.msrb.gmra.mxu3 %vm2539_vm4, %v18556_v15 }
 0xa55   : > { %v9312_v6 = vpop.f32.mrf.mxu0  ;;  %v8960_v11 = vpop.f32.mrf.mxu3 }
 0xa56   : > { %v9624_v5 = vadd.f32 %v9312_v6, %v8986_v12  ;;  %v8987_v6 = vadd.f32 %v18566_v63, %v18342_v41  ;;  %v9004_v41 = vadd.f32 %v18581_v16, %v18355_v58  ;;  %v8972_v58 = vadd.f32 %v18641_v36, %v18378_v21 }
 0xa57   : > { %v9328_v54 = vpop.f32.mrf.mxu1  ;;  %v8974_v16 = vadd.f32 %v18605_v32, %v18374_v48  ;;  %v8971_v21 = vadd.f32 %v18575_v8, %v18361_v42  ;;  %v8988_v42 = vadd.f32 %v18587_v61, %v18371_v17 }
 0xa58   : > { %9759 = vrot.lane.b32.xlu0 %v9624_v5, %s16243_s29  ;;  %v18749_v30 = vadd.f32 %v9328_v54, %v8970_v13 }
 0xa5a   : > { %v8877_v52 = vpop.f32.mrf.mxu2 }
 0xa5d   : > { %v9315_v26 = vpop.f32.mrf.mxu0  ;;  %v18754_v12 = vpop.f32.mrf.mxu3 }
 0xa5e   : > { %v9641_v19 = vadd.f32 %v9315_v26, %v9003_v4 }
 0xa5f   : > { %15052 = vmatmul.msk.bf16.vlgmr.msra.gmra.mxu2 %vm2539_vm4, %v18556_v15  ;;  %v9330_v51 = vpop.f32.mrf.mxu1  ;;  %v8973_v15 = vadd.f32 %v18573_v1, %v18393_v39 }
 0xa60   : > { %15057 = vmatmul.msk.bf16.gmra.mxu0 %vm2539_vm4, %v18579_v56  ;;  %9875 = vrot.lane.b32.xlu0 %v9641_v19, %s16244_s19  ;;  %v9625_v9 = vadd.f32 %v9330_v51, %v8987_v6 }
 0xa62   : > { %v18763_v4 = vpop.f32.mrf.mxu2  ;;  %9761 = vrot.lane.b32.xlu2 %v9625_v9, %s16243_s29  ;;  %15055 = vmatmul.msk.bf16.gmra.mxu3 %vm2539_vm4, %v18579_v56 }
 0xa65   : > { %v9317_v28 = vpop.f32.mrf.mxu0  ;;  %v18768_v19 = vpop.f32.mrf.mxu3 }
 0xa67   : > { %v9333_v63 = vpop.f32.mrf.mxu1 }
 0xa68   : > { %9960 = vperm.xlu0 %16003, %v9957_v35   ;;  %v9642_v5 = vadd.f32 %v9333_v63, %v9004_v41 }
 0xa6a   : > { %v18774_v13 = vpop.f32.mrf.mxu2  ;;  %9877 = vrot.lane.b32.xlu2 %v9642_v5, %s16244_s19 }
 0xa6d   : > { %v9382_v11 = vpop.f32.mrf.mxu0  ;;  %v8967_v26 = vpop.f32.mrf.mxu3 }
 0xa6e   : > { %v18776_v54 = vadd.f32 %v9382_v11, %v8973_v15  ;;  %v9007_v11 = vadd.f32 %v18599_v24, %v18425_v29  ;;  %v9006_v26 = vadd.f32 %v18663_v55, %v18419_v38  ;;  %v9008_v38 = vadd.f32 %v18627_v40, %v18415_v60 }
 0xa6f   : > { %15053 = vmatmul.msk.bf16.gmra.mxu2 %vm2539_vm4, %v18579_v56  ;;  %v9335_v52 = vpop.f32.mrf.mxu1  ;;  %v8989_v56 = vadd.f32 %v18651_v33, %v18402_v49  ;;  %v8978_v40 = vadd.f32 %v18649_v46, %v18437_v53  ;;  %v8995_v53 = vadd.f32 %v18660_v31, %v18449_v45  ;;  %v8981_v45 = vadd.f32 %v18667_v14, %v18499_v2 }
 0xa72   : > { %v18781_v51 = vpop.f32.mrf.mxu2 }
 0xa75   : > { %v9384_v6 = vpop.f32.mrf.mxu0  ;;  %v9364_v39 = vpop.f32.mrf.mxu3 }
 0xa76   : > { %v18787_v1 = vadd.f32 %v9364_v39, %v8972_v58  ;;  %v8977_v39 = vadd.f32 %v18623_v25, %v18447_v50  ;;  %v9005_v25 = vadd.f32 %v18601_v57, %v18388_v20 }
 0xa77   : > { %v9400_v9 = vpop.f32.mrf.mxu1 }
 0xa78   : > { %v18789_v28 = vadd.f32 %v9400_v9, %v8974_v16 }
 0xa7a   : > { %v8949_v41 = vpop.f32.mrf.mxu2 }
 0xa7b   : > { %v8994_v41 = vadd.f32 %v18632_v10, %v18464_v0  ;;  %v8990_v0 = vadd.f32 %v18585_v37, %v18413_v59 }
 0xa7d   : > { %v9387_v35 = vpop.f32.mrf.mxu0  ;;  %v9366_v63 = vpop.f32.mrf.mxu3 }
 0xa7e   : > { %v9627_v15 = vadd.f32 %v9366_v63, %v8989_v56  ;;  %v9645_v49 = vadd.f32 %v9387_v35, %v9007_v11  ;;  %v8976_v56 = vadd.f32 %v18684_v62, %v18441_v23  ;;  %v9628_v23 = vadd.f32 %v9384_v6, %v8990_v0 }
 0xa7f   : > { %v9402_v5 = vpop.f32.mrf.mxu1  ;;  %v8975_v11 = vadd.f32 %v18625_v44, %v18423_v3 }
 0xa80   : > { %9765 = vrot.lane.b32.xlu2 %v9627_v15, %s16243_s29 }
 0xa82   : > { %v9346_v48 = vpop.f32.mrf.mxu2 }
 0xa83   : > { %v18796_v32 = vadd.f32 %v9346_v48, %v8971_v21  ;;  %v8991_v48 = vadd.f32 %v18616_v18, %v18395_v27  ;;  %v8992_v27 = vadd.f32 %v18634_v43, %v18435_v34  ;;  %v19963_v34 = vld [vmem:[#allocation24_spill] sm:$0xff]  ;;  %v19964_v43 = vld [vmem:[#allocation58_spill] sm:$0xff] }
 0xa85   : > { %v9389_v36 = vpop.f32.mrf.mxu0  ;;  %v9369_v52 = vpop.f32.mrf.mxu3  ;;  %v9629_v59 = vadd.f32 %v9402_v5, %v8991_v48  ;;  %v19973_v48 = vld [vmem:[#allocation28_spill] sm:$0xff] }
 0xa86   : > { %v9644_v33 = vadd.f32 %v9369_v52, %v9006_v26 }
 0xa87   : > { %v9405_v58 = vpop.f32.mrf.mxu1 }
 0xa88   : > { %9883 = vrot.lane.b32.xlu2 %v9645_v49, %s16244_s19  ;;  %9881 = vrot.lane.b32.xlu0 %v9644_v33, %s16244_s19  ;;  %v9646_v9 = vadd.f32 %v9405_v58, %v9008_v38  ;;  %v9009_v58 = vadd.f32 %v18647_v7, %v18445_v47  ;;  %v8980_v38 = vadd.f32 %v19964_v43, %v19963_v34  ;;  %v19980_v34 = vld [vmem:[#allocation50_spill] sm:$0xff] }
 0xa8a   : > { %v9348_v16 = vpop.f32.mrf.mxu2 }
 0xa8b   : > { %v9626_v24 = vadd.f32 %v9348_v16, %v8988_v42  ;;  %v19962_v42 = vld [vmem:[#allocation52_spill] sm:$0xff] }
 0xa8d   : > { %v9454_v8 = vpop.f32.mrf.mxu0  ;;  %9763 = vrot.lane.b32.xlu1 %v9626_v24, %s16243_s29  ;;  %v9371_v55 = vpop.f32.mrf.mxu3 }
 0xa8e   : > { %v18808_v29 = vadd.f32 %v9454_v8, %v8977_v39  ;;  %v19961_v39 = vld [vmem:[#allocation21_spill] sm:$0xff] }
 0xa8f   : > { %v9407_v50 = vpop.f32.mrf.mxu1  ;;  %v8993_v8 = vadd.f32 %v19962_v42, %v19961_v39 }
 0xa90   : > { %9885 = vrot.lane.b32.xlu2 %v9646_v9, %s16244_s19  ;;  %v19965_v9 = vld [vmem:[#allocation34_spill] sm:$0xff]  ;;  %v19966_v50 = vld [vmem:[#allocation51_spill] sm:$0xff] }
 0xa92   : > { %v9351_v17 = vpop.f32.mrf.mxu2 }
 0xa93   : > { %v9643_v61 = vadd.f32 %v9351_v17, %v9005_v25  ;;  %v8982_v25 = vadd.f32 %v19966_v50, %v19965_v9  ;;  %v19967_v17 = vld [vmem:[#allocation29_spill] sm:$0xff] }
 0xa95   : > { %v9456_v35 = vpop.f32.mrf.mxu0  ;;  %9879 = vrot.lane.b32.xlu1 %v9643_v61, %s16244_s19  ;;  %v9436_v60 = vpop.f32.mrf.mxu3  ;;  %v19968_v61 = vld [vmem:[#allocation44_spill] sm:$0xff] }
 0xa96   : > { %v9632_v63 = vadd.f32 %v9456_v35, %v8994_v41  ;;  %v18823_v15 = vadd.f32 %v9436_v60, %v8976_v56  ;;  %v9011_v41 = vadd.f32 %v19968_v61, %v19967_v17  ;;  %v19969_v56 = vld [vmem:[#allocation23_spill] sm:$0xff]  ;;  %v19970_v60 = vld [vmem:[#allocation54_spill] sm:$0xff] }
 0xa97   : > { %v9472_v21 = vpop.f32.mrf.mxu1 }
 0xa98   : > { %v18825_v20 = vadd.f32 %v9472_v21, %v8978_v40  ;;  %9775 = vrot.lane.b32.xlu2 %v9632_v63, %s16243_s29  ;;  %v9010_v40 = vadd.f32 %v19970_v60, %v19969_v56  ;;  %v19985_v56 = vld [vmem:[#allocation38_spill] sm:$0xff] }
 0xa99   : > { %v8984_v60 = vadd.f32 %v18763_v4, %v19985_v56 }
 0xa9a   : > { %v9353_v10 = vpop.f32.mrf.mxu2 }
 0xa9d   : > { %v9459_v57 = vpop.f32.mrf.mxu0  ;;  %9767 = vrot.lane.b32.xlu1 %v9628_v23, %s16243_s29  ;;  %v9438_v62 = vpop.f32.mrf.mxu3 }
 0xa9e   : > { %v9631_v14 = vadd.f32 %v9438_v62, %v8993_v8  ;;  %v9649_v0 = vadd.f32 %v9459_v57, %v9011_v41 }
 0xa9f   : > { %v9474_v46 = vpop.f32.mrf.mxu1 }
 0xaa0   : > { %v9633_v36 = vadd.f32 %v9474_v46, %v8995_v53  ;;  %v19971_v53 = vld [vmem:[#allocation26_spill] sm:$0xff]  ;;  %v19972_v46 = vld [vmem:[#allocation45_spill] sm:$0xff] }
 0xaa2   : > { %v9418_v52 = vpop.f32.mrf.mxu2  ;;  %9777 = vrot.lane.b32.xlu2 %v9633_v36, %s16243_s29  ;;  %v8979_v36 = vadd.f32 %v19972_v46, %v19971_v53 }
 0xaa3   : > { %v18838_v37 = vadd.f32 %v9418_v52, %v8975_v11  ;;  %v19974_v11 = vld [vmem:[#allocation46_spill] sm:$0xff] }
 0xaa5   : > { %v9461_v26 = vpop.f32.mrf.mxu0  ;;  %9769 = vrot.lane.b32.xlu1 %v9629_v59, %s16243_s29  ;;  %v9441_v6 = vpop.f32.mrf.mxu3 }
 0xaa6   : > { %v9648_v10 = vadd.f32 %v9441_v6, %v9010_v40  ;;  %v9012_v26 = vadd.f32 %v19974_v11, %v19973_v48 }
 0xaa7   : > { %v9477_v49 = vpop.f32.mrf.mxu1 }
 0xaaa   : > { %v9420_v31 = vpop.f32.mrf.mxu2 }
 0xaab   : > { %v9630_v44 = vadd.f32 %v9420_v31, %v8992_v27  ;;  %v19976_v31 = vld [vmem:[#allocation47_spill] sm:$0xff] }
 0xaad   : > { %v9526_v18 = vpop.f32.mrf.mxu0  ;;  %9771 = vrot.lane.b32.xlu0 %v9630_v44, %s16243_s29  ;;  %v9443_v5 = vpop.f32.mrf.mxu3 }
 0xaae   : > { %v18845_v3 = vadd.f32 %v9526_v18, %v8981_v45  ;;  %v9650_v45 = vadd.f32 %v9477_v49, %v9012_v26  ;;  %v19975_v18 = vld [vmem:[#allocation31_spill] sm:$0xff]  ;;  %v19977_v5 = vld [vmem:[#allocation32_spill] sm:$0xff] }
 0xaaf   : > { %v9479_v33 = vpop.f32.mrf.mxu1  ;;  %v8998_v44 = vadd.f32 %v19976_v31, %v19975_v18  ;;  %v19991_v31 = vld [vmem:[#allocation35_spill] sm:$0xff] }
 0xab0   : > { %v19978_v33 = vld [vmem:[#allocation48_spill] sm:$0xff] }
 0xab2   : > { %v9423_v2 = vpop.f32.mrf.mxu2 }
 0xab3   : > { %v9647_v24 = vadd.f32 %v9423_v2, %v9009_v58  ;;  %v8996_v58 = vadd.f32 %v19978_v33, %v19977_v5 }
 0xab5   : > { %v9528_v16 = vpop.f32.mrf.mxu0  ;;  %9887 = vrot.lane.b32.xlu1 %v9647_v24, %s16244_s19  ;;  %9773 = vrot.lane.b32.xlu0 %v9631_v14, %s16243_s29  ;;  %v9508_v55 = vpop.f32.mrf.mxu3  ;;  %v19979_v24 = vld [vmem:[#allocation33_spill] sm:$0xff] }
 0xab6   : > { %v18858_v35 = vadd.f32 %v9508_v55, %v8980_v38  ;;  %v9636_v8 = vadd.f32 %v9528_v16, %v8998_v44  ;;  %v9013_v43 = vadd.f32 %v19980_v34, %v19979_v24  ;;  %v19981_v38 = vld [vmem:[#allocation27_spill] sm:$0xff]  ;;  %v19982_v55 = vld [vmem:[#allocation53_spill] sm:$0xff]  ;;  %v19992_v44 = vld [vmem:[#allocation56_spill] sm:$0xff] }
 0xab7   : > { %v9544_v47 = vpop.f32.mrf.mxu1  ;;  %v8999_v9 = vadd.f32 %v19982_v55, %v19981_v38  ;;  %v9016_v5 = vadd.f32 %v19992_v44, %v19991_v31  ;;  %v19996_v38 = vld [vmem:[#allocation39_spill] sm:$0xff] }
 0xab8   : > { %v18860_v7 = vadd.f32 %v9544_v47, %v8982_v25  ;;  %v19983_v25 = vld [vmem:[#allocation30_spill] sm:$0xff]  ;;  %v19984_v47 = vld [vmem:[#allocation60_spill] sm:$0xff] }
 0xab9   : > { %v8997_v17 = vadd.f32 %v19984_v47, %v19983_v25 }
 0xaba   : > { %v9425_v21 = vpop.f32.mrf.mxu2 }
 0xabd   : > { %v9531_v63 = vpop.f32.mrf.mxu0  ;;  %9891 = vrot.lane.b32.xlu0 %v9649_v0, %s16244_s19  ;;  %9889 = vrot.lane.b32.xlu1 %v9648_v10, %s16244_s19  ;;  %v9510_v23 = vpop.f32.mrf.mxu3  ;;  %v19986_v10 = vld [vmem:[#allocation22_spill] sm:$0xff] }
 0xabe   : > { %v9635_v40 = vadd.f32 %v9510_v23, %v8997_v17  ;;  %v9014_v53 = vadd.f32 %v18740_v22, %v19986_v10 }
 0xabf   : > { %v9546_v62 = vpop.f32.mrf.mxu1 }
 0xac0   : > { %v9637_v41 = vadd.f32 %v9546_v62, %v8999_v9  ;;  %v19988_v62 = vld [vmem:[#allocation49_spill] sm:$0xff]  ;;  %v19998_v9 = vld [vmem:[#allocation40_spill] sm:$0xff] }
 0xac1   : > { %v9001_v25 = vadd.f32 %v18774_v13, %v19998_v9  ;;  %v18958_v9 = vld [vmem:[%s20002_s16] sm:$0xff] }
 0xac2   : > { %v9490_v59 = vpop.f32.mrf.mxu2 }
 0xac3   : > { %v18872_v27 = vadd.f32 %v9490_v59, %v8979_v36  ;;  %v19987_v36 = vld [vmem:[#allocation36_spill] sm:$0xff]  ;;  %v19990_v59 = vld [vmem:[#allocation55_spill] sm:$0xff] }
 0xac4   : > { %v9015_v48 = vadd.f32 %v19988_v62, %v19987_v36 }
 0xac5   : > { %v9533_v52 = vpop.f32.mrf.mxu0  ;;  %9893 = vrot.lane.b32.xlu0 %v9650_v45, %s16244_s19  ;;  %v9513_v57 = vpop.f32.mrf.mxu3 }
 0xac6   : > { %v9652_v26 = vadd.f32 %v9513_v57, %v9014_v53  ;;  %v9653_v4 = vadd.f32 %v9531_v63, %v9015_v48  ;;  %v19989_v52 = vld [vmem:[#allocation25_spill] sm:$0xff] }
 0xac7   : > { %v9549_v6 = vpop.f32.mrf.mxu1  ;;  %v8983_v45 = vadd.f32 %v19990_v59, %v19989_v52  ;;  %v19993_v63 = vld [vmem:[#allocation37_spill] sm:$0xff] }
 0xac8   : > { %v19994_v57 = vld [vmem:[#allocation57_spill] sm:$0xff] }
 0xaca   : > { %v9492_v42 = vpop.f32.mrf.mxu2 }
 0xacb   : > { %v9634_v2 = vadd.f32 %v9492_v42, %v8996_v58  ;;  %v9654_v58 = vadd.f32 %v9549_v6, %v9016_v5  ;;  %v9000_v42 = vadd.f32 %v19994_v57, %v19993_v63  ;;  %v19997_v6 = vld [vmem:[#allocation59_spill] sm:$0xff] }
 0xacc   : > { %v9017_v55 = vadd.f32 %v19997_v6, %v19996_v38 }
 0xacd   : > { %v9598_v39 = vpop.f32.mrf.mxu0  ;;  %9783 = vrot.lane.b32.xlu0 %v9636_v8, %s16243_s29  ;;  %9779 = vrot.lane.b32.xlu1 %v9634_v2, %s16243_s29  ;;  %v9515_v49 = vpop.f32.mrf.mxu3  ;;  %v19995_v8 = vld [vmem:[#allocation42_spill] sm:$0xff] }
 0xace   : > { %v9002_v2 = vadd.f32 %v18754_v12, %v19995_v8  ;;  %v19999_v12 = vld [vmem:[#allocation43_spill] sm:$0xff] }
 0xacf   : > { %v9551_v14 = vpop.f32.mrf.mxu1 }
 0xad2   : > { %v9495_v61 = vpop.f32.mrf.mxu2 }
 0xad3   : > { %v9651_v16 = vadd.f32 %v9495_v61, %v9013_v43  ;;  %v9760_v43 = vpop.permute.xlu0 %9759 }
 0xad5   : > { %v9600_v50 = vpop.f32.mrf.mxu0  ;;  %9895 = vrot.lane.b32.xlu2 %v9651_v16, %s16244_s19  ;;  %9785 = vrot.lane.b32.xlu0 %v9637_v41, %s16243_s29  ;;  %v9580_v21 = vpop.f32.mrf.mxu3  ;;  %v20000_v16 = vld [vmem:[#allocation41_spill] sm:$0xff] }
 0xad6   : > { %9781 = vrot.lane.b32.xlu1 %v9635_v40, %s16243_s29  ;;  %v18892_v0 = vadd.f32 %v9580_v21, %v8984_v60  ;;  %v9640_v24 = vadd.f32 %v9600_v50, %v9002_v2  ;;  %v9762_v41 = vpop.permute.xlu2 %9761  ;;  %v9019_v50 = vadd.f32 %v18768_v19, %v19999_v12  ;;  %v9018_v56 = vadd.f32 %v18781_v51, %v20000_v16 }
 0xad7   : > { %v9793_v36 = vsel %vm2055_vm1, %v9760_v43, %v9762_v41 }
 0xada   : > { %v9497_v11 = vpop.f32.mrf.mxu2 }
 0xadb   : > { %v9876_v60 = vpop.permute.xlu0 %9875  ;;  %v20001_v11 = vld [vmem:[#allocation61_spill] sm:$0xff] }
 0xadc   : > { %v9825_v51 = vadd.f32 %v9793_v36, %v20001_v11 }
 0xadd   : > { %v9603_v46 = vpop.f32.mrf.mxu0  ;;  %9897 = vrot.lane.b32.xlu2 %v9652_v26, %s16244_s19  ;;  %v9582_v23 = vpop.f32.mrf.mxu3 }
 0xade   : > { %9899 = vrot.lane.b32.xlu1 %v9653_v4, %s16244_s19  ;;  %v9639_v17 = vadd.f32 %v9582_v23, %v9001_v25  ;;  %v9657_v21 = vadd.f32 %v9603_v46, %v9019_v50  ;;  %v9878_v13 = vpop.permute.xlu2 %9877 }
 0xadf   : > { %v9909_v48 = vsel %vm2078_vm3, %v9876_v60, %v9878_v13  ;;  %v10013_v60 = vld [vmem:[%s20002_s16 + $0x8] sm:$0xf] }
 0xae0   : > { %v9941_v26 = vadd.f32 %v9909_v48, %v9825_v51  ;;  %v10027_v36 = vunpack.c.l.b16 %v10013_v60 }
 0xae2   : > { %v9562_v22 = vpop.f32.mrf.mxu2  ;;  %v18987_v51 = vpack.c.b16 %v10027_v36, %v10027_v36 }
 0xae3   : > { %v18904_v33 = vadd.f32 %v9562_v22, %v8983_v45  ;;  %v18926_v62 = vpop.permute.xlu0 %9960 }
 0xae4   : > { %v9963_v45 = vadd.f32 %v18926_v62, %v9941_v26 }
 0xae5   : > { %v9605_v18 = vpop.f32.mrf.mxu0  ;;  %v9585_v39 = vpop.f32.mrf.mxu3 }
 0xae6   : > { %9901 = vrot.lane.b32.xlu1 %v9654_v58, %s16244_s19  ;;  %v9656_v10 = vadd.f32 %v9585_v39, %v9018_v56  ;;  %v9766_v4 = vpop.permute.xlu2 %9765  ;;  %v9979_v58 = vmax.f32 %v9963_v45, 0.0 }
 0xaea   : > { %v9564_v49 = vpop.f32.mrf.mxu2 }
 0xaeb   : > { %v9638_v14 = vadd.f32 %v9564_v49, %v9000_v42 }
 0xaed   : > { %9787 = vrot.lane.b32.xlu2 %v9638_v14, %s16243_s29  ;;  %v9587_v34 = vpop.f32.mrf.mxu3 }
 0xaee   : > { %9791 = vrot.lane.b32.xlu1 %v9640_v24, %s16243_s29  ;;  %v9884_v8 = vpop.permute.xlu2 %9883 }
 0xaf2   : > { %v9567_v47 = vpop.f32.mrf.mxu2 }
 0xaf3   : > { %v9655_v61 = vadd.f32 %v9567_v47, %v9017_v55 }
 0xaf5   : > { %9903 = vrot.lane.b32.xlu0 %v9655_v61, %s16244_s19  ;;  %9789 = vrot.lane.b32.xlu2 %v9639_v17, %s16243_s29 }
 0xafa   : > { %v9569_v40 = vpop.f32.mrf.mxu2  ;;  %v9882_v31 = vpop.permute.xlu0 %9881 }
 0xafb   : > { %v9912_v24 = vsel %vm2078_vm3, %v9882_v31, %v9884_v8 }
 0xafd   : > { %9907 = vrot.lane.b32.xlu2 %v9657_v21, %s16244_s19  ;;  %9905 = vrot.lane.b32.xlu0 %v9656_v10, %s16244_s19 }
 0xaff   : > { %v9764_v53 = vpop.permute.xlu1 %9763 }
 0xb00   : > { %v9794_v19 = vsel %vm2055_vm1, %v9762_v41, %v9764_v53  ;;  %v9795_v18 = vsel %vm2055_vm1, %v9764_v53, %v9766_v4 }
 0xb01   : > { %v9826_v46 = vadd.f32 %v9794_v19, %v18749_v30  ;;  %v9827_v22 = vadd.f32 %v9795_v18, %v18796_v32 }
 0xb07   : > { %v9880_v23 = vpop.permute.xlu1 %9879 }
 0xb08   : > { %v9910_v52 = vsel %vm2078_vm3, %v9878_v13, %v9880_v23  ;;  %v9911_v5 = vsel %vm2078_vm3, %v9880_v23, %v9882_v31  ;;  %v9886_v13 = vpop.permute.xlu2 %9885 }
 0xb09   : > { %v9942_v59 = vadd.f32 %v9910_v52, %v9826_v46  ;;  %v9943_v63 = vadd.f32 %v9911_v5, %v9827_v22  ;;  %v9913_v48 = vsel %vm2078_vm3, %v9884_v8, %v9886_v13 }
 0xb0b   : > { %v9964_v44 = vadd.f32 %v18926_v62, %v9942_v59  ;;  %v9965_v34 = vadd.f32 %v18926_v62, %v9943_v63 }
 0xb0d   : > { %v9980_v39 = vmax.f32 %v9964_v44, 0.0  ;;  %v9981_v25 = vmax.f32 %v9965_v34, 0.0 }
 0xb0f   : > { %v9995_v57 = vpack.c.bf16 %v9980_v39, %v9979_v58  ;;  %v9768_v30 = vpop.permute.xlu1 %9767 }
 0xb10   : > { %v9796_v42 = vsel %vm2055_vm1, %v9766_v4, %v9768_v30  ;;  %v9776_v45 = vpop.permute.xlu2 %9775 }
 0xb11   : > { %v9828_v2 = vadd.f32 %v9796_v42, %v18787_v1  ;;  %v10508_v49 = vunpack.c.l.b16 %v9995_v57  ;;  %v10509_v14 = vunpack.c.h.b16 %v9995_v57 }
 0xb13   : > { %v9944_v43 = vadd.f32 %v9912_v24, %v9828_v2  ;;  %v18942_v38 = vpack.c.b16 %v10508_v49, %v10508_v49  ;;  %v18944_v32 = vpack.c.b16 %v10509_v14, %v10509_v14 }
 0xb15   : > { %v9966_v6 = vadd.f32 %v18926_v62, %v9944_v43  ;;  %10540 = vrot.lane.b32.xlu1 %v18942_v38, %s16247_s26  ;;  %10542 = vrot.lane.b32.xlu0 %v18944_v32, %s16247_s26  ;;  %v10076_v1 = vsel %vm1508_vm2, %v18942_v38, 0  ;;  %v10079_v55 = vsel %vm1508_vm2, %v18944_v32, 0 }
 0xb16   : > { %10127 = vmatpush.bf16.msra.mxu1 %v10076_v1  ;;  %10145 = vmatpush.bf16.msrb.mxu2 %v10079_v55 }
 0xb17   : > { %v9982_v47 = vmax.f32 %v9966_v6, 0.0  ;;  %v9770_v61 = vpop.permute.xlu1 %9769 }
 0xb18   : > { %v9797_v56 = vsel %vm2055_vm1, %v9768_v30, %v9770_v61  ;;  %v9778_v55 = vpop.permute.xlu2 %9777 }
 0xb19   : > { %v9996_v17 = vpack.c.bf16 %v9982_v47, %v9981_v25  ;;  %15062 = vmatmul.msk.bf16.vlgmr.msra.gmra.mxu1 %vm10068_vm9, %v18958_v9  ;;  %15064 = vmatmul.msk.bf16.vlgmr.msrb.gmra.mxu2 %vm10068_vm9, %v18958_v9  ;;  %v9829_v53 = vadd.f32 %v9797_v56, %v18776_v54 }
 0xb1b   : > { %v10511_v41 = vunpack.c.h.b16 %v9996_v17  ;;  %v10510_v12 = vunpack.c.l.b16 %v9996_v17  ;;  %v9945_v11 = vadd.f32 %v9913_v48, %v9829_v53  ;;  %v9801_v17 = vsel %vm2055_vm1, %v9776_v45, %v9778_v55 }
 0xb1d   : > { %v18964_v50 = vpack.c.b16 %v10511_v41, %v10511_v41  ;;  %v18966_v16 = vpack.c.b16 %v10510_v12, %v10510_v12  ;;  %v9967_v23 = vadd.f32 %v18926_v62, %v9945_v11 }
 0xb1f   : > { %v9772_v40 = vpop.permute.xlu0 %9771  ;;  %10546 = vrot.lane.b32.xlu1 %v18964_v50, %s16247_s26  ;;  %10544 = vrot.lane.b32.xlu2 %v18966_v16, %s16247_s26  ;;  %v10082_v21 = vsel %vm1508_vm2, %v18966_v16, 0  ;;  %v10085_v10 = vsel %vm1508_vm2, %v18964_v50, 0  ;;  %v9983_v18 = vmax.f32 %v9967_v23, 0.0 }
 0xb20   : > { %10163 = vmatpush.bf16.msra.mxu3 %v10082_v21  ;;  %10181 = vmatpush.bf16.msrb.mxu0 %v10085_v10  ;;  %v9798_v19 = vsel %vm2055_vm1, %v9770_v61, %v9772_v40 }
 0xb21   : > { %v9830_v26 = vadd.f32 %v9798_v19, %v18789_v28 }
 0xb23   : > { %15066 = vmatmul.msk.bf16.vlgmr.msra.gmra.mxu3 %vm10068_vm9, %v18958_v9  ;;  %15068 = vmatmul.msk.bf16.vlgmr.msrb.gmra.mxu0 %vm10068_vm9, %v18958_v9 }
 0xb27   : > { %v9888_v4 = vpop.permute.xlu1 %9887  ;;  %v9774_v46 = vpop.permute.xlu0 %9773 }
 0xb28   : > { %v9914_v54 = vsel %vm2078_vm3, %v9886_v13, %v9888_v4  ;;  %v9799_v28 = vsel %vm2055_vm1, %v9772_v40, %v9774_v46  ;;  %v9800_v44 = vsel %vm2055_vm1, %v9774_v46, %v9776_v45  ;;  %v9833_v40 = vadd.f32 %v9801_v17, %v18808_v29 }
 0xb29   : > { %v9946_v52 = vadd.f32 %v9914_v54, %v9830_v26  ;;  %15063 = vmatmul.msk.bf16.gmra.mxu1 %vm10068_vm9, %v18987_v51  ;;  %15065 = vmatmul.msk.bf16.gmra.mxu2 %vm10068_vm9, %v18987_v51  ;;  %v9831_v58 = vadd.f32 %v9799_v28, %v18838_v37  ;;  %v9832_v39 = vadd.f32 %v9800_v44, %v18823_v15 }
 0xb2b   : > { %v9968_v59 = vadd.f32 %v18926_v62, %v9946_v52 }
 0xb2d   : > { %v9984_v31 = vmax.f32 %v9968_v59, 0.0 }
 0xb2f   : > { %v9997_v5 = vpack.c.bf16 %v9984_v31, %v9983_v18  ;;  %v9892_v22 = vpop.permute.xlu0 %9891  ;;  %v9890_v63 = vpop.permute.xlu1 %9889 }
 0xb30   : > { %v9915_v57 = vsel %vm2078_vm3, %v9888_v4, %v9890_v63  ;;  %v9916_v30 = vsel %vm2078_vm3, %v9890_v63, %v9892_v22  ;;  %v9896_v36 = vpop.permute.xlu2 %9895 }
 0xb31   : > { %v10513_v42 = vunpack.c.h.b16 %v9997_v5  ;;  %v10512_v8 = vunpack.c.l.b16 %v9997_v5  ;;  %v9947_v2 = vadd.f32 %v9915_v57, %v9831_v58  ;;  %v9948_v49 = vadd.f32 %v9916_v30, %v9832_v39 }
 0xb33   : > { %v19003_v14 = vpack.c.b16 %v10513_v42, %v10513_v42  ;;  %v19005_v24 = vpack.c.b16 %v10512_v8, %v10512_v8  ;;  %15067 = vmatmul.msk.bf16.gmra.mxu3 %vm10068_vm9, %v18987_v51  ;;  %15069 = vmatmul.msk.bf16.gmra.mxu0 %vm10068_vm9, %v18987_v51  ;;  %v9969_v15 = vadd.f32 %v18926_v62, %v9947_v2 }
 0xb34   : > { %v9970_v37 = vadd.f32 %v18926_v62, %v9948_v49 }
 0xb35   : > { %10550 = vrot.lane.b32.xlu2 %v19003_v14, %s16247_s26  ;;  %10548 = vrot.lane.b32.xlu0 %v19005_v24, %s16247_s26  ;;  %v10088_v34 = vsel %vm1508_vm2, %v19005_v24, 0  ;;  %v10091_v43 = vsel %vm1508_vm2, %v19003_v14, 0  ;;  %v9985_v6 = vmax.f32 %v9969_v15, 0.0 }
 0xb36   : > { %v9986_v1 = vmax.f32 %v9970_v37, 0.0  ;;  %10199 = vmatpush.bf16.msrb.mxu1 %v10088_v34  ;;  %10217 = vmatpush.bf16.msra.mxu2 %v10091_v43 }
 0xb37   : > { %v9894_v47 = vpop.permute.xlu0 %9893 }
 0xb38   : > { %v9998_v25 = vpack.c.bf16 %v9986_v1, %v9985_v6  ;;  %v9917_v12 = vsel %vm2078_vm3, %v9892_v22, %v9894_v47  ;;  %v9918_v19 = vsel %vm2078_vm3, %v9894_v47, %v9896_v36 }
 0xb39   : > { %15070 = vmatmul.msk.bf16.vlgmr.msrb.gmra.mxu1 %vm10068_vm9, %v18958_v9  ;;  %15072 = vmatmul.msk.bf16.vlgmr.msra.gmra.mxu2 %vm10068_vm9, %v18958_v9  ;;  %v9949_v13 = vadd.f32 %v9917_v12, %v9833_v40 }
 0xb3a   : > { %v10514_v61 = vunpack.c.l.b16 %v9998_v25  ;;  %v10515_v41 = vunpack.c.h.b16 %v9998_v25 }
 0xb3b   : > { %v9971_v11 = vadd.f32 %v18926_v62, %v9949_v13 }
 0xb3c   : > { %v19027_v56 = vpack.c.b16 %v10514_v61, %v10514_v61  ;;  %v19029_v60 = vpack.c.b16 %v10515_v41, %v10515_v41 }
 0xb3d   : > { %v9987_v46 = vmax.f32 %v9971_v11, 0.0 }
 0xb3e   : > { %10552 = vrot.lane.b32.xlu1 %v19027_v56, %s16247_s26  ;;  %10554 = vrot.lane.b32.xlu0 %v19029_v60, %s16247_s26  ;;  %v10094_v21 = vsel %vm1508_vm2, %v19027_v56, 0  ;;  %v10097_v10 = vsel %vm1508_vm2, %v19029_v60, 0 }
 0xb3f   : > { %v9780_v53 = vpop.permute.xlu1 %9779  ;;  %10235 = vmatpush.bf16.msrb.mxu3 %v10094_v21  ;;  %10253 = vmatpush.bf16.msra.mxu0 %v10097_v10  ;;  %v9784_v28 = vpop.permute.xlu0 %9783 }
 0xb40   : > { %v9802_v48 = vsel %vm2055_vm1, %v9778_v55, %v9780_v53 }
 0xb41   : > { %v9834_v29 = vadd.f32 %v9802_v48, %v18825_v20  ;;  %v9898_v20 = vpop.permute.xlu2 %9897 }
 0xb42   : > { %v9919_v44 = vsel %vm2078_vm3, %v9896_v36, %v9898_v20 }
 0xb43   : > { %v9950_v26 = vadd.f32 %v9918_v19, %v9834_v29  ;;  %15074 = vmatmul.msk.bf16.vlgmr.msrb.gmra.mxu3 %vm10068_vm9, %v18958_v9  ;;  %15076 = vmatmul.msk.bf16.vlgmr.msra.gmra.mxu0 %vm10068_vm9, %v18958_v9 }
 0xb45   : > { %v9972_v4 = vadd.f32 %v18926_v62, %v9950_v26 }
 0xb47   : > { %v9988_v54 = vmax.f32 %v9972_v4, 0.0  ;;  %v9786_v25 = vpop.permute.xlu0 %9785 }
 0xb48   : > { %v9782_v23 = vpop.permute.xlu1 %9781  ;;  %v9805_v41 = vsel %vm2055_vm1, %v9784_v28, %v9786_v25 }
 0xb49   : > { %v9999_v52 = vpack.c.bf16 %v9988_v54, %v9987_v46  ;;  %v9803_v59 = vsel %vm2055_vm1, %v9780_v53, %v9782_v23  ;;  %15071 = vmatmul.msk.bf16.gmra.mxu1 %vm10068_vm9, %v18987_v51  ;;  %15073 = vmatmul.msk.bf16.gmra.mxu2 %vm10068_vm9, %v18987_v51  ;;  %v9804_v5 = vsel %vm2055_vm1, %v9782_v23, %v9784_v28  ;;  %v9788_v6 = vpop.permute.xlu2 %9787 }
 0xb4a   : > { %v9835_v45 = vadd.f32 %v9803_v59, %v18872_v27  ;;  %v9836_v57 = vadd.f32 %v9804_v5, %v18858_v35  ;;  %v9837_v40 = vadd.f32 %v9805_v41, %v18845_v3  ;;  %v9806_v21 = vsel %vm2055_vm1, %v9786_v25, %v9788_v6 }
 0xb4b   : > { %v10517_v18 = vunpack.c.h.b16 %v9999_v52  ;;  %v10516_v31 = vunpack.c.l.b16 %v9999_v52  ;;  %v9838_v53 = vadd.f32 %v9806_v21, %v18860_v7 }
 0xb4c   : > { %v9951_v39 = vadd.f32 %v9919_v44, %v9835_v45 }
 0xb4d   : > { %v19057_v22 = vpack.c.b16 %v10517_v18, %v10517_v18  ;;  %v19059_v58 = vpack.c.b16 %v10516_v31, %v10516_v31 }
 0xb4e   : > { %v9973_v8 = vadd.f32 %v18926_v62, %v9951_v39 }
 0xb4f   : > { %10558 = vrot.lane.b32.xlu1 %v19057_v22, %s16247_s26  ;;  %10556 = vrot.lane.b32.xlu2 %v19059_v58, %s16247_s26  ;;  %v10100_v27 = vsel %vm1508_vm2, %v19059_v58, 0  ;;  %v10103_v63 = vsel %vm1508_vm2, %v19057_v22, 0 }
 0xb50   : > { %v9900_v30 = vpop.permute.xlu1 %9899  ;;  %10271 = vmatpush.bf16.msra.mxu1 %v10100_v27  ;;  %10289 = vmatpush.bf16.msrb.mxu2 %v10103_v63  ;;  %v9989_v15 = vmax.f32 %v9973_v8, 0.0 }
 0xb51   : > { %v9920_v42 = vsel %vm2078_vm3, %v9898_v20, %v9900_v30  ;;  %v9790_v10 = vpop.permute.xlu2 %9789 }
 0xb52   : > { %v9952_v2 = vadd.f32 %v9920_v42, %v9836_v57  ;;  %v9807_v26 = vsel %vm2055_vm1, %v9788_v6, %v9790_v10 }
 0xb53   : > { %15075 = vmatmul.msk.bf16.gmra.mxu3 %vm10068_vm9, %v18987_v51  ;;  %15077 = vmatmul.msk.bf16.gmra.mxu0 %vm10068_vm9, %v18987_v51  ;;  %v9839_v54 = vadd.f32 %v9807_v26, %v18904_v33 }
 0xb54   : > { %v9974_v49 = vadd.f32 %v18926_v62, %v9952_v2 }
 0xb56   : > { %v9990_v37 = vmax.f32 %v9974_v49, 0.0 }
 0xb58   : > { %v10000_v34 = vpack.c.bf16 %v9990_v37, %v9989_v15  ;;  %v9902_v61 = vpop.permute.xlu1 %9901 }
 0xb59   : > { %15078 = vmatmul.msk.bf16.vlgmr.msra.gmra.mxu1 %vm10068_vm9, %v18958_v9  ;;  %15080 = vmatmul.msk.bf16.vlgmr.msrb.gmra.mxu2 %vm10068_vm9, %v18958_v9  ;;  %v9921_v12 = vsel %vm2078_vm3, %v9900_v30, %v9902_v61  ;;  %v9908_v23 = vpop.permute.xlu2 %9907 }
 0xb5a   : > { %v10519_v35 = vunpack.c.h.b16 %v10000_v34  ;;  %v10518_v43 = vunpack.c.l.b16 %v10000_v34  ;;  %v9953_v13 = vadd.f32 %v9921_v12, %v9837_v40  ;;  %v15094_v12 = vld [vmem:[%s20002_s16 + $0x14] sm:$0xf] }
 0xb5c   : > { %v19081_v1 = vpack.c.b16 %v10519_v35, %v10519_v35  ;;  %v19083_v55 = vpack.c.b16 %v10518_v43, %v10518_v43  ;;  %v9975_v29 = vadd.f32 %v18926_v62, %v9953_v13 }
 0xb5e   : > { %10562 = vrot.lane.b32.xlu2 %v19081_v1, %s16247_s26  ;;  %10560 = vrot.lane.b32.xlu0 %v19083_v55, %s16247_s26  ;;  %v10106_v47 = vsel %vm1508_vm2, %v19083_v55, 0  ;;  %v10109_v17 = vsel %vm1508_vm2, %v19081_v1, 0  ;;  %v9991_v7 = vmax.f32 %v9975_v29, 0.0 }
 0xb5f   : > { %10307 = vmatpush.bf16.msra.mxu3 %v10106_v47  ;;  %10325 = vmatpush.bf16.msrb.mxu0 %v10109_v17 }
 0xb60   : > { %v9792_v19 = vpop.permute.xlu1 %9791 }
 0xb61   : > { %v9808_v4 = vsel %vm2055_vm1, %v9790_v10, %v9792_v19 }
 0xb62   : > { %v9840_v52 = vadd.f32 %v9808_v4, %v18892_v0 }
 0xb63   : > { %15082 = vmatmul.msk.bf16.vlgmr.msra.gmra.mxu3 %vm10068_vm9, %v18958_v9  ;;  %15084 = vmatmul.msk.bf16.vlgmr.msrb.gmra.mxu0 %vm10068_vm9, %v18958_v9 }
 0xb67   : > { %v9904_v36 = vpop.permute.xlu0 %9903 }
 0xb68   : > { %v9922_v48 = vsel %vm2078_vm3, %v9902_v61, %v9904_v36 }
 0xb69   : > { %v9954_v11 = vadd.f32 %v9922_v48, %v9838_v53  ;;  %15079 = vmatmul.msk.bf16.gmra.mxu1 %vm10068_vm9, %v18987_v51  ;;  %15081 = vmatmul.msk.bf16.gmra.mxu2 %vm10068_vm9, %v18987_v51 }
 0xb6b   : > { %v9976_v3 = vadd.f32 %v18926_v62, %v9954_v11 }
 0xb6d   : > { %v9992_v46 = vmax.f32 %v9976_v3, 0.0 }
 0xb6f   : > { %v10001_v59 = vpack.c.bf16 %v9992_v46, %v9991_v7  ;;  %v9906_v20 = vpop.permute.xlu0 %9905 }
 0xb70   : > { %v9923_v45 = vsel %vm2078_vm3, %v9904_v36, %v9906_v20  ;;  %v9924_v18 = vsel %vm2078_vm3, %v9906_v20, %v9908_v23 }
 0xb71   : > { %v9955_v31 = vadd.f32 %v9923_v45, %v9839_v54  ;;  %v9956_v28 = vadd.f32 %v9924_v18, %v9840_v52  ;;  %v10520_v44 = vunpack.c.l.b16 %v10001_v59  ;;  %v10521_v5 = vunpack.c.h.b16 %v10001_v59 }
 0xb73   : > { %v9977_v39 = vadd.f32 %v18926_v62, %v9955_v31  ;;  %v9978_v27 = vadd.f32 %v18926_v62, %v9956_v28  ;;  %v10536_v63 = vpack.c.b16 %v10520_v44, %v10520_v44  ;;  %v19117_v57 = vpack.c.b16 %v10521_v5, %v10521_v5  ;;  %15083 = vmatmul.msk.bf16.gmra.mxu3 %vm10068_vm9, %v18987_v51 }
 0xb74   : > { %15085 = vmatmul.msk.bf16.gmra.mxu0 %vm10068_vm9, %v18987_v51 }
 0xb75   : > { %v9993_v0 = vmax.f32 %v9977_v39, 0.0  ;;  %v9994_v33 = vmax.f32 %v9978_v27, 0.0  ;;  %10564 = vrot.lane.b32.xlu1 %v10536_v63, %s16247_s26  ;;  %10566 = vrot.lane.b32.xlu0 %v19117_v57, %s16247_s26  ;;  %v10112_v30 = vsel %vm1508_vm2, %v10536_v63, 0  ;;  %v10115_v62 = vsel %vm1508_vm2, %v19117_v57, 0 }
 0xb76   : > { %10343 = vmatpush.bf16.msrb.mxu1 %v10112_v30  ;;  %10361 = vmatpush.bf16.msra.mxu2 %v10115_v62 }
 0xb77   : > { %v10002_v42 = vpack.c.bf16 %v9994_v33, %v9993_v0 }
 0xb79   : > { %10010 = vst [vmem:[#allocation8 + $0x38] sm:$0xff] %v10002_v42  ;;  %15086 = vmatmul.msk.bf16.vlgmr.msrb.gmra.mxu1 %vm10068_vm9, %v18958_v9  ;;  %v10523_v8 = vunpack.c.h.b16 %v10002_v42  ;;  %v10522_v2 = vunpack.c.l.b16 %v10002_v42  ;;  %15088 = vmatmul.msk.bf16.vlgmr.msra.gmra.mxu2 %vm10068_vm9, %v18958_v9  ;;  %v10545_v6 = vpop.permute.xlu2 %10544 }
 0xb7b   : > { %v10539_v49 = vpack.c.b16 %v10523_v8, %v10523_v8  ;;  %v10538_v15 = vpack.c.b16 %v10522_v2, %v10522_v2 }
 0xb7d   : > { %11103 = vrot.lane.b32.xlu0 %v18942_v38, %s16248_s27  ;;  %10570 = vrot.lane.b32.xlu1 %v10539_v49, %s16247_s26 }
 0xb7e   : > { %10568 = vrot.lane.b32.xlu2 %v10538_v15, %s16247_s26 }
 0xb80   : > { %v10021_v37 = vld [vmem:[#allocation8 + $0x38] sm:$0xf] }
 0xb81   : > { %v10052_v34 = vunpack.c.l.b16 %v10021_v37 }
 0xb83   : > { %v10067_v35 = vpack.c.b16 %v10052_v34, %v10052_v34 }
 0xb85   : > { %v10118_v43 = vsel %vm1508_vm2, %v10067_v35, 0  ;;  %11109 = vrot.lane.b32.xlu0 %v18964_v50, %s16248_s27  ;;  %11107 = vrot.lane.b32.xlu1 %v18966_v16, %s16248_s27 }
 0xb86   : > { %10379 = vmatpush.bf16.msrb.mxu3 %v10118_v43  ;;  %11105 = vrot.lane.b32.xlu2 %v18944_v32, %s16248_s27  ;;  %v19157_v32 = vld [vmem:[%s20002_s16 + $0xc] sm:$0xff] }
 0xb87   : > { %v10541_v38 = vpop.permute.xlu1 %10540  ;;  %v10543_v25 = vpop.permute.xlu0 %10542 }
 0xb88   : > { %v10572_v47 = vsel %vm8622_vm7, %v10541_v38, %v10543_v25  ;;  %v10573_v17 = vsel %vm8622_vm7, %v10543_v25, %v10545_v6 }
 0xb89   : > { %v10594_v61 = vsel %vm1508_vm2, %v10572_v47, 0  ;;  %v10597_v41 = vsel %vm1508_vm2, %v10573_v17, 0  ;;  %15087 = vmatmul.msk.bf16.gmra.mxu1 %vm10068_vm9, %v18987_v51  ;;  %15090 = vmatmul.msk.bf16.vlgmr.msrb.gmra.mxu3 %vm10068_vm9, %v18958_v9 }
 0xb8a   : > { %15089 = vmatmul.msk.bf16.gmra.mxu2 %vm10068_vm9, %v18987_v51  ;;  %10645 = vmatpush.bf16.msra.mxu0 %v10594_v61 }
 0xb8b   : > { %10663 = vmatpush.bf16.msra.mxu1 %v10597_v41 }
 0xb8d   : > { %11115 = vrot.lane.b32.xlu0 %v19027_v56, %s16248_s27  ;;  %11113 = vrot.lane.b32.xlu1 %v19003_v14, %s16248_s27 }
 0xb8e   : > { %11111 = vrot.lane.b32.xlu2 %v19005_v24, %s16248_s27  ;;  %15099 = vmatmul.msk.bf16.vlgmr.msra.gmra.mxu0 %vm10068_vm9, %v19157_v32  ;;  %v10497_v24 = vunpack.c.l.b16 %v15094_v12 }
 0xb90   : > { %v19186_v56 = vpack.c.b16 %v10497_v24, %v10497_v24 }
 0xb91   : > { %v10547_v9 = vpop.permute.xlu1 %10546 }
 0xb92   : > { %v10574_v50 = vsel %vm8622_vm7, %v10545_v6, %v10547_v9 }
 0xb93   : > { %v10600_v16 = vsel %vm1508_vm2, %v10574_v50, 0 }
 0xb94   : > { %10681 = vmatpush.bf16.msrb.mxu2 %v10600_v16 }
 0xb95   : > { %11121 = vrot.lane.b32.xlu0 %v19057_v22, %s16248_s27  ;;  %11119 = vrot.lane.b32.xlu1 %v19059_v58, %s16248_s27 }
 0xb96   : > { %11117 = vrot.lane.b32.xlu2 %v19029_v60, %s16248_s27  ;;  %v19178_v14 = vpop.f32.mrf.mxu1 }
 0xb99   : > { %15101 = vmatmul.msk.bf16.vlgmr.msra.gmra.mxu1 %vm10068_vm9, %v19157_v32  ;;  %15091 = vmatmul.msk.bf16.gmra.mxu3 %vm10068_vm9, %v18987_v51 }
 0xb9a   : > { %15103 = vmatmul.msk.bf16.vlgmr.msrb.gmra.mxu2 %vm10068_vm9, %v19157_v32 }
 0xb9c   : > { %v19188_v22 = vpop.f32.mrf.mxu2 }
 0xb9d   : > { %11127 = vrot.lane.b32.xlu0 %v10536_v63, %s16248_s27  ;;  %11125 = vrot.lane.b32.xlu1 %v19081_v1, %s16248_s27 }
 0xb9e   : > { %11123 = vrot.lane.b32.xlu2 %v19083_v55, %s16248_s27  ;;  %15100 = vmatmul.msk.bf16.gmra.mxu0 %vm10068_vm9, %v19186_v56  ;;  %v19197_v60 = vpop.f32.mrf.mxu1  ;;  %v10551_v55 = vpop.permute.xlu2 %10550 }
 0xba0   : > { %v19199_v51 = vpop.f32.mrf.mxu0 }
 0xba4   : > { %v19201_v58 = vpop.f32.mrf.mxu2 }
 0xba5   : > { %11133 = vrot.lane.b32.xlu0 %v10539_v49, %s16248_s27  ;;  %11131 = vrot.lane.b32.xlu1 %v10538_v15, %s16248_s27 }
 0xba6   : > { %11129 = vrot.lane.b32.xlu2 %v19117_v57, %s16248_s27  ;;  %v19207_v1 = vpop.f32.mrf.mxu1  ;;  %v19209_v40 = vpop.f32.mrf.mxu3 }
 0xba7   : > { %v10549_v21 = vpop.permute.xlu0 %10548 }
 0xba8   : > { %v10575_v10 = vsel %vm8622_vm7, %v10547_v9, %v10549_v21  ;;  %v10576_v13 = vsel %vm8622_vm7, %v10549_v21, %v10551_v55  ;;  %v19213_v53 = vpop.f32.mrf.mxu0 }
 0xba9   : > { %v10603_v36 = vsel %vm1508_vm2, %v10575_v10, 0  ;;  %v10606_v48 = vsel %vm1508_vm2, %v10576_v13, 0  ;;  %15102 = vmatmul.msk.bf16.gmra.mxu1 %vm10068_vm9, %v19186_v56  ;;  %v10557_v3 = vpop.permute.xlu2 %10556 }
 0xbaa   : > { %15104 = vmatmul.msk.bf16.gmra.mxu2 %vm10068_vm9, %v19186_v56  ;;  %10699 = vmatpush.bf16.msra.mxu3 %v10603_v36 }
 0xbab   : > { %10717 = vmatpush.bf16.msrb.mxu0 %v10606_v48 }
 0xbac   : > { %v19221_v29 = vpop.f32.mrf.mxu2 }
 0xbad   : > { %15105 = vmatmul.msk.bf16.vlgmr.msra.gmra.mxu3 %vm10068_vm9, %v19157_v32 }
 0xbae   : > { %15107 = vmatmul.msk.bf16.vlgmr.msrb.gmra.mxu0 %vm10068_vm9, %v19157_v32  ;;  %v10136_v19 = vpop.f32.mrf.mxu1  ;;  %v19227_v11 = vpop.f32.mrf.mxu3 }
 0xbb0   : > { %v10553_v26 = vpop.permute.xlu1 %10552  ;;  %v10555_v4 = vpop.permute.xlu0 %10554 }
 0xbb1   : > { %v10577_v7 = vsel %vm8622_vm7, %v10551_v55, %v10553_v26  ;;  %v10578_v46 = vsel %vm8622_vm7, %v10553_v26, %v10555_v4  ;;  %v10579_v54 = vsel %vm8622_vm7, %v10555_v4, %v10557_v3  ;;  %v19232_v23 = vpop.f32.mrf.mxu0 }
 0xbb2   : > { %v10609_v52 = vsel %vm1508_vm2, %v10577_v7, 0  ;;  %v10612_v59 = vsel %vm1508_vm2, %v10578_v46, 0  ;;  %v10615_v20 = vsel %vm1508_vm2, %v10579_v54, 0 }
 0xbb3   : > { %10735 = vmatpush.bf16.msrb.mxu1 %v10609_v52  ;;  %10753 = vmatpush.bf16.msra.mxu2 %v10612_v59 }
 0xbb4   : > { %10771 = vmatpush.bf16.msrb.mxu3 %v10615_v20  ;;  %v10154_v45 = vpop.f32.mrf.mxu2 }
 0xbb6   : > { %v19237_v18 = vpop.f32.mrf.mxu1  ;;  %v19239_v31 = vpop.f32.mrf.mxu3 }
 0xbb8   : > { %v10563_v15 = vpop.permute.xlu2 %10562 }
 0xbb9   : > { %15109 = vmatmul.msk.bf16.vlgmr.msrb.gmra.mxu1 %vm10068_vm9, %v19157_v32  ;;  %v10190_v28 = vpop.f32.mrf.mxu0 }
 0xbba   : > { %15111 = vmatmul.msk.bf16.vlgmr.msra.gmra.mxu2 %vm10068_vm9, %v19157_v32 }
 0xbbc   : > { %v19245_v44 = vpop.f32.mrf.mxu2 }
 0xbbd   : > { %15106 = vmatmul.msk.bf16.gmra.mxu3 %vm10068_vm9, %v19186_v56 }
 0xbbe   : > { %15108 = vmatmul.msk.bf16.gmra.mxu0 %vm10068_vm9, %v19186_v56  ;;  %v19251_v5 = vpop.f32.mrf.mxu1  ;;  %v10172_v39 = vpop.f32.mrf.mxu3 }
 0xbc1   : > { %v10559_v27 = vpop.permute.xlu1 %10558  ;;  %v19253_v63 = vpop.f32.mrf.mxu0 }
 0xbc2   : > { %v10580_v57 = vsel %vm8622_vm7, %v10557_v3, %v10559_v27 }
 0xbc3   : > { %v10618_v0 = vsel %vm1508_vm2, %v10580_v57, 0 }
 0xbc4   : > { %v19257_v33 = vpop.f32.mrf.mxu2  ;;  %10789 = vmatpush.bf16.msra.mxu0 %v10618_v0 }
 0xbc6   : > { %v19259_v30 = vpop.f32.mrf.mxu1  ;;  %v19261_v62 = vpop.f32.mrf.mxu3 }
 0xbc9   : > { %15110 = vmatmul.msk.bf16.gmra.mxu1 %vm10068_vm9, %v19186_v56  ;;  %v19265_v42 = vpop.f32.mrf.mxu0 }
 0xbca   : > { %15112 = vmatmul.msk.bf16.gmra.mxu2 %vm10068_vm9, %v19186_v56 }
 0xbcc   : > { %v19269_v8 = vpop.f32.mrf.mxu2 }
 0xbcd   : > { %15113 = vmatmul.msk.bf16.vlgmr.msrb.gmra.mxu3 %vm10068_vm9, %v19157_v32 }
 0xbce   : > { %15115 = vmatmul.msk.bf16.vlgmr.msra.gmra.mxu0 %vm10068_vm9, %v19157_v32  ;;  %v10208_v2 = vpop.f32.mrf.mxu1  ;;  %v19275_v49 = vpop.f32.mrf.mxu3 }
 0xbd0   : > { %v10561_v37 = vpop.permute.xlu0 %10560 }
 0xbd1   : > { %v10581_v34 = vsel %vm8622_vm7, %v10559_v27, %v10561_v37  ;;  %v10582_v35 = vsel %vm8622_vm7, %v10561_v37, %v10563_v15  ;;  %v19279_v43 = vpop.f32.mrf.mxu0 }
 0xbd2   : > { %v10621_v6 = vsel %vm1508_vm2, %v10581_v34, 0  ;;  %v10624_v38 = vsel %vm1508_vm2, %v10582_v35, 0 }
 0xbd3   : > { %10807 = vmatpush.bf16.msra.mxu1 %v10621_v6  ;;  %10825 = vmatpush.bf16.msrb.mxu2 %v10624_v38 }
 0xbd4   : > { %v10226_v25 = vpop.f32.mrf.mxu2 }
 0xbd6   : > { %v19283_v47 = vpop.f32.mrf.mxu1  ;;  %v19285_v17 = vpop.f32.mrf.mxu3 }
 0xbd8   : > { %v10569_v16 = vpop.permute.xlu2 %10568 }
 0xbd9   : > { %15117 = vmatmul.msk.bf16.vlgmr.msra.gmra.mxu1 %vm10068_vm9, %v19157_v32  ;;  %v10262_v61 = vpop.f32.mrf.mxu0 }
 0xbda   : > { %15119 = vmatmul.msk.bf16.vlgmr.msrb.gmra.mxu2 %vm10068_vm9, %v19157_v32 }
 0xbdc   : > { %v19291_v41 = vpop.f32.mrf.mxu2 }
 0xbdd   : > { %15114 = vmatmul.msk.bf16.gmra.mxu3 %vm10068_vm9, %v19186_v56 }
 0xbde   : > { %15116 = vmatmul.msk.bf16.gmra.mxu0 %vm10068_vm9, %v19186_v56  ;;  %v19297_v9 = vpop.f32.mrf.mxu1  ;;  %v10244_v50 = vpop.f32.mrf.mxu3 }
 0xbdf   : > { %20003 = vst [vmem:[#allocation21_spill] sm:$0xff] %v19297_v9 }
 0xbe0   : > { %v11106_v3 = vpop.permute.xlu2 %11105 }
 0xbe1   : > { %v19299_v12 = vpop.f32.mrf.mxu0 }
 0xbe2   : > { %20004 = vst [vmem:[#allocation52_spill] sm:$0xff] %v19299_v12 }
 0xbe4   : > { %v19301_v24 = vpop.f32.mrf.mxu2 }
 0xbe6   : > { %v19303_v55 = vpop.f32.mrf.mxu1  ;;  %v19305_v21 = vpop.f32.mrf.mxu3 }
 0xbe7   : > { %20005 = vst [vmem:[#allocation24_spill] sm:$0xff] %v19303_v55  ;;  %v10565_v10 = vpop.permute.xlu1 %10564  ;;  %v10567_v13 = vpop.permute.xlu0 %10566 }
 0xbe8   : > { %20006 = vst [vmem:[#allocation58_spill] sm:$0xff] %v19305_v21  ;;  %v10583_v36 = vsel %vm8622_vm7, %v10563_v15, %v10565_v10  ;;  %v10584_v48 = vsel %vm8622_vm7, %v10565_v10, %v10567_v13  ;;  %v10585_v19 = vsel %vm8622_vm7, %v10567_v13, %v10569_v16  ;;  %v11112_v2 = vpop.permute.xlu2 %11111 }
 0xbe9   : > { %v10627_v26 = vsel %vm1508_vm2, %v10583_v36, 0  ;;  %v10630_v4 = vsel %vm1508_vm2, %v10584_v48, 0  ;;  %v10633_v7 = vsel %vm1508_vm2, %v10585_v19, 0  ;;  %15118 = vmatmul.msk.bf16.gmra.mxu1 %vm10068_vm9, %v19186_v56  ;;  %v19315_v46 = vpop.f32.mrf.mxu0 }
 0xbea   : > { %20007 = vst [vmem:[#allocation34_spill] sm:$0xff] %v19315_v46  ;;  %15120 = vmatmul.msk.bf16.gmra.mxu2 %vm10068_vm9, %v19186_v56  ;;  %10843 = vmatpush.bf16.msra.mxu3 %v10627_v26 }
 0xbeb   : > { %10861 = vmatpush.bf16.msrb.mxu0 %v10630_v4  ;;  %10879 = vmatpush.bf16.msrb.mxu1 %v10633_v7 }
 0xbec   : > { %v19319_v54 = vpop.f32.mrf.mxu2 }
 0xbed   : > { %20008 = vst [vmem:[#allocation51_spill] sm:$0xff] %v19319_v54  ;;  %15121 = vmatmul.msk.bf16.vlgmr.msra.gmra.mxu3 %vm10068_vm9, %v19157_v32 }
 0xbee   : > { %15123 = vmatmul.msk.bf16.vlgmr.msrb.gmra.mxu0 %vm10068_vm9, %v19157_v32  ;;  %v10280_v52 = vpop.f32.mrf.mxu1  ;;  %v19325_v59 = vpop.f32.mrf.mxu3 }
 0xbef   : > { %20009 = vst [vmem:[#allocation29_spill] sm:$0xff] %v19325_v59  ;;  %v10571_v20 = vpop.permute.xlu1 %10570  ;;  %v11104_v45 = vpop.permute.xlu0 %11103 }
 0xbf0   : > { %v10586_v28 = vsel %vm8622_vm7, %v10569_v16, %v10571_v20  ;;  %v11135_v39 = vsel %vm9260_vm8, %v11104_v45, %v11106_v3  ;;  %v11118_v36 = vpop.permute.xlu2 %11117 }
 0xbf1   : > { %v10636_v27 = vsel %vm1508_vm2, %v10586_v28, 0  ;;  %v11157_v57 = vsel %vm1508_vm2, %v11135_v39, 0  ;;  %v19331_v0 = vpop.f32.mrf.mxu0 }
 0xbf2   : > { %20010 = vst [vmem:[#allocation44_spill] sm:$0xff] %v19331_v0  ;;  %10897 = vmatpush.bf16.msra.mxu2 %v10636_v27  ;;  %11208 = vmatpush.bf16.msrb.mxu3 %v11157_v57 }
 0xbf4   : > { %v10298_v15 = vpop.f32.mrf.mxu2 }
 0xbf6   : > { %v19333_v37 = vpop.f32.mrf.mxu1  ;;  %v19335_v34 = vpop.f32.mrf.mxu3 }
 0xbf7   : > { %20011 = vst [vmem:[#allocation23_spill] sm:$0xff] %v19333_v37  ;;  %v11108_v35 = vpop.permute.xlu1 %11107  ;;  %v11110_v6 = vpop.permute.xlu0 %11109 }
 0xbf8   : > { %20012 = vst [vmem:[#allocation54_spill] sm:$0xff] %v19335_v34  ;;  %v11136_v38 = vsel %vm9260_vm8, %v11106_v3, %v11108_v35  ;;  %v11137_v25 = vsel %vm9260_vm8, %v11108_v35, %v11110_v6  ;;  %v11138_v61 = vsel %vm9260_vm8, %v11110_v6, %v11112_v2  ;;  %v19372_v6 = vld [vmem:[%s20002_s16 + $0x18] sm:$0xff] }
 0xbf9   : > { %v11160_v50 = vsel %vm1508_vm2, %v11136_v38, 0  ;;  %v11163_v16 = vsel %vm1508_vm2, %v11137_v25, 0  ;;  %v11166_v10 = vsel %vm1508_vm2, %v11138_v61, 0  ;;  %15125 = vmatmul.msk.bf16.vlgmr.msrb.gmra.mxu1 %vm10068_vm9, %v19157_v32  ;;  %v10334_v13 = vpop.f32.mrf.mxu0  ;;  %v11124_v38 = vpop.permute.xlu2 %11123 }
 0xbfa   : > { %15127 = vmatmul.msk.bf16.vlgmr.msra.gmra.mxu2 %vm10068_vm9, %v19157_v32  ;;  %11226 = vmatpush.bf16.msra.mxu0 %v11160_v50 }
 0xbfb   : > { %11244 = vmatpush.bf16.msra.mxu1 %v11163_v16  ;;  %11262 = vmatpush.bf16.msrb.mxu2 %v11166_v10 }
 0xbfc   : > { %v19347_v48 = vpop.f32.mrf.mxu2 }
 0xbfd   : > { %20013 = vst [vmem:[#allocation26_spill] sm:$0xff] %v19347_v48  ;;  %15122 = vmatmul.msk.bf16.gmra.mxu3 %vm10068_vm9, %v19186_v56 }
 0xbfe   : > { %15124 = vmatmul.msk.bf16.gmra.mxu0 %vm10068_vm9, %v19186_v56  ;;  %v19353_v19 = vpop.f32.mrf.mxu1  ;;  %v10316_v3 = vpop.f32.mrf.mxu3 }
 0xbff   : > { %20014 = vst [vmem:[#allocation45_spill] sm:$0xff] %v19353_v19  ;;  %v11114_v26 = vpop.permute.xlu1 %11113  ;;  %v11116_v4 = vpop.permute.xlu0 %11115  ;;  %v15131_v3 = vld [vmem:[%s20002_s16 + $0x20] sm:$0xf] }
 0xc00   : > { %v11139_v7 = vsel %vm9260_vm8, %v11112_v2, %v11114_v26  ;;  %v11140_v32 = vsel %vm9260_vm8, %v11114_v26, %v11116_v4  ;;  %v11141_v52 = vsel %vm9260_vm8, %v11116_v4, %v11118_v36 }
 0xc01   : > { %v11169_v20 = vsel %vm1508_vm2, %v11139_v7, 0  ;;  %v11172_v45 = vsel %vm1508_vm2, %v11140_v32, 0  ;;  %v11175_v28 = vsel %vm1508_vm2, %v11141_v52, 0 }
 0xc02   : > { %11280 = vmatpush.bf16.msra.mxu3 %v11169_v20  ;;  %11298 = vmatpush.bf16.msrb.mxu0 %v11172_v45  ;;  %v11060_v20 = vunpack.c.l.b16 %v15131_v3 }
 0xc03   : > { %11316 = vmatpush.bf16.msrb.mxu1 %v11175_v28 }
 0xc04   : > { %v19361_v39 = vpop.f32.mrf.mxu2 }
 0xc05   : > { %20015 = vst [vmem:[#allocation28_spill] sm:$0xff] %v19361_v39 }
 0xc06   : > { %v19363_v27 = vpop.f32.mrf.mxu1 }
 0xc07   : > { %20016 = vst [vmem:[#allocation46_spill] sm:$0xff] %v19363_v27  ;;  %v11120_v57 = vpop.permute.xlu1 %11119  ;;  %v11122_v15 = vpop.permute.xlu0 %11121 }
 0xc08   : > { %v11142_v2 = vsel %vm9260_vm8, %v11118_v36, %v11120_v57  ;;  %v11143_v25 = vsel %vm9260_vm8, %v11120_v57, %v11122_v15  ;;  %v11144_v61 = vsel %vm9260_vm8, %v11122_v15, %v11124_v38 }
 0xc09   : > { %v11178_v35 = vsel %vm1508_vm2, %v11142_v2, 0  ;;  %15126 = vmatmul.msk.bf16.gmra.mxu1 %vm10068_vm9, %v19186_v56  ;;  %v11181_v10 = vsel %vm1508_vm2, %v11143_v25, 0  ;;  %v11184_v36 = vsel %vm1508_vm2, %v11144_v61, 0  ;;  %v19402_v2 = vpack.c.b16 %v11060_v20, %v11060_v20 }
 0xc0a   : > { %15128 = vmatmul.msk.bf16.gmra.mxu2 %vm10068_vm9, %v19186_v56 }
 0xc0b   : > { %v19378_v50 = vpop.f32.mrf.mxu0  ;;  %11334 = vmatpush.bf16.msra.mxu2 %v11178_v35 }
 0xc0c   : > { %v10381_v16 = vpop.f32.mrf.mxu3 }
 0xc0d   : > { %v19381_v13 = vpop.f32.mrf.mxu2  ;;  %15136 = vmatmul.msk.bf16.vlgmr.msrb.gmra.mxu3 %vm10068_vm9, %v19372_v6 }
 0xc0e   : > { %20017 = vst [vmem:[#allocation31_spill] sm:$0xff] %v19381_v13  ;;  %15138 = vmatmul.msk.bf16.vlgmr.msra.gmra.mxu0 %vm10068_vm9, %v19372_v6  ;;  %11352 = vmatpush.bf16.msrb.mxu3 %v11181_v10  ;;  %v10352_v56 = vpop.f32.mrf.mxu1 }
 0xc0f   : > { %11370 = vmatpush.bf16.msra.mxu0 %v11184_v36  ;;  %v11126_v26 = vpop.permute.xlu1 %11125  ;;  %v11128_v7 = vpop.permute.xlu0 %11127 }
 0xc10   : > { %v11145_v45 = vsel %vm9260_vm8, %v11124_v38, %v11126_v26  ;;  %v11146_v57 = vsel %vm9260_vm8, %v11126_v26, %v11128_v7 }
 0xc11   : > { %v11187_v15 = vsel %vm1508_vm2, %v11145_v45, 0  ;;  %v11190_v35 = vsel %vm1508_vm2, %v11146_v57, 0 }
 0xc13   : > { %v19391_v4 = vpop.f32.mrf.mxu0 }
 0xc14   : > { %v19393_v32 = vpop.f32.mrf.mxu3 }
 0xc15   : > { %20018 = vst [vmem:[#allocation47_spill] sm:$0xff] %v19393_v32  ;;  %v10370_v52 = vpop.f32.mrf.mxu2 }
 0xc16   : > { %v19396_v28 = vpop.f32.mrf.mxu1  ;;  %v11130_v52 = vpop.permute.xlu2 %11129 }
 0xc17   : > { %v11132_v26 = vpop.permute.xlu1 %11131  ;;  %v11147_v20 = vsel %vm9260_vm8, %v11128_v7, %v11130_v52 }
 0xc18   : > { %v11148_v45 = vsel %vm9260_vm8, %v11130_v52, %v11132_v26  ;;  %v11134_v52 = vpop.permute.xlu0 %11133 }
 0xc19   : > { %15140 = vmatmul.msk.bf16.vlgmr.msra.gmra.mxu1 %vm10068_vm9, %v19372_v6 }
 0xc1a   : > { %15142 = vmatmul.msk.bf16.vlgmr.msrb.gmra.mxu2 %vm10068_vm9, %v19372_v6  ;;  %11388 = vmatpush.bf16.msra.mxu1 %v11187_v15  ;;  %v11193_v15 = vsel %vm1508_vm2, %v11147_v20, 0  ;;  %v11149_v20 = vsel %vm9260_vm8, %v11132_v26, %v11134_v52 }
 0xc1b   : > { %11406 = vmatpush.bf16.msrb.mxu2 %v11190_v35  ;;  %v19407_v25 = vpop.f32.mrf.mxu0 }
 0xc1c   : > { %v19409_v38 = vpop.f32.mrf.mxu3 }
 0xc1d   : > { %20019 = vst [vmem:[#allocation32_spill] sm:$0xff] %v19409_v38  ;;  %v19411_v61 = vpop.f32.mrf.mxu2  ;;  %15137 = vmatmul.msk.bf16.gmra.mxu3 %vm10068_vm9, %v19402_v2 }
 0xc1e   : > { %15139 = vmatmul.msk.bf16.gmra.mxu0 %vm10068_vm9, %v19402_v2  ;;  %v19417_v16 = vpop.f32.mrf.mxu1 }
 0xc23   : > { %v10654_v10 = vpop.f32.mrf.mxu0 }
 0xc24   : > { %v10388_v36 = vpop.f32.mrf.mxu3  ;;  %v11196_v10 = vsel %vm1508_vm2, %v11148_v45, 0  ;;  %v11199_v45 = vsel %vm1508_vm2, %v11149_v20, 0 }
 0xc25   : > { %v19419_v56 = vpop.f32.mrf.mxu2 }
 0xc26   : > { %v19421_v3 = vpop.f32.mrf.mxu1 }
 0xc29   : > { %15141 = vmatmul.msk.bf16.gmra.mxu1 %vm10068_vm9, %v19402_v2 }
 0xc2a   : > { %15143 = vmatmul.msk.bf16.gmra.mxu2 %vm10068_vm9, %v19402_v2 }
 0xc2b   : > { %v19429_v57 = vpop.f32.mrf.mxu0 }
 0xc2d   : > { %v19432_v35 = vpop.f32.mrf.mxu2  ;;  %15144 = vmatmul.msk.bf16.vlgmr.msra.gmra.mxu3 %vm10068_vm9, %v19372_v6 }
 0xc2e   : > { %15146 = vmatmul.msk.bf16.vlgmr.msrb.gmra.mxu0 %vm10068_vm9, %v19372_v6  ;;  %11424 = vmatpush.bf16.msra.mxu3 %v11193_v15  ;;  %v10672_v7 = vpop.f32.mrf.mxu1 }
 0xc2f   : > { %11442 = vmatpush.bf16.msrb.mxu0 %v11196_v10 }
 0xc30   : > { %v19439_v36 = vpop.f32.mrf.mxu3 }
 0xc33   : > { %v19441_v38 = vpop.f32.mrf.mxu0 }
 0xc35   : > { %v10690_v27 = vpop.f32.mrf.mxu2 }
 0xc36   : > { %v19444_v32 = vpop.f32.mrf.mxu1 }
 0xc38   : > { %v19446_v13 = vpop.f32.mrf.mxu3 }
 0xc39   : > { %15148 = vmatmul.msk.bf16.vlgmr.msrb.gmra.mxu1 %vm10068_vm9, %v19372_v6 }
 0xc3a   : > { %15150 = vmatmul.msk.bf16.vlgmr.msra.gmra.mxu2 %vm10068_vm9, %v19372_v6  ;;  %11460 = vmatpush.bf16.msrb.mxu1 %v11199_v45 }
 0xc3b   : > { %v19453_v15 = vpop.f32.mrf.mxu0 }
 0xc3d   : > { %v19455_v10 = vpop.f32.mrf.mxu2  ;;  %15145 = vmatmul.msk.bf16.gmra.mxu3 %vm10068_vm9, %v19402_v2 }
 0xc3e   : > { %15147 = vmatmul.msk.bf16.gmra.mxu0 %vm10068_vm9, %v19402_v2  ;;  %v19461_v27 = vpop.f32.mrf.mxu1 }
 0xc40   : > { %v19463_v26 = vpop.f32.mrf.mxu3 }
 0xc43   : > { %v10726_v7 = vpop.f32.mrf.mxu0 }
 0xc45   : > { %v19465_v52 = vpop.f32.mrf.mxu2 }
 0xc46   : > { %v19467_v20 = vpop.f32.mrf.mxu1 }
 0xc48   : > { %v10708_v45 = vpop.f32.mrf.mxu3 }
 0xc49   : > { %15149 = vmatmul.msk.bf16.gmra.mxu1 %vm10068_vm9, %v19402_v2 }
 0xc4a   : > { %15151 = vmatmul.msk.bf16.gmra.mxu2 %vm10068_vm9, %v19402_v2 }
 0xc4b   : > { %v19473_v19 = vpop.f32.mrf.mxu0 }
 0xc4d   : > { %v19475_v39 = vpop.f32.mrf.mxu2  ;;  %15152 = vmatmul.msk.bf16.vlgmr.msrb.gmra.mxu3 %vm10068_vm9, %v19372_v6 }
 0xc4e   : > { %15154 = vmatmul.msk.bf16.vlgmr.msra.gmra.mxu0 %vm10068_vm9, %v19372_v6  ;;  %v10744_v7 = vpop.f32.mrf.mxu1 }
 0xc50   : > { %v19481_v0 = vpop.f32.mrf.mxu3 }
 0xc53   : > { %v19483_v45 = vpop.f32.mrf.mxu0 }
 0xc54   : > { %20020 = vst [vmem:[#allocation48_spill] sm:$0xff] %v19483_v45 }
 0xc55   : > { %v10762_v37 = vpop.f32.mrf.mxu2 }
 0xc56   : > { %v19485_v48 = vpop.f32.mrf.mxu1 }
 0xc58   : > { %v19487_v46 = vpop.f32.mrf.mxu3 }
 0xc59   : > { %15156 = vmatmul.msk.bf16.vlgmr.msra.gmra.mxu1 %vm10068_vm9, %v19372_v6 }
 0xc5a   : > { %15158 = vmatmul.msk.bf16.vlgmr.msrb.gmra.mxu2 %vm10068_vm9, %v19372_v6 }
 0xc5b   : > { %v19493_v34 = vpop.f32.mrf.mxu0 }
 0xc5c   : > { %20021 = vst [vmem:[#allocation33_spill] sm:$0xff] %v19493_v34 }
 0xc5d   : > { %v19495_v55 = vpop.f32.mrf.mxu2  ;;  %15153 = vmatmul.msk.bf16.gmra.mxu3 %vm10068_vm9, %v19402_v2 }
 0xc5e   : > { %20022 = vst [vmem:[#allocation50_spill] sm:$0xff] %v19495_v55  ;;  %15155 = vmatmul.msk.bf16.gmra.mxu0 %vm10068_vm9, %v19402_v2  ;;  %v19501_v37 = vpop.f32.mrf.mxu1 }
 0xc5f   : > { %20023 = vst [vmem:[#allocation27_spill] sm:$0xff] %v19501_v37 }
 0xc60   : > { %v19503_v7 = vpop.f32.mrf.mxu3 }
 0xc63   : > { %v10798_v59 = vpop.f32.mrf.mxu0 }
 0xc65   : > { %v19505_v12 = vpop.f32.mrf.mxu2 }
 0xc66   : > { %20024 = vst [vmem:[#allocation53_spill] sm:$0xff] %v19505_v12  ;;  %v19507_v54 = vpop.f32.mrf.mxu1 }
 0xc67   : > { %20025 = vst [vmem:[#allocation30_spill] sm:$0xff] %v19507_v54 }
 0xc68   : > { %v10780_v45 = vpop.f32.mrf.mxu3 }
 0xc69   : > { %15157 = vmatmul.msk.bf16.gmra.mxu1 %vm10068_vm9, %v19402_v2 }
 0xc6a   : > { %15159 = vmatmul.msk.bf16.gmra.mxu2 %vm10068_vm9, %v19402_v2 }
 0xc6b   : > { %v19513_v34 = vpop.f32.mrf.mxu0 }
 0xc6c   : > { %20026 = vst [vmem:[#allocation60_spill] sm:$0xff] %v19513_v34 }
 0xc6d   : > { %v19515_v9 = vpop.f32.mrf.mxu2  ;;  %15160 = vmatmul.msk.bf16.vlgmr.msra.gmra.mxu3 %vm10068_vm9, %v19372_v6 }
 0xc6e   : > { %20027 = vst [vmem:[#allocation38_spill] sm:$0xff] %v19515_v9  ;;  %15162 = vmatmul.msk.bf16.vlgmr.msrb.gmra.mxu0 %vm10068_vm9, %v19372_v6  ;;  %v10816_v59 = vpop.f32.mrf.mxu1 }
 0xc70   : > { %v19521_v12 = vpop.f32.mrf.mxu3 }
 0xc71   : > { %20028 = vst [vmem:[#allocation22_spill] sm:$0xff] %v19521_v12 }
 0xc73   : > { %v19523_v45 = vpop.f32.mrf.mxu0 }
 0xc74   : > { %20029 = vst [vmem:[#allocation36_spill] sm:$0xff] %v19523_v45 }
 0xc75   : > { %v10834_v54 = vpop.f32.mrf.mxu2 }
 0xc76   : > { %v19525_v55 = vpop.f32.mrf.mxu1 }
 0xc77   : > { %20030 = vst [vmem:[#allocation49_spill] sm:$0xff] %v19525_v55 }
 0xc78   : > { %v19527_v21 = vpop.f32.mrf.mxu3 }
 0xc79   : > { %20031 = vst [vmem:[#allocation25_spill] sm:$0xff] %v19527_v21  ;;  %15164 = vmatmul.msk.bf16.vlgmr.msrb.gmra.mxu1 %vm10068_vm9, %v19372_v6 }
 0xc7b   : > { %v19531_v34 = vpop.f32.mrf.mxu0 }
 0xc7c   : > { %20032 = vst [vmem:[#allocation55_spill] sm:$0xff] %v19531_v34 }
 0xc7d   : > { %v10899_v9 = vpop.f32.mrf.mxu2  ;;  %15161 = vmatmul.msk.bf16.gmra.mxu3 %vm10068_vm9, %v19402_v2 }
 0xc7e   : > { %15163 = vmatmul.msk.bf16.gmra.mxu0 %vm10068_vm9, %v19402_v2  ;;  %v19537_v59 = vpop.f32.mrf.mxu1  ;;  %v10909_v9 = vadd.f32 %v19396_v28, %v19188_v22  ;;  %v10910_v22 = vadd.f32 %v19411_v61, %v19209_v40  ;;  %v10911_v40 = vadd.f32 %v19439_v36, %v19199_v51  ;;  %v10925_v61 = vadd.f32 %v19419_v56, %v19227_v11 }
 0xc7f   : > { %20033 = vst [vmem:[#allocation35_spill] sm:$0xff] %v19537_v59  ;;  %v10940_v51 = vadd.f32 %v19432_v35, %v19239_v31  ;;  %v10926_v36 = vadd.f32 %v19446_v13, %v19213_v53  ;;  %v10912_v35 = vadd.f32 %v19429_v57, %v19237_v18  ;;  %v10941_v53 = vadd.f32 %v19463_v26, %v19232_v23 }
 0xc80   : > { %v19539_v45 = vpop.f32.mrf.mxu3  ;;  %v10927_v23 = vadd.f32 %v19441_v38, %v19251_v5  ;;  %v10942_v38 = vadd.f32 %v19453_v15, %v19259_v30  ;;  %v10917_v30 = vadd.f32 %v19485_v48, %v19291_v41 }
 0xc81   : > { %20034 = vst [vmem:[#allocation56_spill] sm:$0xff] %v19539_v45 }
 0xc83   : > { %v10870_v54 = vpop.f32.mrf.mxu0 }
 0xc84   : > { %v10908_v54 = vadd.f32 %v19378_v50, %v19178_v14 }
 0xc85   : > { %v19541_v55 = vpop.f32.mrf.mxu2 }
 0xc86   : > { %20035 = vst [vmem:[#allocation37_spill] sm:$0xff] %v19541_v55  ;;  %v19543_v21 = vpop.f32.mrf.mxu1 }
 0xc87   : > { %20036 = vst [vmem:[#allocation57_spill] sm:$0xff] %v19543_v21 }
 0xc88   : > { %v10852_v12 = vpop.f32.mrf.mxu3 }
 0xc89   : > { %15165 = vmatmul.msk.bf16.gmra.mxu1 %vm10068_vm9, %v19402_v2  ;;  %v10924_v12 = vadd.f32 %v19417_v16, %v19201_v58 }
 0xc8b   : > { %v11228_v6 = vpop.f32.mrf.mxu0 }
 0xc8c   : > { %v19549_v34 = vadd.f32 %v11228_v6, %v10909_v9 }
 0xc8d   : > { %v19551_v37 = vpop.f32.mrf.mxu2 }
 0xc8e   : > { %v10888_v59 = vpop.f32.mrf.mxu1 }
 0xc8f   : > { %v10923_v59 = vadd.f32 %v19391_v4, %v19197_v60  ;;  %v10938_v4 = vadd.f32 %v19407_v25, %v19207_v1  ;;  %v10913_v1 = vadd.f32 %v19444_v32, %v19245_v44  ;;  %v10928_v44 = vadd.f32 %v19461_v27, %v19257_v33 }
 0xc90   : > { %v11210_v45 = vpop.f32.mrf.mxu3  ;;  %v10943_v33 = vadd.f32 %v19467_v20, %v19269_v8 }
 0xc91   : > { %v19555_v55 = vadd.f32 %v11210_v45, %v10908_v54  ;;  %v10939_v45 = vadd.f32 %v19421_v3, %v19221_v29 }
 0xc93   : > { %v11230_v21 = vpop.f32.mrf.mxu0 }
 0xc94   : > { %v11487_v2 = vadd.f32 %v11230_v21, %v10924_v12 }
 0xc95   : > { %v10906_v28 = vpop.f32.mrf.mxu2 }
 0xc96   : > { %11607 = vrot.lane.b32.xlu1 %v11487_v2, %s16243_s29  ;;  %v11246_v9 = vpop.f32.mrf.mxu1 }
 0xc97   : > { %v19564_v6 = vadd.f32 %v11246_v9, %v10910_v22 }
 0xc98   : > { %v11212_v14 = vpop.f32.mrf.mxu3 }
 0xc99   : > { %v11486_v50 = vadd.f32 %v11212_v14, %v10923_v59 }
 0xc9b   : > { %v11233_v58 = vpop.f32.mrf.mxu0  ;;  %11605 = vrot.lane.b32.xlu2 %v11486_v50, %s16243_s29 }
 0xc9c   : > { %v11502_v21 = vadd.f32 %v11233_v58, %v10939_v45 }
 0xc9d   : > { %v11264_v16 = vpop.f32.mrf.mxu2 }
 0xc9e   : > { %v19573_v54 = vadd.f32 %v11264_v16, %v10911_v40  ;;  %11709 = vrot.lane.b32.xlu1 %v11502_v21, %s16244_s19  ;;  %v11248_v60 = vpop.f32.mrf.mxu1  ;;  %v10914_v40 = vadd.f32 %v19455_v10, %v19261_v62  ;;  %v10915_v62 = vadd.f32 %v19481_v0, %v19253_v63  ;;  %v10929_v16 = vadd.f32 %v19465_v52, %v19275_v49 }
 0xc9f   : > { %v11488_v29 = vadd.f32 %v11248_v60, %v10925_v61  ;;  %v10944_v63 = vadd.f32 %v19475_v39, %v19285_v17  ;;  %v10930_v52 = vadd.f32 %v19487_v46, %v19265_v42  ;;  %v10916_v39 = vadd.f32 %v19473_v19, %v19283_v47  ;;  %v20040_v19 = vld [vmem:[#allocation21_spill] sm:$0xff] }
 0xca0   : > { %v11215_v3 = vpop.f32.mrf.mxu3  ;;  %v10945_v42 = vadd.f32 %v19503_v7, %v19279_v43  ;;  %v20041_v43 = vld [vmem:[#allocation48_spill] sm:$0xff] }
 0xca1   : > { %v11501_v12 = vadd.f32 %v11215_v3, %v10938_v4  ;;  %11609 = vrot.lane.b32.xlu0 %v11488_v29, %s16243_s29  ;;  %v10931_v7 = vadd.f32 %v20041_v43, %v20040_v19  ;;  %v20060_v43 = vld [vmem:[#allocation28_spill] sm:$0xff] }
 0xca3   : > { %v11235_v2 = vpop.f32.mrf.mxu0  ;;  %11707 = vrot.lane.b32.xlu2 %v11501_v12, %s16244_s19 }
 0xca5   : > { %v11266_v11 = vpop.f32.mrf.mxu2 }
 0xca6   : > { %v11251_v56 = vpop.f32.mrf.mxu1  ;;  %v11489_v9 = vadd.f32 %v11266_v11, %v10926_v36 }
 0xca7   : > { %v11503_v22 = vadd.f32 %v11251_v56, %v10940_v51 }
 0xca8   : > { %v11217_v28 = vpop.f32.mrf.mxu3 }
 0xca9   : > { %11711 = vrot.lane.b32.xlu0 %v11503_v22, %s16244_s19  ;;  %v20037_v28 = vld [vmem:[#allocation27_spill] sm:$0xff] }
 0xcaa   : > { %v10932_v41 = vadd.f32 %v20037_v28, %v19301_v24  ;;  %v20043_v24 = vld [vmem:[#allocation30_spill] sm:$0xff] }
 0xcab   : > { %v11300_v25 = vpop.f32.mrf.mxu0  ;;  %11611 = vrot.lane.b32.xlu2 %v11489_v9, %s16243_s29 }
 0xcac   : > { %v19588_v59 = vadd.f32 %v11300_v25, %v10913_v1  ;;  %v20038_v1 = vld [vmem:[#allocation58_spill] sm:$0xff] }
 0xcad   : > { %v11269_v14 = vpop.f32.mrf.mxu2  ;;  %v20039_v25 = vld [vmem:[#allocation50_spill] sm:$0xff] }
 0xcae   : > { %v11253_v31 = vpop.f32.mrf.mxu1  ;;  %v11504_v50 = vadd.f32 %v11269_v14, %v10941_v53  ;;  %v10918_v14 = vadd.f32 %v20039_v25, %v20038_v1  ;;  %v20058_v1 = vld [vmem:[#allocation44_spill] sm:$0xff] }
 0xcaf   : > { %v20059_v25 = vld [vmem:[#allocation56_spill] sm:$0xff] }
 0xcb0   : > { %v11282_v13 = vpop.f32.mrf.mxu3 }
 0xcb1   : > { %v19594_v45 = vadd.f32 %v11282_v13, %v10912_v35 }
 0xcb3   : > { %v11302_v32 = vpop.f32.mrf.mxu0  ;;  %11713 = vrot.lane.b32.xlu2 %v11504_v50, %s16244_s19  ;;  %v20042_v50 = vld [vmem:[#allocation51_spill] sm:$0xff] }
 0xcb4   : > { %v11491_v58 = vadd.f32 %v11302_v32, %v10928_v44  ;;  %v10947_v44 = vadd.f32 %v20043_v24, %v20042_v50 }
 0xcb5   : > { %v11271_v21 = vpop.f32.mrf.mxu2 }
 0xcb6   : > { %11615 = vrot.lane.b32.xlu0 %v11491_v58, %s16243_s29  ;;  %v11318_v18 = vpop.f32.mrf.mxu1  ;;  %v20044_v58 = vld [vmem:[#allocation52_spill] sm:$0xff] }
 0xcb7   : > { %v19604_v57 = vadd.f32 %v11318_v18, %v10914_v40  ;;  %v20045_v40 = vld [vmem:[#allocation22_spill] sm:$0xff] }
 0xcb8   : > { %v11284_v26 = vpop.f32.mrf.mxu3  ;;  %v10919_v21 = vadd.f32 %v20045_v40, %v20044_v58  ;;  %v20063_v58 = vld [vmem:[#allocation36_spill] sm:$0xff] }
 0xcb9   : > { %v11490_v61 = vadd.f32 %v11284_v26, %v10927_v23  ;;  %v20046_v23 = vld [vmem:[#allocation29_spill] sm:$0xff] }
 0xcba   : > { %v20047_v26 = vld [vmem:[#allocation53_spill] sm:$0xff] }
 0xcbb   : > { %v11305_v27 = vpop.f32.mrf.mxu0  ;;  %11613 = vrot.lane.b32.xlu1 %v11490_v61, %s16243_s29  ;;  %v10933_v61 = vadd.f32 %v20047_v26, %v20046_v23  ;;  %v20064_v23 = vld [vmem:[#allocation31_spill] sm:$0xff]  ;;  %v20065_v26 = vld [vmem:[#allocation57_spill] sm:$0xff] }
 0xcbc   : > { %v11506_v10 = vadd.f32 %v11305_v27, %v10943_v33 }
 0xcbd   : > { %v11336_v60 = vpop.f32.mrf.mxu2 }
 0xcbe   : > { %v19613_v4 = vadd.f32 %v11336_v60, %v10915_v62  ;;  %11717 = vrot.lane.b32.xlu0 %v11506_v10, %s16244_s19  ;;  %v11320_v5 = vpop.f32.mrf.mxu1  ;;  %v20048_v10 = vld [vmem:[#allocation24_spill] sm:$0xff] }
 0xcbf   : > { %v11492_v8 = vadd.f32 %v11320_v5, %v10929_v16  ;;  %v20049_v16 = vld [vmem:[#allocation33_spill] sm:$0xff] }
 0xcc0   : > { %v11287_v20 = vpop.f32.mrf.mxu3  ;;  %v10946_v60 = vadd.f32 %v20049_v16, %v20048_v10  ;;  %v20066_v10 = vld [vmem:[#allocation47_spill] sm:$0xff]  ;;  %v20067_v16 = vld [vmem:[#allocation37_spill] sm:$0xff] }
 0xcc1   : > { %v11505_v29 = vadd.f32 %v11287_v20, %v10942_v38  ;;  %11617 = vrot.lane.b32.xlu2 %v11492_v8, %s16243_s29 }
 0xcc3   : > { %v11307_v3 = vpop.f32.mrf.mxu0  ;;  %11715 = vrot.lane.b32.xlu1 %v11505_v29, %s16244_s19  ;;  %v20050_v29 = vld [vmem:[#allocation54_spill] sm:$0xff] }
 0xcc4   : > { %v20051_v3 = vld [vmem:[#allocation38_spill] sm:$0xff] }
 0xcc5   : > { %v11338_v49 = vpop.f32.mrf.mxu2 }
 0xcc6   : > { %v11323_v0 = vpop.f32.mrf.mxu1  ;;  %v11493_v51 = vadd.f32 %v11338_v49, %v10930_v52  ;;  %v20052_v52 = vld [vmem:[#allocation34_spill] sm:$0xff] }
 0xcc7   : > { %v11507_v12 = vadd.f32 %v11323_v0, %v10944_v63  ;;  %v10948_v63 = vadd.f32 %v20051_v3, %v20050_v29 }
 0xcc8   : > { %v11289_v2 = vpop.f32.mrf.mxu3 }
 0xcc9   : > { %11719 = vrot.lane.b32.xlu2 %v11507_v12, %s16244_s19  ;;  %v20053_v12 = vld [vmem:[#allocation25_spill] sm:$0xff] }
 0xcca   : > { %v10934_v2 = vadd.f32 %v20053_v12, %v20052_v52 }
 0xccb   : > { %v11372_v15 = vpop.f32.mrf.mxu0  ;;  %11619 = vrot.lane.b32.xlu1 %v11493_v51, %s16243_s29 }
 0xccc   : > { %v19628_v11 = vadd.f32 %v11372_v15, %v10917_v30 }
 0xccd   : > { %v11341_v56 = vpop.f32.mrf.mxu2 }
 0xcce   : > { %v11325_v17 = vpop.f32.mrf.mxu1  ;;  %v11508_v36 = vadd.f32 %v11341_v56, %v10945_v42  ;;  %v20054_v56 = vld [vmem:[#allocation26_spill] sm:$0xff] }
 0xccf   : > { %v20055_v17 = vld [vmem:[#allocation49_spill] sm:$0xff] }
 0xcd0   : > { %v11354_v46 = vpop.f32.mrf.mxu3 }
 0xcd1   : > { %v19634_v22 = vadd.f32 %v11354_v46, %v10916_v39  ;;  %v10921_v39 = vadd.f32 %v20055_v17, %v20054_v56 }
 0xcd3   : > { %v11374_v48 = vpop.f32.mrf.mxu0  ;;  %11721 = vrot.lane.b32.xlu1 %v11508_v36, %s16244_s19 }
 0xcd4   : > { %v11495_v9 = vadd.f32 %v11374_v48, %v10932_v41  ;;  %v20056_v41 = vld [vmem:[#allocation23_spill] sm:$0xff]  ;;  %v20057_v48 = vld [vmem:[#allocation60_spill] sm:$0xff] }
 0xcd5   : > { %v11343_v31 = vpop.f32.mrf.mxu2 }
 0xcd6   : > { %11623 = vrot.lane.b32.xlu2 %v11495_v9, %s16243_s29  ;;  %v11390_v47 = vpop.f32.mrf.mxu1  ;;  %v10920_v9 = vadd.f32 %v20057_v48, %v20056_v41 }
 0xcd7   : > { %v19644_v35 = vadd.f32 %v11390_v47, %v10918_v14  ;;  %v10949_v14 = vadd.f32 %v20059_v25, %v20058_v1 }
 0xcd8   : > { %v11356_v53 = vpop.f32.mrf.mxu3 }
 0xcd9   : > { %v11494_v13 = vadd.f32 %v11356_v53, %v10931_v7  ;;  %v20061_v7 = vld [vmem:[#allocation35_spill] sm:$0xff] }
 0xcda   : > { %v10936_v53 = vadd.f32 %v20061_v7, %v20060_v43 }
 0xcdb   : > { %v11377_v32 = vpop.f32.mrf.mxu0  ;;  %11621 = vrot.lane.b32.xlu0 %v11494_v13, %s16243_s29 }
 0xcdc   : > { %v11510_v18 = vadd.f32 %v11377_v32, %v10947_v44  ;;  %v20062_v32 = vld [vmem:[#allocation45_spill] sm:$0xff] }
 0xcdd   : > { %v11408_v33 = vpop.f32.mrf.mxu2  ;;  %v10935_v40 = vadd.f32 %v20063_v58, %v20062_v32 }
 0xcde   : > { %v19653_v27 = vadd.f32 %v11408_v33, %v10919_v21  ;;  %11725 = vrot.lane.b32.xlu2 %v11510_v18, %s16244_s19  ;;  %v11392_v62 = vpop.f32.mrf.mxu1 }
 0xcdf   : > { %v11496_v5 = vadd.f32 %v11392_v62, %v10933_v61  ;;  %v10951_v61 = vadd.f32 %v20065_v26, %v20064_v23 }
 0xce0   : > { %v11359_v38 = vpop.f32.mrf.mxu3 }
 0xce1   : > { %v11509_v8 = vadd.f32 %v11359_v38, %v10946_v60  ;;  %11625 = vrot.lane.b32.xlu1 %v11496_v5, %s16243_s29  ;;  %v10937_v60 = vadd.f32 %v20067_v16, %v20066_v10  ;;  %v20068_v38 = vld [vmem:[#allocation46_spill] sm:$0xff] }
 0xce3   : > { %v11379_v20 = vpop.f32.mrf.mxu0  ;;  %11723 = vrot.lane.b32.xlu0 %v11509_v8, %s16244_s19  ;;  %v20069_v8 = vld [vmem:[#allocation55_spill] sm:$0xff] }
 0xce4   : > { %v10950_v20 = vadd.f32 %v20069_v8, %v20068_v38 }
 0xce5   : > { %v11410_v49 = vpop.f32.mrf.mxu2 }
 0xce6   : > { %v11395_v0 = vpop.f32.mrf.mxu1  ;;  %v11497_v15 = vadd.f32 %v11410_v49, %v10934_v2 }
 0xce7   : > { %v11511_v51 = vadd.f32 %v11395_v0, %v10948_v63  ;;  %v20070_v0 = vld [vmem:[#allocation32_spill] sm:$0xff] }
 0xce8   : > { %v11361_v30 = vpop.f32.mrf.mxu3  ;;  %v10952_v52 = vadd.f32 %v19551_v37, %v20070_v0 }
 0xce9   : > { %11727 = vrot.lane.b32.xlu1 %v11511_v51, %s16244_s19 }
 0xceb   : > { %v11444_v42 = vpop.f32.mrf.mxu0  ;;  %11627 = vrot.lane.b32.xlu0 %v11497_v15, %s16243_s29  ;;  %v11779_v15 = vld [vmem:[%s20071_s14] sm:$0xff] }
 0xcec   : > { %v19668_v46 = vadd.f32 %v11444_v42, %v10921_v39 }
 0xced   : > { %v11413_v36 = vpop.f32.mrf.mxu2 }
 0xcee   : > { %v11397_v28 = vpop.f32.mrf.mxu1  ;;  %v11512_v47 = vadd.f32 %v11413_v36, %v10949_v14 }
 0xcf0   : > { %v11426_v31 = vpop.f32.mrf.mxu3 }
 0xcf1   : > { %v19674_v19 = vadd.f32 %v11426_v31, %v10920_v9 }
 0xcf3   : > { %v11446_v13 = vpop.f32.mrf.mxu0  ;;  %11729 = vrot.lane.b32.xlu0 %v11512_v47, %s16244_s19 }
 0xcf4   : > { %v11499_v50 = vadd.f32 %v11446_v13, %v10936_v53 }
 0xcf5   : > { %v11415_v24 = vpop.f32.mrf.mxu2  ;;  %v11606_v12 = vpop.permute.xlu2 %11605 }
 0xcf6   : > { %11631 = vrot.lane.b32.xlu1 %v11499_v50, %s16243_s29  ;;  %v11462_v44 = vpop.f32.mrf.mxu1 }
 0xcf8   : > { %v11428_v21 = vpop.f32.mrf.mxu3 }
 0xcf9   : > { %v11498_v18 = vadd.f32 %v11428_v21, %v10935_v40 }
 0xcfb   : > { %v11449_v33 = vpop.f32.mrf.mxu0  ;;  %11629 = vrot.lane.b32.xlu2 %v11498_v18, %s16243_s29 }
 0xcfc   : > { %v11514_v62 = vadd.f32 %v11449_v33, %v10951_v61 }
 0xcfd   : > { %v11708_v36 = vpop.permute.xlu2 %11707 }
 0xcfe   : > { %11733 = vrot.lane.b32.xlu1 %v11514_v62, %s16244_s19  ;;  %v11464_v5 = vpop.f32.mrf.mxu1 }
 0xcff   : > { %v11500_v29 = vadd.f32 %v11464_v5, %v10937_v60 }
 0xd00   : > { %v11431_v3 = vpop.f32.mrf.mxu3 }
 0xd01   : > { %v11513_v63 = vadd.f32 %v11431_v3, %v10950_v20  ;;  %11633 = vrot.lane.b32.xlu0 %v11500_v29, %s16243_s29  ;;  %s15902_s29 = smul.u32 112, %s20078_s28 }
 0xd03   : > { %11731 = vrot.lane.b32.xlu2 %v11513_v63, %s16244_s19  ;;  %v11451_v49 = vpop.f32.mrf.mxu0  ;;  %s19762_s26 = scalar_lea.vmem %s20072_s20, %s15902_s29 }
 0xd05   : > { %v11612_v48 = vpop.permute.xlu2 %11611 }
 0xd06   : > { %v11467_v2 = vpop.f32.mrf.mxu1 }
 0xd07   : > { %v11515_v51 = vadd.f32 %v11467_v2, %v10952_v52 }
 0xd08   : > { %v11608_v30 = vpop.permute.xlu1 %11607  ;;  %v11433_v56 = vpop.f32.mrf.mxu3 }
 0xd09   : > { %v11635_v17 = vsel %vm2055_vm1, %v11606_v12, %v11608_v30  ;;  %11735 = vrot.lane.b32.xlu0 %v11515_v51, %s16244_s19 }
 0xd0a   : > { %v11663_v39 = vadd.f32 %v11635_v17, %v19555_v55 }
 0xd0b   : > { %11782 = vperm.xlu2 %16002, %v11779_v15  }
 0xd0d   : > { %v11714_v9 = vpop.permute.xlu2 %11713 }
 0xd0e   : > { %v11469_v42 = vpop.f32.mrf.mxu1 }
 0xd10   : > { %v11710_v28 = vpop.permute.xlu1 %11709 }
 0xd11   : > { %v11737_v37 = vsel %vm2078_vm3, %v11708_v36, %v11710_v28 }
 0xd12   : > { %v11765_v41 = vadd.f32 %v11737_v37, %v11663_v39 }
 0xd13   : > { %v11610_v1 = vpop.permute.xlu0 %11609 }
 0xd14   : > { %v11636_v21 = vsel %vm2055_vm1, %v11608_v30, %v11610_v1  ;;  %v11637_v26 = vsel %vm2055_vm1, %v11610_v1, %v11612_v48 }
 0xd15   : > { %v11664_v33 = vadd.f32 %v11636_v21, %v19549_v34  ;;  %v11665_v60 = vadd.f32 %v11637_v26, %v19564_v6 }
 0xd1b   : > { %v11618_v14 = vpop.permute.xlu2 %11617  ;;  %v11712_v31 = vpop.permute.xlu0 %11711 }
 0xd1c   : > { %v11738_v61 = vsel %vm2078_vm3, %v11710_v28, %v11712_v31  ;;  %v11739_v8 = vsel %vm2078_vm3, %v11712_v31, %v11714_v9 }
 0xd1d   : > { %v11766_v20 = vadd.f32 %v11738_v61, %v11664_v33  ;;  %v11767_v51 = vadd.f32 %v11739_v8, %v11665_v60 }
 0xd23   : > { %v11720_v43 = vpop.permute.xlu2 %11719 }
 0xd28   : > { %v11616_v7 = vpop.permute.xlu0 %11615 }
 0xd29   : > { %v11640_v62 = vsel %vm2055_vm1, %v11616_v7, %v11618_v14 }
 0xd2a   : > { %v11668_v34 = vadd.f32 %v11640_v62, %v19588_v59 }
 0xd2d   : > { %v11614_v25 = vpop.permute.xlu1 %11613 }
 0xd2e   : > { %v11638_v10 = vsel %vm2055_vm1, %v11612_v48, %v11614_v25  ;;  %v11639_v5 = vsel %vm2055_vm1, %v11614_v25, %v11616_v7 }
 0xd2f   : > { %v11666_v63 = vadd.f32 %v11638_v10, %v19573_v54  ;;  %v11667_v0 = vadd.f32 %v11639_v5, %v19594_v45 }
 0xd30   : > { %v11624_v53 = vpop.permute.xlu2 %11623  ;;  %v11718_v50 = vpop.permute.xlu0 %11717 }
 0xd31   : > { %v11742_v29 = vsel %vm2078_vm3, %v11718_v50, %v11720_v43 }
 0xd32   : > { %v11770_v30 = vadd.f32 %v11742_v29, %v11668_v34 }
 0xd35   : > { %v11716_v47 = vpop.permute.xlu1 %11715 }
 0xd36   : > { %v11740_v3 = vsel %vm2078_vm3, %v11714_v9, %v11716_v47  ;;  %v11741_v6 = vsel %vm2078_vm3, %v11716_v47, %v11718_v50 }
 0xd37   : > { %v11768_v15 = vadd.f32 %v11740_v3, %v11666_v63  ;;  %v11769_v56 = vadd.f32 %v11741_v6, %v11667_v0 }
 0xd38   : > { %v11726_v55 = vpop.permute.xlu2 %11725 }
 0xd3d   : > { %v11620_v13 = vpop.permute.xlu1 %11619 }
 0xd3e   : > { %v11641_v38 = vsel %vm2055_vm1, %v11618_v14, %v11620_v13 }
 0xd3f   : > { %v11669_v52 = vadd.f32 %v11641_v38, %v19604_v57 }
 0xd45   : > { %v11722_v44 = vpop.permute.xlu1 %11721 }
 0xd46   : > { %v11743_v49 = vsel %vm2078_vm3, %v11720_v43, %v11722_v44 }
 0xd47   : > { %v11771_v17 = vadd.f32 %v11743_v49, %v11669_v52 }
 0xd4d   : > { %v11622_v24 = vpop.permute.xlu0 %11621 }
 0xd4e   : > { %v11642_v12 = vsel %vm2055_vm1, %v11620_v13, %v11622_v24  ;;  %v11643_v2 = vsel %vm2055_vm1, %v11622_v24, %v11624_v53 }
 0xd4f   : > { %v11670_v57 = vadd.f32 %v11642_v12, %v19613_v4  ;;  %v11671_v36 = vadd.f32 %v11643_v2, %v19634_v22 }
 0xd53   : > { %v11626_v40 = vpop.permute.xlu1 %11625 }
 0xd54   : > { %v11644_v59 = vsel %vm2055_vm1, %v11624_v53, %v11626_v40 }
 0xd55   : > { %v11724_v32 = vpop.permute.xlu0 %11723  ;;  %v19701_v58 = vpop.permute.xlu2 %11629  ;;  %v11672_v48 = vadd.f32 %v11644_v59, %v19628_v11 }
 0xd56   : > { %v11744_v39 = vsel %vm2078_vm3, %v11722_v44, %v11724_v32  ;;  %v11745_v9 = vsel %vm2078_vm3, %v11724_v32, %v11726_v55 }
 0xd57   : > { %v11773_v7 = vadd.f32 %v11745_v9, %v11671_v36 }
 0xd5b   : > { %v11728_v16 = vpop.permute.xlu1 %11727 }
 0xd5c   : > { %v11746_v31 = vsel %vm2078_vm3, %v11726_v55, %v11728_v16 }
 0xd5d   : > { %v11628_v18 = vpop.permute.xlu0 %11627  ;;  %v19704_v23 = vpop.permute.xlu2 %11731  ;;  %v11774_v50 = vadd.f32 %v11746_v31, %v11672_v48 }
 0xd5e   : > { %v11645_v28 = vsel %vm2055_vm1, %v11626_v40, %v11628_v18  ;;  %v11646_v1 = vsel %vm2055_vm1, %v11628_v18, %v19701_v58 }
 0xd5f   : > { %v11673_v47 = vadd.f32 %v11645_v28, %v19644_v35  ;;  %v11674_v53 = vadd.f32 %v11646_v1, %v19653_v27 }
 0xd65   : > { %v19727_v54 = vpop.permute.xlu2 %11782  ;;  %v11730_v42 = vpop.permute.xlu0 %11729 }
 0xd66   : > { %v11785_v45 = vadd.f32 %v19727_v54, %v11765_v41  ;;  %v11786_v37 = vadd.f32 %v19727_v54, %v11766_v20  ;;  %v11787_v25 = vadd.f32 %v19727_v54, %v11767_v51  ;;  %v11772_v41 = vadd.f32 %v11744_v39, %v11670_v57 }
 0xd67   : > { %v11747_v4 = vsel %vm2078_vm3, %v11728_v16, %v11730_v42  ;;  %v11788_v22 = vadd.f32 %v19727_v54, %v11768_v15  ;;  %v11748_v11 = vsel %vm2078_vm3, %v11730_v42, %v19704_v23  ;;  %v11789_v43 = vadd.f32 %v19727_v54, %v11769_v56 }
 0xd68   : > { %v11632_v14 = vpop.permute.xlu1 %11631  ;;  %16005 = vtanh.f32 %v11785_v45  ;;  %v11790_v13 = vadd.f32 %v19727_v54, %v11770_v30  ;;  %v11775_v55 = vadd.f32 %v11747_v4, %v11673_v47  ;;  %v11791_v24 = vadd.f32 %v19727_v54, %v11771_v17 }
 0xd69   : > { %16007 = vtanh.f32 %v11786_v37  ;;  %v11776_v44 = vadd.f32 %v11748_v11, %v11674_v53  ;;  %v11792_v35 = vadd.f32 %v19727_v54, %v11772_v41  ;;  %v11647_v32 = vsel %vm2055_vm1, %v19701_v58, %v11632_v14 }
 0xd6a   : > { %16009 = vtanh.f32 %v11787_v25  ;;  %v11793_v27 = vadd.f32 %v19727_v54, %v11773_v7  ;;  %v11794_v40 = vadd.f32 %v19727_v54, %v11774_v50  ;;  %v11795_v18 = vadd.f32 %v19727_v54, %v11775_v55 }
 0xd6b   : > { %16011 = vtanh.f32 %v11788_v22  ;;  %v11675_v58 = vadd.f32 %v11647_v32, %v19674_v19  ;;  %v11796_v33 = vadd.f32 %v19727_v54, %v11776_v44 }
 0xd6c   : > { %16013 = vtanh.f32 %v11789_v43 }
 0xd6d   : > { %16015 = vtanh.f32 %v11790_v13 }
 0xd6e   : > { %v16006_v21 = vpop.eup %16005  ;;  %16017 = vtanh.f32 %v11791_v24 }
 0xd6f   : > { %v16008_v61 = vpop.eup %16007  ;;  %16019 = vtanh.f32 %v11792_v35  ;;  %11813 = vst [vmem:[%s19762_s26] sm:$0xff] %v16006_v21 }
 0xd70   : > { %v11734_v26 = vpop.permute.xlu1 %11733  ;;  %v16010_v10 = vpop.eup %16009  ;;  %16021 = vtanh.f32 %v11793_v27  ;;  %11814 = vst [vmem:[%s19762_s26 + $0x8] sm:$0xff] %v16008_v61 }
 0xd71   : > { %v11749_v62 = vsel %vm2078_vm3, %v19704_v23, %v11734_v26  ;;  %v16012_v60 = vpop.eup %16011  ;;  %16023 = vtanh.f32 %v11794_v40  ;;  %11815 = vst [vmem:[%s19762_s26 + $0x10] sm:$0xff] %v16010_v10 }
 0xd72   : > { %v11777_v16 = vadd.f32 %v11749_v62, %v11675_v58  ;;  %v16014_v5 = vpop.eup %16013  ;;  %16025 = vtanh.f32 %v11795_v18  ;;  %11816 = vst [vmem:[%s19762_s26 + $0x18] sm:$0xff] %v16012_v60 }
 0xd73   : > { %v11634_v19 = vpop.permute.xlu0 %11633  ;;  %v16016_v8 = vpop.eup %16015  ;;  %16027 = vtanh.f32 %v11796_v33  ;;  %11817 = vst [vmem:[%s19762_s26 + $0x20] sm:$0xff] %v16014_v5 }
 0xd74   : > { %v11797_v38 = vadd.f32 %v19727_v54, %v11777_v16  ;;  %v16018_v23 = vpop.eup %16017  ;;  %11818 = vst [vmem:[%s19762_s26 + $0x28] sm:$0xff] %v16016_v8  ;;  %v11648_v3 = vsel %vm2055_vm1, %v11632_v14, %v11634_v19 }
 0xd75   : > { %v16020_v20 = vpop.eup %16019  ;;  %11819 = vst [vmem:[%s19762_s26 + $0x30] sm:$0xff] %v16018_v23  ;;  %v11676_v49 = vadd.f32 %v11648_v3, %v19668_v46 }
 0xd76   : > { %16029 = vtanh.f32 %v11797_v38  ;;  %v16022_v29 = vpop.eup %16021  ;;  %11820 = vst [vmem:[%s19762_s26 + $0x38] sm:$0xff] %v16020_v20 }
 0xd77   : > { %v16024_v34 = vpop.eup %16023  ;;  %11821 = vst [vmem:[%s19762_s26 + $0x40] sm:$0xff] %v16022_v29 }
 0xd78   : > { %v16026_v63 = vpop.eup %16025  ;;  %11822 = vst [vmem:[%s19762_s26 + $0x48] sm:$0xff] %v16024_v34 }
 0xd79   : > { %v16028_v6 = vpop.eup %16027  ;;  %11823 = vst [vmem:[%s19762_s26 + $0x50] sm:$0xff] %v16026_v63 }
 0xd7a   : > { %11824 = vst [vmem:[%s19762_s26 + $0x58] sm:$0xff] %v16028_v6 }
 0xd7b   : > { %v11736_v0 = vpop.permute.xlu0 %11735 }
 0xd7c   : > { %v16030_v52 = vpop.eup %16029  ;;  %v11750_v12 = vsel %vm2078_vm3, %v11734_v26, %v11736_v0 }
 0xd7d   : > { %11825 = vst [vmem:[%s19762_s26 + $0x60] sm:$0xff] %v16030_v52  ;;  %v11778_v2 = vadd.f32 %v11750_v12, %v11676_v49 }
 0xd7f   : > { %v11798_v51 = vadd.f32 %v19727_v54, %v11778_v2 }
 0xd81   : > { %16031 = vtanh.f32 %v11798_v51 }
 0xd87   : > { %v16032_v30 = vpop.eup %16031 }
 0xd88   : > { %11826 = vst [vmem:[%s19762_s26 + $0x68] sm:$0xff] %v16032_v30 }
 0xd89 PF: > { %p28_p3 = scmp.ge.s32.totalorder %s16393_s17, 4   ;;  %s20073_s21 = smov %s16217_s22 }
 0xd8a   : > { %s20074_s22 = smov %s16221_s23  ;;  %s20075_s23 = smov %s16405_s6 }
 0xd8b   : > { %s20076_s24 = smov %s16393_s17  ;;  %30 = sbr.rel (!%p28_p3) target bundleno = 13 (0xd), region = 148 }
 0xd90   :  { %11848 = vsyncpa [#allocation11], 1 }
 0xd91   :  { %11850 = vsyncpa [#allocation11 + $0x1], 1 }
 0xd92   :  { %11851 = vsyncpa [#allocation13], 1 }
 0xd93   :  { %11852 = vsyncpa [#allocation16], 1 }

</bundles_post_ra>
